<compile_context>
chip_gen: v7x
topology: tpu7x:2x2x1
jax: 0.10.0
libtpu: 0.0.40
codegen_flags: <defaults>
</compile_context>

<pallas_src>
import functools
import math

import jax
import jax.numpy as jnp
from jax.experimental import pallas as pl
from jax.experimental.pallas import tpu as pltpu


def _vmem_limit_bytes():
    """Per-generation VMEM limit: physical capacity minus headroom (v5e/v6e 128 MiB, v7x 64 MiB)."""
    default_cap = 64 * 1024 * 1024
    try:
        cap = int(getattr(pltpu.get_tpu_info(), "vmem_capacity_bytes", default_cap))
    except Exception:
        cap = default_cap
    return max(32 * 1024 * 1024, cap - 16 * 1024 * 1024)


VMEM_LIMIT = _vmem_limit_bytes()


def _choose_tile(dim, preferred, align):
    """Largest tile <= preferred that divides dim and is a multiple of align (else full dim)."""
    if dim <= preferred:
        return dim
    t = (preferred // align) * align
    while t >= align:
        if dim % t == 0:
            return t
        t -= align
    return dim


def _choose_m_tile(M, preferred=256):
    """M tile: 16-aligned for bf16 sublane packing; split so the parallel M axis has >=2 steps (v7x)."""
    align = 16 if M % 16 == 0 else 8
    t = _choose_tile(M, preferred, align)
    if t == M and M % 16 == 0:
        t = M // 2           # give the 2nd TensorCore on v7x something to do
    return t


# ----------------------------------------------------------------------------
# Pallas kernels
# ----------------------------------------------------------------------------
def _linear_kernel(x_ref, w_ref, b_ref, o_ref, acc_ref, *, act):
    """Tiled matmul y = act(x @ w + b); grid = (M/tm, N/tn, K/tk), K innermost reduction."""
    k = pl.program_id(2)

    @pl.when(k == 0)
    def _():
        acc_ref[...] = jnp.zeros_like(acc_ref)

    acc_ref[...] += jnp.dot(x_ref[...], w_ref[...],
                            preferred_element_type=jnp.float32)

    @pl.when(k == pl.num_programs(2) - 1)
    def _():
        r = acc_ref[...] + b_ref[...].astype(jnp.float32)
        if act == "gelu":
            # TODO(synk): HF BERT uses exact erf GELU; tanh approximation used here.
            r = 0.5 * r * (1.0 + jnp.tanh(0.7978845608028654 *
                                          (r + 0.044715 * r * r * r)))
        o_ref[...] = r.astype(o_ref.dtype)


def pallas_linear(x, w, b, act="none"):
    M, K = x.shape
    Kw, N = w.shape
    assert K == Kw
    tm = _choose_m_tile(M)
    tk = _choose_tile(K, 768, 128)
    tn = _choose_tile(N, 768, 128)
    # TODO(synk): int8 (v5e/v6e) / fp8 (v7x) weight quantization and pl.Buffered(3) weight
    # streaming for the weight-DMA-bound regime are not implemented.
    kernel = functools.partial(_linear_kernel, act=act)
    return pl.pallas_call(
        kernel,
        out_shape=jax.ShapeDtypeStruct((M, N), x.dtype),
        grid_spec=pltpu.PrefetchScalarGridSpec(
            num_scalar_prefetch=0,
            grid=(M // tm, N // tn, K // tk),
            in_specs=[
                pl.BlockSpec((tm, tk), lambda m, n, k: (m, k)),
                pl.BlockSpec((tk, tn), lambda m, n, k: (k, n)),
                pl.BlockSpec((1, tn), lambda m, n, k: (0, n)),
            ],
            out_specs=pl.BlockSpec((tm, tn), lambda m, n, k: (m, n)),
            scratch_shapes=[pltpu.VMEM((tm, tn), jnp.float32)],
        ),
        compiler_params=pltpu.CompilerParams(
            dimension_semantics=("parallel", "parallel", "arbitrary"),
            vmem_limit_bytes=VMEM_LIMIT),
    )(x, w, b.reshape(1, N))


def _linear_res_ln_kernel(x_ref, w_ref, b_ref, r_ref, g_ref, bt_ref, o_ref, acc_ref):
    """y = LayerNorm((x @ w + b) + residual); N is a single full-row block, K innermost."""
    k = pl.program_id(1)

    @pl.when(k == 0)
    def _():
        acc_ref[...] = jnp.zeros_like(acc_ref)

    acc_ref[...] += jnp.dot(x_ref[...], w_ref[...],
                            preferred_element_type=jnp.float32)

    @pl.when(k == pl.num_programs(1) - 1)
    def _():
        r = (acc_ref[...] + b_ref[...].astype(jnp.float32)
             + r_ref[...].astype(jnp.float32))
        mu = jnp.mean(r, axis=-1, keepdims=True)
        var = jnp.mean(jnp.square(r - mu), axis=-1, keepdims=True)
        y = (r - mu) * jax.lax.rsqrt(var + 1e-12)
        o_ref[...] = (y * g_ref[...] + bt_ref[...]).astype(o_ref.dtype)


def pallas_linear_res_ln(x, w, b, residual, gamma, beta):
    M, K = x.shape
    Kw, N = w.shape
    assert K == Kw and residual.shape == (M, N)
    tm = _choose_m_tile(M)
    tk = _choose_tile(K, 768, 128)
    return pl.pallas_call(
        _linear_res_ln_kernel,
        out_shape=jax.ShapeDtypeStruct((M, N), x.dtype),
        grid_spec=pltpu.PrefetchScalarGridSpec(
            num_scalar_prefetch=0,
            grid=(M // tm, K // tk),
            in_specs=[
                pl.BlockSpec((tm, tk), lambda m, k: (m, k)),
                pl.BlockSpec((tk, N), lambda m, k: (k, 0)),
                pl.BlockSpec((1, N), lambda m, k: (0, 0)),
                pl.BlockSpec((tm, N), lambda m, k: (m, 0)),   # residual (fetched once per m)
                pl.BlockSpec((1, N), lambda m, k: (0, 0)),
                pl.BlockSpec((1, N), lambda m, k: (0, 0)),
            ],
            out_specs=pl.BlockSpec((tm, N), lambda m, k: (m, 0)),
            scratch_shapes=[pltpu.VMEM((tm, N), jnp.float32)],
        ),
        compiler_params=pltpu.CompilerParams(
            dimension_semantics=("parallel", "arbitrary"),
            vmem_limit_bytes=VMEM_LIMIT),
    )(x, w, b.reshape(1, N), residual, gamma.reshape(1, N), beta.reshape(1, N))


def _layernorm_kernel(x_ref, g_ref, b_ref, o_ref):
    x = x_ref[...].astype(jnp.float32)
    mu = jnp.mean(x, axis=-1, keepdims=True)
    var = jnp.mean(jnp.square(x - mu), axis=-1, keepdims=True)
    y = (x - mu) * jax.lax.rsqrt(var + 1e-12)
    o_ref[...] = (y * g_ref[...] + b_ref[...]).astype(o_ref.dtype)


def pallas_layernorm(x, gamma, beta):
    """LayerNorm over the last dim, row-tiled over M (used for the embedding LN only)."""
    M, H = x.shape
    tm = _choose_m_tile(M, preferred=512)
    row = pl.BlockSpec((tm, H), lambda m: (m, 0))
    vec = pl.BlockSpec((1, H), lambda m: (0, 0))
    return pl.pallas_call(
        _layernorm_kernel,
        out_shape=jax.ShapeDtypeStruct((M, H), x.dtype),
        grid_spec=pltpu.PrefetchScalarGridSpec(
            num_scalar_prefetch=0,
            grid=(M // tm,),
            in_specs=[row, vec, vec],
            out_specs=row,
        ),
        compiler_params=pltpu.CompilerParams(
            dimension_semantics=("parallel",),
            vmem_limit_bytes=VMEM_LIMIT),
    )(x, gamma.reshape(1, H), beta.reshape(1, H))


def _attention_kernel(q_ref, k_ref, v_ref, m_ref, o_ref, *, heads, dh):
    # q/k/v refs are the (S, H) column slices of the fused QKV activation for one batch
    # element (Q already scaled by 1/sqrt(dh) via the folded weight); m_ref is a (1, S)
    # additive key mask.  Heads are processed via static lane slices: no transposes,
    # no reshapes, and the output block is written lane-dense as (S, H).
    mask = m_ref[...].astype(jnp.float32)
    qa = q_ref[...]
    ka = k_ref[...]
    va = v_ref[...]
    for h in range(heads):
        lo = h * dh
        q = qa[:, lo:lo + dh]
        k = ka[:, lo:lo + dh]
        v = va[:, lo:lo + dh]
        s = jax.lax.dot_general(q, k, (((1,), (1,)), ((), ())),
                                preferred_element_type=jnp.float32)    # (S, S)
        s = s + mask
        s = s - jnp.max(s, axis=-1, keepdims=True)
        p = jnp.exp(s)
        p = p * pl.reciprocal(jnp.sum(p, axis=-1, keepdims=True), approx=True)
        o = jnp.dot(p.astype(v.dtype), v, preferred_element_type=jnp.float32)
        o_ref[:, lo:lo + dh] = o.astype(o_ref.dtype)


def _qkv_col_spec(seq, hidden, col):
    return pl.BlockSpec((seq, hidden), lambda b: (b, col))


def pallas_attention_qkv(qkv, add_mask, *, batch, seq, hidden, heads):
    """Multi-head self-attention reading the fused (B*S, 3H) QKV activation in place."""
    assert seq % 8 == 0 and hidden % 128 == 0
    dh = hidden // heads
    kernel = functools.partial(_attention_kernel, heads=heads, dh=dh)
    return pl.pallas_call(
        kernel,
        out_shape=jax.ShapeDtypeStruct((batch * seq, hidden), qkv.dtype),
        grid_spec=pltpu.PrefetchScalarGridSpec(
            num_scalar_prefetch=0,
            grid=(batch,),
            in_specs=[
                _qkv_col_spec(seq, hidden, 0),                      # Q columns [0, H)
                _qkv_col_spec(seq, hidden, 1),                      # K columns [H, 2H)
                _qkv_col_spec(seq, hidden, 2),                      # V columns [2H, 3H)
                pl.BlockSpec((None, 1, seq), lambda b: (b, 0, 0)),  # additive key mask
            ],
            out_specs=pl.BlockSpec((seq, hidden), lambda b: (b, 0)),
        ),
        compiler_params=pltpu.CompilerParams(
            dimension_semantics=("parallel",),
            vmem_limit_bytes=VMEM_LIMIT),
    )(qkv, qkv, qkv, add_mask)


def _head_kernel(x_ref, pw_ref, pb_ref, g_ref, bt_ref, mu_ref, var_ref,
                 cw_ref, cb_ref, o_ref):
    # Pooler: dense + tanh on the [CLS] rows (BERT outputs[1]).
    pooled = jnp.dot(x_ref[...], pw_ref[...],
                     preferred_element_type=jnp.float32) + pb_ref[...]
    pooled = jnp.tanh(pooled)
    # BatchNorm1d(768) with running statistics (inference mode).
    xn = (pooled - mu_ref[...]) * jax.lax.rsqrt(var_ref[...] + 1e-5)
    xn = xn * g_ref[...] + bt_ref[...]
    # Dropout(p=0.75): inference-mode identity.
    # TODO(synk): training-mode dropout masking / batch-statistics BatchNorm not implemented.
    logits = jnp.dot(xn, cw_ref[...], preferred_element_type=jnp.float32) + cb_ref[...]
    o_ref[...] = logits


def pallas_pooler_bn_classifier(cls_x, pooler_w, pooler_b, gamma, beta, mean, var,
                                cls_w_padded, cls_b_padded, num_labels):
    B, H = cls_x.shape
    Lp = cls_w_padded.shape[1]
    vec = pl.BlockSpec((1, H), lambda i: (0, 0))
    out = pl.pallas_call(
        _head_kernel,
        out_shape=jax.ShapeDtypeStruct((B, Lp), jnp.float32),
        grid_spec=pltpu.PrefetchScalarGridSpec(
            num_scalar_prefetch=0,
            grid=(1,),
            in_specs=[
                pl.BlockSpec((B, H), lambda i: (0, 0)),
                pl.BlockSpec((H, H), lambda i: (0, 0)),
                vec, vec, vec, vec, vec,
                pl.BlockSpec((H, Lp), lambda i: (0, 0)),
                pl.BlockSpec((1, Lp), lambda i: (0, 0)),
            ],
            out_specs=pl.BlockSpec((B, Lp), lambda i: (0, 0)),
        ),
        compiler_params=pltpu.CompilerParams(vmem_limit_bytes=VMEM_LIMIT),
    )(cls_x, pooler_w, pooler_b.reshape(1, H),
      gamma.reshape(1, H), beta.reshape(1, H),
      mean.reshape(1, H), var.reshape(1, H),
      cls_w_padded, cls_b_padded)
    return out[:, :num_labels]


# ----------------------------------------------------------------------------
# Parameters (deterministic synthetic init), bf16/fusion prep, forward pass
# ----------------------------------------------------------------------------
def init_params(key, *, vocab, max_pos, hidden, layers, inter, num_labels):
    def dense(k, fan_in, fan_out):
        w = jax.random.normal(k, (fan_in, fan_out), jnp.float32) * 0.02
        return {"w": w, "b": jnp.zeros((fan_out,), jnp.float32)}

    keys = jax.random.split(key, 8 + layers)
    params = {
        "word_emb": jax.random.normal(keys[0], (vocab, hidden), jnp.float32) * 0.02,
        "pos_emb": jax.random.normal(keys[1], (max_pos, hidden), jnp.float32) * 0.02,
        "type_emb": jax.random.normal(keys[2], (2, hidden), jnp.float32) * 0.02,
        "emb_ln_g": jnp.ones((hidden,), jnp.float32),
        "emb_ln_b": jnp.zeros((hidden,), jnp.float32),
        "pooler": dense(keys[3], hidden, hidden),
        "bn_gamma": jnp.ones((hidden,), jnp.float32),
        "bn_beta": jnp.zeros((hidden,), jnp.float32),
        "bn_mean": jnp.zeros((hidden,), jnp.float32),
        "bn_var": jnp.ones((hidden,), jnp.float32),
        "classifier": dense(keys[4], hidden, num_labels),
        "layers": [],
    }
    for l in range(layers):
        lk = jax.random.split(keys[8 + l], 6)
        params["layers"].append({
            "q": dense(lk[0], hidden, hidden),
            "k": dense(lk[1], hidden, hidden),
            "v": dense(lk[2], hidden, hidden),
            "attn_out": dense(lk[3], hidden, hidden),
            "ln1_g": jnp.ones((hidden,), jnp.float32),
            "ln1_b": jnp.zeros((hidden,), jnp.float32),
            "inter": dense(lk[4], hidden, inter),
            "ffn_out": dense(lk[5], inter, hidden),
            "ln2_g": jnp.ones((hidden,), jnp.float32),
            "ln2_b": jnp.zeros((hidden,), jnp.float32),
        })
    return params


def prepare_params(params, *, heads):
    """bf16-cast matmul weights, fuse Q/K/V (folding 1/sqrt(Dh) into Q), pad the classifier."""
    hidden = params["word_emb"].shape[1]
    dh = hidden // heads
    scale = 1.0 / math.sqrt(dh)

    def cast_dense(d):
        return {"w": d["w"].astype(jnp.bfloat16), "b": d["b"]}

    num_labels = params["classifier"]["w"].shape[1]
    lp_pad = ((num_labels + 127) // 128) * 128        # lane-dense padded classifier width
    cls_w = jnp.zeros((hidden, lp_pad), jnp.float32).at[:, :num_labels].set(
        params["classifier"]["w"].astype(jnp.float32))
    cls_b = jnp.zeros((1, lp_pad), jnp.float32).at[:, :num_labels].set(
        params["classifier"]["b"].reshape(1, num_labels).astype(jnp.float32))

    prepared = {
        "word_emb": params["word_emb"],
        "pos_emb": params["pos_emb"],
        "type_emb": params["type_emb"],
        "emb_ln_g": params["emb_ln_g"], "emb_ln_b": params["emb_ln_b"],
        "pooler": cast_dense(params["pooler"]),
        "bn_gamma": params["bn_gamma"], "bn_beta": params["bn_beta"],
        "bn_mean": params["bn_mean"], "bn_var": params["bn_var"],
        "classifier": {"w": cls_w, "b": cls_b},
        "layers": [],
    }
    for lp in params["layers"]:
        wqkv = jnp.concatenate(
            [lp["q"]["w"] * scale, lp["k"]["w"], lp["v"]["w"]],
            axis=1).astype(jnp.bfloat16)
        bqkv = jnp.concatenate(
            [lp["q"]["b"] * scale, lp["k"]["b"], lp["v"]["b"]], axis=0)
        prepared["layers"].append({
            "qkv": {"w": wqkv, "b": bqkv},
            "attn_out": cast_dense(lp["attn_out"]),
            "ln1_g": lp["ln1_g"], "ln1_b": lp["ln1_b"],
            "inter": cast_dense(lp["inter"]),
            "ffn_out": cast_dense(lp["ffn_out"]),
            "ln2_g": lp["ln2_g"], "ln2_b": lp["ln2_b"],
        })
    return prepared


def bert_with_regularization_forward(params, input_ids, attention_mask, *, heads, num_labels):
    B, S = input_ids.shape
    H = params["word_emb"].shape[1]

    # Embeddings (glue: gather + adds), then LayerNorm in a Pallas kernel.
    emb = (params["word_emb"][input_ids]
           + params["pos_emb"][:S][None, :, :]
           + params["type_emb"][0][None, None, :])
    x = emb.reshape(B * S, H).astype(jnp.bfloat16)
    x = pallas_layernorm(x, params["emb_ln_g"], params["emb_ln_b"])

    add_mask = ((1.0 - attention_mask.astype(jnp.float32)) * -10000.0).reshape(B, 1, S)

    # TODO(synk): cross-layer weight prefetch / per-layer fused weight pipeline not implemented;
    # each layer's weight DMA is only overlapped within its own pallas_call.
    for lp in params["layers"]:
        qkv = pallas_linear(x, lp["qkv"]["w"], lp["qkv"]["b"])       # (B*S, 3H) fused QKV
        ctx = pallas_attention_qkv(qkv, add_mask, batch=B, seq=S, hidden=H, heads=heads)
        x = pallas_linear_res_ln(ctx, lp["attn_out"]["w"], lp["attn_out"]["b"],
                                 x, lp["ln1_g"], lp["ln1_b"])
        ffn = pallas_linear(x, lp["inter"]["w"], lp["inter"]["b"], act="gelu")
        x = pallas_linear_res_ln(ffn, lp["ffn_out"]["w"], lp["ffn_out"]["b"],
                                 x, lp["ln2_g"], lp["ln2_b"])

    # Head: pooler (dense+tanh on [CLS]) -> BatchNorm1d -> Dropout(eval) -> Linear, one kernel.
    cls = x.reshape(B, S, H)[:, 0, :]
    logits = pallas_pooler_bn_classifier(
        cls, params["pooler"]["w"], params["pooler"]["b"],
        params["bn_gamma"], params["bn_beta"], params["bn_mean"], params["bn_var"],
        params["classifier"]["w"], params["classifier"]["b"], num_labels)
    return logits


# ----------------------------------------------------------------------------
if __name__ == "__main__":
    key = jax.random.PRNGKey(0)
    pkey, ikey = jax.random.split(key)

    B, S = 2, 8
    VOCAB, MAX_POS = 100, 32
    HIDDEN, HEADS, LAYERS, INTER = 768, 12, 2, 3072   # hidden=768 fixed by BatchNorm1d(768)
    NUM_LABELS = 5

    params = init_params(pkey, vocab=VOCAB, max_pos=MAX_POS, hidden=HIDDEN,
                         layers=LAYERS, inter=INTER, num_labels=NUM_LABELS)
    prepared = prepare_params(params, heads=HEADS)

    input_ids = jax.random.randint(ikey, (B, S), 0, VOCAB, dtype=jnp.int32)
    attention_mask = jnp.ones((B, S), dtype=jnp.int32)

    fwd = jax.jit(functools.partial(bert_with_regularization_forward,
                                    heads=HEADS, num_labels=NUM_LABELS))
    logits = fwd(prepared, input_ids, attention_mask)
    jax.block_until_ready(logits)
    assert logits.shape == (B, NUM_LABELS) and logits.dtype == jnp.float32
    print("KERNEL_OK")
</pallas_src>

<mosaic_0001>
module attributes {stable_mosaic.version = 11 : i64} {
  func.func @_layernorm_kernel(%arg0: i32, %arg1: memref<8x768xbf16, #tpu.memory_space<vmem>>, %arg2: memref<1x768xf32, #tpu.memory_space<vmem>>, %arg3: memref<1x768xf32, #tpu.memory_space<vmem>>, %arg4: memref<8x768xbf16, #tpu.memory_space<vmem>>) attributes {dimension_semantics = [#tpu.dimension_semantics<parallel>], iteration_bounds = array<i64: 2>, scalar_prefetch = 0 : i64, scratch_operands = 0 : i64, tpu.core_type = #tpu.core_type<tc>, window_params = [{transform_indices = @transform_0, window_bounds = array<i64: 8, 768>}, {pipeline_mode = #tpu.pipeline_mode<synchronous>, transform_indices = @transform_1, window_bounds = array<i64: 1, 768>}, {pipeline_mode = #tpu.pipeline_mode<synchronous>, transform_indices = @transform_2, window_bounds = array<i64: 1, 768>}, {transform_indices = @transform_3, window_bounds = array<i64: 8, 768>}]} {
    %c0 = arith.constant 0 : index
    %c0_0 = arith.constant 0 : index
    %0 = vector.load %arg1[%c0, %c0_0] : memref<8x768xbf16, #tpu.memory_space<vmem>>, vector<8x768xbf16>
    %1 = arith.extf %0 : vector<8x768xbf16> to vector<8x768xf32>
    %cst = arith.constant dense<0.000000e+00> : vector<8xf32>
    %2 = vector.multi_reduction <add>, %1, %cst [1] : vector<8x768xf32> to vector<8xf32>
    %3 = vector.shape_cast %2 : vector<8xf32> to vector<8x1xf32>
    %cst_1 = arith.constant 7.680000e+02 : f32
    %4 = vector.broadcast %cst_1 : f32 to vector<8x1xf32>
    %5 = arith.divf %3, %4 : vector<8x1xf32>
    %6 = vector.broadcast %5 : vector<8x1xf32> to vector<8x768xf32>
    %7 = arith.subf %1, %6 : vector<8x768xf32>
    %8 = arith.mulf %7, %7 : vector<8x768xf32>
    %cst_2 = arith.constant dense<0.000000e+00> : vector<8xf32>
    %9 = vector.multi_reduction <add>, %8, %cst_2 [1] : vector<8x768xf32> to vector<8xf32>
    %10 = vector.shape_cast %9 : vector<8xf32> to vector<8x1xf32>
    %cst_3 = arith.constant 7.680000e+02 : f32
    %11 = vector.broadcast %cst_3 : f32 to vector<8x1xf32>
    %12 = arith.divf %10, %11 : vector<8x1xf32>
    %13 = vector.broadcast %5 : vector<8x1xf32> to vector<8x768xf32>
    %14 = arith.subf %1, %13 : vector<8x768xf32>
    %cst_4 = arith.constant 9.99999996E-13 : f32
    %15 = vector.broadcast %cst_4 : f32 to vector<8x1xf32>
    %16 = arith.addf %12, %15 : vector<8x1xf32>
    %17 = math.rsqrt %16 : vector<8x1xf32>
    %18 = vector.broadcast %17 : vector<8x1xf32> to vector<8x768xf32>
    %19 = arith.mulf %14, %18 : vector<8x768xf32>
    %c0_5 = arith.constant 0 : index
    %c0_6 = arith.constant 0 : index
    %20 = vector.load %arg2[%c0_5, %c0_6] : memref<1x768xf32, #tpu.memory_space<vmem>>, vector<1x768xf32>
    %21 = vector.broadcast %20 : vector<1x768xf32> to vector<8x768xf32>
    %22 = arith.mulf %19, %21 : vector<8x768xf32>
    %c0_7 = arith.constant 0 : index
    %c0_8 = arith.constant 0 : index
    %23 = vector.load %arg3[%c0_7, %c0_8] : memref<1x768xf32, #tpu.memory_space<vmem>>, vector<1x768xf32>
    %24 = vector.broadcast %23 : vector<1x768xf32> to vector<8x768xf32>
    %25 = arith.addf %22, %24 : vector<8x768xf32>
    %26 = arith.truncf %25 : vector<8x768xf32> to vector<8x768xbf16>
    %c0_9 = arith.constant 0 : index
    %c0_10 = arith.constant 0 : index
    %27 = vector.load %arg4[%c0_9, %c0_10] : memref<8x768xbf16, #tpu.memory_space<vmem>>, vector<8x768xbf16>
    tpu.vector_store %arg4[%c0_9, %c0_10], %26 {strides = array<i32>} : memref<8x768xbf16, #tpu.memory_space<vmem>>, vector<8x768xbf16>,
    return
  }
  func.func @transform_0(%arg0: i32) -> (i32, i32) {
    %c0_i32 = arith.constant 0 : i32
    %c0_i32_0 = arith.constant 0 : i32
    return %arg0, %c0_i32 : i32, i32
  }
  func.func @transform_1(%arg0: i32) -> (i32, i32) {
    %c0_i32 = arith.constant 0 : i32
    %c0_i32_0 = arith.constant 0 : i32
    %c0_i32_1 = arith.constant 0 : i32
    return %c0_i32, %c0_i32_0 : i32, i32
  }
  func.func @transform_2(%arg0: i32) -> (i32, i32) {
    %c0_i32 = arith.constant 0 : i32
    %c0_i32_0 = arith.constant 0 : i32
    %c0_i32_1 = arith.constant 0 : i32
    return %c0_i32, %c0_i32_0 : i32, i32
  }
  func.func @transform_3(%arg0: i32) -> (i32, i32) {
    %c0_i32 = arith.constant 0 : i32
    %c0_i32_0 = arith.constant 0 : i32
    return %arg0, %c0_i32 : i32, i32
  }
}

module attributes {stable_mosaic.version = 11 : i64} {
  func.func @_linear_kernel(%arg0: i32, %arg1: i32, %arg2: i32, %arg3: memref<8x768xbf16, #tpu.memory_space<vmem>>, %arg4: memref<768x768xbf16, #tpu.memory_space<vmem>>, %arg5: memref<1x768xf32, #tpu.memory_space<vmem>>, %arg6: memref<8x768xbf16, #tpu.memory_space<vmem>>, %arg7: memref<8x768xf32, #tpu.memory_space<vmem>>) attributes {dimension_semantics = [#tpu.dimension_semantics<parallel>, #tpu.dimension_semantics<parallel>, #tpu.dimension_semantics<arbitrary>], iteration_bounds = array<i64: 2, 3, 1>, scalar_prefetch = 0 : i64, scratch_operands = 1 : i64, tpu.core_type = #tpu.core_type<tc>, window_params = [{transform_indices = @transform_0, window_bounds = array<i64: 8, 768>}, {transform_indices = @transform_1, window_bounds = array<i64: 768, 768>}, {transform_indices = @transform_2, window_bounds = array<i64: 1, 768>}, {transform_indices = @transform_3, window_bounds = array<i64: 8, 768>}]} {
    %c0_i32 = arith.constant 0 : i32
    %0 = arith.cmpi eq, %arg2, %c0_i32 : i32
    %1 = arith.extui %0 : i1 to i32
    %c0_i32_0 = arith.constant 0 : i32
    %2 = arith.cmpi ne, %1, %c0_i32_0 : i32
    scf.if %2 {
      %cst_10 = arith.constant 0.000000e+00 : f32
      %12 = vector.broadcast %cst_10 : f32 to vector<8x768xf32>
      %c0_11 = arith.constant 0 : index
      %c0_12 = arith.constant 0 : index
      %13 = vector.load %arg7[%c0_11, %c0_12] : memref<8x768xf32, #tpu.memory_space<vmem>>, vector<8x768xf32>
      tpu.vector_store %arg7[%c0_11, %c0_12], %12 {strides = array<i32>} : memref<8x768xf32, #tpu.memory_space<vmem>>, vector<8x768xf32>,
    } else {
    }
    %c0 = arith.constant 0 : index
    %c0_1 = arith.constant 0 : index
    %3 = vector.load %arg7[%c0, %c0_1] : memref<8x768xf32, #tpu.memory_space<vmem>>, vector<8x768xf32>
    %c0_2 = arith.constant 0 : index
    %c0_3 = arith.constant 0 : index
    %4 = vector.load %arg3[%c0_2, %c0_3] : memref<8x768xbf16, #tpu.memory_space<vmem>>, vector<8x768xbf16>
    %c0_4 = arith.constant 0 : index
    %c0_5 = arith.constant 0 : index
    %5 = vector.load %arg4[%c0_4, %c0_5] : memref<768x768xbf16, #tpu.memory_space<vmem>>, vector<768x768xbf16>
    %cst = arith.constant dense<0.000000e+00> : vector<8x768xf32>
    %6 = tpu.matmul %4, %5, %cst {dimension_numbers = #tpu.dot_dimension_numbers<[1], [0], [0], [1], [0, 0, 1, 1], [], []>} : vector<8x768xbf16>, vector<768x768xbf16>, vector<8x768xf32> -> vector<8x768xf32>
    %7 = arith.addf %3, %6 : vector<8x768xf32>
    %c0_6 = arith.constant 0 : index
    %c0_7 = arith.constant 0 : index
    %8 = vector.load %arg7[%c0_6, %c0_7] : memref<8x768xf32, #tpu.memory_space<vmem>>, vector<8x768xf32>
    tpu.vector_store %arg7[%c0_6, %c0_7], %7 {strides = array<i32>} : memref<8x768xf32, #tpu.memory_space<vmem>>, vector<8x768xf32>,
    %c0_i32_8 = arith.constant 0 : i32
    %9 = arith.cmpi eq, %arg2, %c0_i32_8 : i32
    %10 = arith.extui %9 : i1 to i32
    %c0_i32_9 = arith.constant 0 : i32
    %11 = arith.cmpi ne, %10, %c0_i32_9 : i32
    scf.if %11 {
      %c0_10 = arith.constant 0 : index
      %c0_11 = arith.constant 0 : index
      %12 = vector.load %arg7[%c0_10, %c0_11] : memref<8x768xf32, #tpu.memory_space<vmem>>, vector<8x768xf32>
      %c0_12 = arith.constant 0 : index
      %c0_13 = arith.constant 0 : index
      %13 = vector.load %arg5[%c0_12, %c0_13] : memref<1x768xf32, #tpu.memory_space<vmem>>, vector<1x768xf32>
      %14 = vector.broadcast %13 : vector<1x768xf32> to vector<8x768xf32>
      %15 = arith.addf %12, %14 : vector<8x768xf32>
      %16 = arith.truncf %15 : vector<8x768xf32> to vector<8x768xbf16>
      %c0_14 = arith.constant 0 : index
      %c0_15 = arith.constant 0 : index
      %17 = vector.load %arg6[%c0_14, %c0_15] : memref<8x768xbf16, #tpu.memory_space<vmem>>, vector<8x768xbf16>
      tpu.vector_store %arg6[%c0_14, %c0_15], %16 {strides = array<i32>} : memref<8x768xbf16, #tpu.memory_space<vmem>>, vector<8x768xbf16>,
    } else {
    }
    return
  }
  func.func @transform_0(%arg0: i32, %arg1: i32, %arg2: i32) -> (i32, i32) {
    %c0_i32 = arith.constant 0 : i32
    return %arg0, %arg2 : i32, i32
  }
  func.func @transform_1(%arg0: i32, %arg1: i32, %arg2: i32) -> (i32, i32) {
    %c0_i32 = arith.constant 0 : i32
    return %arg2, %arg1 : i32, i32
  }
  func.func @transform_2(%arg0: i32, %arg1: i32, %arg2: i32) -> (i32, i32) {
    %c0_i32 = arith.constant 0 : i32
    %c0_i32_0 = arith.constant 0 : i32
    return %c0_i32, %arg1 : i32, i32
  }
  func.func @transform_3(%arg0: i32, %arg1: i32, %arg2: i32) -> (i32, i32) {
    %c0_i32 = arith.constant 0 : i32
    return %arg0, %arg1 : i32, i32
  }
}

module attributes {stable_mosaic.version = 11 : i64} {
  func.func @_attention_kernel(%arg0: i32, %arg1: memref<8x768xbf16, #tpu.memory_space<vmem>>, %arg2: memref<8x768xbf16, #tpu.memory_space<vmem>>, %arg3: memref<8x768xbf16, #tpu.memory_space<vmem>>, %arg4: memref<1x1x8xf32, #tpu.memory_space<vmem>>, %arg5: memref<8x768xbf16, #tpu.memory_space<vmem>>) attributes {dimension_semantics = [#tpu.dimension_semantics<parallel>], iteration_bounds = array<i64: 2>, scalar_prefetch = 0 : i64, scratch_operands = 0 : i64, tpu.core_type = #tpu.core_type<tc>, window_params = [{transform_indices = @transform_0, window_bounds = array<i64: 8, 768>}, {transform_indices = @transform_1, window_bounds = array<i64: 8, 768>}, {transform_indices = @transform_2, window_bounds = array<i64: 8, 768>}, {transform_indices = @transform_3, window_bounds = array<i64: 1, 1, 8>}, {transform_indices = @transform_4, window_bounds = array<i64: 8, 768>}]} {
    %c0 = arith.constant 0 : index
    %c0_0 = arith.constant 0 : index
    %c0_1 = arith.constant 0 : index
    %0 = vector.load %arg4[%c0, %c0_0, %c0_1] : memref<1x1x8xf32, #tpu.memory_space<vmem>>, vector<1x1x8xf32>
    %1 = vector.shape_cast %0 : vector<1x1x8xf32> to vector<1x8xf32>
    %c0_2 = arith.constant 0 : index
    %c0_3 = arith.constant 0 : index
    %2 = vector.load %arg1[%c0_2, %c0_3] : memref<8x768xbf16, #tpu.memory_space<vmem>>, vector<8x768xbf16>
    %c0_4 = arith.constant 0 : index
    %c0_5 = arith.constant 0 : index
    %3 = vector.load %arg2[%c0_4, %c0_5] : memref<8x768xbf16, #tpu.memory_space<vmem>>, vector<8x768xbf16>
    %c0_6 = arith.constant 0 : index
    %c0_7 = arith.constant 0 : index
    %4 = vector.load %arg3[%c0_6, %c0_7] : memref<8x768xbf16, #tpu.memory_space<vmem>>, vector<8x768xbf16>
    %5 = vector.extract_strided_slice %2 {offsets = [0, 0], sizes = [8, 64], strides = [1, 1]} : vector<8x768xbf16> to vector<8x64xbf16>
    %6 = vector.extract_strided_slice %3 {offsets = [0, 0], sizes = [8, 64], strides = [1, 1]} : vector<8x768xbf16> to vector<8x64xbf16>
    %7 = vector.extract_strided_slice %4 {offsets = [0, 0], sizes = [8, 64], strides = [1, 1]} : vector<8x768xbf16> to vector<8x64xbf16>
    %cst = arith.constant dense<0.000000e+00> : vector<8x8xf32>
    %8 = tpu.matmul %5, %6, %cst {dimension_numbers = #tpu.dot_dimension_numbers<[1], [1], [0], [0], [0, 0, 1, 0], [], []>} : vector<8x64xbf16>, vector<8x64xbf16>, vector<8x8xf32> -> vector<8x8xf32>
    %9 = vector.broadcast %1 : vector<1x8xf32> to vector<8x8xf32>
    %10 = arith.addf %8, %9 : vector<8x8xf32>
    %cst_8 = arith.constant dense<0xFF800000> : vector<8xf32>
    %11 = vector.multi_reduction <maximumf>, %10, %cst_8 [1] : vector<8x8xf32> to vector<8xf32>
    %12 = vector.shape_cast %11 : vector<8xf32> to vector<8x1xf32>
    %13 = vector.broadcast %12 : vector<8x1xf32> to vector<8x8xf32>
    %14 = arith.subf %10, %13 : vector<8x8xf32>
    %15 = math.exp %14 : vector<8x8xf32>
    %cst_9 = arith.constant dense<0.000000e+00> : vector<8xf32>
    %16 = vector.multi_reduction <add>, %15, %cst_9 [1] : vector<8x8xf32> to vector<8xf32>
    %17 = vector.shape_cast %16 : vector<8xf32> to vector<8x1xf32>
    %18 = tpu.reciprocal %17 {approx = true} : vector<8x1xf32> -> vector<8x1xf32>
    %19 = vector.broadcast %18 : vector<8x1xf32> to vector<8x8xf32>
    %20 = arith.mulf %15, %19 : vector<8x8xf32>
    %21 = arith.truncf %20 : vector<8x8xf32> to vector<8x8xbf16>
    %cst_10 = arith.constant dense<0.000000e+00> : vector<8x64xf32>
    %22 = tpu.matmul %21, %7, %cst_10 {dimension_numbers = #tpu.dot_dimension_numbers<[1], [0], [0], [1], [0, 0, 1, 1], [], []>} : vector<8x8xbf16>, vector<8x64xbf16>, vector<8x64xf32> -> vector<8x64xf32>
    %23 = arith.truncf %22 : vector<8x64xf32> to vector<8x64xbf16>
    %c0_11 = arith.constant 0 : index
    %c0_12 = arith.constant 0 : index
    %24 = vector.load %arg5[%c0_11, %c0_12] : memref<8x768xbf16, #tpu.memory_space<vmem>>, vector<8x64xbf16>
    tpu.vector_store %arg5[%c0_11, %c0_12], %23 {strides = array<i32>} : memref<8x768xbf16, #tpu.memory_space<vmem>>, vector<8x64xbf16>,
    %25 = vector.extract_strided_slice %2 {offsets = [0, 64], sizes = [8, 64], strides = [1, 1]} : vector<8x768xbf16> to vector<8x64xbf16>
    %26 = vector.extract_strided_slice %3 {offsets = [0, 64], sizes = [8, 64], strides = [1, 1]} : vector<8x768xbf16> to vector<8x64xbf16>
    %27 = vector.extract_strided_slice %4 {offsets = [0, 64], sizes = [8, 64], strides = [1, 1]} : vector<8x768xbf16> to vector<8x64xbf16>
    %cst_13 = arith.constant dense<0.000000e+00> : vector<8x8xf32>
    %28 = tpu.matmul %25, %26, %cst_13 {dimension_numbers = #tpu.dot_dimension_numbers<[1], [1], [0], [0], [0, 0, 1, 0], [], []>} : vector<8x64xbf16>, vector<8x64xbf16>, vector<8x8xf32> -> vector<8x8xf32>
    %29 = vector.broadcast %1 : vector<1x8xf32> to vector<8x8xf32>
    %30 = arith.addf %28, %29 : vector<8x8xf32>
    %cst_14 = arith.constant dense<0xFF800000> : vector<8xf32>
    %31 = vector.multi_reduction <maximumf>, %30, %cst_14 [1] : vector<8x8xf32> to vector<8xf32>
    %32 = vector.shape_cast %31 : vector<8xf32> to vector<8x1xf32>
    %33 = vector.broadcast %32 : vector<8x1xf32> to vector<8x8xf32>
    %34 = arith.subf %30, %33 : vector<8x8xf32>
    %35 = math.exp %34 : vector<8x8xf32>
    %cst_15 = arith.constant dense<0.000000e+00> : vector<8xf32>
    %36 = vector.multi_reduction <add>, %35, %cst_15 [1] : vector<8x8xf32> to vector<8xf32>
    %37 = vector.shape_cast %36 : vector<8xf32> to vector<8x1xf32>
    %38 = tpu.reciprocal %37 {approx = true} : vector<8x1xf32> -> vector<8x1xf32>
    %39 = vector.broadcast %38 : vector<8x1xf32> to vector<8x8xf32>
    %40 = arith.mulf %35, %39 : vector<8x8xf32>
    %41 = arith.truncf %40 : vector<8x8xf32> to vector<8x8xbf16>
    %cst_16 = arith.constant dense<0.000000e+00> : vector<8x64xf32>
    %42 = tpu.matmul %41, %27, %cst_16 {dimension_numbers = #tpu.dot_dimension_numbers<[1], [0], [0], [1], [0, 0, 1, 1], [], []>} : vector<8x8xbf16>, vector<8x64xbf16>, vector<8x64xf32> -> vector<8x64xf32>
    %43 = arith.truncf %42 : vector<8x64xf32> to vector<8x64xbf16>
    %c0_17 = arith.constant 0 : index
    %c64 = arith.constant 64 : index
    %44 = vector.load %arg5[%c0_17, %c64] : memref<8x768xbf16, #tpu.memory_space<vmem>>, vector<8x64xbf16>
    tpu.vector_store %arg5[%c0_17, %c64], %43 {strides = array<i32>} : memref<8x768xbf16, #tpu.memory_space<vmem>>, vector<8x64xbf16>,
    %45 = vector.extract_strided_slice %2 {offsets = [0, 128], sizes = [8, 64], strides = [1, 1]} : vector<8x768xbf16> to vector<8x64xbf16>
    %46 = vector.extract_strided_slice %3 {offsets = [0, 128], sizes = [8, 64], strides = [1, 1]} : vector<8x768xbf16> to vector<8x64xbf16>
    %47 = vector.extract_strided_slice %4 {offsets = [0, 128], sizes = [8, 64], strides = [1, 1]} : vector<8x768xbf16> to vector<8x64xbf16>
    %cst_18 = arith.constant dense<0.000000e+00> : vector<8x8xf32>
    %48 = tpu.matmul %45, %46, %cst_18 {dimension_numbers = #tpu.dot_dimension_numbers<[1], [1], [0], [0], [0, 0, 1, 0], [], []>} : vector<8x64xbf16>, vector<8x64xbf16>, vector<8x8xf32> -> vector<8x8xf32>
    %49 = vector.broadcast %1 : vector<1x8xf32> to vector<8x8xf32>
    %50 = arith.addf %48, %49 : vector<8x8xf32>
    %cst_19 = arith.constant dense<0xFF800000> : vector<8xf32>
    %51 = vector.multi_reduction <maximumf>, %50, %cst_19 [1] : vector<8x8xf32> to vector<8xf32>
    %52 = vector.shape_cast %51 : vector<8xf32> to vector<8x1xf32>
    %53 = vector.broadcast %52 : vector<8x1xf32> to vector<8x8xf32>
    %54 = arith.subf %50, %53 : vector<8x8xf32>
    %55 = math.exp %54 : vector<8x8xf32>
    %cst_20 = arith.constant dense<0.000000e+00> : vector<8xf32>
    %56 = vector.multi_reduction <add>, %55, %cst_20 [1] : vector<8x8xf32> to vector<8xf32>
    %57 = vector.shape_cast %56 : vector<8xf32> to vector<8x1xf32>
    %58 = tpu.reciprocal %57 {approx = true} : vector<8x1xf32> -> vector<8x1xf32>
    %59 = vector.broadcast %58 : vector<8x1xf32> to vector<8x8xf32>
    %60 = arith.mulf %55, %59 : vector<8x8xf32>
    %61 = arith.truncf %60 : vector<8x8xf32> to vector<8x8xbf16>
    %cst_21 = arith.constant dense<0.000000e+00> : vector<8x64xf32>
    %62 = tpu.matmul %61, %47, %cst_21 {dimension_numbers = #tpu.dot_dimension_numbers<[1], [0], [0], [1], [0, 0, 1, 1], [], []>} : vector<8x8xbf16>, vector<8x64xbf16>, vector<8x64xf32> -> vector<8x64xf32>
    %63 = arith.truncf %62 : vector<8x64xf32> to vector<8x64xbf16>
    %c0_22 = arith.constant 0 : index
    %c128 = arith.constant 128 : index
    %64 = vector.load %arg5[%c0_22, %c128] : memref<8x768xbf16, #tpu.memory_space<vmem>>, vector<8x64xbf16>
    tpu.vector_store %arg5[%c0_22, %c128], %63 {strides = array<i32>} : memref<8x768xbf16, #tpu.memory_space<vmem>>, vector<8x64xbf16>,
    %65 = vector.extract_strided_slice %2 {offsets = [0, 192], sizes = [8, 64], strides = [1, 1]} : vector<8x768xbf16> to vector<8x64xbf16>
    %66 = vector.extract_strided_slice %3 {offsets = [0, 192], sizes = [8, 64], strides = [1, 1]} : vector<8x768xbf16> to vector<8x64xbf16>
    %67 = vector.extract_strided_slice %4 {offsets = [0, 192], sizes = [8, 64], strides = [1, 1]} : vector<8x768xbf16> to vector<8x64xbf16>
    %cst_23 = arith.constant dense<0.000000e+00> : vector<8x8xf32>
    %68 = tpu.matmul %65, %66, %cst_23 {dimension_numbers = #tpu.dot_dimension_numbers<[1], [1], [0], [0], [0, 0, 1, 0], [], []>} : vector<8x64xbf16>, vector<8x64xbf16>, vector<8x8xf32> -> vector<8x8xf32>
    %69 = vector.broadcast %1 : vector<1x8xf32> to vector<8x8xf32>
    %70 = arith.addf %68, %69 : vector<8x8xf32>
    %cst_24 = arith.constant dense<0xFF800000> : vector<8xf32>
    %71 = vector.multi_reduction <maximumf>, %70, %cst_24 [1] : vector<8x8xf32> to vector<8xf32>
    %72 = vector.shape_cast %71 : vector<8xf32> to vector<8x1xf32>
    %73 = vector.broadcast %72 : vector<8x1xf32> to vector<8x8xf32>
    %74 = arith.subf %70, %73 : vector<8x8xf32>
    %75 = math.exp %74 : vector<8x8xf32>
    %cst_25 = arith.constant dense<0.000000e+00> : vector<8xf32>
    %76 = vector.multi_reduction <add>, %75, %cst_25 [1] : vector<8x8xf32> to vector<8xf32>
    %77 = vector.shape_cast %76 : vector<8xf32> to vector<8x1xf32>
    %78 = tpu.reciprocal %77 {approx = true} : vector<8x1xf32> -> vector<8x1xf32>
    %79 = vector.broadcast %78 : vector<8x1xf32> to vector<8x8xf32>
    %80 = arith.mulf %75, %79 : vector<8x8xf32>
    %81 = arith.truncf %80 : vector<8x8xf32> to vector<8x8xbf16>
    %cst_26 = arith.constant dense<0.000000e+00> : vector<8x64xf32>
    %82 = tpu.matmul %81, %67, %cst_26 {dimension_numbers = #tpu.dot_dimension_numbers<[1], [0], [0], [1], [0, 0, 1, 1], [], []>} : vector<8x8xbf16>, vector<8x64xbf16>, vector<8x64xf32> -> vector<8x64xf32>
    %83 = arith.truncf %82 : vector<8x64xf32> to vector<8x64xbf16>
    %c0_27 = arith.constant 0 : index
    %c192 = arith.constant 192 : index
    %84 = vector.load %arg5[%c0_27, %c192] : memref<8x768xbf16, #tpu.memory_space<vmem>>, vector<8x64xbf16>
    tpu.vector_store %arg5[%c0_27, %c192], %83 {strides = array<i32>} : memref<8x768xbf16, #tpu.memory_space<vmem>>, vector<8x64xbf16>,
    %85 = vector.extract_strided_slice %2 {offsets = [0, 256], sizes = [8, 64], strides = [1, 1]} : vector<8x768xbf16> to vector<8x64xbf16>
    %86 = vector.extract_strided_slice %3 {offsets = [0, 256], sizes = [8, 64], strides = [1, 1]} : vector<8x768xbf16> to vector<8x64xbf16>
    %87 = vector.extract_strided_slice %4 {offsets = [0, 256], sizes = [8, 64], strides = [1, 1]} : vector<8x768xbf16> to vector<8x64xbf16>
    %cst_28 = arith.constant dense<0.000000e+00> : vector<8x8xf32>
    %88 = tpu.matmul %85, %86, %cst_28 {dimension_numbers = #tpu.dot_dimension_numbers<[1], [1], [0], [0], [0, 0, 1, 0], [], []>} : vector<8x64xbf16>, vector<8x64xbf16>, vector<8x8xf32> -> vector<8x8xf32>
    %89 = vector.broadcast %1 : vector<1x8xf32> to vector<8x8xf32>
    %90 = arith.addf %88, %89 : vector<8x8xf32>
    %cst_29 = arith.constant dense<0xFF800000> : vector<8xf32>
    %91 = vector.multi_reduction <maximumf>, %90, %cst_29 [1] : vector<8x8xf32> to vector<8xf32>
    %92 = vector.shape_cast %91 : vector<8xf32> to vector<8x1xf32>
    %93 = vector.broadcast %92 : vector<8x1xf32> to vector<8x8xf32>
    %94 = arith.subf %90, %93 : vector<8x8xf32>
    %95 = math.exp %94 : vector<8x8xf32>
    %cst_30 = arith.constant dense<0.000000e+00> : vector<8xf32>
    %96 = vector.multi_reduction <add>, %95, %cst_30 [1] : vector<8x8xf32> to vector<8xf32>
    %97 = vector.shape_cast %96 : vector<8xf32> to vector<8x1xf32>
    %98 = tpu.reciprocal %97 {approx = true} : vector<8x1xf32> -> vector<8x1xf32>
    %99 = vector.broadcast %98 : vector<8x1xf32> to vector<8x8xf32>
    %100 = arith.mulf %95, %99 : vector<8x8xf32>
    %101 = arith.truncf %100 : vector<8x8xf32> to vector<8x8xbf16>
    %cst_31 = arith.constant dense<0.000000e+00> : vector<8x64xf32>
    %102 = tpu.matmul %101, %87, %cst_31 {dimension_numbers = #tpu.dot_dimension_numbers<[1], [0], [0], [1], [0, 0, 1, 1], [], []>} : vector<8x8xbf16>, vector<8x64xbf16>, vector<8x64xf32> -> vector<8x64xf32>
    %103 = arith.truncf %102 : vector<8x64xf32> to vector<8x64xbf16>
    %c0_32 = arith.constant 0 : index
    %c256 = arith.constant 256 : index
    %104 = vector.load %arg5[%c0_32, %c256] : memref<8x768xbf16, #tpu.memory_space<vmem>>, vector<8x64xbf16>
    tpu.vector_store %arg5[%c0_32, %c256], %103 {strides = array<i32>} : memref<8x768xbf16, #tpu.memory_space<vmem>>, vector<8x64xbf16>,
    %105 = vector.extract_strided_slice %2 {offsets = [0, 320], sizes = [8, 64], strides = [1, 1]} : vector<8x768xbf16> to vector<8x64xbf16>
    %106 = vector.extract_strided_slice %3 {offsets = [0, 320], sizes = [8, 64], strides = [1, 1]} : vector<8x768xbf16> to vector<8x64xbf16>
    %107 = vector.extract_strided_slice %4 {offsets = [0, 320], sizes = [8, 64], strides = [1, 1]} : vector<8x768xbf16> to vector<8x64xbf16>
    %cst_33 = arith.constant dense<0.000000e+00> : vector<8x8xf32>
    %108 = tpu.matmul %105, %106, %cst_33 {dimension_numbers = #tpu.dot_dimension_numbers<[1], [1], [0], [0], [0, 0, 1, 0], [], []>} : vector<8x64xbf16>, vector<8x64xbf16>, vector<8x8xf32> -> vector<8x8xf32>
    %109 = vector.broadcast %1 : vector<1x8xf32> to vector<8x8xf32>
    %110 = arith.addf %108, %109 : vector<8x8xf32>
    %cst_34 = arith.constant dense<0xFF800000> : vector<8xf32>
    %111 = vector.multi_reduction <maximumf>, %110, %cst_34 [1] : vector<8x8xf32> to vector<8xf32>
    %112 = vector.shape_cast %111 : vector<8xf32> to vector<8x1xf32>
    %113 = vector.broadcast %112 : vector<8x1xf32> to vector<8x8xf32>
    %114 = arith.subf %110, %113 : vector<8x8xf32>
    %115 = math.exp %114 : vector<8x8xf32>
    %cst_35 = arith.constant dense<0.000000e+00> : vector<8xf32>
    %116 = vector.multi_reduction <add>, %115, %cst_35 [1] : vector<8x8xf32> to vector<8xf32>
    %117 = vector.shape_cast %116 : vector<8xf32> to vector<8x1xf32>
    %118 = tpu.reciprocal %117 {approx = true} : vector<8x1xf32> -> vector<8x1xf32>
    %119 = vector.broadcast %118 : vector<8x1xf32> to vector<8x8xf32>
    %120 = arith.mulf %115, %119 : vector<8x8xf32>
    %121 = arith.truncf %120 : vector<8x8xf32> to vector<8x8xbf16>
    %cst_36 = arith.constant dense<0.000000e+00> : vector<8x64xf32>
    %122 = tpu.matmul %121, %107, %cst_36 {dimension_numbers = #tpu.dot_dimension_numbers<[1], [0], [0], [1], [0, 0, 1, 1], [], []>} : vector<8x8xbf16>, vector<8x64xbf16>, vector<8x64xf32> -> vector<8x64xf32>
    %123 = arith.truncf %122 : vector<8x64xf32> to vector<8x64xbf16>
    %c0_37 = arith.constant 0 : index
    %c320 = arith.constant 320 : index
    %124 = vector.load %arg5[%c0_37, %c320] : memref<8x768xbf16, #tpu.memory_space<vmem>>, vector<8x64xbf16>
    tpu.vector_store %arg5[%c0_37, %c320], %123 {strides = array<i32>} : memref<8x768xbf16, #tpu.memory_space<vmem>>, vector<8x64xbf16>,
    %125 = vector.extract_strided_slice %2 {offsets = [0, 384], sizes = [8, 64], strides = [1, 1]} : vector<8x768xbf16> to vector<8x64xbf16>
    %126 = vector.extract_strided_slice %3 {offsets = [0, 384], sizes = [8, 64], strides = [1, 1]} : vector<8x768xbf16> to vector<8x64xbf16>
    %127 = vector.extract_strided_slice %4 {offsets = [0, 384], sizes = [8, 64], strides = [1, 1]} : vector<8x768xbf16> to vector<8x64xbf16>
    %cst_38 = arith.constant dense<0.000000e+00> : vector<8x8xf32>
    %128 = tpu.matmul %125, %126, %cst_38 {dimension_numbers = #tpu.dot_dimension_numbers<[1], [1], [0], [0], [0, 0, 1, 0], [], []>} : vector<8x64xbf16>, vector<8x64xbf16>, vector<8x8xf32> -> vector<8x8xf32>
    %129 = vector.broadcast %1 : vector<1x8xf32> to vector<8x8xf32>
    %130 = arith.addf %128, %129 : vector<8x8xf32>
    %cst_39 = arith.constant dense<0xFF800000> : vector<8xf32>
    %131 = vector.multi_reduction <maximumf>, %130, %cst_39 [1] : vector<8x8xf32> to vector<8xf32>
    %132 = vector.shape_cast %131 : vector<8xf32> to vector<8x1xf32>
    %133 = vector.broadcast %132 : vector<8x1xf32> to vector<8x8xf32>
    %134 = arith.subf %130, %133 : vector<8x8xf32>
    %135 = math.exp %134 : vector<8x8xf32>
    %cst_40 = arith.constant dense<0.000000e+00> : vector<8xf32>
    %136 = vector.multi_reduction <add>, %135, %cst_40 [1] : vector<8x8xf32> to vector<8xf32>
    %137 = vector.shape_cast %136 : vector<8xf32> to vector<8x1xf32>
    %138 = tpu.reciprocal %137 {approx = true} : vector<8x1xf32> -> vector<8x1xf32>
    %139 = vector.broadcast %138 : vector<8x1xf32> to vector<8x8xf32>
    %140 = arith.mulf %135, %139 : vector<8x8xf32>
    %141 = arith.truncf %140 : vector<8x8xf32> to vector<8x8xbf16>
    %cst_41 = arith.constant dense<0.000000e+00> : vector<8x64xf32>
    %142 = tpu.matmul %141, %127, %cst_41 {dimension_numbers = #tpu.dot_dimension_numbers<[1], [0], [0], [1], [0, 0, 1, 1], [], []>} : vector<8x8xbf16>, vector<8x64xbf16>, vector<8x64xf32> -> vector<8x64xf32>
    %143 = arith.truncf %142 : vector<8x64xf32> to vector<8x64xbf16>
    %c0_42 = arith.constant 0 : index
    %c384 = arith.constant 384 : index
    %144 = vector.load %arg5[%c0_42, %c384] : memref<8x768xbf16, #tpu.memory_space<vmem>>, vector<8x64xbf16>
    tpu.vector_store %arg5[%c0_42, %c384], %143 {strides = array<i32>} : memref<8x768xbf16, #tpu.memory_space<vmem>>, vector<8x64xbf16>,
    %145 = vector.extract_strided_slice %2 {offsets = [0, 448], sizes = [8, 64], strides = [1, 1]} : vector<8x768xbf16> to vector<8x64xbf16>
    %146 = vector.extract_strided_slice %3 {offsets = [0, 448], sizes = [8, 64], strides = [1, 1]} : vector<8x768xbf16> to vector<8x64xbf16>
    %147 = vector.extract_strided_slice %4 {offsets = [0, 448], sizes = [8, 64], strides = [1, 1]} : vector<8x768xbf16> to vector<8x64xbf16>
    %cst_43 = arith.constant dense<0.000000e+00> : vector<8x8xf32>
    %148 = tpu.matmul %145, %146, %cst_43 {dimension_numbers = #tpu.dot_dimension_numbers<[1], [1], [0], [0], [0, 0, 1, 0], [], []>} : vector<8x64xbf16>, vector<8x64xbf16>, vector<8x8xf32> -> vector<8x8xf32>
    %149 = vector.broadcast %1 : vector<1x8xf32> to vector<8x8xf32>
    %150 = arith.addf %148, %149 : vector<8x8xf32>
    %cst_44 = arith.constant dense<0xFF800000> : vector<8xf32>
    %151 = vector.multi_reduction <maximumf>, %150, %cst_44 [1] : vector<8x8xf32> to vector<8xf32>
    %152 = vector.shape_cast %151 : vector<8xf32> to vector<8x1xf32>
    %153 = vector.broadcast %152 : vector<8x1xf32> to vector<8x8xf32>
    %154 = arith.subf %150, %153 : vector<8x8xf32>
    %155 = math.exp %154 : vector<8x8xf32>
    %cst_45 = arith.constant dense<0.000000e+00> : vector<8xf32>
    %156 = vector.multi_reduction <add>, %155, %cst_45 [1] : vector<8x8xf32> to vector<8xf32>
    %157 = vector.shape_cast %156 : vector<8xf32> to vector<8x1xf32>
    %158 = tpu.reciprocal %157 {approx = true} : vector<8x1xf32> -> vector<8x1xf32>
    %159 = vector.broadcast %158 : vector<8x1xf32> to vector<8x8xf32>
    %160 = arith.mulf %155, %159 : vector<8x8xf32>
    %161 = arith.truncf %160 : vector<8x8xf32> to vector<8x8xbf16>
    %cst_46 = arith.constant dense<0.000000e+00> : vector<8x64xf32>
    %162 = tpu.matmul %161, %147, %cst_46 {dimension_numbers = #tpu.dot_dimension_numbers<[1], [0], [0], [1], [0, 0, 1, 1], [], []>} : vector<8x8xbf16>, vector<8x64xbf16>, vector<8x64xf32> -> vector<8x64xf32>
    %163 = arith.truncf %162 : vector<8x64xf32> to vector<8x64xbf16>
    %c0_47 = arith.constant 0 : index
    %c448 = arith.constant 448 : index
    %164 = vector.load %arg5[%c0_47, %c448] : memref<8x768xbf16, #tpu.memory_space<vmem>>, vector<8x64xbf16>
    tpu.vector_store %arg5[%c0_47, %c448], %163 {strides = array<i32>} : memref<8x768xbf16, #tpu.memory_space<vmem>>, vector<8x64xbf16>,
    %165 = vector.extract_strided_slice %2 {offsets = [0, 512], sizes = [8, 64], strides = [1, 1]} : vector<8x768xbf16> to vector<8x64xbf16>
    %166 = vector.extract_strided_slice %3 {offsets = [0, 512], sizes = [8, 64], strides = [1, 1]} : vector<8x768xbf16> to vector<8x64xbf16>
    %167 = vector.extract_strided_slice %4 {offsets = [0, 512], sizes = [8, 64], strides = [1, 1]} : vector<8x768xbf16> to vector<8x64xbf16>
    %cst_48 = arith.constant dense<0.000000e+00> : vector<8x8xf32>
    %168 = tpu.matmul %165, %166, %cst_48 {dimension_numbers = #tpu.dot_dimension_numbers<[1], [1], [0], [0], [0, 0, 1, 0], [], []>} : vector<8x64xbf16>, vector<8x64xbf16>, vector<8x8xf32> -> vector<8x8xf32>
    %169 = vector.broadcast %1 : vector<1x8xf32> to vector<8x8xf32>
    %170 = arith.addf %168, %169 : vector<8x8xf32>
    %cst_49 = arith.constant dense<0xFF800000> : vector<8xf32>
    %171 = vector.multi_reduction <maximumf>, %170, %cst_49 [1] : vector<8x8xf32> to vector<8xf32>
    %172 = vector.shape_cast %171 : vector<8xf32> to vector<8x1xf32>
    %173 = vector.broadcast %172 : vector<8x1xf32> to vector<8x8xf32>
    %174 = arith.subf %170, %173 : vector<8x8xf32>
    %175 = math.exp %174 : vector<8x8xf32>
    %cst_50 = arith.constant dense<0.000000e+00> : vector<8xf32>
    %176 = vector.multi_reduction <add>, %175, %cst_50 [1] : vector<8x8xf32> to vector<8xf32>
    %177 = vector.shape_cast %176 : vector<8xf32> to vector<8x1xf32>
    %178 = tpu.reciprocal %177 {approx = true} : vector<8x1xf32> -> vector<8x1xf32>
    %179 = vector.broadcast %178 : vector<8x1xf32> to vector<8x8xf32>
    %180 = arith.mulf %175, %179 : vector<8x8xf32>
    %181 = arith.truncf %180 : vector<8x8xf32> to vector<8x8xbf16>
    %cst_51 = arith.constant dense<0.000000e+00> : vector<8x64xf32>
    %182 = tpu.matmul %181, %167, %cst_51 {dimension_numbers = #tpu.dot_dimension_numbers<[1], [0], [0], [1], [0, 0, 1, 1], [], []>} : vector<8x8xbf16>, vector<8x64xbf16>, vector<8x64xf32> -> vector<8x64xf32>
    %183 = arith.truncf %182 : vector<8x64xf32> to vector<8x64xbf16>
    %c0_52 = arith.constant 0 : index
    %c512 = arith.constant 512 : index
    %184 = vector.load %arg5[%c0_52, %c512] : memref<8x768xbf16, #tpu.memory_space<vmem>>, vector<8x64xbf16>
    tpu.vector_store %arg5[%c0_52, %c512], %183 {strides = array<i32>} : memref<8x768xbf16, #tpu.memory_space<vmem>>, vector<8x64xbf16>,
    %185 = vector.extract_strided_slice %2 {offsets = [0, 576], sizes = [8, 64], strides = [1, 1]} : vector<8x768xbf16> to vector<8x64xbf16>
    %186 = vector.extract_strided_slice %3 {offsets = [0, 576], sizes = [8, 64], strides = [1, 1]} : vector<8x768xbf16> to vector<8x64xbf16>
    %187 = vector.extract_strided_slice %4 {offsets = [0, 576], sizes = [8, 64], strides = [1, 1]} : vector<8x768xbf16> to vector<8x64xbf16>
    %cst_53 = arith.constant dense<0.000000e+00> : vector<8x8xf32>
    %188 = tpu.matmul %185, %186, %cst_53 {dimension_numbers = #tpu.dot_dimension_numbers<[1], [1], [0], [0], [0, 0, 1, 0], [], []>} : vector<8x64xbf16>, vector<8x64xbf16>, vector<8x8xf32> -> vector<8x8xf32>
    %189 = vector.broadcast %1 : vector<1x8xf32> to vector<8x8xf32>
    %190 = arith.addf %188, %189 : vector<8x8xf32>
    %cst_54 = arith.constant dense<0xFF800000> : vector<8xf32>
    %191 = vector.multi_reduction <maximumf>, %190, %cst_54 [1] : vector<8x8xf32> to vector<8xf32>
    %192 = vector.shape_cast %191 : vector<8xf32> to vector<8x1xf32>
    %193 = vector.broadcast %192 : vector<8x1xf32> to vector<8x8xf32>
    %194 = arith.subf %190, %193 : vector<8x8xf32>
    %195 = math.exp %194 : vector<8x8xf32>
    %cst_55 = arith.constant dense<0.000000e+00> : vector<8xf32>
    %196 = vector.multi_reduction <add>, %195, %cst_55 [1] : vector<8x8xf32> to vector<8xf32>
    %197 = vector.shape_cast %196 : vector<8xf32> to vector<8x1xf32>
    %198 = tpu.reciprocal %197 {approx = true} : vector<8x1xf32> -> vector<8x1xf32>
    %199 = vector.broadcast %198 : vector<8x1xf32> to vector<8x8xf32>
    %200 = arith.mulf %195, %199 : vector<8x8xf32>
    %201 = arith.truncf %200 : vector<8x8xf32> to vector<8x8xbf16>
    %cst_56 = arith.constant dense<0.000000e+00> : vector<8x64xf32>
    %202 = tpu.matmul %201, %187, %cst_56 {dimension_numbers = #tpu.dot_dimension_numbers<[1], [0], [0], [1], [0, 0, 1, 1], [], []>} : vector<8x8xbf16>, vector<8x64xbf16>, vector<8x64xf32> -> vector<8x64xf32>
    %203 = arith.truncf %202 : vector<8x64xf32> to vector<8x64xbf16>
    %c0_57 = arith.constant 0 : index
    %c576 = arith.constant 576 : index
    %204 = vector.load %arg5[%c0_57, %c576] : memref<8x768xbf16, #tpu.memory_space<vmem>>, vector<8x64xbf16>
    tpu.vector_store %arg5[%c0_57, %c576], %203 {strides = array<i32>} : memref<8x768xbf16, #tpu.memory_space<vmem>>, vector<8x64xbf16>,
    %205 = vector.extract_strided_slice %2 {offsets = [0, 640], sizes = [8, 64], strides = [1, 1]} : vector<8x768xbf16> to vector<8x64xbf16>
    %206 = vector.extract_strided_slice %3 {offsets = [0, 640], sizes = [8, 64], strides = [1, 1]} : vector<8x768xbf16> to vector<8x64xbf16>
    %207 = vector.extract_strided_slice %4 {offsets = [0, 640], sizes = [8, 64], strides = [1, 1]} : vector<8x768xbf16> to vector<8x64xbf16>
    %cst_58 = arith.constant dense<0.000000e+00> : vector<8x8xf32>
    %208 = tpu.matmul %205, %206, %cst_58 {dimension_numbers = #tpu.dot_dimension_numbers<[1], [1], [0], [0], [0, 0, 1, 0], [], []>} : vector<8x64xbf16>, vector<8x64xbf16>, vector<8x8xf32> -> vector<8x8xf32>
    %209 = vector.broadcast %1 : vector<1x8xf32> to vector<8x8xf32>
    %210 = arith.addf %208, %209 : vector<8x8xf32>
    %cst_59 = arith.constant dense<0xFF800000> : vector<8xf32>
    %211 = vector.multi_reduction <maximumf>, %210, %cst_59 [1] : vector<8x8xf32> to vector<8xf32>
    %212 = vector.shape_cast %211 : vector<8xf32> to vector<8x1xf32>
    %213 = vector.broadcast %212 : vector<8x1xf32> to vector<8x8xf32>
    %214 = arith.subf %210, %213 : vector<8x8xf32>
    %215 = math.exp %214 : vector<8x8xf32>
    %cst_60 = arith.constant dense<0.000000e+00> : vector<8xf32>
    %216 = vector.multi_reduction <add>, %215, %cst_60 [1] : vector<8x8xf32> to vector<8xf32>
    %217 = vector.shape_cast %216 : vector<8xf32> to vector<8x1xf32>
    %218 = tpu.reciprocal %217 {approx = true} : vector<8x1xf32> -> vector<8x1xf32>
    %219 = vector.broadcast %218 : vector<8x1xf32> to vector<8x8xf32>
    %220 = arith.mulf %215, %219 : vector<8x8xf32>
    %221 = arith.truncf %220 : vector<8x8xf32> to vector<8x8xbf16>
    %cst_61 = arith.constant dense<0.000000e+00> : vector<8x64xf32>
    %222 = tpu.matmul %221, %207, %cst_61 {dimension_numbers = #tpu.dot_dimension_numbers<[1], [0], [0], [1], [0, 0, 1, 1], [], []>} : vector<8x8xbf16>, vector<8x64xbf16>, vector<8x64xf32> -> vector<8x64xf32>
    %223 = arith.truncf %222 : vector<8x64xf32> to vector<8x64xbf16>
    %c0_62 = arith.constant 0 : index
    %c640 = arith.constant 640 : index
    %224 = vector.load %arg5[%c0_62, %c640] : memref<8x768xbf16, #tpu.memory_space<vmem>>, vector<8x64xbf16>
    tpu.vector_store %arg5[%c0_62, %c640], %223 {strides = array<i32>} : memref<8x768xbf16, #tpu.memory_space<vmem>>, vector<8x64xbf16>,
    %225 = vector.extract_strided_slice %2 {offsets = [0, 704], sizes = [8, 64], strides = [1, 1]} : vector<8x768xbf16> to vector<8x64xbf16>
    %226 = vector.extract_strided_slice %3 {offsets = [0, 704], sizes = [8, 64], strides = [1, 1]} : vector<8x768xbf16> to vector<8x64xbf16>
    %227 = vector.extract_strided_slice %4 {offsets = [0, 704], sizes = [8, 64], strides = [1, 1]} : vector<8x768xbf16> to vector<8x64xbf16>
    %cst_63 = arith.constant dense<0.000000e+00> : vector<8x8xf32>
    %228 = tpu.matmul %225, %226, %cst_63 {dimension_numbers = #tpu.dot_dimension_numbers<[1], [1], [0], [0], [0, 0, 1, 0], [], []>} : vector<8x64xbf16>, vector<8x64xbf16>, vector<8x8xf32> -> vector<8x8xf32>
    %229 = vector.broadcast %1 : vector<1x8xf32> to vector<8x8xf32>
    %230 = arith.addf %228, %229 : vector<8x8xf32>
    %cst_64 = arith.constant dense<0xFF800000> : vector<8xf32>
    %231 = vector.multi_reduction <maximumf>, %230, %cst_64 [1] : vector<8x8xf32> to vector<8xf32>
    %232 = vector.shape_cast %231 : vector<8xf32> to vector<8x1xf32>
    %233 = vector.broadcast %232 : vector<8x1xf32> to vector<8x8xf32>
    %234 = arith.subf %230, %233 : vector<8x8xf32>
    %235 = math.exp %234 : vector<8x8xf32>
    %cst_65 = arith.constant dense<0.000000e+00> : vector<8xf32>
    %236 = vector.multi_reduction <add>, %235, %cst_65 [1] : vector<8x8xf32> to vector<8xf32>
    %237 = vector.shape_cast %236 : vector<8xf32> to vector<8x1xf32>
    %238 = tpu.reciprocal %237 {approx = true} : vector<8x1xf32> -> vector<8x1xf32>
    %239 = vector.broadcast %238 : vector<8x1xf32> to vector<8x8xf32>
    %240 = arith.mulf %235, %239 : vector<8x8xf32>
    %241 = arith.truncf %240 : vector<8x8xf32> to vector<8x8xbf16>
    %cst_66 = arith.constant dense<0.000000e+00> : vector<8x64xf32>
    %242 = tpu.matmul %241, %227, %cst_66 {dimension_numbers = #tpu.dot_dimension_numbers<[1], [0], [0], [1], [0, 0, 1, 1], [], []>} : vector<8x8xbf16>, vector<8x64xbf16>, vector<8x64xf32> -> vector<8x64xf32>
    %243 = arith.truncf %242 : vector<8x64xf32> to vector<8x64xbf16>
    %c0_67 = arith.constant 0 : index
    %c704 = arith.constant 704 : index
    %244 = vector.load %arg5[%c0_67, %c704] : memref<8x768xbf16, #tpu.memory_space<vmem>>, vector<8x64xbf16>
    tpu.vector_store %arg5[%c0_67, %c704], %243 {strides = array<i32>} : memref<8x768xbf16, #tpu.memory_space<vmem>>, vector<8x64xbf16>,
    return
  }
  func.func @transform_0(%arg0: i32) -> (i32, i32) {
    %c0_i32 = arith.constant 0 : i32
    %c0_i32_0 = arith.constant 0 : i32
    return %arg0, %c0_i32 : i32, i32
  }
  func.func @transform_1(%arg0: i32) -> (i32, i32) {
    %c1_i32 = arith.constant 1 : i32
    %c0_i32 = arith.constant 0 : i32
    return %arg0, %c1_i32 : i32, i32
  }
  func.func @transform_2(%arg0: i32) -> (i32, i32) {
    %c2_i32 = arith.constant 2 : i32
    %c0_i32 = arith.constant 0 : i32
    return %arg0, %c2_i32 : i32, i32
  }
  func.func @transform_3(%arg0: i32) -> (i32, i32, i32) {
    %c0_i32 = arith.constant 0 : i32
    %c0_i32_0 = arith.constant 0 : i32
    %c0_i32_1 = arith.constant 0 : i32
    return %arg0, %c0_i32, %c0_i32_0 : i32, i32, i32
  }
  func.func @transform_4(%arg0: i32) -> (i32, i32) {
    %c0_i32 = arith.constant 0 : i32
    %c0_i32_0 = arith.constant 0 : i32
    return %arg0, %c0_i32 : i32, i32
  }
}

module attributes {stable_mosaic.version = 11 : i64} {
  func.func @_linear_res_ln_kernel(%arg0: i32, %arg1: i32, %arg2: memref<8x768xbf16, #tpu.memory_space<vmem>>, %arg3: memref<768x768xbf16, #tpu.memory_space<vmem>>, %arg4: memref<1x768xf32, #tpu.memory_space<vmem>>, %arg5: memref<8x768xbf16, #tpu.memory_space<vmem>>, %arg6: memref<1x768xf32, #tpu.memory_space<vmem>>, %arg7: memref<1x768xf32, #tpu.memory_space<vmem>>, %arg8: memref<8x768xbf16, #tpu.memory_space<vmem>>, %arg9: memref<8x768xf32, #tpu.memory_space<vmem>>) attributes {dimension_semantics = [#tpu.dimension_semantics<parallel>, #tpu.dimension_semantics<arbitrary>], iteration_bounds = array<i64: 2, 1>, scalar_prefetch = 0 : i64, scratch_operands = 1 : i64, tpu.core_type = #tpu.core_type<tc>, window_params = [{transform_indices = @transform_0, window_bounds = array<i64: 8, 768>}, {transform_indices = @transform_1, window_bounds = array<i64: 768, 768>}, {pipeline_mode = #tpu.pipeline_mode<synchronous>, transform_indices = @transform_2, window_bounds = array<i64: 1, 768>}, {transform_indices = @transform_3, window_bounds = array<i64: 8, 768>}, {pipeline_mode = #tpu.pipeline_mode<synchronous>, transform_indices = @transform_4, window_bounds = array<i64: 1, 768>}, {pipeline_mode = #tpu.pipeline_mode<synchronous>, transform_indices = @transform_5, window_bounds = array<i64: 1, 768>}, {transform_indices = @transform_6, window_bounds = array<i64: 8, 768>}]} {
    %c0_i32 = arith.constant 0 : i32
    %0 = arith.cmpi eq, %arg1, %c0_i32 : i32
    %1 = arith.extui %0 : i1 to i32
    %c0_i32_0 = arith.constant 0 : i32
    %2 = arith.cmpi ne, %1, %c0_i32_0 : i32
    scf.if %2 {
      %cst_10 = arith.constant 0.000000e+00 : f32
      %12 = vector.broadcast %cst_10 : f32 to vector<8x768xf32>
      %c0_11 = arith.constant 0 : index
      %c0_12 = arith.constant 0 : index
      %13 = vector.load %arg9[%c0_11, %c0_12] : memref<8x768xf32, #tpu.memory_space<vmem>>, vector<8x768xf32>
      tpu.vector_store %arg9[%c0_11, %c0_12], %12 {strides = array<i32>} : memref<8x768xf32, #tpu.memory_space<vmem>>, vector<8x768xf32>,
    } else {
    }
    %c0 = arith.constant 0 : index
    %c0_1 = arith.constant 0 : index
    %3 = vector.load %arg9[%c0, %c0_1] : memref<8x768xf32, #tpu.memory_space<vmem>>, vector<8x768xf32>
    %c0_2 = arith.constant 0 : index
    %c0_3 = arith.constant 0 : index
    %4 = vector.load %arg2[%c0_2, %c0_3] : memref<8x768xbf16, #tpu.memory_space<vmem>>, vector<8x768xbf16>
    %c0_4 = arith.constant 0 : index
    %c0_5 = arith.constant 0 : index
    %5 = vector.load %arg3[%c0_4, %c0_5] : memref<768x768xbf16, #tpu.memory_space<vmem>>, vector<768x768xbf16>
    %cst = arith.constant dense<0.000000e+00> : vector<8x768xf32>
    %6 = tpu.matmul %4, %5, %cst {dimension_numbers = #tpu.dot_dimension_numbers<[1], [0], [0], [1], [0, 0, 1, 1], [], []>} : vector<8x768xbf16>, vector<768x768xbf16>, vector<8x768xf32> -> vector<8x768xf32>
    %7 = arith.addf %3, %6 : vector<8x768xf32>
    %c0_6 = arith.constant 0 : index
    %c0_7 = arith.constant 0 : index
    %8 = vector.load %arg9[%c0_6, %c0_7] : memref<8x768xf32, #tpu.memory_space<vmem>>, vector<8x768xf32>
    tpu.vector_store %arg9[%c0_6, %c0_7], %7 {strides = array<i32>} : memref<8x768xf32, #tpu.memory_space<vmem>>, vector<8x768xf32>,
    %c0_i32_8 = arith.constant 0 : i32
    %9 = arith.cmpi eq, %arg1, %c0_i32_8 : i32
    %10 = arith.extui %9 : i1 to i32
    %c0_i32_9 = arith.constant 0 : i32
    %11 = arith.cmpi ne, %10, %c0_i32_9 : i32
    scf.if %11 {
      %c0_10 = arith.constant 0 : index
      %c0_11 = arith.constant 0 : index
      %12 = vector.load %arg9[%c0_10, %c0_11] : memref<8x768xf32, #tpu.memory_space<vmem>>, vector<8x768xf32>
      %c0_12 = arith.constant 0 : index
      %c0_13 = arith.constant 0 : index
      %13 = vector.load %arg4[%c0_12, %c0_13] : memref<1x768xf32, #tpu.memory_space<vmem>>, vector<1x768xf32>
      %14 = vector.broadcast %13 : vector<1x768xf32> to vector<8x768xf32>
      %15 = arith.addf %12, %14 : vector<8x768xf32>
      %c0_14 = arith.constant 0 : index
      %c0_15 = arith.constant 0 : index
      %16 = vector.load %arg5[%c0_14, %c0_15] : memref<8x768xbf16, #tpu.memory_space<vmem>>, vector<8x768xbf16>
      %17 = arith.extf %16 : vector<8x768xbf16> to vector<8x768xf32>
      %18 = arith.addf %15, %17 : vector<8x768xf32>
      %cst_16 = arith.constant dense<0.000000e+00> : vector<8xf32>
      %19 = vector.multi_reduction <add>, %18, %cst_16 [1] : vector<8x768xf32> to vector<8xf32>
      %20 = vector.shape_cast %19 : vector<8xf32> to vector<8x1xf32>
      %cst_17 = arith.constant 7.680000e+02 : f32
      %21 = vector.broadcast %cst_17 : f32 to vector<8x1xf32>
      %22 = arith.divf %20, %21 : vector<8x1xf32>
      %23 = vector.broadcast %22 : vector<8x1xf32> to vector<8x768xf32>
      %24 = arith.subf %18, %23 : vector<8x768xf32>
      %25 = arith.mulf %24, %24 : vector<8x768xf32>
      %cst_18 = arith.constant dense<0.000000e+00> : vector<8xf32>
      %26 = vector.multi_reduction <add>, %25, %cst_18 [1] : vector<8x768xf32> to vector<8xf32>
      %27 = vector.shape_cast %26 : vector<8xf32> to vector<8x1xf32>
      %cst_19 = arith.constant 7.680000e+02 : f32
      %28 = vector.broadcast %cst_19 : f32 to vector<8x1xf32>
      %29 = arith.divf %27, %28 : vector<8x1xf32>
      %30 = vector.broadcast %22 : vector<8x1xf32> to vector<8x768xf32>
      %31 = arith.subf %18, %30 : vector<8x768xf32>
      %cst_20 = arith.constant 9.99999996E-13 : f32
      %32 = vector.broadcast %cst_20 : f32 to vector<8x1xf32>
      %33 = arith.addf %29, %32 : vector<8x1xf32>
      %34 = math.rsqrt %33 : vector<8x1xf32>
      %35 = vector.broadcast %34 : vector<8x1xf32> to vector<8x768xf32>
      %36 = arith.mulf %31, %35 : vector<8x768xf32>
      %c0_21 = arith.constant 0 : index
      %c0_22 = arith.constant 0 : index
      %37 = vector.load %arg6[%c0_21, %c0_22] : memref<1x768xf32, #tpu.memory_space<vmem>>, vector<1x768xf32>
      %38 = vector.broadcast %37 : vector<1x768xf32> to vector<8x768xf32>
      %39 = arith.mulf %36, %38 : vector<8x768xf32>
      %c0_23 = arith.constant 0 : index
      %c0_24 = arith.constant 0 : index
      %40 = vector.load %arg7[%c0_23, %c0_24] : memref<1x768xf32, #tpu.memory_space<vmem>>, vector<1x768xf32>
      %41 = vector.broadcast %40 : vector<1x768xf32> to vector<8x768xf32>
      %42 = arith.addf %39, %41 : vector<8x768xf32>
      %43 = arith.truncf %42 : vector<8x768xf32> to vector<8x768xbf16>
      %c0_25 = arith.constant 0 : index
      %c0_26 = arith.constant 0 : index
      %44 = vector.load %arg8[%c0_25, %c0_26] : memref<8x768xbf16, #tpu.memory_space<vmem>>, vector<8x768xbf16>
      tpu.vector_store %arg8[%c0_25, %c0_26], %43 {strides = array<i32>} : memref<8x768xbf16, #tpu.memory_space<vmem>>, vector<8x768xbf16>,
    } else {
    }
    return
  }
  func.func @transform_0(%arg0: i32, %arg1: i32) -> (i32, i32) {
    %c0_i32 = arith.constant 0 : i32
    return %arg0, %arg1 : i32, i32
  }
  func.func @transform_1(%arg0: i32, %arg1: i32) -> (i32, i32) {
    %c0_i32 = arith.constant 0 : i32
    %c0_i32_0 = arith.constant 0 : i32
    return %arg1, %c0_i32 : i32, i32
  }
  func.func @transform_2(%arg0: i32, %arg1: i32) -> (i32, i32) {
    %c0_i32 = arith.constant 0 : i32
    %c0_i32_0 = arith.constant 0 : i32
    %c0_i32_1 = arith.constant 0 : i32
    return %c0_i32, %c0_i32_0 : i32, i32
  }
  func.func @transform_3(%arg0: i32, %arg1: i32) -> (i32, i32) {
    %c0_i32 = arith.constant 0 : i32
    %c0_i32_0 = arith.constant 0 : i32
    return %arg0, %c0_i32 : i32, i32
  }
  func.func @transform_4(%arg0: i32, %arg1: i32) -> (i32, i32) {
    %c0_i32 = arith.constant 0 : i32
    %c0_i32_0 = arith.constant 0 : i32
    %c0_i32_1 = arith.constant 0 : i32
    return %c0_i32, %c0_i32_0 : i32, i32
  }
  func.func @transform_5(%arg0: i32, %arg1: i32) -> (i32, i32) {
    %c0_i32 = arith.constant 0 : i32
    %c0_i32_0 = arith.constant 0 : i32
    %c0_i32_1 = arith.constant 0 : i32
    return %c0_i32, %c0_i32_0 : i32, i32
  }
  func.func @transform_6(%arg0: i32, %arg1: i32) -> (i32, i32) {
    %c0_i32 = arith.constant 0 : i32
    %c0_i32_0 = arith.constant 0 : i32
    return %arg0, %c0_i32 : i32, i32
  }
}

module attributes {stable_mosaic.version = 11 : i64} {
  func.func @_linear_kernel(%arg0: i32, %arg1: i32, %arg2: i32, %arg3: memref<8x768xbf16, #tpu.memory_space<vmem>>, %arg4: memref<768x768xbf16, #tpu.memory_space<vmem>>, %arg5: memref<1x768xf32, #tpu.memory_space<vmem>>, %arg6: memref<8x768xbf16, #tpu.memory_space<vmem>>, %arg7: memref<8x768xf32, #tpu.memory_space<vmem>>) attributes {dimension_semantics = [#tpu.dimension_semantics<parallel>, #tpu.dimension_semantics<parallel>, #tpu.dimension_semantics<arbitrary>], iteration_bounds = array<i64: 2, 4, 1>, scalar_prefetch = 0 : i64, scratch_operands = 1 : i64, tpu.core_type = #tpu.core_type<tc>, window_params = [{transform_indices = @transform_0, window_bounds = array<i64: 8, 768>}, {transform_indices = @transform_1, window_bounds = array<i64: 768, 768>}, {transform_indices = @transform_2, window_bounds = array<i64: 1, 768>}, {transform_indices = @transform_3, window_bounds = array<i64: 8, 768>}]} {
    %c0_i32 = arith.constant 0 : i32
    %0 = arith.cmpi eq, %arg2, %c0_i32 : i32
    %1 = arith.extui %0 : i1 to i32
    %c0_i32_0 = arith.constant 0 : i32
    %2 = arith.cmpi ne, %1, %c0_i32_0 : i32
    scf.if %2 {
      %cst_10 = arith.constant 0.000000e+00 : f32
      %12 = vector.broadcast %cst_10 : f32 to vector<8x768xf32>
      %c0_11 = arith.constant 0 : index
      %c0_12 = arith.constant 0 : index
      %13 = vector.load %arg7[%c0_11, %c0_12] : memref<8x768xf32, #tpu.memory_space<vmem>>, vector<8x768xf32>
      tpu.vector_store %arg7[%c0_11, %c0_12], %12 {strides = array<i32>} : memref<8x768xf32, #tpu.memory_space<vmem>>, vector<8x768xf32>,
    } else {
    }
    %c0 = arith.constant 0 : index
    %c0_1 = arith.constant 0 : index
    %3 = vector.load %arg7[%c0, %c0_1] : memref<8x768xf32, #tpu.memory_space<vmem>>, vector<8x768xf32>
    %c0_2 = arith.constant 0 : index
    %c0_3 = arith.constant 0 : index
    %4 = vector.load %arg3[%c0_2, %c0_3] : memref<8x768xbf16, #tpu.memory_space<vmem>>, vector<8x768xbf16>
    %c0_4 = arith.constant 0 : index
    %c0_5 = arith.constant 0 : index
    %5 = vector.load %arg4[%c0_4, %c0_5] : memref<768x768xbf16, #tpu.memory_space<vmem>>, vector<768x768xbf16>
    %cst = arith.constant dense<0.000000e+00> : vector<8x768xf32>
    %6 = tpu.matmul %4, %5, %cst {dimension_numbers = #tpu.dot_dimension_numbers<[1], [0], [0], [1], [0, 0, 1, 1], [], []>} : vector<8x768xbf16>, vector<768x768xbf16>, vector<8x768xf32> -> vector<8x768xf32>
    %7 = arith.addf %3, %6 : vector<8x768xf32>
    %c0_6 = arith.constant 0 : index
    %c0_7 = arith.constant 0 : index
    %8 = vector.load %arg7[%c0_6, %c0_7] : memref<8x768xf32, #tpu.memory_space<vmem>>, vector<8x768xf32>
    tpu.vector_store %arg7[%c0_6, %c0_7], %7 {strides = array<i32>} : memref<8x768xf32, #tpu.memory_space<vmem>>, vector<8x768xf32>,
    %c0_i32_8 = arith.constant 0 : i32
    %9 = arith.cmpi eq, %arg2, %c0_i32_8 : i32
    %10 = arith.extui %9 : i1 to i32
    %c0_i32_9 = arith.constant 0 : i32
    %11 = arith.cmpi ne, %10, %c0_i32_9 : i32
    scf.if %11 {
      %c0_10 = arith.constant 0 : index
      %c0_11 = arith.constant 0 : index
      %12 = vector.load %arg7[%c0_10, %c0_11] : memref<8x768xf32, #tpu.memory_space<vmem>>, vector<8x768xf32>
      %c0_12 = arith.constant 0 : index
      %c0_13 = arith.constant 0 : index
      %13 = vector.load %arg5[%c0_12, %c0_13] : memref<1x768xf32, #tpu.memory_space<vmem>>, vector<1x768xf32>
      %14 = vector.broadcast %13 : vector<1x768xf32> to vector<8x768xf32>
      %15 = arith.addf %12, %14 : vector<8x768xf32>
      %cst_14 = arith.constant 5.000000e-01 : f32
      %16 = vector.broadcast %cst_14 : f32 to vector<8x768xf32>
      %17 = arith.mulf %16, %15 : vector<8x768xf32>
      %cst_15 = arith.constant 4.471500e-02 : f32
      %18 = vector.broadcast %cst_15 : f32 to vector<8x768xf32>
      %19 = arith.mulf %18, %15 : vector<8x768xf32>
      %20 = arith.mulf %19, %15 : vector<8x768xf32>
      %21 = arith.mulf %20, %15 : vector<8x768xf32>
      %22 = arith.addf %15, %21 : vector<8x768xf32>
      %cst_16 = arith.constant 0.797884583 : f32
      %23 = vector.broadcast %cst_16 : f32 to vector<8x768xf32>
      %24 = arith.mulf %23, %22 : vector<8x768xf32>
      %25 = math.tanh %24 : vector<8x768xf32>
      %cst_17 = arith.constant 1.000000e+00 : f32
      %26 = vector.broadcast %cst_17 : f32 to vector<8x768xf32>
      %27 = arith.addf %26, %25 : vector<8x768xf32>
      %28 = arith.mulf %17, %27 : vector<8x768xf32>
      %29 = arith.truncf %28 : vector<8x768xf32> to vector<8x768xbf16>
      %c0_18 = arith.constant 0 : index
      %c0_19 = arith.constant 0 : index
      %30 = vector.load %arg6[%c0_18, %c0_19] : memref<8x768xbf16, #tpu.memory_space<vmem>>, vector<8x768xbf16>
      tpu.vector_store %arg6[%c0_18, %c0_19], %29 {strides = array<i32>} : memref<8x768xbf16, #tpu.memory_space<vmem>>, vector<8x768xbf16>,
    } else {
    }
    return
  }
  func.func @transform_0(%arg0: i32, %arg1: i32, %arg2: i32) -> (i32, i32) {
    %c0_i32 = arith.constant 0 : i32
    return %arg0, %arg2 : i32, i32
  }
  func.func @transform_1(%arg0: i32, %arg1: i32, %arg2: i32) -> (i32, i32) {
    %c0_i32 = arith.constant 0 : i32
    return %arg2, %arg1 : i32, i32
  }
  func.func @transform_2(%arg0: i32, %arg1: i32, %arg2: i32) -> (i32, i32) {
    %c0_i32 = arith.constant 0 : i32
    %c0_i32_0 = arith.constant 0 : i32
    return %c0_i32, %arg1 : i32, i32
  }
  func.func @transform_3(%arg0: i32, %arg1: i32, %arg2: i32) -> (i32, i32) {
    %c0_i32 = arith.constant 0 : i32
    return %arg0, %arg1 : i32, i32
  }
}

module attributes {stable_mosaic.version = 11 : i64} {
  func.func @_linear_res_ln_kernel(%arg0: i32, %arg1: i32, %arg2: memref<8x768xbf16, #tpu.memory_space<vmem>>, %arg3: memref<768x768xbf16, #tpu.memory_space<vmem>>, %arg4: memref<1x768xf32, #tpu.memory_space<vmem>>, %arg5: memref<8x768xbf16, #tpu.memory_space<vmem>>, %arg6: memref<1x768xf32, #tpu.memory_space<vmem>>, %arg7: memref<1x768xf32, #tpu.memory_space<vmem>>, %arg8: memref<8x768xbf16, #tpu.memory_space<vmem>>, %arg9: memref<8x768xf32, #tpu.memory_space<vmem>>) attributes {dimension_semantics = [#tpu.dimension_semantics<parallel>, #tpu.dimension_semantics<arbitrary>], iteration_bounds = array<i64: 2, 4>, scalar_prefetch = 0 : i64, scratch_operands = 1 : i64, tpu.core_type = #tpu.core_type<tc>, window_params = [{transform_indices = @transform_0, window_bounds = array<i64: 8, 768>}, {transform_indices = @transform_1, window_bounds = array<i64: 768, 768>}, {pipeline_mode = #tpu.pipeline_mode<synchronous>, transform_indices = @transform_2, window_bounds = array<i64: 1, 768>}, {transform_indices = @transform_3, window_bounds = array<i64: 8, 768>}, {pipeline_mode = #tpu.pipeline_mode<synchronous>, transform_indices = @transform_4, window_bounds = array<i64: 1, 768>}, {pipeline_mode = #tpu.pipeline_mode<synchronous>, transform_indices = @transform_5, window_bounds = array<i64: 1, 768>}, {transform_indices = @transform_6, window_bounds = array<i64: 8, 768>}]} {
    %c0_i32 = arith.constant 0 : i32
    %0 = arith.cmpi eq, %arg1, %c0_i32 : i32
    %1 = arith.extui %0 : i1 to i32
    %c0_i32_0 = arith.constant 0 : i32
    %2 = arith.cmpi ne, %1, %c0_i32_0 : i32
    scf.if %2 {
      %cst_9 = arith.constant 0.000000e+00 : f32
      %12 = vector.broadcast %cst_9 : f32 to vector<8x768xf32>
      %c0_10 = arith.constant 0 : index
      %c0_11 = arith.constant 0 : index
      %13 = vector.load %arg9[%c0_10, %c0_11] : memref<8x768xf32, #tpu.memory_space<vmem>>, vector<8x768xf32>
      tpu.vector_store %arg9[%c0_10, %c0_11], %12 {strides = array<i32>} : memref<8x768xf32, #tpu.memory_space<vmem>>, vector<8x768xf32>,
    } else {
    }
    %c0 = arith.constant 0 : index
    %c0_1 = arith.constant 0 : index
    %3 = vector.load %arg9[%c0, %c0_1] : memref<8x768xf32, #tpu.memory_space<vmem>>, vector<8x768xf32>
    %c0_2 = arith.constant 0 : index
    %c0_3 = arith.constant 0 : index
    %4 = vector.load %arg2[%c0_2, %c0_3] : memref<8x768xbf16, #tpu.memory_space<vmem>>, vector<8x768xbf16>
    %c0_4 = arith.constant 0 : index
    %c0_5 = arith.constant 0 : index
    %5 = vector.load %arg3[%c0_4, %c0_5] : memref<768x768xbf16, #tpu.memory_space<vmem>>, vector<768x768xbf16>
    %cst = arith.constant dense<0.000000e+00> : vector<8x768xf32>
    %6 = tpu.matmul %4, %5, %cst {dimension_numbers = #tpu.dot_dimension_numbers<[1], [0], [0], [1], [0, 0, 1, 1], [], []>} : vector<8x768xbf16>, vector<768x768xbf16>, vector<8x768xf32> -> vector<8x768xf32>
    %7 = arith.addf %3, %6 : vector<8x768xf32>
    %c0_6 = arith.constant 0 : index
    %c0_7 = arith.constant 0 : index
    %8 = vector.load %arg9[%c0_6, %c0_7] : memref<8x768xf32, #tpu.memory_space<vmem>>, vector<8x768xf32>
    tpu.vector_store %arg9[%c0_6, %c0_7], %7 {strides = array<i32>} : memref<8x768xf32, #tpu.memory_space<vmem>>, vector<8x768xf32>,
    %c3_i32 = arith.constant 3 : i32
    %9 = arith.cmpi eq, %arg1, %c3_i32 : i32
    %10 = arith.extui %9 : i1 to i32
    %c0_i32_8 = arith.constant 0 : i32
    %11 = arith.cmpi ne, %10, %c0_i32_8 : i32
    scf.if %11 {
      %c0_9 = arith.constant 0 : index
      %c0_10 = arith.constant 0 : index
      %12 = vector.load %arg9[%c0_9, %c0_10] : memref<8x768xf32, #tpu.memory_space<vmem>>, vector<8x768xf32>
      %c0_11 = arith.constant 0 : index
      %c0_12 = arith.constant 0 : index
      %13 = vector.load %arg4[%c0_11, %c0_12] : memref<1x768xf32, #tpu.memory_space<vmem>>, vector<1x768xf32>
      %14 = vector.broadcast %13 : vector<1x768xf32> to vector<8x768xf32>
      %15 = arith.addf %12, %14 : vector<8x768xf32>
      %c0_13 = arith.constant 0 : index
      %c0_14 = arith.constant 0 : index
      %16 = vector.load %arg5[%c0_13, %c0_14] : memref<8x768xbf16, #tpu.memory_space<vmem>>, vector<8x768xbf16>
      %17 = arith.extf %16 : vector<8x768xbf16> to vector<8x768xf32>
      %18 = arith.addf %15, %17 : vector<8x768xf32>
      %cst_15 = arith.constant dense<0.000000e+00> : vector<8xf32>
      %19 = vector.multi_reduction <add>, %18, %cst_15 [1] : vector<8x768xf32> to vector<8xf32>
      %20 = vector.shape_cast %19 : vector<8xf32> to vector<8x1xf32>
      %cst_16 = arith.constant 7.680000e+02 : f32
      %21 = vector.broadcast %cst_16 : f32 to vector<8x1xf32>
      %22 = arith.divf %20, %21 : vector<8x1xf32>
      %23 = vector.broadcast %22 : vector<8x1xf32> to vector<8x768xf32>
      %24 = arith.subf %18, %23 : vector<8x768xf32>
      %25 = arith.mulf %24, %24 : vector<8x768xf32>
      %cst_17 = arith.constant dense<0.000000e+00> : vector<8xf32>
      %26 = vector.multi_reduction <add>, %25, %cst_17 [1] : vector<8x768xf32> to vector<8xf32>
      %27 = vector.shape_cast %26 : vector<8xf32> to vector<8x1xf32>
      %cst_18 = arith.constant 7.680000e+02 : f32
      %28 = vector.broadcast %cst_18 : f32 to vector<8x1xf32>
      %29 = arith.divf %27, %28 : vector<8x1xf32>
      %30 = vector.broadcast %22 : vector<8x1xf32> to vector<8x768xf32>
      %31 = arith.subf %18, %30 : vector<8x768xf32>
      %cst_19 = arith.constant 9.99999996E-13 : f32
      %32 = vector.broadcast %cst_19 : f32 to vector<8x1xf32>
      %33 = arith.addf %29, %32 : vector<8x1xf32>
      %34 = math.rsqrt %33 : vector<8x1xf32>
      %35 = vector.broadcast %34 : vector<8x1xf32> to vector<8x768xf32>
      %36 = arith.mulf %31, %35 : vector<8x768xf32>
      %c0_20 = arith.constant 0 : index
      %c0_21 = arith.constant 0 : index
      %37 = vector.load %arg6[%c0_20, %c0_21] : memref<1x768xf32, #tpu.memory_space<vmem>>, vector<1x768xf32>
      %38 = vector.broadcast %37 : vector<1x768xf32> to vector<8x768xf32>
      %39 = arith.mulf %36, %38 : vector<8x768xf32>
      %c0_22 = arith.constant 0 : index
      %c0_23 = arith.constant 0 : index
      %40 = vector.load %arg7[%c0_22, %c0_23] : memref<1x768xf32, #tpu.memory_space<vmem>>, vector<1x768xf32>
      %41 = vector.broadcast %40 : vector<1x768xf32> to vector<8x768xf32>
      %42 = arith.addf %39, %41 : vector<8x768xf32>
      %43 = arith.truncf %42 : vector<8x768xf32> to vector<8x768xbf16>
      %c0_24 = arith.constant 0 : index
      %c0_25 = arith.constant 0 : index
      %44 = vector.load %arg8[%c0_24, %c0_25] : memref<8x768xbf16, #tpu.memory_space<vmem>>, vector<8x768xbf16>
      tpu.vector_store %arg8[%c0_24, %c0_25], %43 {strides = array<i32>} : memref<8x768xbf16, #tpu.memory_space<vmem>>, vector<8x768xbf16>,
    } else {
    }
    return
  }
  func.func @transform_0(%arg0: i32, %arg1: i32) -> (i32, i32) {
    %c0_i32 = arith.constant 0 : i32
    return %arg0, %arg1 : i32, i32
  }
  func.func @transform_1(%arg0: i32, %arg1: i32) -> (i32, i32) {
    %c0_i32 = arith.constant 0 : i32
    %c0_i32_0 = arith.constant 0 : i32
    return %arg1, %c0_i32 : i32, i32
  }
  func.func @transform_2(%arg0: i32, %arg1: i32) -> (i32, i32) {
    %c0_i32 = arith.constant 0 : i32
    %c0_i32_0 = arith.constant 0 : i32
    %c0_i32_1 = arith.constant 0 : i32
    return %c0_i32, %c0_i32_0 : i32, i32
  }
  func.func @transform_3(%arg0: i32, %arg1: i32) -> (i32, i32) {
    %c0_i32 = arith.constant 0 : i32
    %c0_i32_0 = arith.constant 0 : i32
    return %arg0, %c0_i32 : i32, i32
  }
  func.func @transform_4(%arg0: i32, %arg1: i32) -> (i32, i32) {
    %c0_i32 = arith.constant 0 : i32
    %c0_i32_0 = arith.constant 0 : i32
    %c0_i32_1 = arith.constant 0 : i32
    return %c0_i32, %c0_i32_0 : i32, i32
  }
  func.func @transform_5(%arg0: i32, %arg1: i32) -> (i32, i32) {
    %c0_i32 = arith.constant 0 : i32
    %c0_i32_0 = arith.constant 0 : i32
    %c0_i32_1 = arith.constant 0 : i32
    return %c0_i32, %c0_i32_0 : i32, i32
  }
  func.func @transform_6(%arg0: i32, %arg1: i32) -> (i32, i32) {
    %c0_i32 = arith.constant 0 : i32
    %c0_i32_0 = arith.constant 0 : i32
    return %arg0, %c0_i32 : i32, i32
  }
}

module attributes {stable_mosaic.version = 11 : i64} {
  func.func @_head_kernel(%arg0: i32, %arg1: memref<2x768xbf16, #tpu.memory_space<vmem>>, %arg2: memref<768x768xbf16, #tpu.memory_space<vmem>>, %arg3: memref<1x768xf32, #tpu.memory_space<vmem>>, %arg4: memref<1x768xf32, #tpu.memory_space<vmem>>, %arg5: memref<1x768xf32, #tpu.memory_space<vmem>>, %arg6: memref<1x768xf32, #tpu.memory_space<vmem>>, %arg7: memref<1x768xf32, #tpu.memory_space<vmem>>, %arg8: memref<768x128xf32, #tpu.memory_space<vmem>>, %arg9: memref<1x128xf32, #tpu.memory_space<vmem>>, %arg10: memref<2x128xf32, #tpu.memory_space<vmem>>) attributes {dimension_semantics = [#tpu.dimension_semantics<arbitrary>], iteration_bounds = array<i64: 1>, scalar_prefetch = 0 : i64, scratch_operands = 0 : i64, tpu.core_type = #tpu.core_type<tc>, window_params = [{pipeline_mode = #tpu.pipeline_mode<synchronous>, transform_indices = @transform_0, window_bounds = array<i64: 2, 768>}, {pipeline_mode = #tpu.pipeline_mode<synchronous>, transform_indices = @transform_1, window_bounds = array<i64: 768, 768>}, {pipeline_mode = #tpu.pipeline_mode<synchronous>, transform_indices = @transform_2, window_bounds = array<i64: 1, 768>}, {pipeline_mode = #tpu.pipeline_mode<synchronous>, transform_indices = @transform_3, window_bounds = array<i64: 1, 768>}, {pipeline_mode = #tpu.pipeline_mode<synchronous>, transform_indices = @transform_4, window_bounds = array<i64: 1, 768>}, {pipeline_mode = #tpu.pipeline_mode<synchronous>, transform_indices = @transform_5, window_bounds = array<i64: 1, 768>}, {pipeline_mode = #tpu.pipeline_mode<synchronous>, transform_indices = @transform_6, window_bounds = array<i64: 1, 768>}, {pipeline_mode = #tpu.pipeline_mode<synchronous>, transform_indices = @transform_7, window_bounds = array<i64: 768, 128>}, {pipeline_mode = #tpu.pipeline_mode<synchronous>, transform_indices = @transform_8, window_bounds = array<i64: 1, 128>}, {pipeline_mode = #tpu.pipeline_mode<synchronous>, transform_indices = @transform_9, window_bounds = array<i64: 2, 128>}]} {
    %c0 = arith.constant 0 : index
    %c0_0 = arith.constant 0 : index
    %0 = vector.load %arg1[%c0, %c0_0] : memref<2x768xbf16, #tpu.memory_space<vmem>>, vector<2x768xbf16>
    %c0_1 = arith.constant 0 : index
    %c0_2 = arith.constant 0 : index
    %1 = vector.load %arg2[%c0_1, %c0_2] : memref<768x768xbf16, #tpu.memory_space<vmem>>, vector<768x768xbf16>
    %cst = arith.constant dense<0.000000e+00> : vector<2x768xf32>
    %2 = tpu.matmul %0, %1, %cst {dimension_numbers = #tpu.dot_dimension_numbers<[1], [0], [0], [1], [0, 0, 1, 1], [], []>} : vector<2x768xbf16>, vector<768x768xbf16>, vector<2x768xf32> -> vector<2x768xf32>
    %c0_3 = arith.constant 0 : index
    %c0_4 = arith.constant 0 : index
    %3 = vector.load %arg3[%c0_3, %c0_4] : memref<1x768xf32, #tpu.memory_space<vmem>>, vector<1x768xf32>
    %4 = vector.broadcast %3 : vector<1x768xf32> to vector<2x768xf32>
    %5 = arith.addf %2, %4 : vector<2x768xf32>
    %6 = math.tanh %5 : vector<2x768xf32>
    %c0_5 = arith.constant 0 : index
    %c0_6 = arith.constant 0 : index
    %7 = vector.load %arg6[%c0_5, %c0_6] : memref<1x768xf32, #tpu.memory_space<vmem>>, vector<1x768xf32>
    %8 = vector.broadcast %7 : vector<1x768xf32> to vector<2x768xf32>
    %9 = arith.subf %6, %8 : vector<2x768xf32>
    %c0_7 = arith.constant 0 : index
    %c0_8 = arith.constant 0 : index
    %10 = vector.load %arg7[%c0_7, %c0_8] : memref<1x768xf32, #tpu.memory_space<vmem>>, vector<1x768xf32>
    %cst_9 = arith.constant 9.99999974E-6 : f32
    %11 = vector.broadcast %cst_9 : f32 to vector<1x768xf32>
    %12 = arith.addf %10, %11 : vector<1x768xf32>
    %13 = math.rsqrt %12 : vector<1x768xf32>
    %14 = vector.broadcast %13 : vector<1x768xf32> to vector<2x768xf32>
    %15 = arith.mulf %9, %14 : vector<2x768xf32>
    %c0_10 = arith.constant 0 : index
    %c0_11 = arith.constant 0 : index
    %16 = vector.load %arg4[%c0_10, %c0_11] : memref<1x768xf32, #tpu.memory_space<vmem>>, vector<1x768xf32>
    %17 = vector.broadcast %16 : vector<1x768xf32> to vector<2x768xf32>
    %18 = arith.mulf %15, %17 : vector<2x768xf32>
    %c0_12 = arith.constant 0 : index
    %c0_13 = arith.constant 0 : index
    %19 = vector.load %arg5[%c0_12, %c0_13] : memref<1x768xf32, #tpu.memory_space<vmem>>, vector<1x768xf32>
    %20 = vector.broadcast %19 : vector<1x768xf32> to vector<2x768xf32>
    %21 = arith.addf %18, %20 : vector<2x768xf32>
    %c0_14 = arith.constant 0 : index
    %c0_15 = arith.constant 0 : index
    %22 = vector.load %arg8[%c0_14, %c0_15] : memref<768x128xf32, #tpu.memory_space<vmem>>, vector<768x128xf32>
    %cst_16 = arith.constant dense<0.000000e+00> : vector<2x128xf32>
    %23 = tpu.matmul %21, %22, %cst_16 {dimension_numbers = #tpu.dot_dimension_numbers<[1], [0], [0], [1], [0, 0, 1, 1], [], []>} : vector<2x768xf32>, vector<768x128xf32>, vector<2x128xf32> -> vector<2x128xf32>
    %c0_17 = arith.constant 0 : index
    %c0_18 = arith.constant 0 : index
    %24 = vector.load %arg9[%c0_17, %c0_18] : memref<1x128xf32, #tpu.memory_space<vmem>>, vector<1x128xf32>
    %25 = vector.broadcast %24 : vector<1x128xf32> to vector<2x128xf32>
    %26 = arith.addf %23, %25 : vector<2x128xf32>
    %c0_19 = arith.constant 0 : index
    %c0_20 = arith.constant 0 : index
    %27 = vector.load %arg10[%c0_19, %c0_20] : memref<2x128xf32, #tpu.memory_space<vmem>>, vector<2x128xf32>
    tpu.vector_store %arg10[%c0_19, %c0_20], %26 {strides = array<i32>} : memref<2x128xf32, #tpu.memory_space<vmem>>, vector<2x128xf32>,
    return
  }
  func.func @transform_0(%arg0: i32) -> (i32, i32) {
    %c0_i32 = arith.constant 0 : i32
    %c0_i32_0 = arith.constant 0 : i32
    %c0_i32_1 = arith.constant 0 : i32
    return %c0_i32, %c0_i32_0 : i32, i32
  }
  func.func @transform_1(%arg0: i32) -> (i32, i32) {
    %c0_i32 = arith.constant 0 : i32
    %c0_i32_0 = arith.constant 0 : i32
    %c0_i32_1 = arith.constant 0 : i32
    return %c0_i32, %c0_i32_0 : i32, i32
  }
  func.func @transform_2(%arg0: i32) -> (i32, i32) {
    %c0_i32 = arith.constant 0 : i32
    %c0_i32_0 = arith.constant 0 : i32
    %c0_i32_1 = arith.constant 0 : i32
    return %c0_i32, %c0_i32_0 : i32, i32
  }
  func.func @transform_3(%arg0: i32) -> (i32, i32) {
    %c0_i32 = arith.constant 0 : i32
    %c0_i32_0 = arith.constant 0 : i32
    %c0_i32_1 = arith.constant 0 : i32
    return %c0_i32, %c0_i32_0 : i32, i32
  }
  func.func @transform_4(%arg0: i32) -> (i32, i32) {
    %c0_i32 = arith.constant 0 : i32
    %c0_i32_0 = arith.constant 0 : i32
    %c0_i32_1 = arith.constant 0 : i32
    return %c0_i32, %c0_i32_0 : i32, i32
  }
  func.func @transform_5(%arg0: i32) -> (i32, i32) {
    %c0_i32 = arith.constant 0 : i32
    %c0_i32_0 = arith.constant 0 : i32
    %c0_i32_1 = arith.constant 0 : i32
    return %c0_i32, %c0_i32_0 : i32, i32
  }
  func.func @transform_6(%arg0: i32) -> (i32, i32) {
    %c0_i32 = arith.constant 0 : i32
    %c0_i32_0 = arith.constant 0 : i32
    %c0_i32_1 = arith.constant 0 : i32
    return %c0_i32, %c0_i32_0 : i32, i32
  }
  func.func @transform_7(%arg0: i32) -> (i32, i32) {
    %c0_i32 = arith.constant 0 : i32
    %c0_i32_0 = arith.constant 0 : i32
    %c0_i32_1 = arith.constant 0 : i32
    return %c0_i32, %c0_i32_0 : i32, i32
  }
  func.func @transform_8(%arg0: i32) -> (i32, i32) {
    %c0_i32 = arith.constant 0 : i32
    %c0_i32_0 = arith.constant 0 : i32
    %c0_i32_1 = arith.constant 0 : i32
    return %c0_i32, %c0_i32_0 : i32, i32
  }
  func.func @transform_9(%arg0: i32) -> (i32, i32) {
    %c0_i32 = arith.constant 0 : i32
    %c0_i32_0 = arith.constant 0 : i32
    %c0_i32_1 = arith.constant 0 : i32
    return %c0_i32, %c0_i32_0 : i32, i32
  }
}

</mosaic_0001>

<bundles_post_ra>
// kernel: bert_with_regularization_forward.12
= control target key start
LH: loop header
LB: loop body
LE: loop exit
PB: predicated region body
PF: predicated region fallthrough
CT: control target
= control target key end

     0   :  { %s429_s12 = smov 0   ;;  %s459_s0 = inlined_call_operand.vmem [shape: bf16[16,768], index: 0, kind: input, shape index: {}]   ;;  %s460_s1 = inlined_call_operand.vmem [shape: f32[1,768], index: 1, kind: input, shape index: {}]   ;;  %s461_s2 = inlined_call_operand.vmem [shape: f32[1,768], index: 2, kind: input, shape index: {}]   ;;  %s462_s3 = inlined_call_operand.vmem [shape: bf16[16,768], index: 3, kind: output, shape index: {}]  }
   0x1 LB: > { %s375_s13 = sadd.s32 4294967295, %s407_s12   ;;  %p379_p0 = scmp.ge.s32.totalorder %s407_s12, 1  ;;  %s407_s12 = sphi %s429_s12, %s13_s12  }
   0x2   : > { %p137_p1 = scmp.lt.s32.totalorder %s407_s12, 3 }
   0x4   : > { %p138_p2 = pnand %p379_p0, %p137_p1 }
   0x5   : > { %p161_p3 = scmp.lt.s32.totalorder (!%p138_p2), %s375_s13, 1  ;;  %v219_v34 = vlaneseq (!%p138_p2)  ;;  %v217_v40 = vld [vmem:[%s460_s1] sm:$0x3f] (!%p138_p2) }
   0x6   : > { %141 = sbr.rel (%p138_p2) target bundleno = 355 (0x163), region = 32  ;;  %v255_v45 = vld [vmem:[%s461_s2] sm:$0x3f] (!%p138_p2) }
   0x7   : > { %v220_v37 = vshrl.u32 (!%p138_p2), %v219_v34, 7 }
   0x9   : > { %v221_v38 = vsub.s32 (!%p138_p2), 0, %v220_v37  ;;  %v225_v39 = vsub.s32 (!%p138_p2), 1, %v220_v37  ;;  %v229_v41 = vsub.s32 (!%p138_p2), 2, %v220_v37  ;;  %v233_v42 = vsub.s32 (!%p138_p2), 3, %v220_v37 }
   0xa   : > { %v237_v43 = vsub.s32 (!%p138_p2), 4, %v220_v37  ;;  %v241_v44 = vsub.s32 (!%p138_p2), 5, %v220_v37 }
   0xb   : > { %v222_v46 = vrot.slane (!%p138_p2), %v217_v40, %v221_v38  ;;  %v226_v47 = vrot.slane (!%p138_p2), %v217_v40, %v225_v39  ;;  %v230_v48 = vrot.slane (!%p138_p2), %v217_v40, %v229_v41  ;;  %v234_v49 = vrot.slane (!%p138_p2), %v217_v40, %v233_v42 }
   0xc   : > { %v238_v50 = vrot.slane (!%p138_p2), %v217_v40, %v237_v43  ;;  %v242_v51 = vrot.slane (!%p138_p2), %v217_v40, %v241_v44  ;;  %v260_v53 = vrot.slane (!%p138_p2), %v255_v45, %v221_v38  ;;  %v264_v54 = vrot.slane (!%p138_p2), %v255_v45, %v225_v39 }
   0xd   : > { %s464_s13 = smov (!%p161_p3, %s375_s13), 1  ;;  %v268_v55 = vrot.slane %v255_v45, %v229_v41  ;;  %v272_v56 = vrot.slane %v255_v45, %v233_v42  ;;  %v276_v61 = vrot.slane %v255_v45, %v237_v43  ;;  %v280_v62 = vrot.slane %v255_v45, %v241_v44 }
   0xe   : > { %s390_s14 = smul.u32 24, %s464_s13 }
  0x10   : > { %s165_s17 = scalar_lea.vmem %s459_s0, %s390_s14  ;;  %s170_s24 = scalar_lea.vmem %s462_s3, %s390_s14 }
  0x11   : > { %v171_v0 = vld [vmem:[%s165_s17] sm:$0xff]  ;;  %v172_v1 = vld [vmem:[%s165_s17 + $0x8] sm:$0xff]  ;;  %v173_v5 = vld [vmem:[%s165_s17 + $0x10] sm:$0xff] }
  0x12   : > { %v174_v2 = vunpack.c.l.bf16 %v171_v0  ;;  %v175_v3 = vunpack.c.h.bf16 %v171_v0  ;;  %v176_v4 = vunpack.c.l.bf16 %v172_v1  ;;  %v177_v6 = vunpack.c.h.bf16 %v172_v1 }
  0x13   : > { %v178_v8 = vunpack.c.l.bf16 %v173_v5  ;;  %v179_v10 = vunpack.c.h.bf16 %v173_v5 }
  0x14   : > { %v180_v7 = vadd.f32 %v175_v3, %v174_v2 }
  0x16   : > { %v181_v9 = vadd.f32 %v180_v7, %v176_v4 }
  0x18   : > { %v182_v11 = vadd.f32 %v181_v9, %v177_v6 }
  0x1a   : > { %v183_v12 = vadd.f32 %v182_v11, %v178_v8 }
  0x1c   : > { %v184_v13 = vadd.f32 %v183_v12, %v179_v10 }
  0x1e   : > { %185 = vadd.xlane.f32.xlu0 %v184_v13 }
  0xab   : > { %v186_v14 = vpop.xlane.xlu0 %185 }
  0xac   : > { %v188_v15 = vmul.f32 0.0013020834, %v186_v14 }
  0xae   : > { %v189_v16 = vsub.f32 %v174_v2, %v188_v15  ;;  %v190_v17 = vsub.f32 %v175_v3, %v188_v15  ;;  %v191_v18 = vsub.f32 %v176_v4, %v188_v15  ;;  %v192_v19 = vsub.f32 %v177_v6, %v188_v15 }
  0xaf   : > { %v193_v22 = vsub.f32 %v178_v8, %v188_v15  ;;  %v194_v25 = vsub.f32 %v179_v10, %v188_v15 }
  0xb0   : > { %v195_v20 = vmul.f32 %v189_v16, %v189_v16  ;;  %v196_v21 = vmul.f32 %v190_v17, %v190_v17  ;;  %v197_v23 = vmul.f32 %v191_v18, %v191_v18  ;;  %v198_v26 = vmul.f32 %v192_v19, %v192_v19 }
  0xb1   : > { %v199_v28 = vmul.f32 %v193_v22, %v193_v22  ;;  %v200_v30 = vmul.f32 %v194_v25, %v194_v25 }
  0xb2   : > { %v201_v24 = vadd.f32 %v196_v21, %v195_v20 }
  0xb4   : > { %v202_v27 = vadd.f32 %v201_v24, %v197_v23 }
  0xb6   : > { %v203_v29 = vadd.f32 %v202_v27, %v198_v26 }
  0xb8   : > { %v204_v31 = vadd.f32 %v203_v29, %v199_v28 }
  0xba   : > { %v205_v32 = vadd.f32 %v204_v31, %v200_v30 }
  0xbc   : > { %206 = vadd.xlane.f32.xlu0 %v205_v32 }
 0x149   : > { %v207_v33 = vpop.xlane.xlu0 %206 }
 0x14a   : > { %v208_v35 = vmul.f32 0.0013020834, %v207_v33 }
 0x14c   : > { %v209_v36 = vadd.f32 1e-12, %v208_v35 }
 0x14e   : > { %399 = vrsqrt.f32 %v209_v36 }
 0x158   : > { %v400_v52 = vpop.eup %399 }
 0x159   : > { %v211_v57 = vmul.f32 %v400_v52, %v189_v16  ;;  %v212_v58 = vmul.f32 %v400_v52, %v190_v17  ;;  %v213_v59 = vmul.f32 %v400_v52, %v191_v18  ;;  %v214_v60 = vmul.f32 %v400_v52, %v192_v19 }
 0x15a   : > { %v215_v63 = vmul.f32 %v400_v52, %v193_v22  ;;  %v216_v0 = vmul.f32 %v400_v52, %v194_v25 }
 0x15b   : > { %v249_v1 = vmul.f32 %v222_v46, %v211_v57  ;;  %v250_v2 = vmul.f32 %v226_v47, %v212_v58  ;;  %v251_v3 = vmul.f32 %v230_v48, %v213_v59  ;;  %v252_v4 = vmul.f32 %v234_v49, %v214_v60 }
 0x15c   : > { %v253_v5 = vmul.f32 %v238_v50, %v215_v63  ;;  %v254_v6 = vmul.f32 %v242_v51, %v216_v0 }
 0x15d   : > { %v287_v7 = vadd.f32 %v260_v53, %v249_v1  ;;  %v288_v8 = vadd.f32 %v264_v54, %v250_v2  ;;  %v289_v9 = vadd.f32 %v268_v55, %v251_v3  ;;  %v290_v10 = vadd.f32 %v272_v56, %v252_v4 }
 0x15e   : > { %v291_v11 = vadd.f32 %v276_v61, %v253_v5  ;;  %v292_v12 = vadd.f32 %v280_v62, %v254_v6 }
 0x15f   : > { %v387_v13 = vpack.c.bf16 %v288_v8, %v287_v7  ;;  %v388_v14 = vpack.c.bf16 %v290_v10, %v289_v9 }
 0x160   : > { %v389_v15 = vpack.c.bf16 %v292_v12, %v291_v11 }
 0x161   : > { %317 = vst [vmem:[%s170_s24] sm:$0xff] %v387_v13  ;;  %318 = vst [vmem:[%s170_s24 + $0x8] sm:$0xff] %v388_v14 }
 0x162   : > { %319 = vst [vmem:[%s170_s24 + $0x10] sm:$0xff] %v389_v15 }
 0x163 PF: > { %s13_s12 = sadd.s32 1, %s407_s12  }
 0x164   : > { %p10_p4 = scmp.ge.s32.totalorder %s13_s12, 4  }
 0x166   :  { %12 = sbr.rel (!%p10_p4) target bundleno = 1 (0x1), region = 62 }

// kernel: bert_with_regularization_forward.14
= control target key start
LH: loop header
LB: loop body
LE: loop exit
PB: predicated region body
PF: predicated region fallthrough
CT: control target
= control target key end

     0   :  { %s2146_s15 = smov 0   ;;  %s2556_s0 = inlined_call_operand.vmem [shape: bf16[16,2304], index: 0, kind: input, shape index: {}, may-alias: {0,1,2}]   ;;  %s2557_s1 = inlined_call_operand.vmem [shape: bf16[16,2304], index: 1, kind: input, shape index: {}, may-alias: {0,1,2}]   ;;  %s2558_s2 = inlined_call_operand.vmem [shape: bf16[16,2304], index: 2, kind: input, shape index: {}, may-alias: {0,1,2}]   ;;  %s2559_s3 = inlined_call_operand.vmem [shape: f32[2,1,8], index: 3, kind: input, shape index: {}]   ;;  %s2560_s4 = inlined_call_operand.vmem [shape: bf16[16,768], index: 4, kind: output, shape index: {}]  }
   0x1 LB: > { %s1769_s16 = sadd.s32 4294967295, %s2116_s15   ;;  %p1773_p0 = scmp.ge.s32.totalorder %s2116_s15, 1  ;;  %s2116_s15 = sphi %s2146_s15, %s14_s15  }
   0x2   : > { %p192_p1 = scmp.lt.s32.totalorder %s2116_s15, 3 }
   0x4   : > { %p193_p2 = pnand %p1773_p0, %p192_p1 }
   0x5   : > { %p233_p3 = scmp.lt.s32.totalorder (!%p193_p2), %s1769_s16, 1  ;;  %v2118_v0 = vmov (!%p193_p2), 0.0   ;;  %vm2119_vm0 = vmmov (!%p193_p2), 0   ;;  %vm275_vm1 = vcmask (!%p193_p2), 523264   ;;  %vm322_vm2 = vcmask (!%p193_p2), 64512   ;;  %s2120_s27 = smov (!%p193_p2), 64  }
   0x6   : > { %196 = sbr.rel (%p193_p2) target bundleno = 1570 (0x622), region = 36  ;;  %1889 = vmatprep.subr.bf16.mxu0 (!%p193_p2), %v2118_v0  ;;  %1891 = vmatprep.mubr.msk.bf16.mxu0 (!%p193_p2), %vm2119_vm0, %v2118_v0  ;;  %vm338_vm3 = vcmask (!%p193_p2), 1043456   ;;  %vm383_vm4 = vcmask (!%p193_p2), 519168   ;;  %vm511_vm5 = vcmask (!%p193_p2), 1043968  }
   0x7   : > { %1895 = vmatprep.subr.bf16.mxu1 (!%p193_p2), %v2118_v0  ;;  %1897 = vmatprep.mubr.msk.bf16.mxu1 (!%p193_p2), %vm2119_vm0, %v2118_v0 }
   0xd   : > { %s2562_s16 = smov (!%p233_p3, %s1769_s16), 1 }
   0xe   : > { %s2163_s17 = smul.u32 72, %s2562_s16  ;;  %s252_s26 = scalar_lea.vmem %s2559_s3, %s2562_s16 }
   0xf   : > { %v2188_v4 = vld [vmem:[%s252_s26] ss:$0 sm:$0xff]  ;;  %s2034_s5 = smul.u32 24, %s2562_s16 }
  0x10   : > { %s2169_s20 = scalar_lea.vmem %s2557_s1, %s2163_s17  ;;  %s2177_s23 = scalar_lea.vmem %s2556_s0, %s2163_s17 }
  0x11   : > { %v1778_v1 = vld [vmem:[%s2169_s20 + $0x18] sm:$0xff]  ;;  %v260_v3 = vld [vmem:[%s2177_s23] sm:$0xff]  ;;  %v2197_v16 = vld [vmem:[%s2177_s23 + $0x8] sm:$0xff]  ;;  %s2230_s30 = scalar_lea.vmem %s2558_s2, %s2163_s17  ;;  %s2310_s8 = scalar_lea.vmem %s2560_s4, %s2034_s5 }
  0x12   : > { %v280_v2 = vsel %vm275_vm1, %v1778_v1, 0  ;;  %v1788_v11 = vcombine.low %v1778_v1, %v1778_v1  ;;  %v1787_v12 = vcombine.low %v260_v3, %v260_v3  ;;  %v1793_v13 = vcombine.high %v260_v3, %v260_v3  ;;  %v1779_v14 = vld [vmem:[%s2169_s20 + $0x20] sm:$0xff]  ;;  %v2212_v20 = vld [vmem:[%s2169_s20 + $0x28] sm:$0xff]  ;;  %v2233_v28 = vld [vmem:[%s2230_s30 + $0x30] sm:$0xff] }
  0x13   : > { %1890 = vmatpush3.bf16.xpose.msra.mxu0 %v280_v2  ;;  %v1804_v15 = vcombine.low %v1779_v14, %v1779_v14  ;;  %v1803_v17 = vcombine.low %v2197_v16, %v2197_v16  ;;  %v2203_v18 = vcombine.high %v1779_v14, %v1779_v14  ;;  %v2209_v19 = vcombine.high %v2197_v16, %v2197_v16  ;;  %v262_v31 = vld [vmem:[%s2177_s23 + $0x10] sm:$0xff] }
  0x14   : > { %1907 = vmatprep.subr.bf16.mxu0 %v2118_v0  ;;  %393 = vrot.lane.b32.xlu1 %v1788_v11, %s2120_s27  ;;  %v1820_v21 = vcombine.low %v2212_v20, %v2212_v20  ;;  %v2221_v22 = vcombine.high %v2212_v20, %v2212_v20  ;;  %v340_v29 = vsel %vm338_vm3, %v2233_v28, 0  ;;  %v1794_v30 = vcombine.high %v1778_v1, %v1778_v1 }
  0x15   : > { %1896 = vmatpush3.bf16.msra.mxu1 %v340_v29  ;;  %v1819_v32 = vcombine.low %v262_v31, %v262_v31  ;;  %v2241_v33 = vcombine.high %v262_v31, %v262_v31  ;;  %v747_v45 = vsel %vm275_vm1, %v1779_v14, 0  ;;  %v984_v49 = vsel %vm275_vm1, %v2203_v18, 0 }
  0x16   : > { %1901 = vmatprep.subr.bf16.mxu1 %v2118_v0  ;;  %v521_v41 = vsel %vm275_vm1, %v1794_v30, 0  ;;  %v1210_v53 = vsel %vm275_vm1, %v2212_v20, 0  ;;  %v1447_v57 = vsel %vm275_vm1, %v2221_v22, 0 }
  0x18   : > { %388 = vrot.lane.b32.xlu1 %v1787_v12, %s2120_s27 }
  0x1a   : > { %1892 = vmatmul.mubr.msk.bf16.vlgmr.msra.gmra.mrb[0].mxu0 %vm275_vm1, %v260_v3 }
  0x1b   : > { %1909 = vmatprep.mubr.msk.bf16.mxu0 %vm2119_vm0, %v2118_v0 }
  0x1c   : > { %625 = vrot.lane.b32.xlu1 %v1793_v13, %s2120_s27 }
  0x20   : > { %857 = vrot.lane.b32.xlu1 %v1804_v15, %s2120_s27 }
  0x24   : > { %852 = vrot.lane.b32.xlu1 %v1803_v17, %s2120_s27 }
  0x28   : > { %1090 = vrot.lane.b32.xlu1 %v2203_v18, %s2120_s27 }
  0x2c   : > { %1088 = vrot.lane.b32.xlu1 %v2209_v19, %s2120_s27 }
  0x30   : > { %1320 = vrot.lane.b32.xlu1 %v1820_v21, %s2120_s27 }
  0x34   : > { %1553 = vrot.lane.b32.xlu1 %v2221_v22, %s2120_s27 }
  0x86   : > { %v394_v36 = vpop.permute.xlu1 %393 }
  0x87   : > { %v399_v38 = vsel %vm275_vm1, %v394_v36, 0 }
  0x8a   : > { %v389_v40 = vpop.permute.xlu1 %388 }
  0x8e   : > { %v626_v44 = vpop.permute.xlu1 %625 }
  0x92   : > { %v858_v46 = vpop.permute.xlu1 %857 }
  0x93   : > { %v863_v47 = vsel %vm275_vm1, %v858_v46, 0 }
  0x96   : > { %v853_v48 = vpop.permute.xlu1 %852 }
  0x9a   : > { %v1091_v50 = vpop.permute.xlu1 %1090 }
  0x9b   : > { %v1096_v51 = vsel %vm275_vm1, %v1091_v50, 0 }
  0x9e   : > { %v1089_v52 = vpop.permute.xlu1 %1088 }
  0xa2   : > { %v1321_v54 = vpop.permute.xlu1 %1320 }
  0xa3   : > { %v1326_v55 = vsel %vm275_vm1, %v1321_v54, 0 }
  0xa6   : > { %v1554_v58 = vpop.permute.xlu1 %1553 }
  0xa7   : > { %v1559_v59 = vsel %vm275_vm1, %v1554_v58, 0 }
  0xed   : > { %v316_v5 = vpop.f32.mrb[0].mxu0 }
  0xee   : > { %v317_v6 = vadd.f32 %v2188_v4, %v316_v5  ;;  %v1893_v7 = vpop.f32.mrb[1].mxu0 }
  0xef   : > { %v319_v8 = vpop.f32.mrb[2].mxu0 }
  0xf0   : > { %v1894_v9 = vpop.f32.mrb[3].mxu0  ;;  %v323_v10 = vsel %vm322_vm2, %v317_v6, -inf }
  0xf1   : > { %324 = vmax.xlane.f32.xlu0 %v323_v10 }
 0x17e   : > { %v325_v23 = vpop.xlane.xlu0 %324 }
 0x17f   : > { %v326_v24 = vsub.f32 %v317_v6, %v325_v23 }
 0x181   : > { %v327_v25 = vmul.f32 1.442695, %v326_v24 }
 0x183   : > { %2062 = vpow2.f32 %v327_v25 }
 0x18d   : > { %v2063_v26 = vpop.eup %2062 }
 0x18e   : > { %v329_v27 = vsel %vm322_vm2, %v2063_v26, 0.0 }
 0x18f   : > { %330 = vadd.xlane.f32.xlu0 %v329_v27 }
 0x1a5   : > { %627 = vrot.lane.b32.xlu0 %v1794_v30, %s2120_s27 }
 0x1a9   : > { %1315 = vrot.lane.b32.xlu0 %v1819_v32, %s2120_s27 }
 0x1ad   : > { %1551 = vrot.lane.b32.xlu0 %v2241_v33, %s2120_s27 }
 0x21c   : > { %v331_v34 = vpop.xlane.xlu0 %330 }
 0x21d   : > { %2064 = vrcp.f32 %v331_v34 }
 0x220   : > { %v628_v42 = vpop.permute.xlu0 %627 }
 0x221   : > { %v633_v43 = vsel %vm275_vm1, %v628_v42, 0 }
 0x224   : > { %v1316_v56 = vpop.permute.xlu0 %1315 }
 0x227   : > { %v2065_v35 = vpop.eup %2064 }
 0x228   : > { %v333_v37 = vmul.f32 %v2065_v35, %v2063_v26  ;;  %v1552_v60 = vpop.permute.xlu0 %1551 }
 0x22a   : > { %v334_v39 = vpack.c.bf16 %v333_v37, %v333_v37 }
 0x22c   : > { %1898 = vmatmul.mubr.msk.bf16.vlgmr.msra.gmra.mrb[0].mxu1 %vm322_vm2, %v334_v39 }
 0x22d   : > { %1902 = vmatpush3.bf16.xpose.msra.mxu1 %v399_v38  ;;  %1903 = vmatprep.mubr.msk.bf16.mxu1 %vm2119_vm0, %v2118_v0 }
 0x22e   : > { %1913 = vmatprep.subr.bf16.mxu1 %v2118_v0 }
 0x234   : > { %1904 = vmatmul.mubr.msk.bf16.vlgmr.msra.gmra.mrb[4].mxu1 %vm275_vm1, %v389_v40 }
 0x235   : > { %1914 = vmatpush3.bf16.xpose.msra.mxu1 %v521_v41  ;;  %1915 = vmatprep.mubr.msk.bf16.mxu1 %vm2119_vm0, %v2118_v0 }
 0x236   : > { %1925 = vmatprep.subr.bf16.mxu1 %v2118_v0 }
 0x23c   : > { %1916 = vmatmul.mubr.msk.bf16.vlgmr.msra.gmra.mrb[8].mxu1 %vm275_vm1, %v1793_v13 }
 0x23d   : > { %1926 = vmatpush3.bf16.xpose.msra.mxu1 %v633_v43  ;;  %1927 = vmatprep.mubr.msk.bf16.mxu1 %vm2119_vm0, %v2118_v0 }
 0x23e   : > { %1937 = vmatprep.subr.bf16.mxu1 %v2118_v0 }
 0x244   : > { %1928 = vmatmul.mubr.msk.bf16.vlgmr.msra.gmra.mrb[12].mxu1 %vm275_vm1, %v626_v44 }
 0x245   : > { %1938 = vmatpush3.bf16.xpose.msra.mxu1 %v747_v45  ;;  %1939 = vmatprep.mubr.msk.bf16.mxu1 %vm2119_vm0, %v2118_v0 }
 0x246   : > { %1949 = vmatprep.subr.bf16.mxu1 %v2118_v0 }
 0x24c   : > { %1940 = vmatmul.mubr.msk.bf16.vlgmr.msra.gmra.mrb[16].mxu1 %vm275_vm1, %v2197_v16 }
 0x24d   : > { %1950 = vmatpush3.bf16.xpose.msra.mxu1 %v863_v47  ;;  %1951 = vmatprep.mubr.msk.bf16.mxu1 %vm2119_vm0, %v2118_v0 }
 0x24e   : > { %1961 = vmatprep.subr.bf16.mxu1 %v2118_v0 }
 0x254   : > { %1952 = vmatmul.mubr.msk.bf16.vlgmr.msra.gmra.mrb[20].mxu1 %vm275_vm1, %v853_v48 }
 0x255   : > { %1962 = vmatpush3.bf16.xpose.msra.mxu1 %v984_v49  ;;  %1963 = vmatprep.mubr.msk.bf16.mxu1 %vm2119_vm0, %v2118_v0 }
 0x256   : > { %1973 = vmatprep.subr.bf16.mxu1 %v2118_v0 }
 0x25c   : > { %1964 = vmatmul.mubr.msk.bf16.vlgmr.msra.gmra.mrb[24].mxu1 %vm275_vm1, %v2209_v19 }
 0x25d   : > { %1974 = vmatpush3.bf16.xpose.msra.mxu1 %v1096_v51  ;;  %1975 = vmatprep.mubr.msk.bf16.mxu1 %vm2119_vm0, %v2118_v0 }
 0x25e   : > { %1985 = vmatprep.subr.bf16.mxu1 %v2118_v0 }
 0x264   : > { %1976 = vmatmul.mubr.msk.bf16.vlgmr.msra.gmra.mrb[28].mxu1 %vm275_vm1, %v1089_v52 }
 0x265   : > { %1986 = vmatpush3.bf16.xpose.msra.mxu1 %v1210_v53  ;;  %1987 = vmatprep.mubr.msk.bf16.mxu1 %vm2119_vm0, %v2118_v0 }
 0x266   : > { %1997 = vmatprep.subr.bf16.mxu1 %v2118_v0 }
 0x26c   : > { %1988 = vmatmul.mubr.msk.bf16.vlgmr.msra.gmra.mrb[32].mxu1 %vm275_vm1, %v262_v31 }
 0x26d   : > { %1998 = vmatpush3.bf16.xpose.msra.mxu1 %v1326_v55  ;;  %1999 = vmatprep.mubr.msk.bf16.mxu1 %vm2119_vm0, %v2118_v0 }
 0x26e   : > { %2009 = vmatprep.subr.bf16.mxu1 %v2118_v0 }
 0x274   : > { %2000 = vmatmul.mubr.msk.bf16.vlgmr.msra.gmra.mrb[36].mxu1 %vm275_vm1, %v1316_v56 }
 0x275   : > { %2010 = vmatpush3.bf16.xpose.msra.mxu1 %v1447_v57  ;;  %2011 = vmatprep.mubr.msk.bf16.mxu1 %vm2119_vm0, %v2118_v0 }
 0x276   : > { %2021 = vmatprep.subr.bf16.mxu1 %v2118_v0 }
 0x27c   : > { %2012 = vmatmul.mubr.msk.bf16.vlgmr.msra.gmra.mrb[40].mxu1 %vm275_vm1, %v2241_v33 }
 0x27d   : > { %2022 = vmatpush3.bf16.xpose.msra.mxu1 %v1559_v59  ;;  %2023 = vmatprep.mubr.msk.bf16.mxu1 %vm2119_vm0, %v2118_v0 }
 0x284   : > { %2024 = vmatmul.mubr.msk.bf16.vlgmr.msra.gmra.mrb[44].mxu1 %vm275_vm1, %v1552_v60 }
 0x2ff   : > { %v376_v61 = vpop.f32.mrb[0].mxu1 }
 0x300   : > { %v382_v62 = vpack.c.bf16 %v376_v61, %v376_v61  ;;  %v1899_v63 = vpop.f32.mrb[1].mxu1 }
 0x301   : > { %v379_v1 = vpop.f32.mrb[2].mxu1 }
 0x302   : > { %384 = vst.msk [vmem:[%s2310_s8] sm:$0xf] %vm383_vm4, %v382_v62  ;;  %v1900_v2 = vpop.f32.mrb[3].mxu1 }
 0x307   : > { %v435_v3 = vpop.f32.mrb[4].mxu1 }
 0x308   : > { %v2315_v5 = vadd.f32 %v2188_v4, %v435_v3  ;;  %v1905_v6 = vpop.f32.mrb[5].mxu1 }
 0x309   : > { %v438_v7 = vpop.f32.mrb[6].mxu1 }
 0x30a   : > { %v1906_v8 = vpop.f32.mrb[7].mxu1  ;;  %v441_v9 = vsel %vm322_vm2, %v2315_v5, -inf }
 0x30b   : > { %442 = vmax.xlane.f32.xlu1 %v441_v9 }
 0x30f   : > { %v557_v10 = vpop.f32.mrb[8].mxu1 }
 0x310   : > { %v2320_v11 = vadd.f32 %v2188_v4, %v557_v10  ;;  %v1917_v12 = vpop.f32.mrb[9].mxu1 }
 0x311   : > { %v560_v13 = vpop.f32.mrb[10].mxu1 }
 0x312   : > { %v1918_v14 = vpop.f32.mrb[11].mxu1  ;;  %v563_v15 = vsel %vm322_vm2, %v2320_v11, -inf }
 0x313   : > { %564 = vmax.xlane.f32.xlu0 %v563_v15 }
 0x317   : > { %v669_v16 = vpop.f32.mrb[12].mxu1 }
 0x318   : > { %v2325_v17 = vadd.f32 %v2188_v4, %v669_v16  ;;  %v1929_v18 = vpop.f32.mrb[13].mxu1 }
 0x319   : > { %v672_v19 = vpop.f32.mrb[14].mxu1 }
 0x31a   : > { %v675_v20 = vsel %vm322_vm2, %v2325_v17, -inf  ;;  %v1930_v21 = vpop.f32.mrb[15].mxu1 }
 0x31b   : > { %676 = vmax.xlane.f32.xlu0 %v675_v20 }
 0x31f   : > { %v783_v22 = vpop.f32.mrb[16].mxu1 }
 0x320   : > { %v2330_v23 = vadd.f32 %v2188_v4, %v783_v22  ;;  %v1941_v24 = vpop.f32.mrb[17].mxu1 }
 0x321   : > { %v786_v25 = vpop.f32.mrb[18].mxu1 }
 0x322   : > { %v789_v26 = vsel %vm322_vm2, %v2330_v23, -inf  ;;  %v1942_v27 = vpop.f32.mrb[19].mxu1  ;;  %v2386_v25 = vcombine.high %v2233_v28, %v2233_v28 }
 0x323   : > { %790 = vmax.xlane.f32.xlu1 %v789_v26 }
 0x327   : > { %v899_v29 = vpop.f32.mrb[20].mxu1 }
 0x328   : > { %v2335_v30 = vadd.f32 %v2188_v4, %v899_v29  ;;  %v1953_v31 = vpop.f32.mrb[21].mxu1 }
 0x329   : > { %v902_v32 = vpop.f32.mrb[22].mxu1 }
 0x32a   : > { %v905_v33 = vsel %vm322_vm2, %v2335_v30, -inf  ;;  %v1954_v34 = vpop.f32.mrb[23].mxu1 }
 0x32b   : > { %906 = vmax.xlane.f32.xlu0 %v905_v33 }
 0x32f   : > { %v1020_v35 = vpop.f32.mrb[24].mxu1 }
 0x330   : > { %v2340_v36 = vadd.f32 %v2188_v4, %v1020_v35  ;;  %v1965_v37 = vpop.f32.mrb[25].mxu1 }
 0x331   : > { %v1023_v38 = vpop.f32.mrb[26].mxu1 }
 0x332   : > { %v1026_v39 = vsel %vm322_vm2, %v2340_v36, -inf  ;;  %v1966_v40 = vpop.f32.mrb[27].mxu1 }
 0x333   : > { %1027 = vmax.xlane.f32.xlu1 %v1026_v39 }
 0x337   : > { %v1132_v41 = vpop.f32.mrb[28].mxu1 }
 0x338   : > { %v2345_v42 = vadd.f32 %v2188_v4, %v1132_v41  ;;  %v1977_v43 = vpop.f32.mrb[29].mxu1 }
 0x339   : > { %v1135_v44 = vpop.f32.mrb[30].mxu1 }
 0x33a   : > { %v1138_v45 = vsel %vm322_vm2, %v2345_v42, -inf  ;;  %v1978_v46 = vpop.f32.mrb[31].mxu1 }
 0x33b   : > { %1139 = vmax.xlane.f32.xlu0 %v1138_v45  ;;  %v2414_v45 = vld [vmem:[%s2230_s30 + $0x38] sm:$0xff] }
 0x33c   : > { %v1806_v46 = vcombine.low %v2414_v45, %v2414_v45 }
 0x33f   : > { %v1246_v47 = vpop.f32.mrb[32].mxu1 }
 0x340   : > { %v2350_v48 = vadd.f32 %v2188_v4, %v1246_v47  ;;  %v1989_v49 = vpop.f32.mrb[33].mxu1  ;;  %v2421_v47 = vcombine.high %v2414_v45, %v2414_v45 }
 0x341   : > { %v1249_v50 = vpop.f32.mrb[34].mxu1 }
 0x342   : > { %v1252_v51 = vsel %vm322_vm2, %v2350_v48, -inf  ;;  %v1990_v52 = vpop.f32.mrb[35].mxu1 }
 0x343   : > { %1253 = vmax.xlane.f32.xlu1 %v1252_v51 }
 0x347   : > { %v1362_v53 = vpop.f32.mrb[36].mxu1 }
 0x348   : > { %v2355_v54 = vadd.f32 %v2188_v4, %v1362_v53  ;;  %v2001_v55 = vpop.f32.mrb[37].mxu1 }
 0x349   : > { %v1365_v56 = vpop.f32.mrb[38].mxu1 }
 0x34a   : > { %v1368_v57 = vsel %vm322_vm2, %v2355_v54, -inf  ;;  %v2002_v58 = vpop.f32.mrb[39].mxu1 }
 0x34b   : > { %1369 = vmax.xlane.f32.xlu0 %v1368_v57 }
 0x34f   : > { %v1483_v59 = vpop.f32.mrb[40].mxu1 }
 0x350   : > { %v2360_v60 = vadd.f32 %v2188_v4, %v1483_v59  ;;  %v2013_v61 = vpop.f32.mrb[41].mxu1 }
 0x351   : > { %v1486_v62 = vpop.f32.mrb[42].mxu1 }
 0x352   : > { %v1489_v63 = vsel %vm322_vm2, %v2360_v60, -inf  ;;  %v2014_v1 = vpop.f32.mrb[43].mxu1 }
 0x353   : > { %1490 = vmax.xlane.f32.xlu1 %v1489_v63 }
 0x357   : > { %v1595_v2 = vpop.f32.mrb[44].mxu1 }
 0x358   : > { %v2365_v3 = vadd.f32 %v2188_v4, %v1595_v2  ;;  %v2025_v6 = vpop.f32.mrb[45].mxu1 }
 0x359   : > { %v1598_v7 = vpop.f32.mrb[46].mxu1 }
 0x35a   : > { %v1601_v8 = vsel %vm322_vm2, %v2365_v3, -inf  ;;  %v2026_v9 = vpop.f32.mrb[47].mxu1 }
 0x35b   : > { %1602 = vmax.xlane.f32.xlu0 %v1601_v8  ;;  %v2446_v8 = vld [vmem:[%s2230_s30 + $0x40] sm:$0xff] }
 0x35c   : > { %v1822_v9 = vcombine.low %v2446_v8, %v2446_v8 }
 0x398   : > { %v443_v10 = vpop.xlane.xlu1 %442 }
 0x399   : > { %v444_v12 = vsub.f32 %v2315_v5, %v443_v10 }
 0x39b   : > { %v445_v13 = vmul.f32 1.442695, %v444_v12  ;;  %v2453_v12 = vcombine.high %v2446_v8, %v2446_v8 }
 0x39d   : > { %2066 = vpow2.f32 %v445_v13 }
 0x3a0   : > { %v565_v14 = vpop.xlane.xlu0 %564 }
 0x3a1   : > { %v566_v15 = vsub.f32 %v2320_v11, %v565_v14 }
 0x3a3   : > { %v567_v16 = vmul.f32 1.442695, %v566_v15 }
 0x3a5   : > { %2068 = vpow2.f32 %v567_v16 }
 0x3a7   : > { %v2371_v18 = vpop.eup %2066 }
 0x3a8   : > { %v677_v4 = vpop.xlane.xlu0 %676  ;;  %v447_v19 = vsel %vm322_vm2, %v2371_v18, 0.0 }
 0x3a9   : > { %v678_v20 = vsub.f32 %v2325_v17, %v677_v4  ;;  %448 = vadd.xlane.f32.xlu1 %v447_v19  ;;  %v1790_v17 = vcombine.low %v2233_v28, %v2233_v28 }
 0x3ab   : > { %v679_v21 = vmul.f32 1.442695, %v678_v20  ;;  %v581_v20 = vsel %vm338_vm3, %v2386_v25, 0 }
 0x3ad   : > { %2070 = vpow2.f32 %v679_v21 }
 0x3af   : > { %v2376_v22 = vpop.eup %2068 }
 0x3b0   : > { %v569_v5 = vsel %vm322_vm2, %v2376_v22, 0.0  ;;  %v791_v26 = vpop.xlane.xlu1 %790 }
 0x3b1   : > { %570 = vadd.xlane.f32.xlu0 %v569_v5  ;;  %v792_v27 = vsub.f32 %v2330_v23, %v791_v26 }
 0x3b3   : > { %v793_v31 = vmul.f32 1.442695, %v792_v27 }
 0x3b5   : > { %2072 = vpow2.f32 %v793_v31 }
 0x3b7   : > { %v2380_v11 = vpop.eup %2070 }
 0x3b8   : > { %v681_v24 = vsel %vm322_vm2, %v2380_v11, 0.0  ;;  %v907_v29 = vpop.xlane.xlu0 %906 }
 0x3b9   : > { %682 = vadd.xlane.f32.xlu1 %v681_v24  ;;  %v908_v32 = vsub.f32 %v2335_v30, %v907_v29 }
 0x3bb   : > { %v909_v37 = vmul.f32 1.442695, %v908_v32 }
 0x3bd   : > { %2074 = vpow2.f32 %v909_v37 }
 0x3bf   : > { %v2397_v40 = vpop.eup %2072 }
 0x3c0   : > { %v1028_v33 = vpop.xlane.xlu1 %1027  ;;  %v795_v23 = vsel %vm322_vm2, %v2397_v40, 0.0 }
 0x3c1   : > { %v1029_v35 = vsub.f32 %v2340_v36, %v1028_v33 }
 0x3c3   : > { %v1030_v38 = vmul.f32 1.442695, %v1029_v35 }
 0x3c5   : > { %2076 = vpow2.f32 %v1030_v38 }
 0x3c7   : > { %687 = vrot.lane.b32.xlu0 %v2386_v25, %s2120_s27  ;;  %v2401_v30 = vpop.eup %2074 }
 0x3c8   : > { %v1140_v34 = vpop.xlane.xlu0 %1139  ;;  %v911_v36 = vsel %vm322_vm2, %v2401_v30, 0.0 }
 0x3c9   : > { %v1141_v28 = vsub.f32 %v2345_v42, %v1140_v34 }
 0x3ca   : > { %456 = vrot.lane.b32.xlu1 %v1790_v17, %s2120_s27 }
 0x3cb   : > { %v1142_v39 = vmul.f32 1.442695, %v1141_v28 }
 0x3cd   : > { %2078 = vpow2.f32 %v1142_v39 }
 0x3cf   : > { %v2403_v41 = vpop.eup %2076 }
 0x3d0   : > { %v1032_v43 = vsel %vm322_vm2, %v2403_v41, 0.0  ;;  %v1254_v50 = vpop.xlane.xlu1 %1253 }
 0x3d1   : > { %v1255_v52 = vsub.f32 %v2350_v48, %v1254_v50 }
 0x3d3   : > { %v1256_v55 = vmul.f32 1.442695, %v1255_v52 }
 0x3d5   : > { %2080 = vpow2.f32 %v1256_v55 }
 0x3d7   : > { %v2407_v42 = vpop.eup %2078 }
 0x3d8   : > { %v1144_v44 = vsel %vm322_vm2, %v2407_v42, 0.0  ;;  %v1370_v49 = vpop.xlane.xlu0 %1369 }
 0x3d9   : > { %v1371_v56 = vsub.f32 %v2355_v54, %v1370_v49 }
 0x3db   : > { %v1372_v59 = vmul.f32 1.442695, %v1371_v56 }
 0x3df   : > { %v2429_v63 = vpop.eup %2080 }
 0x3e0   : > { %v1491_v58 = vpop.xlane.xlu1 %1490  ;;  %v1258_v48 = vsel %vm322_vm2, %v2429_v63, 0.0 }
 0x3e1   : > { %v1492_v61 = vsub.f32 %v2360_v60, %v1491_v58 }
 0x3e3   : > { %v1493_v62 = vmul.f32 1.442695, %v1492_v61 }
 0x3e6   : > { %796 = vadd.xlane.f32.xlu0 %v795_v23 }
 0x3e8   : > { %v1603_v51 = vpop.xlane.xlu0 %1602 }
 0x3e9   : > { %v1604_v53 = vsub.f32 %v2365_v3, %v1603_v51 }
 0x3ea   : > { %912 = vadd.xlane.f32.xlu0 %v911_v36 }
 0x3eb   : > { %v1605_v57 = vmul.f32 1.442695, %v1604_v53 }
 0x3ed   : > { %2082 = vpow2.f32 %v1605_v57 }
 0x3ee   : > { %1033 = vadd.xlane.f32.xlu0 %v1032_v43  ;;  %1145 = vadd.xlane.f32.xlu1 %v1144_v44  ;;  %2084 = vpow2.f32 %v1372_v59 }
 0x3ef   : > { %2086 = vpow2.f32 %v1493_v62 }
 0x3f7   : > { %v2431_v1 = vpop.eup %2082 }
 0x3f8   : > { %v1607_v54 = vsel %vm322_vm2, %v2431_v1, 0.0  ;;  %v2437_v2 = vpop.eup %2084 }
 0x3f9   : > { %v1374_v60 = vsel %vm322_vm2, %v2437_v2, 0.0  ;;  %v2441_v3 = vpop.eup %2086 }
 0x3fa   : > { %v1495_v6 = vsel %vm322_vm2, %v2441_v3, 0.0 }
 0x3ff   : > { %920 = vrot.lane.b32.xlu1 %v1806_v46, %s2120_s27 }
 0x404   : > { %1150 = vrot.lane.b32.xlu0 %v2421_v47, %s2120_s27 }
 0x423   : > { %1259 = vadd.xlane.f32.xlu0 %v1258_v48  ;;  %1608 = vadd.xlane.f32.xlu1 %v1607_v54 }
 0x427   : > { %1375 = vadd.xlane.f32.xlu0 %v1374_v60 }
 0x42b   : > { %1496 = vadd.xlane.f32.xlu0 %v1495_v6 }
 0x436   : > { %v449_v7 = vpop.xlane.xlu1 %448 }
 0x437   : > { %2088 = vrcp.f32 %v449_v7 }
 0x43e   : > { %v571_v10 = vpop.xlane.xlu0 %570 }
 0x43f   : > { %2090 = vrcp.f32 %v571_v10 }
 0x441   : > { %1383 = vrot.lane.b32.xlu0 %v1822_v9, %s2120_s27  ;;  %v2089_v13 = vpop.eup %2088 }
 0x442   : > { %v451_v15 = vmul.f32 %v2089_v13, %v2371_v18  ;;  %v688_v5 = vpop.permute.xlu0 %687 }
 0x443   : > { %v693_v26 = vsel %vm338_vm3, %v688_v5, 0 }
 0x444   : > { %v452_v19 = vpack.c.bf16 %v451_v15, %v451_v15 }
 0x445   : > { %1613 = vrot.lane.b32.xlu0 %v2453_v12, %s2120_s27 }
 0x446   : > { %v683_v14 = vpop.xlane.xlu1 %682 }
 0x447   : > { %2092 = vrcp.f32 %v683_v14 }
 0x449   : > { %v2091_v21 = vpop.eup %2090 }
 0x44a   : > { %v457_v16 = vpop.permute.xlu1 %456  ;;  %v573_v18 = vmul.f32 %v2091_v21, %v2376_v22  ;;  %v805_v22 = vsel %vm338_vm3, %v2414_v45, 0 }
 0x44b   : > { %v462_v4 = vsel %vm338_vm3, %v457_v16, 0 }
 0x44c   : > { %1908 = vmatpush3.bf16.msra.mxu0 %v462_v4  ;;  %v574_v24 = vpack.c.bf16 %v573_v18, %v573_v18 }
 0x44d   : > { %1919 = vmatprep.subr.bf16.mxu0 %v2118_v0 }
 0x44f   : > { %1910 = vmatmul.mubr.msk.bf16.vlgmr.msra.gmra.mrb[4].mxu0 %vm322_vm2, %v452_v19 }
 0x450   : > { %1920 = vmatpush3.bf16.msra.mxu0 %v581_v20  ;;  %1921 = vmatprep.mubr.msk.bf16.mxu0 %vm2119_vm0, %v2118_v0 }
 0x451   : > { %1931 = vmatprep.subr.bf16.mxu0 %v2118_v0  ;;  %v2093_v17 = vpop.eup %2092 }
 0x452   : > { %v685_v25 = vmul.f32 %v2093_v17, %v2380_v11 }
 0x454   : > { %v686_v27 = vpack.c.bf16 %v685_v25, %v685_v25 }
 0x457   : > { %1922 = vmatmul.mubr.msk.bf16.vlgmr.msra.gmra.mrb[8].mxu0 %vm322_vm2, %v574_v24 }
 0x458   : > { %1932 = vmatpush3.bf16.msra.mxu0 %v693_v26  ;;  %1933 = vmatprep.mubr.msk.bf16.mxu0 %vm2119_vm0, %v2118_v0 }
 0x459   : > { %1943 = vmatprep.subr.bf16.mxu0 %v2118_v0 }
 0x45f   : > { %1934 = vmatmul.mubr.msk.bf16.vlgmr.msra.gmra.mrb[12].mxu0 %vm322_vm2, %v686_v27 }
 0x460   : > { %1944 = vmatpush3.bf16.msra.mxu0 %v805_v22  ;;  %1945 = vmatprep.mubr.msk.bf16.mxu0 %vm2119_vm0, %v2118_v0 }
 0x461   : > { %1955 = vmatprep.subr.bf16.mxu0 %v2118_v0 }
 0x473   : > { %v797_v29 = vpop.xlane.xlu0 %796 }
 0x474   : > { %2094 = vrcp.f32 %v797_v29 }
 0x477   : > { %v913_v31 = vpop.xlane.xlu0 %912 }
 0x478   : > { %2096 = vrcp.f32 %v913_v31 }
 0x47b   : > { %v1146_v32 = vpop.xlane.xlu1 %1145  ;;  %v1034_v11 = vpop.xlane.xlu0 %1033 }
 0x47c   : > { %2098 = vrcp.f32 %v1034_v11 }
 0x47d   : > { %2100 = vrcp.f32 %v1146_v32 }
 0x47e   : > { %v2095_v33 = vpop.eup %2094 }
 0x47f   : > { %v799_v34 = vmul.f32 %v2095_v33, %v2397_v40  ;;  %v921_v35 = vpop.permute.xlu1 %920  ;;  %v1044_v40 = vsel %vm338_vm3, %v2421_v47, 0  ;;  %v1151_v44 = vpop.permute.xlu0 %1150 }
 0x480   : > { %v926_v28 = vsel %vm338_vm3, %v921_v35, 0  ;;  %v1156_v46 = vsel %vm338_vm3, %v1151_v44, 0 }
 0x481   : > { %v800_v37 = vpack.c.bf16 %v799_v34, %v799_v34 }
 0x482   : > { %v2097_v38 = vpop.eup %2096 }
 0x483   : > { %1946 = vmatmul.mubr.msk.bf16.vlgmr.msra.gmra.mrb[16].mxu0 %vm322_vm2, %v800_v37  ;;  %v915_v39 = vmul.f32 %v2097_v38, %v2401_v30 }
 0x484   : > { %1956 = vmatpush3.bf16.msra.mxu0 %v926_v28  ;;  %1957 = vmatprep.mubr.msk.bf16.mxu0 %vm2119_vm0, %v2118_v0 }
 0x485   : > { %1967 = vmatprep.subr.bf16.mxu0 %v2118_v0  ;;  %v916_v23 = vpack.c.bf16 %v915_v39, %v915_v39 }
 0x486   : > { %v2099_v36 = vpop.eup %2098 }
 0x487   : > { %v1036_v43 = vmul.f32 %v2099_v36, %v2403_v41  ;;  %v2101_v45 = vpop.eup %2100  ;;  %v1268_v41 = vsel %vm338_vm3, %v2446_v8, 0 }
 0x488   : > { %v1148_v47 = vmul.f32 %v2101_v45, %v2407_v42 }
 0x489   : > { %v1037_v30 = vpack.c.bf16 %v1036_v43, %v1036_v43 }
 0x48a   : > { %v1149_v49 = vpack.c.bf16 %v1148_v47, %v1148_v47 }
 0x48b   : > { %1958 = vmatmul.mubr.msk.bf16.vlgmr.msra.gmra.mrb[20].mxu0 %vm322_vm2, %v916_v23 }
 0x48c   : > { %1968 = vmatpush3.bf16.msra.mxu0 %v1044_v40  ;;  %1969 = vmatprep.mubr.msk.bf16.mxu0 %vm2119_vm0, %v2118_v0 }
 0x48d   : > { %1979 = vmatprep.subr.bf16.mxu0 %v2118_v0 }
 0x493   : > { %1970 = vmatmul.mubr.msk.bf16.vlgmr.msra.gmra.mrb[24].mxu0 %vm322_vm2, %v1037_v30 }
 0x494   : > { %1980 = vmatpush3.bf16.msra.mxu0 %v1156_v46  ;;  %1981 = vmatprep.mubr.msk.bf16.mxu0 %vm2119_vm0, %v2118_v0 }
 0x495   : > { %1991 = vmatprep.subr.bf16.mxu0 %v2118_v0 }
 0x49b   : > { %1982 = vmatmul.mubr.msk.bf16.vlgmr.msra.gmra.mrb[28].mxu0 %vm322_vm2, %v1149_v49 }
 0x49c   : > { %1992 = vmatpush3.bf16.msra.mxu0 %v1268_v41  ;;  %1993 = vmatprep.mubr.msk.bf16.mxu0 %vm2119_vm0, %v2118_v0 }
 0x49d   : > { %2003 = vmatprep.subr.bf16.mxu0 %v2118_v0 }
 0x4b0   : > { %v1260_v50 = vpop.xlane.xlu0 %1259  ;;  %v1609_v59 = vpop.xlane.xlu1 %1608 }
 0x4b1   : > { %2102 = vrcp.f32 %v1260_v50 }
 0x4b4   : > { %v1376_v51 = vpop.xlane.xlu0 %1375 }
 0x4b5   : > { %2104 = vrcp.f32 %v1376_v51 }
 0x4b8   : > { %v1497_v52 = vpop.xlane.xlu0 %1496 }
 0x4b9   : > { %2106 = vrcp.f32 %v1497_v52 }
 0x4ba   : > { %2108 = vrcp.f32 %v1609_v59 }
 0x4bb   : > { %v2103_v42 = vpop.eup %2102 }
 0x4bc   : > { %v1384_v53 = vpop.permute.xlu0 %1383  ;;  %v1262_v55 = vmul.f32 %v2103_v42, %v2429_v63  ;;  %v1507_v63 = vsel %vm338_vm3, %v2453_v12, 0 }
 0x4bd   : > { %v1389_v56 = vsel %vm338_vm3, %v1384_v53, 0 }
 0x4be   : > { %v1263_v57 = vpack.c.bf16 %v1262_v55, %v1262_v55 }
 0x4bf   : > { %v2105_v58 = vpop.eup %2104 }
 0x4c0   : > { %1994 = vmatmul.mubr.msk.bf16.vlgmr.msra.gmra.mrb[32].mxu0 %vm322_vm2, %v1263_v57  ;;  %v1378_v61 = vmul.f32 %v2105_v58, %v2437_v2  ;;  %v1614_v60 = vpop.permute.xlu0 %1613 }
 0x4c1   : > { %2004 = vmatpush3.bf16.msra.mxu0 %v1389_v56  ;;  %2005 = vmatprep.mubr.msk.bf16.mxu0 %vm2119_vm0, %v2118_v0  ;;  %v1619_v2 = vsel %vm338_vm3, %v1614_v60, 0 }
 0x4c2   : > { %2015 = vmatprep.subr.bf16.mxu0 %v2118_v0  ;;  %v1379_v62 = vpack.c.bf16 %v1378_v61, %v1378_v61 }
 0x4c3   : > { %v2107_v48 = vpop.eup %2106 }
 0x4c4   : > { %v1499_v54 = vmul.f32 %v2107_v48, %v2441_v3  ;;  %v2109_v7 = vpop.eup %2108 }
 0x4c5   : > { %v1611_v8 = vmul.f32 %v2109_v7, %v2431_v1 }
 0x4c6   : > { %v1500_v6 = vpack.c.bf16 %v1499_v54, %v1499_v54 }
 0x4c7   : > { %v1612_v9 = vpack.c.bf16 %v1611_v8, %v1611_v8 }
 0x4c8   : > { %2006 = vmatmul.mubr.msk.bf16.vlgmr.msra.gmra.mrb[36].mxu0 %vm322_vm2, %v1379_v62 }
 0x4c9   : > { %2016 = vmatpush3.bf16.msra.mxu0 %v1507_v63  ;;  %2017 = vmatprep.mubr.msk.bf16.mxu0 %vm2119_vm0, %v2118_v0 }
 0x4ca   : > { %2027 = vmatprep.subr.bf16.mxu0 %v2118_v0 }
 0x4d0   : > { %2018 = vmatmul.mubr.msk.bf16.vlgmr.msra.gmra.mrb[40].mxu0 %vm322_vm2, %v1500_v6 }
 0x4d1   : > { %2028 = vmatpush3.bf16.msra.mxu0 %v1619_v2  ;;  %2029 = vmatprep.mubr.msk.bf16.mxu0 %vm2119_vm0, %v2118_v0 }
 0x4d8   : > { %2030 = vmatmul.mubr.msk.bf16.vlgmr.msra.gmra.mrb[44].mxu0 %vm322_vm2, %v1612_v9 }
 0x522   : > { %v498_v3 = vpop.f32.mrb[4].mxu0 }
 0x523   : > { %v1835_v10 = vpack.c.bf16 %v498_v3, %v498_v3  ;;  %v1911_v12 = vpop.f32.mrb[5].mxu0 }
 0x524   : > { %v501_v13 = vpop.f32.mrb[6].mxu0 }
 0x525   : > { %508 = vrot.lane.b32.xlu0 %v1835_v10, %s2120_s27  ;;  %v1912_v14 = vpop.f32.mrb[7].mxu0 }
 0x52a   : > { %v617_v15 = vpop.f32.mrb[8].mxu0 }
 0x52b   : > { %v623_v16 = vpack.c.bf16 %v617_v15, %v617_v15  ;;  %v1923_v4 = vpop.f32.mrb[9].mxu0 }
 0x52c   : > { %v620_v19 = vpop.f32.mrb[10].mxu0 }
 0x52d   : > { %624 = vst.msk [vmem:[%s2310_s8 + $0x4] sm:$0xf] %vm383_vm4, %v623_v16  ;;  %v1924_v0 = vpop.f32.mrb[11].mxu0 }
 0x532   : > { %v729_v20 = vpop.f32.mrb[12].mxu0 }
 0x533   : > { %v1836_v1 = vpack.c.bf16 %v729_v20, %v729_v20  ;;  %v1935_v21 = vpop.f32.mrb[13].mxu0 }
 0x534   : > { %v732_v18 = vpop.f32.mrb[14].mxu0 }
 0x535   : > { %739 = vrot.lane.b32.xlu0 %v1836_v1, %s2120_s27  ;;  %v1936_v5 = vpop.f32.mrb[15].mxu0 }
 0x556   : > { %v841_v24 = vpop.f32.mrb[16].mxu0 }
 0x557   : > { %v847_v17 = vpack.c.bf16 %v841_v24, %v841_v24  ;;  %v1947_v26 = vpop.f32.mrb[17].mxu0 }
 0x558   : > { %v844_v25 = vpop.f32.mrb[18].mxu0 }
 0x559   : > { %848 = vst.msk [vmem:[%s2310_s8 + $0x8] sm:$0xf] %vm383_vm4, %v847_v17  ;;  %v1948_v27 = vpop.f32.mrb[19].mxu0 }
 0x55e   : > { %v962_v22 = vpop.f32.mrb[20].mxu0 }
 0x55f   : > { %v1837_v29 = vpack.c.bf16 %v962_v22, %v962_v22  ;;  %v1959_v31 = vpop.f32.mrb[21].mxu0 }
 0x560   : > { %v965_v32 = vpop.f32.mrb[22].mxu0 }
 0x561   : > { %972 = vrot.lane.b32.xlu1 %v1837_v29, %s2120_s27  ;;  %v1960_v11 = vpop.f32.mrb[23].mxu0 }
 0x566   : > { %v1080_v33 = vpop.f32.mrb[24].mxu0 }
 0x567   : > { %v1086_v34 = vpack.c.bf16 %v1080_v33, %v1080_v33  ;;  %v1971_v35 = vpop.f32.mrb[25].mxu0 }
 0x568   : > { %v1083_v37 = vpop.f32.mrb[26].mxu0 }
 0x569   : > { %1087 = vst.msk [vmem:[%s2310_s8 + $0xc] sm:$0xf] %vm383_vm4, %v1086_v34  ;;  %v1972_v28 = vpop.f32.mrb[27].mxu0 }
 0x56e   : > { %v1192_v38 = vpop.f32.mrb[28].mxu0 }
 0x56f   : > { %v1838_v39 = vpack.c.bf16 %v1192_v38, %v1192_v38  ;;  %v1983_v23 = vpop.f32.mrb[29].mxu0 }
 0x570   : > { %v1195_v40 = vpop.f32.mrb[30].mxu0 }
 0x571   : > { %1202 = vrot.lane.b32.xlu0 %v1838_v39, %s2120_s27  ;;  %v1984_v36 = vpop.f32.mrb[31].mxu0 }
 0x593   : > { %v1304_v43 = vpop.f32.mrb[32].mxu0 }
 0x594   : > { %v1310_v44 = vpack.c.bf16 %v1304_v43, %v1304_v43  ;;  %v1995_v30 = vpop.f32.mrb[33].mxu0 }
 0x595   : > { %v1307_v45 = vpop.f32.mrb[34].mxu0 }
 0x596   : > { %1311 = vst.msk [vmem:[%s2310_s8 + $0x10] sm:$0xf] %vm383_vm4, %v1310_v44  ;;  %v1996_v46 = vpop.f32.mrb[35].mxu0 }
 0x597   : > { %v509_v47 = vpop.permute.xlu0 %508 }
 0x598   : > { %512 = vst.msk [vmem:[%s2310_s8] sm:$0xf] %vm511_vm5, %v509_v47 }
 0x59b   : > { %v1425_v49 = vpop.f32.mrb[36].mxu0 }
 0x59c   : > { %v1839_v41 = vpack.c.bf16 %v1425_v49, %v1425_v49  ;;  %v2007_v50 = vpop.f32.mrb[37].mxu0 }
 0x59d   : > { %v1428_v51 = vpop.f32.mrb[38].mxu0 }
 0x59e   : > { %1435 = vrot.lane.b32.xlu0 %v1839_v41, %s2120_s27  ;;  %v2008_v52 = vpop.f32.mrb[39].mxu0 }
 0x5a3   : > { %v1543_v42 = vpop.f32.mrb[40].mxu0 }
 0x5a4   : > { %v1549_v53 = vpack.c.bf16 %v1543_v42, %v1543_v42  ;;  %v2019_v55 = vpop.f32.mrb[41].mxu0 }
 0x5a5   : > { %v1546_v56 = vpop.f32.mrb[42].mxu0 }
 0x5a6   : > { %1550 = vst.msk [vmem:[%s2310_s8 + $0x14] sm:$0xf] %vm383_vm4, %v1549_v53  ;;  %v2020_v57 = vpop.f32.mrb[43].mxu0 }
 0x5a7   : > { %v740_v58 = vpop.permute.xlu0 %739 }
 0x5a8   : > { %742 = vst.msk [vmem:[%s2310_s8 + $0x4] sm:$0xf] %vm511_vm5, %v740_v58 }
 0x5ab   : > { %v1655_v59 = vpop.f32.mrb[44].mxu0 }
 0x5ac   : > { %v1840_v61 = vpack.c.bf16 %v1655_v59, %v1655_v59  ;;  %v2031_v62 = vpop.f32.mrb[45].mxu0 }
 0x5ad   : > { %v1658_v63 = vpop.f32.mrb[46].mxu0 }
 0x5ae   : > { %1665 = vrot.lane.b32.xlu0 %v1840_v61, %s2120_s27  ;;  %v2032_v48 = vpop.f32.mrb[47].mxu0 }
 0x5d3   : > { %v973_v54 = vpop.permute.xlu1 %972 }
 0x5d4   : > { %975 = vst.msk [vmem:[%s2310_s8 + $0x8] sm:$0xf] %vm511_vm5, %v973_v54 }
 0x5e3   : > { %v1203_v60 = vpop.permute.xlu0 %1202 }
 0x5e4   : > { %1205 = vst.msk [vmem:[%s2310_s8 + $0xc] sm:$0xf] %vm511_vm5, %v1203_v60 }
 0x610   : > { %v1436_v2 = vpop.permute.xlu0 %1435 }
 0x611   : > { %1438 = vst.msk [vmem:[%s2310_s8 + $0x10] sm:$0xf] %vm511_vm5, %v1436_v2 }
 0x620   : > { %v1666_v6 = vpop.permute.xlu0 %1665 }
 0x621   : > { %1668 = vst.msk [vmem:[%s2310_s8 + $0x14] sm:$0xf] %vm511_vm5, %v1666_v6 }
 0x622 PF: > { %s14_s15 = sadd.s32 1, %s2116_s15  }
 0x623   : > { %p11_p4 = scmp.ge.s32.totalorder %s14_s15, 4  }
 0x625   :  { %13 = sbr.rel (!%p11_p4) target bundleno = 1 (0x1), region = 75 }

// kernel: bert_with_regularization_forward.13
= control target key start
LH: loop header
LB: loop body
LE: loop exit
PB: predicated region body
PF: predicated region fallthrough
CT: control target
= control target key end

     0   :  { %8 = vsyncpa [#allocation4], 0  ;;  %s4076_s0 = inlined_call_operand.vmem [shape: bf16[16,768], index: 0, kind: input, shape index: {}]   ;;  %s4077_s1 = inlined_call_operand.hbm [shape: bf16[768,2304], index: 1, kind: input, shape index: {}]   ;;  %s4078_s2 = inlined_call_operand.vmem [shape: f32[1,2304], index: 2, kind: input, shape index: {}]   ;;  %s4079_s3 = inlined_call_operand.vmem [shape: bf16[16,2304], index: 3, kind: output, shape index: {}]  }
   0x1   :  { %10 = vsyncpa [#allocation4 + $0x1], 0  ;;  %s3583_s12 = smov 0   ;;  %s3585_s13 = smov 0  }
   0x2   :  { %s3587_s14 = smov 0   ;;  %s3589_s15 = smov 0  }
   0x3   :  { %s3591_s16 = smov 0   ;;  %s3593_s17 = smov 0  }
   0x4   :  { %s3595_s18 = smov 0   ;;  %s3597_s19 = smov 0  }
   0x5 LB: > { %s2634_s20 = sadd.s32 4294967295, %s3557_s19   ;;  %s31_s21 = sadd.s32 1, %s3549_s17  ;;  %s3557_s19 = sphi %s3597_s19, %s16_s19   ;;  %s3553_s18 = sphi %s3595_s18, %s4089_s18   ;;  %s3549_s17 = sphi %s3593_s17, %s4088_s17   ;;  %s3545_s16 = sphi %s3591_s16, %s4087_s16   ;;  %s3541_s15 = sphi %s3589_s15, %s4086_s15   ;;  %s3537_s14 = sphi %s3587_s14, %s4085_s14   ;;  %s3533_s13 = sphi %s3585_s13, %s4084_s13   ;;  %s3529_s12 = sphi %s3583_s12, %s4083_s12  }
   0x6   : > { %p33_p0 = scmp.ge.s32.totalorder %s31_s21, 3  ;;  %s35_s22 = sadd.s32 1, %s3553_s18 }
   0x7   : > { %s72_s23 = sadd.s32 1, %s3537_s14  ;;  %p79_p1 = scmp.ne.s32.totalorder %s3537_s14, %s3533_s13 }
   0x8   : > { %s4091_s21 = smov (%p33_p0, %s31_s21), 0  ;;  %s4093_s22 = smov (!%p33_p0, %s35_s22), %s3553_s18 }
   0x9   : > { %s68_s24 = ssub.s32 %s3549_s17, %s4091_s21  ;;  %p80_p2 = scmp.eq.s32.totalorder %s3557_s19, 0 }
   0xa   : > { %p37_p3 = scmp.ge.s32.totalorder %s4093_s22, 2  ;;  %p70_p4 = scmp.eq.s32.totalorder %s68_s24, 0 }
   0xb   : > { %p81_p5 = por %p80_p2, %p79_p1  ;;  %p85_p6 = scmp.ne.s32.totalorder %s3533_s13, %s3529_s12 }
   0xc   : > { %s4095_s22 = smov (%p37_p3, %s4093_s22), 0  ;;  %p86_p7 = scmp.eq.s32.totalorder %s2634_s20, 0 }
   0xd   : > { %s3637_s25 = scalar_select %p70_p4, %s3537_s14, %s72_s23  }
   0xe   : > { %p2955_p8 = scmp.lt.s32.totalorder %s3557_s19, 6  ;;  %s176_s26 = sand.u32 1, %s3537_s14  }
   0xf   : > { %p3641_p9 = por %p86_p7, %p85_p6  ;;  %s2945_s28 = smul.u32 2304, %s176_s26 }
  0x10   : > { %p3645_p10 = pnand %p2955_p8, %p81_p5  ;;  %s2941_s30 = smul.u32 384, %s3549_s17 }
  0x11   : > { %s180_s7 = scalar_lea.vmem [#allocation3], %s2945_s28  ;;  %s3658_s9 = scalar_lea.sflag [#allocation4], %s176_s26 }
  0x12   : > { %s3653_s6 = scalar_lea.hbm %s4077_s1, %s2941_s30  ;;  %s190_s8 = sshll.u32 %s180_s7, 4  ;;  %s3655_s8 = int_to_ptr.vmem [resolvable:$true] %s190_s8 }
  0x13   : > { %s3461_s10 = scalar_lea.hbm %s3653_s6, 36864  ;;  %p3463_p13 = pneg %p3645_p10 }
  0x14   : > { %p3462_p12 = scmp.ne.s32.totalorder %s3653_s6, %s3461_s10  ;;  %s3466_s20 = scalar_lea.hbm %s4077_s1, 110592 }
  0x15   : > { %p3467_p2 = scmp.lt.u32.totalorder %s3653_s6, %s4077_s1  ;;  %p3468_p3 = scmp.lt.u32.totalorder %s3466_s20, %s3461_s10 }
  0x16   : > { %p3464_p0 = pnand %p3463_p13, %p3462_p12  ;;  %p3470_p5 = scmp.lt.u32.totalorder %s3461_s10, %s3653_s6 }
  0x17   : > { %p3469_p4 = por %p3468_p3, %p3467_p2 }
  0x18   : > { %p3465_p1 = pneg %p3464_p0 }
  0x19   : > { %p3471_p6 = por %p3470_p5, %p3469_p4 }
  0x1b   : > { %p3472_p7 = pnand %p3471_p6, %p3465_p1 }
  0x1d   : > { %3475 = shalt.err (!%p3472_p7)
}
  0x1e   : > { %s3476_s26 = scalar_lea.vmem %s3655_s8, 36864  ;;  %s3559_s28 = smov [#allocation3]  }
  0x1f   : > { %p3477_p8 = scmp.ne.s32.totalorder %s3655_s8, %s3476_s26  ;;  %s3481_s30 = sshll.u32 %s3559_s28, 4  ;;  %s3482_s30 = int_to_ptr.vmem [resolvable:$false] %s3481_s30 }
  0x20   : > { %s3483_s4 = scalar_lea.vmem %s3482_s30, 73728  ;;  %p3484_p11 = scmp.lt.s32.totalorder %s3655_s8, %s3482_s30 }
  0x21   : > { %p3479_p12 = pnand %p3477_p8, %p3463_p13  ;;  %p3485_p2 = scmp.lt.s32.totalorder %s3483_s4, %s3476_s26 }
  0x23   : > { %p3480_p0 = pneg %p3479_p12  ;;  %p3486_p3 = por %p3485_p2, %p3484_p11 }
  0x25   : > { %p3487_p4 = pnand %p3486_p3, %p3480_p0 }
  0x27   : > { %3490 = shalt.err (!%p3487_p4)
}
  0x28   : > { %s3560_s5 = smov 1152   ;;  %s3561_s7 = smov 384  }
  0x29   : > { %s3562_s10 = smov 24   ;;  %p206_p13 = scmp.lt.s32.totalorder %s3557_s19, 7 }
  0x2a   : > { %2954 = dma.hbm_to_vmem [thread:$0]  (!%p3645_p10), %s3653_s6, 36864, %s3655_s8, %s3658_s9, %s3560_s5, %s3561_s7, %s3562_s10  }
  0x2b   : > { %p4082_p1 = scmp.ge.s32.totalorder %s3557_s19, 1 }
  0x2d   : > { %p207_p5 = pnand %p4082_p1, %p206_p13 }
  0x2e   : > { %s212_s11 = sand.u32 (!%p207_p5), 1, %s3533_s13  }
  0x2f   : > { %210 = sbr.rel (%p207_p5) target bundleno = 596 (0x254), region = 32  ;;  %s213_s20 = scalar_lea.sflag (!%p207_p5), [#allocation4], %s212_s11 }
  0x30   : > { %s2946_s12 = smul.u32 (!%p207_p5), 2304, %s212_s11 }
  0x32   : > { %s3690_s23 = scalar_lea.vmem (!%p207_p5), [#allocation3], %s2946_s12 }
  0x36   : > { %3524 = dma.done.wait (%p3641_p9), %s213_s20, 36864  }
  0x37   : > { %3526 = vsyncadd (%p3641_p9), %s213_s20, 4294930432  ;;  %v3023_v0 = vld [vmem:[%s3690_s23 + $0x4] ss:$24 sps:$4 sm:$0xff]   ;;  %v3027_v2 = vld [vmem:[%s3690_s23] ss:$24 sps:$4 sm:$0xff]   ;;  %p257_p9 = scmp.lt.s32.totalorder %s3545_s16, 1 }
  0x38   : > { %v3025_v1 = vld [vmem:[%s3690_s23 + $0x304] ss:$24 sps:$4 sm:$0xff]   ;;  %2051 = vmatprep.subr.bf16.mxu0 %v3023_v0  ;;  %v3028_v3 = vld [vmem:[%s3690_s23 + $0x300] ss:$24 sps:$4 sm:$0xff]   ;;  %v3029_v4 = vld [vmem:[%s3690_s23 + $0x34] ss:$24 sps:$4 sm:$0xff]  }
  0x39   : > { %2092 = vmatprep.subr.bf16.mxu1 %v3025_v1  ;;  %2052 = vmatpush1.bf16.msra.mxu0 %v3027_v2  ;;  %v3031_v5 = vld [vmem:[%s3690_s23 + $0x334] ss:$24 sps:$4 sm:$0xff]   ;;  %v3033_v6 = vld [vmem:[%s3690_s23 + $0x30] ss:$24 sps:$4 sm:$0xff]   ;;  %v3035_v8 = vld [vmem:[%s3690_s23 + $0x64] ss:$24 sps:$4 sm:$0xff]  }
  0x3a   : > { %2093 = vmatpush1.bf16.msra.mxu1 %v3028_v3  ;;  %2053 = vmatprep.subr.bf16.mxu0 %v3029_v4  ;;  %v3034_v7 = vld [vmem:[%s3690_s23 + $0x330] ss:$24 sps:$4 sm:$0xff]   ;;  %v3037_v9 = vld [vmem:[%s3690_s23 + $0x364] ss:$24 sps:$4 sm:$0xff]   ;;  %v3039_v10 = vld [vmem:[%s3690_s23 + $0x60] ss:$24 sps:$4 sm:$0xff]  }
  0x3b   : > { %2094 = vmatprep.subr.bf16.mxu1 %v3031_v5  ;;  %v3040_v11 = vld [vmem:[%s3690_s23 + $0x360] ss:$24 sps:$4 sm:$0xff]   ;;  %v3041_v12 = vld [vmem:[%s3690_s23 + $0x94] ss:$24 sps:$4 sm:$0xff]   ;;  %v3045_v14 = vld [vmem:[%s3690_s23 + $0x90] ss:$24 sps:$4 sm:$0xff]  }
  0x3c   : > { %v3043_v13 = vld [vmem:[%s3690_s23 + $0x394] ss:$24 sps:$4 sm:$0xff]   ;;  %v3046_v15 = vld [vmem:[%s3690_s23 + $0x390] ss:$24 sps:$4 sm:$0xff]   ;;  %v3047_v16 = vld [vmem:[%s3690_s23 + $0xc4] ss:$24 sps:$4 sm:$0xff]  }
  0x3d   : > { %2054 = vmatpush1.bf16.msra.mxu0 %v3033_v6  ;;  %v3049_v17 = vld [vmem:[%s3690_s23 + $0x3c4] ss:$24 sps:$4 sm:$0xff]   ;;  %v3051_v18 = vld [vmem:[%s3690_s23 + $0xc0] ss:$24 sps:$4 sm:$0xff]   ;;  %v3053_v20 = vld [vmem:[%s3690_s23 + $0xf4] ss:$24 sps:$4 sm:$0xff]  }
  0x3e   : > { %2095 = vmatpush1.bf16.msra.mxu1 %v3034_v7  ;;  %2055 = vmatprep.subr.bf16.mxu0 %v3035_v8  ;;  %v3052_v19 = vld [vmem:[%s3690_s23 + $0x3c0] ss:$24 sps:$4 sm:$0xff]   ;;  %v3055_v21 = vld [vmem:[%s3690_s23 + $0x3f4] ss:$24 sps:$4 sm:$0xff]   ;;  %v3057_v22 = vld [vmem:[%s3690_s23 + $0xf0] ss:$24 sps:$4 sm:$0xff]  }
  0x3f   : > { %2096 = vmatprep.subr.bf16.mxu1 %v3037_v9  ;;  %v3058_v23 = vld [vmem:[%s3690_s23 + $0x3f0] ss:$24 sps:$4 sm:$0xff]   ;;  %v3059_v24 = vld [vmem:[%s3690_s23 + $0x124] ss:$24 sps:$4 sm:$0xff]   ;;  %v3063_v26 = vld [vmem:[%s3690_s23 + $0x120] ss:$24 sps:$4 sm:$0xff]  }
  0x40   : > { %v3061_v25 = vld [vmem:[%s3690_s23 + $0x424] ss:$24 sps:$4 sm:$0xff]   ;;  %v3064_v27 = vld [vmem:[%s3690_s23 + $0x420] ss:$24 sps:$4 sm:$0xff]   ;;  %v3065_v28 = vld [vmem:[%s3690_s23 + $0x154] ss:$24 sps:$4 sm:$0xff]  }
  0x41   : > { %2056 = vmatpush1.bf16.msra.mxu0 %v3039_v10  ;;  %v3067_v29 = vld [vmem:[%s3690_s23 + $0x454] ss:$24 sps:$4 sm:$0xff]   ;;  %v3069_v30 = vld [vmem:[%s3690_s23 + $0x150] ss:$24 sps:$4 sm:$0xff]   ;;  %v3071_v32 = vld [vmem:[%s3690_s23 + $0x184] ss:$24 sps:$4 sm:$0xff]  }
  0x42   : > { %2097 = vmatpush1.bf16.msra.mxu1 %v3040_v11  ;;  %2057 = vmatprep.subr.bf16.mxu0 %v3041_v12  ;;  %v3070_v31 = vld [vmem:[%s3690_s23 + $0x450] ss:$24 sps:$4 sm:$0xff]   ;;  %v3073_v33 = vld [vmem:[%s3690_s23 + $0x484] ss:$24 sps:$4 sm:$0xff]   ;;  %v3075_v34 = vld [vmem:[%s3690_s23 + $0x180] ss:$24 sps:$4 sm:$0xff]  }
  0x43   : > { %2098 = vmatprep.subr.bf16.mxu1 %v3043_v13  ;;  %v3076_v35 = vld [vmem:[%s3690_s23 + $0x480] ss:$24 sps:$4 sm:$0xff]   ;;  %s4097_s16 = smov (!%p257_p9, %s3545_s16), 1  ;;  %v3077_v36 = vld [vmem:[%s3690_s23 + $0x1b4] ss:$24 sps:$4 sm:$0xff]   ;;  %s268_s9 = smul.u32 6, %s3541_s15 }
  0x44   : > { %v3079_v37 = vld [vmem:[%s3690_s23 + $0x4b4] ss:$24 sps:$4 sm:$0xff]   ;;  %v3081_v38 = vld [vmem:[%s3690_s23 + $0x1b0] ss:$24 sps:$4 sm:$0xff]   ;;  %s2947_s27 = smul.u32 24, %s4097_s16 }
  0x45   : > { %2058 = vmatpush1.bf16.msra.mxu0 %v3045_v14  ;;  %v3082_v39 = vld [vmem:[%s3690_s23 + $0x4b0] ss:$24 sps:$4 sm:$0xff]   ;;  %v3083_v40 = vld [vmem:[%s3690_s23 + $0x1e4] ss:$24 sps:$4 sm:$0xff]   ;;  %v3087_v42 = vld [vmem:[%s3690_s23 + $0x1e0] ss:$24 sps:$4 sm:$0xff]  }
  0x46   : > { %2099 = vmatpush1.bf16.msra.mxu1 %v3046_v15  ;;  %2059 = vmatprep.subr.bf16.mxu0 %v3047_v16  ;;  %v3085_v41 = vld [vmem:[%s3690_s23 + $0x4e4] ss:$24 sps:$4 sm:$0xff]   ;;  %v3088_v43 = vld [vmem:[%s3690_s23 + $0x4e0] ss:$24 sps:$4 sm:$0xff]   ;;  %s3748_s8 = scalar_lea.vmem %s4076_s0, %s2947_s27  ;;  %v3089_v44 = vld [vmem:[%s3690_s23 + $0x214] ss:$24 sps:$4 sm:$0xff]  }
  0x47   : > { %2100 = vmatprep.subr.bf16.mxu1 %v3049_v17  ;;  %v3091_v45 = vld [vmem:[%s3690_s23 + $0x514] ss:$24 sps:$4 sm:$0xff]   ;;  %v300_v48 = vld [vmem:[%s3748_s8 + $0x8] sm:$0xff]  ;;  %v3093_v49 = vld [vmem:[%s3690_s23 + $0x210] ss:$24 sps:$4 sm:$0xff]   ;;  %p269_p10 = scmp.lt.s32.totalorder %s268_s9, 17 }
  0x48   : > { %v299_v46 = vld [vmem:[%s3748_s8] sm:$0xff]  ;;  %v3758_v51 = vcombine.high %v300_v48, %v300_v48  ;;  %v3095_v52 = vld [vmem:[%s3690_s23 + $0x244] ss:$24 sps:$4 sm:$0xff]   ;;  %v3099_v54 = vld [vmem:[%s3690_s23 + $0x240] ss:$24 sps:$4 sm:$0xff]   ;;  %v3782_v7 = vcombine.low %v300_v48, %v300_v48  ;;  %s2948_s30 = smul.u32 18, %s4097_s16 }
  0x49   : > { %2060 = vmatpush1.bf16.msra.mxu0 %v3051_v18  ;;  %v3753_v47 = vcombine.high %v299_v46, %v299_v46  ;;  %v3094_v50 = vld [vmem:[%s3690_s23 + $0x510] ss:$24 sps:$4 sm:$0xff]   ;;  %v3097_v53 = vld [vmem:[%s3690_s23 + $0x544] ss:$24 sps:$4 sm:$0xff]   ;;  %v3100_v55 = vld [vmem:[%s3690_s23 + $0x540] ss:$24 sps:$4 sm:$0xff]   ;;  %v3780_v6 = vcombine.low %v299_v46, %v299_v46 }
  0x4a   : > { %2101 = vmatpush1.bf16.msra.mxu1 %v3052_v19  ;;  %2061 = vmatprep.subr.bf16.mxu0 %v3053_v20  ;;  %v3101_v56 = vld [vmem:[%s3690_s23 + $0x274] ss:$24 sps:$4 sm:$0xff]   ;;  %v3105_v58 = vld [vmem:[%s3690_s23 + $0x270] ss:$24 sps:$4 sm:$0xff]   ;;  %v3107_v60 = vld [vmem:[%s3690_s23 + $0x2a4] ss:$24 sps:$4 sm:$0xff]  }
  0x4b   : > { %2102 = vmatprep.subr.bf16.mxu1 %v3055_v21  ;;  %2083 = vmatprep.mubr.bf16.mxu0 %v3753_v47  ;;  %v3103_v57 = vld [vmem:[%s3690_s23 + $0x574] ss:$24 sps:$4 sm:$0xff]   ;;  %v3106_v59 = vld [vmem:[%s3690_s23 + $0x570] ss:$24 sps:$4 sm:$0xff]   ;;  %v3109_v61 = vld [vmem:[%s3690_s23 + $0x5a4] ss:$24 sps:$4 sm:$0xff]  }
  0x4c   : > { %2124 = vmatprep.mubr.bf16.mxu1 %v3758_v51  ;;  %v3111_v62 = vld [vmem:[%s3690_s23 + $0x2a0] ss:$24 sps:$4 sm:$0xff]   ;;  %v3113_v0 = vld [vmem:[%s3690_s23 + $0x2d4] ss:$24 sps:$4 sm:$0xff]   ;;  %v3117_v2 = vld [vmem:[%s3690_s23 + $0x2d0] ss:$24 sps:$4 sm:$0xff]  }
  0x4d   : > { %2062 = vmatpush1.bf16.msra.mxu0 %v3057_v22  ;;  %v3112_v63 = vld [vmem:[%s3690_s23 + $0x5a0] ss:$24 sps:$4 sm:$0xff]   ;;  %v3115_v1 = vld [vmem:[%s3690_s23 + $0x5d4] ss:$24 sps:$4 sm:$0xff]   ;;  %v3118_v3 = vld [vmem:[%s3690_s23 + $0x5d0] ss:$24 sps:$4 sm:$0xff]  }
  0x4e   : > { %2103 = vmatpush1.bf16.msra.mxu1 %v3058_v23  ;;  %2063 = vmatprep.subr.bf16.mxu0 %v3059_v24  ;;  %v3125_v4 = vld [vmem:[%s3690_s23 + $0x604] ss:$24 sps:$4 sm:$0xff]   ;;  %v3123_v8 = vld [vmem:[%s3690_s23 + $0x600] ss:$24 sps:$4 sm:$0xff]   ;;  %v3131_v10 = vld [vmem:[%s3690_s23 + $0x634] ss:$24 sps:$4 sm:$0xff]  }
  0x4f   : > { %2104 = vmatprep.subr.bf16.mxu1 %v3061_v25  ;;  %v3128_v5 = vld [vmem:[%s3690_s23 + $0xc] ss:$24 sps:$4 sm:$0xff]   ;;  %v3126_v9 = vld [vmem:[%s3690_s23 + $0x8] ss:$24 sps:$4 sm:$0xff]   ;;  %v3134_v11 = vld [vmem:[%s3690_s23 + $0x3c] ss:$24 sps:$4 sm:$0xff]  }
  0x50   : > { %v3129_v12 = vld [vmem:[%s3690_s23 + $0x630] ss:$24 sps:$4 sm:$0xff]   ;;  %v3137_v14 = vld [vmem:[%s3690_s23 + $0x664] ss:$24 sps:$4 sm:$0xff]   ;;  %v3135_v16 = vld [vmem:[%s3690_s23 + $0x660] ss:$24 sps:$4 sm:$0xff]  }
  0x51   : > { %2064 = vmatpush1.bf16.msra.mxu0 %v3063_v26  ;;  %v3132_v13 = vld [vmem:[%s3690_s23 + $0x38] ss:$24 sps:$4 sm:$0xff]   ;;  %v3140_v15 = vld [vmem:[%s3690_s23 + $0x6c] ss:$24 sps:$4 sm:$0xff]   ;;  %v3138_v17 = vld [vmem:[%s3690_s23 + $0x68] ss:$24 sps:$4 sm:$0xff]  }
  0x52   : > { %2105 = vmatpush1.bf16.msra.mxu1 %v3064_v27  ;;  %2065 = vmatprep.subr.bf16.mxu0 %v3065_v28  ;;  %v3143_v18 = vld [vmem:[%s3690_s23 + $0x694] ss:$24 sps:$4 sm:$0xff]   ;;  %v3141_v20 = vld [vmem:[%s3690_s23 + $0x690] ss:$24 sps:$4 sm:$0xff]   ;;  %v3149_v22 = vld [vmem:[%s3690_s23 + $0x6c4] ss:$24 sps:$4 sm:$0xff]  }
  0x53   : > { %2106 = vmatprep.subr.bf16.mxu1 %v3067_v29  ;;  %v3146_v19 = vld [vmem:[%s3690_s23 + $0x9c] ss:$24 sps:$4 sm:$0xff]   ;;  %v3144_v21 = vld [vmem:[%s3690_s23 + $0x98] ss:$24 sps:$4 sm:$0xff]   ;;  %v3152_v23 = vld [vmem:[%s3690_s23 + $0xcc] ss:$24 sps:$4 sm:$0xff]  }
  0x54   : > { %v3147_v24 = vld [vmem:[%s3690_s23 + $0x6c0] ss:$24 sps:$4 sm:$0xff]   ;;  %v3155_v26 = vld [vmem:[%s3690_s23 + $0x6f4] ss:$24 sps:$4 sm:$0xff]   ;;  %v3153_v28 = vld [vmem:[%s3690_s23 + $0x6f0] ss:$24 sps:$4 sm:$0xff]  }
  0x55   : > { %2066 = vmatpush1.bf16.msra.mxu0 %v3069_v30  ;;  %v3150_v25 = vld [vmem:[%s3690_s23 + $0xc8] ss:$24 sps:$4 sm:$0xff]   ;;  %v3158_v27 = vld [vmem:[%s3690_s23 + $0xfc] ss:$24 sps:$4 sm:$0xff]   ;;  %v3156_v29 = vld [vmem:[%s3690_s23 + $0xf8] ss:$24 sps:$4 sm:$0xff]  }
  0x56   : > { %2107 = vmatpush1.bf16.msra.mxu1 %v3070_v31  ;;  %2067 = vmatprep.subr.bf16.mxu0 %v3071_v32  ;;  %v3161_v30 = vld [vmem:[%s3690_s23 + $0x724] ss:$24 sps:$4 sm:$0xff]   ;;  %v3177_v46 = vld [vmem:[%s3690_s23 + $0x7b0] ss:$24 sps:$4 sm:$0xff]   ;;  %s4099_s9 = smov (!%p269_p10, %s268_s9), 17 }
  0x57   : > { %2108 = vmatprep.subr.bf16.mxu1 %v3073_v33  ;;  %v3164_v31 = vld [vmem:[%s3690_s23 + $0x12c] ss:$24 sps:$4 sm:$0xff]   ;;  %v3159_v33 = vld [vmem:[%s3690_s23 + $0x720] ss:$24 sps:$4 sm:$0xff]   ;;  %s271_s28 = scalar_lea.vmem %s4078_s2, %s4099_s9  ;;  %s279_s4 = sadd.s32 %s2948_s30, %s4099_s9 }
  0x58   : > { %v3812_v32 = vld [vmem:[%s3748_s8 + $0x10] sm:$0xff]  ;;  %v3180_v48 = vld [vmem:[%s3690_s23 + $0x1b8] ss:$24 sps:$4 sm:$0xff]   ;;  %s2641_s15 = sshll.u32 %s279_s4, 2 }
  0x59   : > { %2068 = vmatpush1.bf16.msra.mxu0 %v3075_v34  ;;  %v3817_v34 = vcombine.high %v3812_v32, %v3812_v32  ;;  %s4047_s7 = scalar_lea.vmem %s4079_s3, %s2641_s15 }
  0x5a   : > { %2109 = vmatpush1.bf16.msra.mxu1 %v3076_v35  ;;  %2069 = vmatprep.subr.bf16.mxu0 %v3077_v36  ;;  %v3162_v35 = vld [vmem:[%s3690_s23 + $0x128] ss:$24 sps:$4 sm:$0xff]   ;;  %v3167_v36 = vld [vmem:[%s3690_s23 + $0x754] ss:$24 sps:$4 sm:$0xff]  }
  0x5b   : > { %2110 = vmatprep.subr.bf16.mxu1 %v3079_v37  ;;  %v3170_v37 = vld [vmem:[%s3690_s23 + $0x15c] ss:$24 sps:$4 sm:$0xff]  }
  0x5d   : > { %2070 = vmatpush1.bf16.msra.mxu0 %v3081_v38  ;;  %v3165_v38 = vld [vmem:[%s3690_s23 + $0x750] ss:$24 sps:$4 sm:$0xff]  }
  0x5e   : > { %2111 = vmatpush1.bf16.msra.mxu1 %v3082_v39  ;;  %2071 = vmatprep.subr.bf16.mxu0 %v3083_v40  ;;  %v3168_v39 = vld [vmem:[%s3690_s23 + $0x158] ss:$24 sps:$4 sm:$0xff]   ;;  %v3173_v40 = vld [vmem:[%s3690_s23 + $0x784] ss:$24 sps:$4 sm:$0xff]  }
  0x5f   : > { %2112 = vmatprep.subr.bf16.mxu1 %v3085_v41  ;;  %v3176_v41 = vld [vmem:[%s3690_s23 + $0x18c] ss:$24 sps:$4 sm:$0xff]  }
  0x61   : > { %2072 = vmatpush1.bf16.msra.mxu0 %v3087_v42  ;;  %v3171_v42 = vld [vmem:[%s3690_s23 + $0x780] ss:$24 sps:$4 sm:$0xff]  }
  0x62   : > { %2113 = vmatpush1.bf16.msra.mxu1 %v3088_v43  ;;  %2073 = vmatprep.subr.bf16.mxu0 %v3089_v44  ;;  %v3174_v43 = vld [vmem:[%s3690_s23 + $0x188] ss:$24 sps:$4 sm:$0xff]   ;;  %v3179_v44 = vld [vmem:[%s3690_s23 + $0x7b4] ss:$24 sps:$4 sm:$0xff]  }
  0x63   : > { %2114 = vmatprep.subr.bf16.mxu1 %v3091_v45  ;;  %v3182_v45 = vld [vmem:[%s3690_s23 + $0x1bc] ss:$24 sps:$4 sm:$0xff]  }
  0x65   : > { %2074 = vmatpush1.bf16.msra.mxu0 %v3093_v49  ;;  %v3185_v49 = vld [vmem:[%s3690_s23 + $0x7e4] ss:$24 sps:$4 sm:$0xff]  }
  0x66   : > { %2115 = vmatpush1.bf16.msra.mxu1 %v3094_v50  ;;  %2075 = vmatprep.subr.bf16.mxu0 %v3095_v52  ;;  %v3188_v50 = vld [vmem:[%s3690_s23 + $0x1ec] ss:$24 sps:$4 sm:$0xff]   ;;  %v3183_v52 = vld [vmem:[%s3690_s23 + $0x7e0] ss:$24 sps:$4 sm:$0xff]  }
  0x67   : > { %2116 = vmatprep.subr.bf16.mxu1 %v3097_v53  ;;  %v3186_v53 = vld [vmem:[%s3690_s23 + $0x1e8] ss:$24 sps:$4 sm:$0xff]  }
  0x69   : > { %2076 = vmatpush1.bf16.msra.mxu0 %v3099_v54  ;;  %v3191_v54 = vld [vmem:[%s3690_s23 + $0x814] ss:$24 sps:$4 sm:$0xff]  }
  0x6a   : > { %2117 = vmatpush1.bf16.msra.mxu1 %v3100_v55  ;;  %2077 = vmatprep.subr.bf16.mxu0 %v3101_v56  ;;  %v3194_v55 = vld [vmem:[%s3690_s23 + $0x21c] ss:$24 sps:$4 sm:$0xff]   ;;  %v3189_v56 = vld [vmem:[%s3690_s23 + $0x810] ss:$24 sps:$4 sm:$0xff]  }
  0x6b   : > { %2118 = vmatprep.subr.bf16.mxu1 %v3103_v57  ;;  %v3192_v57 = vld [vmem:[%s3690_s23 + $0x218] ss:$24 sps:$4 sm:$0xff]  }
  0x6d   : > { %2078 = vmatpush1.bf16.msra.mxu0 %v3105_v58  ;;  %v3197_v58 = vld [vmem:[%s3690_s23 + $0x844] ss:$24 sps:$4 sm:$0xff]  }
  0x6e   : > { %2119 = vmatpush1.bf16.msra.mxu1 %v3106_v59  ;;  %2079 = vmatprep.subr.bf16.mxu0 %v3107_v60  ;;  %v3200_v59 = vld [vmem:[%s3690_s23 + $0x24c] ss:$24 sps:$4 sm:$0xff]   ;;  %v3195_v60 = vld [vmem:[%s3690_s23 + $0x840] ss:$24 sps:$4 sm:$0xff]  }
  0x6f   : > { %2120 = vmatprep.subr.bf16.mxu1 %v3109_v61  ;;  %v3198_v61 = vld [vmem:[%s3690_s23 + $0x248] ss:$24 sps:$4 sm:$0xff]  }
  0x71   : > { %2080 = vmatpush1.bf16.msra.mxu0 %v3111_v62  ;;  %v3203_v62 = vld [vmem:[%s3690_s23 + $0x874] ss:$24 sps:$4 sm:$0xff]  }
  0x72   : > { %2121 = vmatpush1.bf16.msra.mxu1 %v3112_v63  ;;  %2081 = vmatprep.subr.bf16.mxu0 %v3113_v0  ;;  %v3206_v63 = vld [vmem:[%s3690_s23 + $0x27c] ss:$24 sps:$4 sm:$0xff]   ;;  %v3201_v0 = vld [vmem:[%s3690_s23 + $0x870] ss:$24 sps:$4 sm:$0xff]  }
  0x73   : > { %2122 = vmatprep.subr.bf16.mxu1 %v3115_v1  ;;  %v3204_v1 = vld [vmem:[%s3690_s23 + $0x278] ss:$24 sps:$4 sm:$0xff]  }
  0x75   : > { %2082 = vmatpush1.bf16.msra.mxu0 %v3117_v2  ;;  %v3209_v2 = vld [vmem:[%s3690_s23 + $0x8a4] ss:$24 sps:$4 sm:$0xff]  }
  0x76   : > { %2123 = vmatpush1.bf16.msra.mxu1 %v3118_v3  ;;  %2133 = vmatprep.subr.bf16.mxu0 %v3125_v4  ;;  %v3212_v3 = vld [vmem:[%s3690_s23 + $0x2ac] ss:$24 sps:$4 sm:$0xff]   ;;  %v3207_v4 = vld [vmem:[%s3690_s23 + $0x8a0] ss:$24 sps:$4 sm:$0xff]  }
  0x77   : > { %2174 = vmatprep.subr.bf16.mxu1 %v3128_v5  ;;  %v3210_v5 = vld [vmem:[%s3690_s23 + $0x2a8] ss:$24 sps:$4 sm:$0xff]  }
  0x78   : > { %2084 = vmatmul.mubr.bf16.vlgmr.msra.gmra.mrb[0].mxu0 %v3780_v6 }
  0x79   : > { %2125 = vmatmul.mubr.bf16.vlgmr.msra.gmra.mrb[0].mxu1 %v3782_v7  ;;  %2134 = vmatpush1.bf16.msra.mxu0 %v3123_v8  ;;  %v3215_v8 = vld [vmem:[%s3690_s23 + $0x8d4] ss:$24 sps:$4 sm:$0xff]  }
  0x7a   : > { %2175 = vmatpush1.bf16.msra.mxu1 %v3126_v9  ;;  %2135 = vmatprep.subr.bf16.mxu0 %v3131_v10  ;;  %v3218_v9 = vld [vmem:[%s3690_s23 + $0x2dc] ss:$24 sps:$4 sm:$0xff]   ;;  %v3213_v10 = vld [vmem:[%s3690_s23 + $0x8d0] ss:$24 sps:$4 sm:$0xff]  }
  0x7b   : > { %2176 = vmatprep.subr.bf16.mxu1 %v3134_v11  ;;  %2206 = vmatprep.mubr.bf16.mxu1 %v3753_v47  ;;  %v3216_v11 = vld [vmem:[%s3690_s23 + $0x2d8] ss:$24 sps:$4 sm:$0xff]  }
  0x7c   : > { %2165 = vmatprep.mubr.bf16.mxu0 %v3817_v34 }
  0x7d   : > { %2136 = vmatpush1.bf16.msra.mxu0 %v3129_v12  ;;  %v3223_v12 = vld [vmem:[%s3690_s23 + $0x30c] ss:$24 sps:$4 sm:$0xff]  }
  0x7e   : > { %2177 = vmatpush1.bf16.msra.mxu1 %v3132_v13  ;;  %2137 = vmatprep.subr.bf16.mxu0 %v3137_v14  ;;  %v3226_v13 = vld [vmem:[%s3690_s23 + $0x60c] ss:$24 sps:$4 sm:$0xff]   ;;  %v3861_v14 = vcombine.low %v3812_v32, %v3812_v32  ;;  %v3248_v32 = vld [vmem:[%s3690_s23 + $0x6c8] ss:$24 sps:$4 sm:$0xff]  }
  0x7f   : > { %2178 = vmatprep.subr.bf16.mxu1 %v3140_v15  ;;  %v3221_v15 = vld [vmem:[%s3690_s23 + $0x308] ss:$24 sps:$4 sm:$0xff]  }
  0x81   : > { %2138 = vmatpush1.bf16.msra.mxu0 %v3135_v16  ;;  %v3224_v16 = vld [vmem:[%s3690_s23 + $0x608] ss:$24 sps:$4 sm:$0xff]  }
  0x82   : > { %2179 = vmatpush1.bf16.msra.mxu1 %v3138_v17  ;;  %2139 = vmatprep.subr.bf16.mxu0 %v3143_v18  ;;  %v3229_v17 = vld [vmem:[%s3690_s23 + $0x33c] ss:$24 sps:$4 sm:$0xff]  }
  0x83   : > { %2180 = vmatprep.subr.bf16.mxu1 %v3146_v19  ;;  %v3232_v18 = vld [vmem:[%s3690_s23 + $0x63c] ss:$24 sps:$4 sm:$0xff]   ;;  %v3227_v19 = vld [vmem:[%s3690_s23 + $0x338] ss:$24 sps:$4 sm:$0xff]  }
  0x85   : > { %2140 = vmatpush1.bf16.msra.mxu0 %v3141_v20  ;;  %v3230_v20 = vld [vmem:[%s3690_s23 + $0x638] ss:$24 sps:$4 sm:$0xff]  }
  0x86   : > { %2181 = vmatpush1.bf16.msra.mxu1 %v3144_v21  ;;  %2141 = vmatprep.subr.bf16.mxu0 %v3149_v22  ;;  %v3235_v21 = vld [vmem:[%s3690_s23 + $0x36c] ss:$24 sps:$4 sm:$0xff]  }
  0x87   : > { %2182 = vmatprep.subr.bf16.mxu1 %v3152_v23  ;;  %v3238_v22 = vld [vmem:[%s3690_s23 + $0x66c] ss:$24 sps:$4 sm:$0xff]   ;;  %v3233_v23 = vld [vmem:[%s3690_s23 + $0x368] ss:$24 sps:$4 sm:$0xff]  }
  0x89   : > { %2142 = vmatpush1.bf16.msra.mxu0 %v3147_v24  ;;  %v3236_v24 = vld [vmem:[%s3690_s23 + $0x668] ss:$24 sps:$4 sm:$0xff]  }
  0x8a   : > { %2183 = vmatpush1.bf16.msra.mxu1 %v3150_v25  ;;  %2143 = vmatprep.subr.bf16.mxu0 %v3155_v26  ;;  %v3241_v25 = vld [vmem:[%s3690_s23 + $0x39c] ss:$24 sps:$4 sm:$0xff]  }
  0x8b   : > { %2184 = vmatprep.subr.bf16.mxu1 %v3158_v27  ;;  %v3244_v26 = vld [vmem:[%s3690_s23 + $0x69c] ss:$24 sps:$4 sm:$0xff]   ;;  %v3239_v27 = vld [vmem:[%s3690_s23 + $0x398] ss:$24 sps:$4 sm:$0xff]  }
  0x8d   : > { %2144 = vmatpush1.bf16.msra.mxu0 %v3153_v28  ;;  %v3242_v28 = vld [vmem:[%s3690_s23 + $0x698] ss:$24 sps:$4 sm:$0xff]  }
  0x8e   : > { %2185 = vmatpush1.bf16.msra.mxu1 %v3156_v29  ;;  %2145 = vmatprep.subr.bf16.mxu0 %v3161_v30  ;;  %v3247_v29 = vld [vmem:[%s3690_s23 + $0x3cc] ss:$24 sps:$4 sm:$0xff]  }
  0x8f   : > { %2186 = vmatprep.subr.bf16.mxu1 %v3164_v31  ;;  %v3250_v30 = vld [vmem:[%s3690_s23 + $0x6cc] ss:$24 sps:$4 sm:$0xff]   ;;  %v3245_v31 = vld [vmem:[%s3690_s23 + $0x3c8] ss:$24 sps:$4 sm:$0xff]  }
  0x91   : > { %2146 = vmatpush1.bf16.msra.mxu0 %v3159_v33  ;;  %v3253_v33 = vld [vmem:[%s3690_s23 + $0x3fc] ss:$24 sps:$4 sm:$0xff]  }
  0x92   : > { %2187 = vmatpush1.bf16.msra.mxu1 %v3162_v35  ;;  %2147 = vmatprep.subr.bf16.mxu0 %v3167_v36  ;;  %v3256_v35 = vld [vmem:[%s3690_s23 + $0x6fc] ss:$24 sps:$4 sm:$0xff]   ;;  %v3251_v36 = vld [vmem:[%s3690_s23 + $0x3f8] ss:$24 sps:$4 sm:$0xff]  }
  0x93   : > { %2188 = vmatprep.subr.bf16.mxu1 %v3170_v37  ;;  %v3254_v37 = vld [vmem:[%s3690_s23 + $0x6f8] ss:$24 sps:$4 sm:$0xff]  }
  0x95   : > { %2148 = vmatpush1.bf16.msra.mxu0 %v3165_v38  ;;  %v3259_v38 = vld [vmem:[%s3690_s23 + $0x42c] ss:$24 sps:$4 sm:$0xff]  }
  0x96   : > { %2189 = vmatpush1.bf16.msra.mxu1 %v3168_v39  ;;  %2149 = vmatprep.subr.bf16.mxu0 %v3173_v40  ;;  %v3262_v39 = vld [vmem:[%s3690_s23 + $0x72c] ss:$24 sps:$4 sm:$0xff]   ;;  %v3257_v40 = vld [vmem:[%s3690_s23 + $0x428] ss:$24 sps:$4 sm:$0xff]  }
  0x97   : > { %2190 = vmatprep.subr.bf16.mxu1 %v3176_v41  ;;  %v3260_v41 = vld [vmem:[%s3690_s23 + $0x728] ss:$24 sps:$4 sm:$0xff]  }
  0x99   : > { %2150 = vmatpush1.bf16.msra.mxu0 %v3171_v42  ;;  %v3265_v42 = vld [vmem:[%s3690_s23 + $0x45c] ss:$24 sps:$4 sm:$0xff]  }
  0x9a   : > { %2191 = vmatpush1.bf16.msra.mxu1 %v3174_v43  ;;  %2151 = vmatprep.subr.bf16.mxu0 %v3179_v44  ;;  %v3268_v43 = vld [vmem:[%s3690_s23 + $0x75c] ss:$24 sps:$4 sm:$0xff]   ;;  %v3263_v44 = vld [vmem:[%s3690_s23 + $0x458] ss:$24 sps:$4 sm:$0xff]  }
  0x9b   : > { %2192 = vmatprep.subr.bf16.mxu1 %v3182_v45  ;;  %v3266_v45 = vld [vmem:[%s3690_s23 + $0x758] ss:$24 sps:$4 sm:$0xff]  }
  0x9d   : > { %2152 = vmatpush1.bf16.msra.mxu0 %v3177_v46  ;;  %v3271_v46 = vld [vmem:[%s3690_s23 + $0x48c] ss:$24 sps:$4 sm:$0xff]  }
  0x9e   : > { %2193 = vmatpush1.bf16.msra.mxu1 %v3180_v48  ;;  %2153 = vmatprep.subr.bf16.mxu0 %v3185_v49  ;;  %v3274_v48 = vld [vmem:[%s3690_s23 + $0x78c] ss:$24 sps:$4 sm:$0xff]   ;;  %v3269_v49 = vld [vmem:[%s3690_s23 + $0x488] ss:$24 sps:$4 sm:$0xff]  }
  0x9f   : > { %2194 = vmatprep.subr.bf16.mxu1 %v3188_v50  ;;  %v3272_v50 = vld [vmem:[%s3690_s23 + $0x788] ss:$24 sps:$4 sm:$0xff]  }
  0xa1   : > { %2154 = vmatpush1.bf16.msra.mxu0 %v3183_v52  ;;  %v3277_v52 = vld [vmem:[%s3690_s23 + $0x4bc] ss:$24 sps:$4 sm:$0xff]  }
  0xa2   : > { %2195 = vmatpush1.bf16.msra.mxu1 %v3186_v53  ;;  %2155 = vmatprep.subr.bf16.mxu0 %v3191_v54  ;;  %v3280_v53 = vld [vmem:[%s3690_s23 + $0x7bc] ss:$24 sps:$4 sm:$0xff]   ;;  %v3275_v54 = vld [vmem:[%s3690_s23 + $0x4b8] ss:$24 sps:$4 sm:$0xff]  }
  0xa3   : > { %2196 = vmatprep.subr.bf16.mxu1 %v3194_v55  ;;  %v3278_v55 = vld [vmem:[%s3690_s23 + $0x7b8] ss:$24 sps:$4 sm:$0xff]  }
  0xa5   : > { %2156 = vmatpush1.bf16.msra.mxu0 %v3189_v56  ;;  %v3283_v56 = vld [vmem:[%s3690_s23 + $0x4ec] ss:$24 sps:$4 sm:$0xff]  }
  0xa6   : > { %2197 = vmatpush1.bf16.msra.mxu1 %v3192_v57  ;;  %2157 = vmatprep.subr.bf16.mxu0 %v3197_v58  ;;  %v3286_v57 = vld [vmem:[%s3690_s23 + $0x7ec] ss:$24 sps:$4 sm:$0xff]   ;;  %v3281_v58 = vld [vmem:[%s3690_s23 + $0x4e8] ss:$24 sps:$4 sm:$0xff]  }
  0xa7   : > { %2198 = vmatprep.subr.bf16.mxu1 %v3200_v59  ;;  %v3284_v59 = vld [vmem:[%s3690_s23 + $0x7e8] ss:$24 sps:$4 sm:$0xff]  }
  0xa9   : > { %2158 = vmatpush1.bf16.msra.mxu0 %v3195_v60  ;;  %v3289_v60 = vld [vmem:[%s3690_s23 + $0x51c] ss:$24 sps:$4 sm:$0xff]  }
  0xaa   : > { %2199 = vmatpush1.bf16.msra.mxu1 %v3198_v61  ;;  %2159 = vmatprep.subr.bf16.mxu0 %v3203_v62  ;;  %v3292_v61 = vld [vmem:[%s3690_s23 + $0x81c] ss:$24 sps:$4 sm:$0xff]   ;;  %v3287_v62 = vld [vmem:[%s3690_s23 + $0x518] ss:$24 sps:$4 sm:$0xff]  }
  0xab   : > { %2200 = vmatprep.subr.bf16.mxu1 %v3206_v63  ;;  %v3290_v63 = vld [vmem:[%s3690_s23 + $0x818] ss:$24 sps:$4 sm:$0xff]  }
  0xad   : > { %2160 = vmatpush1.bf16.msra.mxu0 %v3201_v0  ;;  %v3295_v0 = vld [vmem:[%s3690_s23 + $0x54c] ss:$24 sps:$4 sm:$0xff]  }
  0xae   : > { %2201 = vmatpush1.bf16.msra.mxu1 %v3204_v1  ;;  %2161 = vmatprep.subr.bf16.mxu0 %v3209_v2  ;;  %v3298_v1 = vld [vmem:[%s3690_s23 + $0x84c] ss:$24 sps:$4 sm:$0xff]   ;;  %v3293_v2 = vld [vmem:[%s3690_s23 + $0x548] ss:$24 sps:$4 sm:$0xff]  }
  0xaf   : > { %2202 = vmatprep.subr.bf16.mxu1 %v3212_v3  ;;  %v3296_v3 = vld [vmem:[%s3690_s23 + $0x848] ss:$24 sps:$4 sm:$0xff]  }
  0xb1   : > { %2162 = vmatpush1.bf16.msra.mxu0 %v3207_v4  ;;  %v3301_v4 = vld [vmem:[%s3690_s23 + $0x57c] ss:$24 sps:$4 sm:$0xff]  }
  0xb2   : > { %2203 = vmatpush1.bf16.msra.mxu1 %v3210_v5  ;;  %2163 = vmatprep.subr.bf16.mxu0 %v3215_v8  ;;  %v3304_v5 = vld [vmem:[%s3690_s23 + $0x87c] ss:$24 sps:$4 sm:$0xff]   ;;  %v3299_v8 = vld [vmem:[%s3690_s23 + $0x578] ss:$24 sps:$4 sm:$0xff]  }
  0xb3   : > { %2204 = vmatprep.subr.bf16.mxu1 %v3218_v9  ;;  %v3302_v9 = vld [vmem:[%s3690_s23 + $0x878] ss:$24 sps:$4 sm:$0xff]  }
  0xb5   : > { %2164 = vmatpush1.bf16.msra.mxu0 %v3213_v10  ;;  %v3307_v10 = vld [vmem:[%s3690_s23 + $0x5ac] ss:$24 sps:$4 sm:$0xff]  }
  0xb6   : > { %2205 = vmatpush1.bf16.msra.mxu1 %v3216_v11  ;;  %2215 = vmatprep.subr.bf16.mxu0 %v3223_v12  ;;  %v3310_v11 = vld [vmem:[%s3690_s23 + $0x8ac] ss:$24 sps:$4 sm:$0xff]   ;;  %v3305_v12 = vld [vmem:[%s3690_s23 + $0x5a8] ss:$24 sps:$4 sm:$0xff]  }
  0xb7   : > { %2256 = vmatprep.subr.bf16.mxu1 %v3226_v13  ;;  %v3308_v13 = vld [vmem:[%s3690_s23 + $0x8a8] ss:$24 sps:$4 sm:$0xff]  }
  0xb8   : > { %2166 = vmatmul.mubr.bf16.vlgmr.msra.gmra.mrb[4].mxu0 %v3861_v14 }
  0xb9   : > { %2207 = vmatmul.mubr.bf16.vlgmr.msra.gmra.mrb[4].mxu1 %v3780_v6  ;;  %2216 = vmatpush1.bf16.msra.mxu0 %v3221_v15  ;;  %v3313_v15 = vld [vmem:[%s3690_s23 + $0x5dc] ss:$24 sps:$4 sm:$0xff]  }
  0xba   : > { %2257 = vmatpush1.bf16.msra.mxu1 %v3224_v16  ;;  %2217 = vmatprep.subr.bf16.mxu0 %v3229_v17  ;;  %v3316_v16 = vld [vmem:[%s3690_s23 + $0x8dc] ss:$24 sps:$4 sm:$0xff]   ;;  %v3311_v17 = vld [vmem:[%s3690_s23 + $0x5d8] ss:$24 sps:$4 sm:$0xff]  }
  0xbb   : > { %2258 = vmatprep.subr.bf16.mxu1 %v3232_v18  ;;  %2247 = vmatprep.mubr.bf16.mxu0 %v3758_v51  ;;  %v3314_v18 = vld [vmem:[%s3690_s23 + $0x8d8] ss:$24 sps:$4 sm:$0xff]  }
  0xbc   : > { %2288 = vmatprep.mubr.bf16.mxu1 %v3817_v34 }
  0xbd   : > { %2218 = vmatpush1.bf16.msra.mxu0 %v3227_v19  ;;  %v3319_v19 = vld [vmem:[%s3690_s23 + $0x14] ss:$24 sps:$4 sm:$0xff]  }
  0xbe   : > { %2259 = vmatpush1.bf16.msra.mxu1 %v3230_v20  ;;  %2219 = vmatprep.subr.bf16.mxu0 %v3235_v21  ;;  %v3322_v20 = vld [vmem:[%s3690_s23 + $0x314] ss:$24 sps:$4 sm:$0xff]   ;;  %v3317_v21 = vld [vmem:[%s3690_s23 + $0x10] ss:$24 sps:$4 sm:$0xff]  }
  0xbf   : > { %2260 = vmatprep.subr.bf16.mxu1 %v3238_v22  ;;  %v3320_v22 = vld [vmem:[%s3690_s23 + $0x310] ss:$24 sps:$4 sm:$0xff]  }
  0xc1   : > { %2220 = vmatpush1.bf16.msra.mxu0 %v3233_v23  ;;  %v3325_v23 = vld [vmem:[%s3690_s23 + $0x44] ss:$24 sps:$4 sm:$0xff]  }
  0xc2   : > { %2261 = vmatpush1.bf16.msra.mxu1 %v3236_v24  ;;  %2221 = vmatprep.subr.bf16.mxu0 %v3241_v25  ;;  %v3328_v24 = vld [vmem:[%s3690_s23 + $0x344] ss:$24 sps:$4 sm:$0xff]   ;;  %v3323_v25 = vld [vmem:[%s3690_s23 + $0x40] ss:$24 sps:$4 sm:$0xff]  }
  0xc3   : > { %2262 = vmatprep.subr.bf16.mxu1 %v3244_v26  ;;  %v3326_v26 = vld [vmem:[%s3690_s23 + $0x340] ss:$24 sps:$4 sm:$0xff]  }
  0xc5   : > { %2222 = vmatpush1.bf16.msra.mxu0 %v3239_v27  ;;  %v3331_v27 = vld [vmem:[%s3690_s23 + $0x74] ss:$24 sps:$4 sm:$0xff]  }
  0xc6   : > { %2263 = vmatpush1.bf16.msra.mxu1 %v3242_v28  ;;  %2223 = vmatprep.subr.bf16.mxu0 %v3247_v29  ;;  %v3334_v28 = vld [vmem:[%s3690_s23 + $0x374] ss:$24 sps:$4 sm:$0xff]   ;;  %v3329_v29 = vld [vmem:[%s3690_s23 + $0x70] ss:$24 sps:$4 sm:$0xff]  }
  0xc7   : > { %2264 = vmatprep.subr.bf16.mxu1 %v3250_v30  ;;  %v3332_v30 = vld [vmem:[%s3690_s23 + $0x370] ss:$24 sps:$4 sm:$0xff]  }
  0xc9   : > { %2224 = vmatpush1.bf16.msra.mxu0 %v3245_v31  ;;  %v3337_v31 = vld [vmem:[%s3690_s23 + $0xa4] ss:$24 sps:$4 sm:$0xff]  }
  0xca   : > { %2265 = vmatpush1.bf16.msra.mxu1 %v3248_v32  ;;  %2225 = vmatprep.subr.bf16.mxu0 %v3253_v33  ;;  %v3340_v32 = vld [vmem:[%s3690_s23 + $0x3a4] ss:$24 sps:$4 sm:$0xff]   ;;  %v3335_v33 = vld [vmem:[%s3690_s23 + $0xa0] ss:$24 sps:$4 sm:$0xff]  }
  0xcb   : > { %2266 = vmatprep.subr.bf16.mxu1 %v3256_v35  ;;  %v3346_v35 = vld [vmem:[%s3690_s23 + $0x3d4] ss:$24 sps:$4 sm:$0xff]  }
  0xcd   : > { %2226 = vmatpush1.bf16.msra.mxu0 %v3251_v36  ;;  %v3341_v36 = vld [vmem:[%s3690_s23 + $0xd0] ss:$24 sps:$4 sm:$0xff]  }
  0xce   : > { %2267 = vmatpush1.bf16.msra.mxu1 %v3254_v37  ;;  %2227 = vmatprep.subr.bf16.mxu0 %v3259_v38  ;;  %v3344_v37 = vld [vmem:[%s3690_s23 + $0x3d0] ss:$24 sps:$4 sm:$0xff]   ;;  %v3349_v38 = vld [vmem:[%s3690_s23 + $0x104] ss:$24 sps:$4 sm:$0xff]  }
  0xcf   : > { %2268 = vmatprep.subr.bf16.mxu1 %v3262_v39  ;;  %v3352_v39 = vld [vmem:[%s3690_s23 + $0x404] ss:$24 sps:$4 sm:$0xff]  }
  0xd1   : > { %2228 = vmatpush1.bf16.msra.mxu0 %v3257_v40  ;;  %v3347_v40 = vld [vmem:[%s3690_s23 + $0x100] ss:$24 sps:$4 sm:$0xff]  }
  0xd2   : > { %2269 = vmatpush1.bf16.msra.mxu1 %v3260_v41  ;;  %2229 = vmatprep.subr.bf16.mxu0 %v3265_v42  ;;  %v3350_v41 = vld [vmem:[%s3690_s23 + $0x400] ss:$24 sps:$4 sm:$0xff]   ;;  %v3355_v42 = vld [vmem:[%s3690_s23 + $0x134] ss:$24 sps:$4 sm:$0xff]  }
  0xd3   : > { %2270 = vmatprep.subr.bf16.mxu1 %v3268_v43  ;;  %v3358_v43 = vld [vmem:[%s3690_s23 + $0x434] ss:$24 sps:$4 sm:$0xff]  }
  0xd5   : > { %2230 = vmatpush1.bf16.msra.mxu0 %v3263_v44  ;;  %v3353_v44 = vld [vmem:[%s3690_s23 + $0x130] ss:$24 sps:$4 sm:$0xff]  }
  0xd6   : > { %2271 = vmatpush1.bf16.msra.mxu1 %v3266_v45  ;;  %2231 = vmatprep.subr.bf16.mxu0 %v3271_v46  ;;  %v3356_v45 = vld [vmem:[%s3690_s23 + $0x430] ss:$24 sps:$4 sm:$0xff]   ;;  %v3361_v46 = vld [vmem:[%s3690_s23 + $0x164] ss:$24 sps:$4 sm:$0xff]  }
  0xd7   : > { %2272 = vmatprep.subr.bf16.mxu1 %v3274_v48  ;;  %v3364_v48 = vld [vmem:[%s3690_s23 + $0x464] ss:$24 sps:$4 sm:$0xff]  }
  0xd9   : > { %2232 = vmatpush1.bf16.msra.mxu0 %v3269_v49  ;;  %v3359_v49 = vld [vmem:[%s3690_s23 + $0x160] ss:$24 sps:$4 sm:$0xff]  }
  0xda   : > { %2273 = vmatpush1.bf16.msra.mxu1 %v3272_v50  ;;  %2233 = vmatprep.subr.bf16.mxu0 %v3277_v52  ;;  %v3362_v50 = vld [vmem:[%s3690_s23 + $0x460] ss:$24 sps:$4 sm:$0xff]   ;;  %v3367_v52 = vld [vmem:[%s3690_s23 + $0x194] ss:$24 sps:$4 sm:$0xff]  }
  0xdb   : > { %2274 = vmatprep.subr.bf16.mxu1 %v3280_v53  ;;  %v3370_v53 = vld [vmem:[%s3690_s23 + $0x494] ss:$24 sps:$4 sm:$0xff]  }
  0xdd   : > { %2234 = vmatpush1.bf16.msra.mxu0 %v3275_v54  ;;  %v3365_v54 = vld [vmem:[%s3690_s23 + $0x190] ss:$24 sps:$4 sm:$0xff]  }
  0xde   : > { %2275 = vmatpush1.bf16.msra.mxu1 %v3278_v55  ;;  %2235 = vmatprep.subr.bf16.mxu0 %v3283_v56  ;;  %v3368_v55 = vld [vmem:[%s3690_s23 + $0x490] ss:$24 sps:$4 sm:$0xff]   ;;  %v3373_v56 = vld [vmem:[%s3690_s23 + $0x1c4] ss:$24 sps:$4 sm:$0xff]  }
  0xdf   : > { %2276 = vmatprep.subr.bf16.mxu1 %v3286_v57  ;;  %v3376_v57 = vld [vmem:[%s3690_s23 + $0x4c4] ss:$24 sps:$4 sm:$0xff]  }
  0xe1   : > { %2236 = vmatpush1.bf16.msra.mxu0 %v3281_v58  ;;  %v3371_v58 = vld [vmem:[%s3690_s23 + $0x1c0] ss:$24 sps:$4 sm:$0xff]  }
  0xe2   : > { %2277 = vmatpush1.bf16.msra.mxu1 %v3284_v59  ;;  %2237 = vmatprep.subr.bf16.mxu0 %v3289_v60  ;;  %v3374_v59 = vld [vmem:[%s3690_s23 + $0x4c0] ss:$24 sps:$4 sm:$0xff]   ;;  %v3379_v60 = vld [vmem:[%s3690_s23 + $0x1f4] ss:$24 sps:$4 sm:$0xff]  }
  0xe3   : > { %2278 = vmatprep.subr.bf16.mxu1 %v3292_v61  ;;  %v3382_v61 = vld [vmem:[%s3690_s23 + $0x4f4] ss:$24 sps:$4 sm:$0xff]  }
  0xe5   : > { %2238 = vmatpush1.bf16.msra.mxu0 %v3287_v62  ;;  %v3377_v62 = vld [vmem:[%s3690_s23 + $0x1f0] ss:$24 sps:$4 sm:$0xff]  }
  0xe6   : > { %2279 = vmatpush1.bf16.msra.mxu1 %v3290_v63  ;;  %2239 = vmatprep.subr.bf16.mxu0 %v3295_v0  ;;  %v3380_v63 = vld [vmem:[%s3690_s23 + $0x4f0] ss:$24 sps:$4 sm:$0xff]   ;;  %v3385_v0 = vld [vmem:[%s3690_s23 + $0x224] ss:$24 sps:$4 sm:$0xff]  }
  0xe7   : > { %2280 = vmatprep.subr.bf16.mxu1 %v3298_v1  ;;  %v3388_v1 = vld [vmem:[%s3690_s23 + $0x524] ss:$24 sps:$4 sm:$0xff]  }
  0xe9   : > { %2240 = vmatpush1.bf16.msra.mxu0 %v3293_v2  ;;  %v3383_v2 = vld [vmem:[%s3690_s23 + $0x220] ss:$24 sps:$4 sm:$0xff]  }
  0xea   : > { %2281 = vmatpush1.bf16.msra.mxu1 %v3296_v3  ;;  %2241 = vmatprep.subr.bf16.mxu0 %v3301_v4  ;;  %v3386_v3 = vld [vmem:[%s3690_s23 + $0x520] ss:$24 sps:$4 sm:$0xff]   ;;  %v3391_v4 = vld [vmem:[%s3690_s23 + $0x254] ss:$24 sps:$4 sm:$0xff]  }
  0xeb   : > { %2282 = vmatprep.subr.bf16.mxu1 %v3304_v5  ;;  %v3394_v5 = vld [vmem:[%s3690_s23 + $0x554] ss:$24 sps:$4 sm:$0xff]  }
  0xed   : > { %2242 = vmatpush1.bf16.msra.mxu0 %v3299_v8  ;;  %v3389_v8 = vld [vmem:[%s3690_s23 + $0x250] ss:$24 sps:$4 sm:$0xff]  }
  0xee   : > { %2283 = vmatpush1.bf16.msra.mxu1 %v3302_v9  ;;  %2243 = vmatprep.subr.bf16.mxu0 %v3307_v10  ;;  %v3392_v9 = vld [vmem:[%s3690_s23 + $0x550] ss:$24 sps:$4 sm:$0xff]   ;;  %v3397_v10 = vld [vmem:[%s3690_s23 + $0x284] ss:$24 sps:$4 sm:$0xff]  }
  0xef   : > { %2284 = vmatprep.subr.bf16.mxu1 %v3310_v11  ;;  %v3400_v11 = vld [vmem:[%s3690_s23 + $0x584] ss:$24 sps:$4 sm:$0xff]  }
  0xf1   : > { %2244 = vmatpush1.bf16.msra.mxu0 %v3305_v12  ;;  %v3395_v12 = vld [vmem:[%s3690_s23 + $0x280] ss:$24 sps:$4 sm:$0xff]  }
  0xf2   : > { %2285 = vmatpush1.bf16.msra.mxu1 %v3308_v13  ;;  %2245 = vmatprep.subr.bf16.mxu0 %v3313_v15  ;;  %v3398_v13 = vld [vmem:[%s3690_s23 + $0x580] ss:$24 sps:$4 sm:$0xff]   ;;  %v3403_v15 = vld [vmem:[%s3690_s23 + $0x2b4] ss:$24 sps:$4 sm:$0xff]  }
  0xf3   : > { %2286 = vmatprep.subr.bf16.mxu1 %v3316_v16  ;;  %v3406_v16 = vld [vmem:[%s3690_s23 + $0x5b4] ss:$24 sps:$4 sm:$0xff]  }
  0xf5   : > { %2246 = vmatpush1.bf16.msra.mxu0 %v3311_v17  ;;  %v3401_v17 = vld [vmem:[%s3690_s23 + $0x2b0] ss:$24 sps:$4 sm:$0xff]  }
  0xf6   : > { %2287 = vmatpush1.bf16.msra.mxu1 %v3314_v18  ;;  %2297 = vmatprep.subr.bf16.mxu0 %v3319_v19  ;;  %v3404_v18 = vld [vmem:[%s3690_s23 + $0x5b0] ss:$24 sps:$4 sm:$0xff]   ;;  %v3409_v19 = vld [vmem:[%s3690_s23 + $0x2e4] ss:$24 sps:$4 sm:$0xff]  }
  0xf7   : > { %2338 = vmatprep.subr.bf16.mxu1 %v3322_v20  ;;  %v3412_v20 = vld [vmem:[%s3690_s23 + $0x5e4] ss:$24 sps:$4 sm:$0xff]  }
  0xf8   : > { %2248 = vmatmul.mubr.bf16.vlgmr.msra.gmra.mrb[8].mxu0 %v3782_v7 }
  0xf9   : > { %2289 = vmatmul.mubr.bf16.vlgmr.msra.gmra.mrb[8].mxu1 %v3861_v14  ;;  %2298 = vmatpush1.bf16.msra.mxu0 %v3317_v21  ;;  %v3407_v21 = vld [vmem:[%s3690_s23 + $0x2e0] ss:$24 sps:$4 sm:$0xff]  }
  0xfa   : > { %2339 = vmatpush1.bf16.msra.mxu1 %v3320_v22  ;;  %2299 = vmatprep.subr.bf16.mxu0 %v3325_v23  ;;  %v3410_v22 = vld [vmem:[%s3690_s23 + $0x5e0] ss:$24 sps:$4 sm:$0xff]   ;;  %v3415_v23 = vld [vmem:[%s3690_s23 + $0x614] ss:$24 sps:$4 sm:$0xff]  }
  0xfb   : > { %2340 = vmatprep.subr.bf16.mxu1 %v3328_v24  ;;  %2329 = vmatprep.mubr.bf16.mxu0 %v3753_v47  ;;  %v3338_v47 = vld [vmem:[%s3690_s23 + $0x3a0] ss:$24 sps:$4 sm:$0xff]   ;;  %v3413_v24 = vld [vmem:[%s3690_s23 + $0x610] ss:$24 sps:$4 sm:$0xff]  }
  0xfc   : > { %2370 = vmatprep.mubr.bf16.mxu1 %v3758_v51  ;;  %v3343_v51 = vld [vmem:[%s3690_s23 + $0xd4] ss:$24 sps:$4 sm:$0xff]  }
  0xfd   : > { %2300 = vmatpush1.bf16.msra.mxu0 %v3323_v25  ;;  %v3418_v25 = vld [vmem:[%s3690_s23 + $0x644] ss:$24 sps:$4 sm:$0xff]  }
  0xfe   : > { %2341 = vmatpush1.bf16.msra.mxu1 %v3326_v26  ;;  %2301 = vmatprep.subr.bf16.mxu0 %v3331_v27  ;;  %v3416_v26 = vld [vmem:[%s3690_s23 + $0x640] ss:$24 sps:$4 sm:$0xff]   ;;  %v3421_v27 = vld [vmem:[%s3690_s23 + $0x674] ss:$24 sps:$4 sm:$0xff]  }
  0xff   : > { %2342 = vmatprep.subr.bf16.mxu1 %v3334_v28  ;;  %v3419_v28 = vld [vmem:[%s3690_s23 + $0x670] ss:$24 sps:$4 sm:$0xff]  }
 0x101   : > { %2302 = vmatpush1.bf16.msra.mxu0 %v3329_v29  ;;  %v3424_v29 = vld [vmem:[%s3690_s23 + $0x6a4] ss:$24 sps:$4 sm:$0xff]  }
 0x102   : > { %2343 = vmatpush1.bf16.msra.mxu1 %v3332_v30  ;;  %2303 = vmatprep.subr.bf16.mxu0 %v3337_v31  ;;  %v3422_v30 = vld [vmem:[%s3690_s23 + $0x6a0] ss:$24 sps:$4 sm:$0xff]   ;;  %v3430_v31 = vld [vmem:[%s3690_s23 + $0x704] ss:$24 sps:$4 sm:$0xff]  }
 0x103   : > { %2344 = vmatprep.subr.bf16.mxu1 %v3340_v32  ;;  %v3433_v32 = vld [vmem:[%s3690_s23 + $0x734] ss:$24 sps:$4 sm:$0xff]  }
 0x105   : > { %2304 = vmatpush1.bf16.msra.mxu0 %v3335_v33 }
 0x106   : > { %2345 = vmatpush1.bf16.msra.mxu1 %v3338_v47  ;;  %2305 = vmatprep.subr.bf16.mxu0 %v3343_v51 }
 0x107   : > { %2346 = vmatprep.subr.bf16.mxu1 %v3346_v35 }
 0x109   : > { %2306 = vmatpush1.bf16.msra.mxu0 %v3341_v36 }
 0x10a   : > { %2347 = vmatpush1.bf16.msra.mxu1 %v3344_v37  ;;  %2307 = vmatprep.subr.bf16.mxu0 %v3349_v38 }
 0x10b   : > { %2348 = vmatprep.subr.bf16.mxu1 %v3352_v39  ;;  %v3431_v39 = vld [vmem:[%s3690_s23 + $0x730] ss:$24 sps:$4 sm:$0xff]  }
 0x10d   : > { %2308 = vmatpush1.bf16.msra.mxu0 %v3347_v40 }
 0x10e   : > { %2349 = vmatpush1.bf16.msra.mxu1 %v3350_v41  ;;  %2309 = vmatprep.subr.bf16.mxu0 %v3355_v42  ;;  %v3436_v42 = vld [vmem:[%s3690_s23 + $0x764] ss:$24 sps:$4 sm:$0xff]  }
 0x10f   : > { %2350 = vmatprep.subr.bf16.mxu1 %v3358_v43 }
 0x111   : > { %2310 = vmatpush1.bf16.msra.mxu0 %v3353_v44  ;;  %v3434_v44 = vld [vmem:[%s3690_s23 + $0x760] ss:$24 sps:$4 sm:$0xff]  }
 0x112   : > { %2351 = vmatpush1.bf16.msra.mxu1 %v3356_v45  ;;  %2311 = vmatprep.subr.bf16.mxu0 %v3361_v46  ;;  %v3439_v45 = vld [vmem:[%s3690_s23 + $0x794] ss:$24 sps:$4 sm:$0xff]   ;;  %v3437_v46 = vld [vmem:[%s3690_s23 + $0x790] ss:$24 sps:$4 sm:$0xff]  }
 0x113   : > { %2352 = vmatprep.subr.bf16.mxu1 %v3364_v48  ;;  %v3442_v48 = vld [vmem:[%s3690_s23 + $0x7c4] ss:$24 sps:$4 sm:$0xff]  }
 0x115   : > { %2312 = vmatpush1.bf16.msra.mxu0 %v3359_v49  ;;  %v3440_v49 = vld [vmem:[%s3690_s23 + $0x7c0] ss:$24 sps:$4 sm:$0xff]  }
 0x116   : > { %2353 = vmatpush1.bf16.msra.mxu1 %v3362_v50  ;;  %2313 = vmatprep.subr.bf16.mxu0 %v3367_v52  ;;  %v3445_v50 = vld [vmem:[%s3690_s23 + $0x7f4] ss:$24 sps:$4 sm:$0xff]   ;;  %v3443_v52 = vld [vmem:[%s3690_s23 + $0x7f0] ss:$24 sps:$4 sm:$0xff]  }
 0x117   : > { %2354 = vmatprep.subr.bf16.mxu1 %v3370_v53  ;;  %v3448_v53 = vld [vmem:[%s3690_s23 + $0x824] ss:$24 sps:$4 sm:$0xff]  }
 0x119   : > { %2314 = vmatpush1.bf16.msra.mxu0 %v3365_v54  ;;  %v3446_v54 = vld [vmem:[%s3690_s23 + $0x820] ss:$24 sps:$4 sm:$0xff]  }
 0x11a   : > { %2355 = vmatpush1.bf16.msra.mxu1 %v3368_v55  ;;  %2315 = vmatprep.subr.bf16.mxu0 %v3373_v56  ;;  %v3451_v55 = vld [vmem:[%s3690_s23 + $0x854] ss:$24 sps:$4 sm:$0xff]   ;;  %v3449_v56 = vld [vmem:[%s3690_s23 + $0x850] ss:$24 sps:$4 sm:$0xff]  }
 0x11b   : > { %2356 = vmatprep.subr.bf16.mxu1 %v3376_v57  ;;  %v3454_v57 = vld [vmem:[%s3690_s23 + $0x884] ss:$24 sps:$4 sm:$0xff]  }
 0x11d   : > { %2316 = vmatpush1.bf16.msra.mxu0 %v3371_v58  ;;  %v3452_v58 = vld [vmem:[%s3690_s23 + $0x880] ss:$24 sps:$4 sm:$0xff]  }
 0x11e   : > { %2357 = vmatpush1.bf16.msra.mxu1 %v3374_v59  ;;  %2317 = vmatprep.subr.bf16.mxu0 %v3379_v60  ;;  %v3457_v59 = vld [vmem:[%s3690_s23 + $0x8b4] ss:$24 sps:$4 sm:$0xff]   ;;  %v3455_v60 = vld [vmem:[%s3690_s23 + $0x8b0] ss:$24 sps:$4 sm:$0xff]  }
 0x11f   : > { %2358 = vmatprep.subr.bf16.mxu1 %v3382_v61  ;;  %v3460_v61 = vld [vmem:[%s3690_s23 + $0x8e4] ss:$24 sps:$4 sm:$0xff]  }
 0x121   : > { %2318 = vmatpush1.bf16.msra.mxu0 %v3377_v62  ;;  %v3458_v62 = vld [vmem:[%s3690_s23 + $0x8e0] ss:$24 sps:$4 sm:$0xff]  }
 0x122   : > { %2359 = vmatpush1.bf16.msra.mxu1 %v3380_v63  ;;  %2319 = vmatprep.subr.bf16.mxu0 %v3385_v0  ;;  %v2443_v63 = vlaneseq }
 0x123   : > { %2360 = vmatprep.subr.bf16.mxu1 %v3388_v1 }
 0x124   : > { %v2444_v0 = vshrl.u32 %v2443_v63, 7 }
 0x125   : > { %2320 = vmatpush1.bf16.msra.mxu0 %v3383_v2  ;;  %v2441_v2 = vld [vmem:[%s271_s28] sm:$0x3f] }
 0x126   : > { %2361 = vmatpush1.bf16.msra.mxu1 %v3386_v3  ;;  %2321 = vmatprep.subr.bf16.mxu0 %v3391_v4  ;;  %v2445_v1 = vsub.s32 0, %v2444_v0  ;;  %v2449_v3 = vsub.s32 1, %v2444_v0 }
 0x127   : > { %2362 = vmatprep.subr.bf16.mxu1 %v3394_v5 }
 0x128   : > { %v2446_v4 = vrot.slane %v2441_v2, %v2445_v1 }
 0x129   : > { %2322 = vmatpush1.bf16.msra.mxu0 %v3389_v8  ;;  %v2450_v8 = vrot.slane %v2441_v2, %v2449_v3 }
 0x12a   : > { %2363 = vmatpush1.bf16.msra.mxu1 %v3392_v9  ;;  %2323 = vmatprep.subr.bf16.mxu0 %v3397_v10 }
 0x12b   : > { %2364 = vmatprep.subr.bf16.mxu1 %v3400_v11 }
 0x12d   : > { %2324 = vmatpush1.bf16.msra.mxu0 %v3395_v12 }
 0x12e   : > { %2365 = vmatpush1.bf16.msra.mxu1 %v3398_v13  ;;  %2325 = vmatprep.subr.bf16.mxu0 %v3403_v15 }
 0x12f   : > { %2366 = vmatprep.subr.bf16.mxu1 %v3406_v16 }
 0x131   : > { %2326 = vmatpush1.bf16.msra.mxu0 %v3401_v17 }
 0x132   : > { %2367 = vmatpush1.bf16.msra.mxu1 %v3404_v18  ;;  %2327 = vmatprep.subr.bf16.mxu0 %v3409_v19 }
 0x133   : > { %2368 = vmatprep.subr.bf16.mxu1 %v3412_v20 }
 0x135   : > { %2328 = vmatpush1.bf16.msra.mxu0 %v3407_v21  ;;  %v2453_v21 = vsub.s32 2, %v2444_v0 }
 0x136   : > { %2369 = vmatpush1.bf16.msra.mxu1 %v3410_v22  ;;  %2379 = vmatprep.subr.bf16.mxu0 %v3415_v23  ;;  %v2457_v22 = vsub.s32 3, %v2444_v0 }
 0x138   : > { %2330 = vmatmul.mubr.bf16.vlgmr.msra.gmra.mrb[12].mxu0 %v3780_v6  ;;  %v3427_v6 = vld [vmem:[%s3690_s23 + $0x6d4] ss:$24 sps:$4 sm:$0xff]  }
 0x139   : > { %2371 = vmatmul.mubr.bf16.vlgmr.msra.gmra.mrb[12].mxu1 %v3782_v7  ;;  %2380 = vmatpush1.bf16.msra.mxu0 %v3413_v24  ;;  %v3425_v7 = vld [vmem:[%s3690_s23 + $0x6d0] ss:$24 sps:$4 sm:$0xff]  }
 0x13a   : > { %2411 = vmatprep.mubr.bf16.mxu0 %v3817_v34  ;;  %2381 = vmatprep.subr.bf16.mxu0 %v3418_v25  ;;  %v3428_v34 = vld [vmem:[%s3690_s23 + $0x700] ss:$24 sps:$4 sm:$0xff]  }
 0x13d   : > { %2382 = vmatpush1.bf16.msra.mxu0 %v3416_v26 }
 0x13e   : > { %2383 = vmatprep.subr.bf16.mxu0 %v3421_v27  ;;  %v2454_v27 = vrot.slane %v2441_v2, %v2453_v21 }
 0x141   : > { %2384 = vmatpush1.bf16.msra.mxu0 %v3419_v28 }
 0x142   : > { %2385 = vmatprep.subr.bf16.mxu0 %v3424_v29 }
 0x145   : > { %2386 = vmatpush1.bf16.msra.mxu0 %v3422_v30 }
 0x146   : > { %2387 = vmatprep.subr.bf16.mxu0 %v3427_v6  ;;  %v2458_v6 = vrot.slane %v2441_v2, %v2457_v22 }
 0x149   : > { %2388 = vmatpush1.bf16.msra.mxu0 %v3425_v7 }
 0x14a   : > { %2389 = vmatprep.subr.bf16.mxu0 %v3430_v31 }
 0x14b   : > { %v2085_v33 = vpop.f32.mrb[0].mxu0 }
 0x14c   : > { %v2126_v47 = vpop.f32.mrb[0].mxu1  ;;  %v2087_v35 = vpop.f32.mrb[1].mxu0 }
 0x14d   : > { %v4013_v51 = vadd.f32 %v2126_v47, %v2085_v33  ;;  %v2128_v36 = vpop.f32.mrb[1].mxu1  ;;  %v2089_v38 = vpop.f32.mrb[2].mxu0  ;;  %2390 = vmatpush1.bf16.msra.mxu0 %v3428_v34 }
 0x14e   : > { %v4015_v37 = vadd.f32 %v2128_v36, %v2087_v35  ;;  %v2130_v40 = vpop.f32.mrb[2].mxu1  ;;  %v2090_v41 = vpop.f32.mrb[3].mxu0  ;;  %2391 = vmatprep.subr.bf16.mxu0 %v3433_v32 }
 0x14f   : > { %v2131_v43 = vpop.f32.mrb[3].mxu1 }
 0x151   : > { %2392 = vmatpush1.bf16.msra.mxu0 %v3431_v39 }
 0x152   : > { %2393 = vmatprep.subr.bf16.mxu0 %v3436_v42 }
 0x155   : > { %2394 = vmatpush1.bf16.msra.mxu0 %v3434_v44 }
 0x156   : > { %2395 = vmatprep.subr.bf16.mxu0 %v3439_v45 }
 0x159   : > { %2396 = vmatpush1.bf16.msra.mxu0 %v3437_v46  ;;  %v2461_v46 = vsub.s32 4, %v2444_v0 }
 0x15a   : > { %2397 = vmatprep.subr.bf16.mxu0 %v3442_v48  ;;  %v2465_v48 = vsub.s32 5, %v2444_v0 }
 0x15d   : > { %2398 = vmatpush1.bf16.msra.mxu0 %v3440_v49  ;;  %v2462_v49 = vrot.slane %v2441_v2, %v2461_v46 }
 0x15e   : > { %2399 = vmatprep.subr.bf16.mxu0 %v3445_v50 }
 0x161   : > { %2400 = vmatpush1.bf16.msra.mxu0 %v3443_v52  ;;  %v2466_v52 = vrot.slane %v2441_v2, %v2465_v48 }
 0x162   : > { %2401 = vmatprep.subr.bf16.mxu0 %v3448_v53 }
 0x165   : > { %2402 = vmatpush1.bf16.msra.mxu0 %v3446_v54 }
 0x166   : > { %2403 = vmatprep.subr.bf16.mxu0 %v3451_v55 }
 0x169   : > { %2404 = vmatpush1.bf16.msra.mxu0 %v3449_v56 }
 0x16a   : > { %2405 = vmatprep.subr.bf16.mxu0 %v3454_v57 }
 0x16d   : > { %2406 = vmatpush1.bf16.msra.mxu0 %v3452_v58 }
 0x16e   : > { %2407 = vmatprep.subr.bf16.mxu0 %v3457_v59 }
 0x171   : > { %2408 = vmatpush1.bf16.msra.mxu0 %v3455_v60 }
 0x172   : > { %2409 = vmatprep.subr.bf16.mxu0 %v3460_v61 }
 0x175   : > { %2410 = vmatpush1.bf16.msra.mxu0 %v3458_v62 }
 0x178   : > { %2412 = vmatmul.mubr.bf16.vlgmr.msra.gmra.mrb[16].mxu0 %v3861_v14 }
 0x18b   : > { %v2167_v5 = vpop.f32.mrb[4].mxu0 }
 0x18c   : > { %v2208_v9 = vpop.f32.mrb[4].mxu1  ;;  %v2168_v14 = vadd.f32 %v2167_v5, %v4013_v51  ;;  %v2169_v10 = vpop.f32.mrb[5].mxu0 }
 0x18d   : > { %v2210_v11 = vpop.f32.mrb[5].mxu1  ;;  %v2170_v12 = vadd.f32 %v2169_v10, %v4015_v37  ;;  %v2171_v13 = vpop.f32.mrb[6].mxu0 }
 0x18e   : > { %v2212_v15 = vpop.f32.mrb[6].mxu1  ;;  %v2473_v16 = vadd.f32 %v2446_v4, %v2168_v14  ;;  %v2172_v17 = vpop.f32.mrb[7].mxu0 }
 0x18f   : > { %v2213_v18 = vpop.f32.mrb[7].mxu1  ;;  %v2474_v19 = vadd.f32 %v2450_v8, %v2170_v12 }
 0x191   : > { %v2942_v20 = vpack.c.bf16 %v2474_v19, %v2473_v16 }
 0x193   : > { %2503 = vst [vmem:[%s4047_s7] sm:$0xff] %v2942_v20 }
 0x1cb   : > { %v2249_v23 = vpop.f32.mrb[8].mxu0 }
 0x1cc   : > { %v2290_v24 = vpop.f32.mrb[8].mxu1  ;;  %v2250_v25 = vadd.f32 %v2249_v23, %v2208_v9  ;;  %v2251_v26 = vpop.f32.mrb[9].mxu0 }
 0x1cd   : > { %v2292_v28 = vpop.f32.mrb[9].mxu1  ;;  %v2252_v29 = vadd.f32 %v2251_v26, %v2210_v11  ;;  %v2253_v30 = vpop.f32.mrb[10].mxu0 }
 0x1ce   : > { %v2294_v7 = vpop.f32.mrb[10].mxu1  ;;  %v2291_v31 = vadd.f32 %v2290_v24, %v2250_v25  ;;  %v2254_v34 = vpop.f32.mrb[11].mxu0 }
 0x1cf   : > { %v2295_v32 = vpop.f32.mrb[11].mxu1  ;;  %v2293_v33 = vadd.f32 %v2292_v28, %v2252_v29 }
 0x1d0   : > { %v2475_v47 = vadd.f32 %v2454_v27, %v2291_v31 }
 0x1d1   : > { %v2476_v51 = vadd.f32 %v2458_v6, %v2293_v33 }
 0x1d3   : > { %v2943_v35 = vpack.c.bf16 %v2476_v51, %v2475_v47 }
 0x1d5   : > { %2504 = vst [vmem:[%s4047_s7 + $0x8] sm:$0xff] %v2943_v35 }
 0x20b   : > { %v2331_v36 = vpop.f32.mrb[12].mxu0 }
 0x20c   : > { %v2372_v37 = vpop.f32.mrb[12].mxu1  ;;  %v2333_v39 = vpop.f32.mrb[13].mxu0 }
 0x20d   : > { %v2373_v38 = vadd.f32 %v2372_v37, %v2331_v36  ;;  %v2374_v40 = vpop.f32.mrb[13].mxu1  ;;  %v2335_v42 = vpop.f32.mrb[14].mxu0 }
 0x20e   : > { %v2375_v41 = vadd.f32 %v2374_v40, %v2333_v39  ;;  %v2376_v43 = vpop.f32.mrb[14].mxu1  ;;  %v2336_v44 = vpop.f32.mrb[15].mxu0 }
 0x20f   : > { %v2377_v45 = vpop.f32.mrb[15].mxu1 }
 0x24b   : > { %v2413_v50 = vpop.f32.mrb[16].mxu0 }
 0x24c   : > { %v2414_v53 = vadd.f32 %v2413_v50, %v2373_v38  ;;  %v2415_v54 = vpop.f32.mrb[17].mxu0 }
 0x24d   : > { %v2416_v55 = vadd.f32 %v2415_v54, %v2375_v41  ;;  %v2417_v56 = vpop.f32.mrb[18].mxu0 }
 0x24e   : > { %v2477_v57 = vadd.f32 %v2462_v49, %v2414_v53  ;;  %v2418_v58 = vpop.f32.mrb[19].mxu0 }
 0x24f   : > { %v2478_v59 = vadd.f32 %v2466_v52, %v2416_v55 }
 0x251   : > { %v2944_v60 = vpack.c.bf16 %v2478_v59, %v2477_v57 }
 0x253   : > { %2505 = vst [vmem:[%s4047_s7 + $0x10] sm:$0xff] %v2944_v60 }
 0x254 PF: > { %s16_s19 = sadd.s32 1, %s3557_s19   ;;  %s4083_s12 = smov %s3533_s13 }
 0x255   : > { %p13_p11 = scmp.ge.s32.totalorder %s16_s19, 8   ;;  %s4084_s13 = smov %s3537_s14 }
 0x256   : > { %s4085_s14 = smov %s3637_s25  ;;  %s4086_s15 = smov %s3549_s17 }
 0x257   : > { %s4087_s16 = smov %s3553_s18  ;;  %s4088_s17 = smov %s4091_s21 }
 0x258   : > { %s4089_s18 = smov %s4095_s22  ;;  %15 = sbr.rel (!%p13_p11) target bundleno = 5 (0x5), region = 86 }
 0x25f   :  { %2536 = vsyncpa [#allocation4], 1 }
 0x260   :  { %2538 = vsyncpa [#allocation4 + $0x1], 1 }

// kernel: bert_with_regularization_forward.16
= control target key start
LH: loop header
LB: loop body
LE: loop exit
PB: predicated region body
PF: predicated region fallthrough
CT: control target
= control target key end

     0   :  { %s4153_s12 = smov 0   ;;  %s4155_s13 = smov 0   ;;  %s5189_s0 = inlined_call_operand.vmem [shape: bf16[16,768], index: 0, kind: input, shape index: {}]   ;;  %s5190_s1 = inlined_call_operand.vmem [shape: bf16[768,3072], index: 1, kind: input, shape index: {}]   ;;  %s5191_s2 = inlined_call_operand.vmem [shape: f32[1,3072], index: 2, kind: input, shape index: {}]   ;;  %s5192_s3 = inlined_call_operand.vmem [shape: bf16[16,3072], index: 3, kind: output, shape index: {}]  }
   0x1   :  { %s4157_s14 = smov 0   ;;  %s4159_s15 = smov 0  }
   0x2   :  { %s4161_s16 = smov 0   ;;  %s4163_s17 = smov 0  }
   0x3   :  { %s4165_s18 = smov 0  }
   0x4 LB: > { %s28_s19 = sadd.s32 1, %s4123_s16  ;;  %s32_s20 = sadd.s32 1, %s4127_s17  ;;  %s4131_s18 = sphi %s4165_s18, %s13_s18   ;;  %s4127_s17 = sphi %s4163_s17, %s5198_s17   ;;  %s4123_s16 = sphi %s4161_s16, %s5197_s16   ;;  %s4119_s15 = sphi %s4159_s15, %s5196_s15   ;;  %s4115_s14 = sphi %s4157_s14, %s5195_s14   ;;  %s4111_s13 = sphi %s4155_s13, %s5194_s13   ;;  %s4107_s12 = sphi %s4153_s12, %s5193_s12  }
   0x5   : > { %p30_p0 = scmp.ge.s32.totalorder %s28_s19, 4  ;;  %s69_s21 = sadd.s32 1, %s4111_s13 }
   0x6   : > { %p76_p1 = scmp.ne.s32.totalorder %s4111_s13, %s4107_s12  ;;  %p77_p2 = scmp.eq.s32.totalorder %s4131_s18, 0 }
   0x7   : > { %s5200_s19 = smov (%p30_p0, %s28_s19), 0  ;;  %s5202_s20 = smov (!%p30_p0, %s32_s20), %s4127_s17 }
   0x8   : > { %s65_s22 = ssub.s32 %s4123_s16, %s5200_s19  ;;  %p78_p3 = por %p77_p2, %p76_p1 }
   0x9   : > { %p34_p4 = scmp.ge.s32.totalorder %s5202_s20, 2  ;;  %p67_p5 = scmp.eq.s32.totalorder %s65_s22, 0 }
   0xa   : > { %p3260_p6 = scmp.ge.s32.totalorder %s4131_s18, 8 }
   0xb   : > { %s5204_s20 = smov (%p34_p4, %s5202_s20), 0 }
   0xc   : > { %s4202_s23 = scalar_select %p67_p5, %s4111_s13, %s69_s21  }
   0xd   : > { %156 = sbr.rel (%p3260_p6) target bundleno = 169 (0xa9), region = 16 }
  0x14   : > { %172 = sbr.rel (!%p78_p3) target bundleno = 169 (0xa9), region = 24  ;;  %s174_s24 = sand.u32 (%p78_p3), 1, %s4111_s13  }
  0x15   : > { %s3564_s25 = smul.u32 (%p78_p3), 24, %s4123_s16 }
  0x16   : > { %s3568_s26 = smul.u32 (%p78_p3), 2304, %s174_s24 }
  0x17   : > { %s4210_s29 = scalar_lea.vmem (%p78_p3), %s5190_s1, %s3564_s25 }
  0x18   : > { %v195_v0 = vld [vmem:[%s4210_s29] sm:$0xff] (%p78_p3)  ;;  %v197_v1 = vld [vmem:[%s4210_s29 + $0x8] sm:$0xff] (%p78_p3)  ;;  %v199_v2 = vld [vmem:[%s4210_s29 + $0x10] sm:$0xff] (%p78_p3)  ;;  %s4215_s30 = scalar_lea.vmem (%p78_p3), [#allocation3], %s3568_s26 }
  0x19   : > { %196 = vst [vmem:[%s4215_s30] sm:$0xff] (%p78_p3), %v195_v0  ;;  %198 = vst [vmem:[%s4215_s30 + $0x8] sm:$0xff] (%p78_p3), %v197_v1  ;;  %v201_v3 = vld [vmem:[%s4210_s29 + $0x60] sm:$0xff] (%p78_p3)  ;;  %v203_v4 = vld [vmem:[%s4210_s29 + $0x68] sm:$0xff] (%p78_p3) }
  0x1a   : > { %200 = vst [vmem:[%s4215_s30 + $0x10] sm:$0xff] (%p78_p3), %v199_v2  ;;  %v205_v5 = vld [vmem:[%s4210_s29 + $0x70] sm:$0xff] (%p78_p3)  ;;  %202 = vst [vmem:[%s4215_s30 + $0x18] sm:$0xff] (%p78_p3), %v201_v3  ;;  %v207_v6 = vld [vmem:[%s4210_s29 + $0xc0] sm:$0xff] (%p78_p3) }
  0x1b   : > { %204 = vst [vmem:[%s4215_s30 + $0x20] sm:$0xff] %v203_v4  ;;  %206 = vst [vmem:[%s4215_s30 + $0x28] sm:$0xff] %v205_v5  ;;  %v209_v7 = vld [vmem:[%s4210_s29 + $0xc8] sm:$0xff]  ;;  %v211_v8 = vld [vmem:[%s4210_s29 + $0xd0] sm:$0xff] }
  0x1c   : > { %208 = vst [vmem:[%s4215_s30 + $0x30] sm:$0xff] %v207_v6  ;;  %210 = vst [vmem:[%s4215_s30 + $0x38] sm:$0xff] %v209_v7  ;;  %v213_v9 = vld [vmem:[%s4210_s29 + $0x120] sm:$0xff]  ;;  %v215_v10 = vld [vmem:[%s4210_s29 + $0x128] sm:$0xff] }
  0x1d   : > { %212 = vst [vmem:[%s4215_s30 + $0x40] sm:$0xff] %v211_v8  ;;  %v217_v11 = vld [vmem:[%s4210_s29 + $0x130] sm:$0xff]  ;;  %214 = vst [vmem:[%s4215_s30 + $0x48] sm:$0xff] %v213_v9  ;;  %v219_v12 = vld [vmem:[%s4210_s29 + $0x180] sm:$0xff] }
  0x1e   : > { %216 = vst [vmem:[%s4215_s30 + $0x50] sm:$0xff] %v215_v10  ;;  %218 = vst [vmem:[%s4215_s30 + $0x58] sm:$0xff] %v217_v11  ;;  %v221_v13 = vld [vmem:[%s4210_s29 + $0x188] sm:$0xff]  ;;  %v223_v14 = vld [vmem:[%s4210_s29 + $0x190] sm:$0xff] }
  0x1f   : > { %220 = vst [vmem:[%s4215_s30 + $0x60] sm:$0xff] %v219_v12  ;;  %222 = vst [vmem:[%s4215_s30 + $0x68] sm:$0xff] %v221_v13  ;;  %v225_v15 = vld [vmem:[%s4210_s29 + $0x1e0] sm:$0xff]  ;;  %v227_v16 = vld [vmem:[%s4210_s29 + $0x1e8] sm:$0xff] }
  0x20   : > { %224 = vst [vmem:[%s4215_s30 + $0x70] sm:$0xff] %v223_v14  ;;  %v229_v17 = vld [vmem:[%s4210_s29 + $0x1f0] sm:$0xff]  ;;  %226 = vst [vmem:[%s4215_s30 + $0x78] sm:$0xff] %v225_v15  ;;  %v231_v18 = vld [vmem:[%s4210_s29 + $0x240] sm:$0xff] }
  0x21   : > { %228 = vst [vmem:[%s4215_s30 + $0x80] sm:$0xff] %v227_v16  ;;  %230 = vst [vmem:[%s4215_s30 + $0x88] sm:$0xff] %v229_v17  ;;  %v233_v19 = vld [vmem:[%s4210_s29 + $0x248] sm:$0xff]  ;;  %v235_v20 = vld [vmem:[%s4210_s29 + $0x250] sm:$0xff] }
  0x22   : > { %232 = vst [vmem:[%s4215_s30 + $0x90] sm:$0xff] %v231_v18  ;;  %234 = vst [vmem:[%s4215_s30 + $0x98] sm:$0xff] %v233_v19  ;;  %v237_v21 = vld [vmem:[%s4210_s29 + $0x2a0] sm:$0xff]  ;;  %v239_v22 = vld [vmem:[%s4210_s29 + $0x2a8] sm:$0xff] }
  0x23   : > { %236 = vst [vmem:[%s4215_s30 + $0xa0] sm:$0xff] %v235_v20  ;;  %v241_v23 = vld [vmem:[%s4210_s29 + $0x2b0] sm:$0xff]  ;;  %238 = vst [vmem:[%s4215_s30 + $0xa8] sm:$0xff] %v237_v21  ;;  %v243_v24 = vld [vmem:[%s4210_s29 + $0x300] sm:$0xff] }
  0x24   : > { %240 = vst [vmem:[%s4215_s30 + $0xb0] sm:$0xff] %v239_v22  ;;  %242 = vst [vmem:[%s4215_s30 + $0xb8] sm:$0xff] %v241_v23  ;;  %v245_v25 = vld [vmem:[%s4210_s29 + $0x308] sm:$0xff]  ;;  %v247_v26 = vld [vmem:[%s4210_s29 + $0x310] sm:$0xff] }
  0x25   : > { %244 = vst [vmem:[%s4215_s30 + $0xc0] sm:$0xff] %v243_v24  ;;  %246 = vst [vmem:[%s4215_s30 + $0xc8] sm:$0xff] %v245_v25  ;;  %v249_v27 = vld [vmem:[%s4210_s29 + $0x360] sm:$0xff]  ;;  %v251_v28 = vld [vmem:[%s4210_s29 + $0x368] sm:$0xff] }
  0x26   : > { %248 = vst [vmem:[%s4215_s30 + $0xd0] sm:$0xff] %v247_v26  ;;  %v253_v29 = vld [vmem:[%s4210_s29 + $0x370] sm:$0xff]  ;;  %250 = vst [vmem:[%s4215_s30 + $0xd8] sm:$0xff] %v249_v27  ;;  %v255_v30 = vld [vmem:[%s4210_s29 + $0x3c0] sm:$0xff] }
  0x27   : > { %252 = vst [vmem:[%s4215_s30 + $0xe0] sm:$0xff] %v251_v28  ;;  %254 = vst [vmem:[%s4215_s30 + $0xe8] sm:$0xff] %v253_v29  ;;  %v257_v31 = vld [vmem:[%s4210_s29 + $0x3c8] sm:$0xff]  ;;  %v259_v32 = vld [vmem:[%s4210_s29 + $0x3d0] sm:$0xff] }
  0x28   : > { %256 = vst [vmem:[%s4215_s30 + $0xf0] sm:$0xff] %v255_v30  ;;  %258 = vst [vmem:[%s4215_s30 + $0xf8] sm:$0xff] %v257_v31  ;;  %v261_v33 = vld [vmem:[%s4210_s29 + $0x420] sm:$0xff]  ;;  %v263_v34 = vld [vmem:[%s4210_s29 + $0x428] sm:$0xff] }
  0x29   : > { %260 = vst [vmem:[%s4215_s30 + $0x100] sm:$0xff] %v259_v32  ;;  %v265_v35 = vld [vmem:[%s4210_s29 + $0x430] sm:$0xff]  ;;  %262 = vst [vmem:[%s4215_s30 + $0x108] sm:$0xff] %v261_v33  ;;  %v267_v36 = vld [vmem:[%s4210_s29 + $0x480] sm:$0xff] }
  0x2a   : > { %264 = vst [vmem:[%s4215_s30 + $0x110] sm:$0xff] %v263_v34  ;;  %266 = vst [vmem:[%s4215_s30 + $0x118] sm:$0xff] %v265_v35  ;;  %v269_v37 = vld [vmem:[%s4210_s29 + $0x488] sm:$0xff]  ;;  %v271_v38 = vld [vmem:[%s4210_s29 + $0x490] sm:$0xff] }
  0x2b   : > { %268 = vst [vmem:[%s4215_s30 + $0x120] sm:$0xff] %v267_v36  ;;  %270 = vst [vmem:[%s4215_s30 + $0x128] sm:$0xff] %v269_v37  ;;  %v273_v39 = vld [vmem:[%s4210_s29 + $0x4e0] sm:$0xff]  ;;  %v275_v40 = vld [vmem:[%s4210_s29 + $0x4e8] sm:$0xff] }
  0x2c   : > { %272 = vst [vmem:[%s4215_s30 + $0x130] sm:$0xff] %v271_v38  ;;  %v277_v41 = vld [vmem:[%s4210_s29 + $0x4f0] sm:$0xff]  ;;  %274 = vst [vmem:[%s4215_s30 + $0x138] sm:$0xff] %v273_v39  ;;  %v279_v42 = vld [vmem:[%s4210_s29 + $0x540] sm:$0xff] }
  0x2d   : > { %276 = vst [vmem:[%s4215_s30 + $0x140] sm:$0xff] %v275_v40  ;;  %278 = vst [vmem:[%s4215_s30 + $0x148] sm:$0xff] %v277_v41  ;;  %v281_v43 = vld [vmem:[%s4210_s29 + $0x548] sm:$0xff]  ;;  %v283_v44 = vld [vmem:[%s4210_s29 + $0x550] sm:$0xff] }
  0x2e   : > { %280 = vst [vmem:[%s4215_s30 + $0x150] sm:$0xff] %v279_v42  ;;  %282 = vst [vmem:[%s4215_s30 + $0x158] sm:$0xff] %v281_v43  ;;  %v285_v45 = vld [vmem:[%s4210_s29 + $0x5a0] sm:$0xff]  ;;  %v287_v46 = vld [vmem:[%s4210_s29 + $0x5a8] sm:$0xff] }
  0x2f   : > { %284 = vst [vmem:[%s4215_s30 + $0x160] sm:$0xff] %v283_v44  ;;  %v289_v47 = vld [vmem:[%s4210_s29 + $0x5b0] sm:$0xff]  ;;  %286 = vst [vmem:[%s4215_s30 + $0x168] sm:$0xff] %v285_v45  ;;  %v291_v48 = vld [vmem:[%s4210_s29 + $0x600] sm:$0xff] }
  0x30   : > { %288 = vst [vmem:[%s4215_s30 + $0x170] sm:$0xff] %v287_v46  ;;  %290 = vst [vmem:[%s4215_s30 + $0x178] sm:$0xff] %v289_v47  ;;  %v293_v49 = vld [vmem:[%s4210_s29 + $0x608] sm:$0xff]  ;;  %v295_v50 = vld [vmem:[%s4210_s29 + $0x610] sm:$0xff] }
  0x31   : > { %292 = vst [vmem:[%s4215_s30 + $0x180] sm:$0xff] %v291_v48  ;;  %294 = vst [vmem:[%s4215_s30 + $0x188] sm:$0xff] %v293_v49  ;;  %v297_v51 = vld [vmem:[%s4210_s29 + $0x660] sm:$0xff]  ;;  %v299_v52 = vld [vmem:[%s4210_s29 + $0x668] sm:$0xff] }
  0x32   : > { %296 = vst [vmem:[%s4215_s30 + $0x190] sm:$0xff] %v295_v50  ;;  %v301_v53 = vld [vmem:[%s4210_s29 + $0x670] sm:$0xff]  ;;  %298 = vst [vmem:[%s4215_s30 + $0x198] sm:$0xff] %v297_v51  ;;  %v303_v54 = vld [vmem:[%s4210_s29 + $0x6c0] sm:$0xff] }
  0x33   : > { %300 = vst [vmem:[%s4215_s30 + $0x1a0] sm:$0xff] %v299_v52  ;;  %302 = vst [vmem:[%s4215_s30 + $0x1a8] sm:$0xff] %v301_v53  ;;  %v305_v55 = vld [vmem:[%s4210_s29 + $0x6c8] sm:$0xff]  ;;  %v307_v56 = vld [vmem:[%s4210_s29 + $0x6d0] sm:$0xff] }
  0x34   : > { %304 = vst [vmem:[%s4215_s30 + $0x1b0] sm:$0xff] %v303_v54  ;;  %306 = vst [vmem:[%s4215_s30 + $0x1b8] sm:$0xff] %v305_v55  ;;  %v309_v57 = vld [vmem:[%s4210_s29 + $0x720] sm:$0xff]  ;;  %v311_v58 = vld [vmem:[%s4210_s29 + $0x728] sm:$0xff] }
  0x35   : > { %308 = vst [vmem:[%s4215_s30 + $0x1c0] sm:$0xff] %v307_v56  ;;  %v313_v59 = vld [vmem:[%s4210_s29 + $0x730] sm:$0xff]  ;;  %310 = vst [vmem:[%s4215_s30 + $0x1c8] sm:$0xff] %v309_v57  ;;  %v315_v60 = vld [vmem:[%s4210_s29 + $0x780] sm:$0xff] }
  0x36   : > { %312 = vst [vmem:[%s4215_s30 + $0x1d0] sm:$0xff] %v311_v58  ;;  %314 = vst [vmem:[%s4215_s30 + $0x1d8] sm:$0xff] %v313_v59  ;;  %v317_v61 = vld [vmem:[%s4210_s29 + $0x788] sm:$0xff]  ;;  %v319_v62 = vld [vmem:[%s4210_s29 + $0x790] sm:$0xff] }
  0x37   : > { %316 = vst [vmem:[%s4215_s30 + $0x1e0] sm:$0xff] %v315_v60  ;;  %318 = vst [vmem:[%s4215_s30 + $0x1e8] sm:$0xff] %v317_v61  ;;  %v321_v63 = vld [vmem:[%s4210_s29 + $0x7e0] sm:$0xff]  ;;  %v323_v0 = vld [vmem:[%s4210_s29 + $0x7e8] sm:$0xff] }
  0x38   : > { %320 = vst [vmem:[%s4215_s30 + $0x1f0] sm:$0xff] %v319_v62  ;;  %v325_v1 = vld [vmem:[%s4210_s29 + $0x7f0] sm:$0xff]  ;;  %322 = vst [vmem:[%s4215_s30 + $0x1f8] sm:$0xff] %v321_v63  ;;  %v327_v2 = vld [vmem:[%s4210_s29 + $0x840] sm:$0xff] }
  0x39   : > { %324 = vst [vmem:[%s4215_s30 + $0x200] sm:$0xff] %v323_v0  ;;  %326 = vst [vmem:[%s4215_s30 + $0x208] sm:$0xff] %v325_v1  ;;  %v329_v3 = vld [vmem:[%s4210_s29 + $0x848] sm:$0xff]  ;;  %v331_v4 = vld [vmem:[%s4210_s29 + $0x850] sm:$0xff] }
  0x3a   : > { %328 = vst [vmem:[%s4215_s30 + $0x210] sm:$0xff] %v327_v2  ;;  %330 = vst [vmem:[%s4215_s30 + $0x218] sm:$0xff] %v329_v3  ;;  %v333_v5 = vld [vmem:[%s4210_s29 + $0x8a0] sm:$0xff]  ;;  %v335_v6 = vld [vmem:[%s4210_s29 + $0x8a8] sm:$0xff] }
  0x3b   : > { %332 = vst [vmem:[%s4215_s30 + $0x220] sm:$0xff] %v331_v4  ;;  %v337_v7 = vld [vmem:[%s4210_s29 + $0x8b0] sm:$0xff]  ;;  %334 = vst [vmem:[%s4215_s30 + $0x228] sm:$0xff] %v333_v5  ;;  %v339_v8 = vld [vmem:[%s4210_s29 + $0x900] sm:$0xff] }
  0x3c   : > { %336 = vst [vmem:[%s4215_s30 + $0x230] sm:$0xff] %v335_v6  ;;  %338 = vst [vmem:[%s4215_s30 + $0x238] sm:$0xff] %v337_v7  ;;  %v341_v9 = vld [vmem:[%s4210_s29 + $0x908] sm:$0xff]  ;;  %v343_v10 = vld [vmem:[%s4210_s29 + $0x910] sm:$0xff] }
  0x3d   : > { %340 = vst [vmem:[%s4215_s30 + $0x240] sm:$0xff] %v339_v8  ;;  %342 = vst [vmem:[%s4215_s30 + $0x248] sm:$0xff] %v341_v9  ;;  %v345_v11 = vld [vmem:[%s4210_s29 + $0x960] sm:$0xff]  ;;  %v347_v12 = vld [vmem:[%s4210_s29 + $0x968] sm:$0xff] }
  0x3e   : > { %344 = vst [vmem:[%s4215_s30 + $0x250] sm:$0xff] %v343_v10  ;;  %v349_v13 = vld [vmem:[%s4210_s29 + $0x970] sm:$0xff]  ;;  %346 = vst [vmem:[%s4215_s30 + $0x258] sm:$0xff] %v345_v11  ;;  %v351_v14 = vld [vmem:[%s4210_s29 + $0x9c0] sm:$0xff] }
  0x3f   : > { %348 = vst [vmem:[%s4215_s30 + $0x260] sm:$0xff] %v347_v12  ;;  %350 = vst [vmem:[%s4215_s30 + $0x268] sm:$0xff] %v349_v13  ;;  %v353_v15 = vld [vmem:[%s4210_s29 + $0x9c8] sm:$0xff]  ;;  %v355_v16 = vld [vmem:[%s4210_s29 + $0x9d0] sm:$0xff] }
  0x40   : > { %352 = vst [vmem:[%s4215_s30 + $0x270] sm:$0xff] %v351_v14  ;;  %354 = vst [vmem:[%s4215_s30 + $0x278] sm:$0xff] %v353_v15  ;;  %v357_v17 = vld [vmem:[%s4210_s29 + $0xa20] sm:$0xff]  ;;  %v359_v18 = vld [vmem:[%s4210_s29 + $0xa28] sm:$0xff] }
  0x41   : > { %356 = vst [vmem:[%s4215_s30 + $0x280] sm:$0xff] %v355_v16  ;;  %v361_v19 = vld [vmem:[%s4210_s29 + $0xa30] sm:$0xff]  ;;  %358 = vst [vmem:[%s4215_s30 + $0x288] sm:$0xff] %v357_v17  ;;  %v363_v20 = vld [vmem:[%s4210_s29 + $0xa80] sm:$0xff] }
  0x42   : > { %360 = vst [vmem:[%s4215_s30 + $0x290] sm:$0xff] %v359_v18  ;;  %362 = vst [vmem:[%s4215_s30 + $0x298] sm:$0xff] %v361_v19  ;;  %v365_v21 = vld [vmem:[%s4210_s29 + $0xa88] sm:$0xff]  ;;  %v367_v22 = vld [vmem:[%s4210_s29 + $0xa90] sm:$0xff] }
  0x43   : > { %364 = vst [vmem:[%s4215_s30 + $0x2a0] sm:$0xff] %v363_v20  ;;  %366 = vst [vmem:[%s4215_s30 + $0x2a8] sm:$0xff] %v365_v21  ;;  %v369_v23 = vld [vmem:[%s4210_s29 + $0xae0] sm:$0xff]  ;;  %v371_v24 = vld [vmem:[%s4210_s29 + $0xae8] sm:$0xff] }
  0x44   : > { %368 = vst [vmem:[%s4215_s30 + $0x2b0] sm:$0xff] %v367_v22  ;;  %v373_v25 = vld [vmem:[%s4210_s29 + $0xaf0] sm:$0xff]  ;;  %370 = vst [vmem:[%s4215_s30 + $0x2b8] sm:$0xff] %v369_v23  ;;  %v375_v26 = vld [vmem:[%s4210_s29 + $0xb40] sm:$0xff] }
  0x45   : > { %372 = vst [vmem:[%s4215_s30 + $0x2c0] sm:$0xff] %v371_v24  ;;  %374 = vst [vmem:[%s4215_s30 + $0x2c8] sm:$0xff] %v373_v25  ;;  %v377_v27 = vld [vmem:[%s4210_s29 + $0xb48] sm:$0xff]  ;;  %v379_v28 = vld [vmem:[%s4210_s29 + $0xb50] sm:$0xff] }
  0x46   : > { %376 = vst [vmem:[%s4215_s30 + $0x2d0] sm:$0xff] %v375_v26  ;;  %378 = vst [vmem:[%s4215_s30 + $0x2d8] sm:$0xff] %v377_v27  ;;  %v381_v29 = vld [vmem:[%s4210_s29 + $0xba0] sm:$0xff]  ;;  %v383_v30 = vld [vmem:[%s4210_s29 + $0xba8] sm:$0xff] }
  0x47   : > { %380 = vst [vmem:[%s4215_s30 + $0x2e0] sm:$0xff] %v379_v28  ;;  %v385_v31 = vld [vmem:[%s4210_s29 + $0xbb0] sm:$0xff]  ;;  %382 = vst [vmem:[%s4215_s30 + $0x2e8] sm:$0xff] %v381_v29  ;;  %v387_v32 = vld [vmem:[%s4210_s29 + $0xc00] sm:$0xff] }
  0x48   : > { %384 = vst [vmem:[%s4215_s30 + $0x2f0] sm:$0xff] %v383_v30  ;;  %386 = vst [vmem:[%s4215_s30 + $0x2f8] sm:$0xff] %v385_v31  ;;  %v389_v33 = vld [vmem:[%s4210_s29 + $0xc08] sm:$0xff]  ;;  %v391_v34 = vld [vmem:[%s4210_s29 + $0xc10] sm:$0xff] }
  0x49   : > { %388 = vst [vmem:[%s4215_s30 + $0x300] sm:$0xff] %v387_v32  ;;  %390 = vst [vmem:[%s4215_s30 + $0x308] sm:$0xff] %v389_v33  ;;  %v393_v35 = vld [vmem:[%s4210_s29 + $0xc60] sm:$0xff]  ;;  %v395_v36 = vld [vmem:[%s4210_s29 + $0xc68] sm:$0xff] }
  0x4a   : > { %392 = vst [vmem:[%s4215_s30 + $0x310] sm:$0xff] %v391_v34  ;;  %v397_v37 = vld [vmem:[%s4210_s29 + $0xc70] sm:$0xff]  ;;  %394 = vst [vmem:[%s4215_s30 + $0x318] sm:$0xff] %v393_v35  ;;  %v399_v38 = vld [vmem:[%s4210_s29 + $0xcc0] sm:$0xff] }
  0x4b   : > { %396 = vst [vmem:[%s4215_s30 + $0x320] sm:$0xff] %v395_v36  ;;  %398 = vst [vmem:[%s4215_s30 + $0x328] sm:$0xff] %v397_v37  ;;  %v401_v39 = vld [vmem:[%s4210_s29 + $0xcc8] sm:$0xff]  ;;  %v403_v40 = vld [vmem:[%s4210_s29 + $0xcd0] sm:$0xff] }
  0x4c   : > { %400 = vst [vmem:[%s4215_s30 + $0x330] sm:$0xff] %v399_v38  ;;  %402 = vst [vmem:[%s4215_s30 + $0x338] sm:$0xff] %v401_v39  ;;  %v405_v41 = vld [vmem:[%s4210_s29 + $0xd20] sm:$0xff]  ;;  %v407_v42 = vld [vmem:[%s4210_s29 + $0xd28] sm:$0xff] }
  0x4d   : > { %404 = vst [vmem:[%s4215_s30 + $0x340] sm:$0xff] %v403_v40  ;;  %v409_v43 = vld [vmem:[%s4210_s29 + $0xd30] sm:$0xff]  ;;  %406 = vst [vmem:[%s4215_s30 + $0x348] sm:$0xff] %v405_v41  ;;  %v411_v44 = vld [vmem:[%s4210_s29 + $0xd80] sm:$0xff] }
  0x4e   : > { %408 = vst [vmem:[%s4215_s30 + $0x350] sm:$0xff] %v407_v42  ;;  %410 = vst [vmem:[%s4215_s30 + $0x358] sm:$0xff] %v409_v43  ;;  %v413_v45 = vld [vmem:[%s4210_s29 + $0xd88] sm:$0xff]  ;;  %v415_v46 = vld [vmem:[%s4210_s29 + $0xd90] sm:$0xff] }
  0x4f   : > { %412 = vst [vmem:[%s4215_s30 + $0x360] sm:$0xff] %v411_v44  ;;  %414 = vst [vmem:[%s4215_s30 + $0x368] sm:$0xff] %v413_v45  ;;  %v417_v47 = vld [vmem:[%s4210_s29 + $0xde0] sm:$0xff]  ;;  %v419_v48 = vld [vmem:[%s4210_s29 + $0xde8] sm:$0xff] }
  0x50   : > { %416 = vst [vmem:[%s4215_s30 + $0x370] sm:$0xff] %v415_v46  ;;  %v421_v49 = vld [vmem:[%s4210_s29 + $0xdf0] sm:$0xff]  ;;  %418 = vst [vmem:[%s4215_s30 + $0x378] sm:$0xff] %v417_v47  ;;  %v423_v50 = vld [vmem:[%s4210_s29 + $0xe40] sm:$0xff] }
  0x51   : > { %420 = vst [vmem:[%s4215_s30 + $0x380] sm:$0xff] %v419_v48  ;;  %422 = vst [vmem:[%s4215_s30 + $0x388] sm:$0xff] %v421_v49  ;;  %v425_v51 = vld [vmem:[%s4210_s29 + $0xe48] sm:$0xff]  ;;  %v427_v52 = vld [vmem:[%s4210_s29 + $0xe50] sm:$0xff] }
  0x52   : > { %424 = vst [vmem:[%s4215_s30 + $0x390] sm:$0xff] %v423_v50  ;;  %426 = vst [vmem:[%s4215_s30 + $0x398] sm:$0xff] %v425_v51  ;;  %v429_v53 = vld [vmem:[%s4210_s29 + $0xea0] sm:$0xff]  ;;  %v431_v54 = vld [vmem:[%s4210_s29 + $0xea8] sm:$0xff] }
  0x53   : > { %428 = vst [vmem:[%s4215_s30 + $0x3a0] sm:$0xff] %v427_v52  ;;  %v433_v55 = vld [vmem:[%s4210_s29 + $0xeb0] sm:$0xff]  ;;  %430 = vst [vmem:[%s4215_s30 + $0x3a8] sm:$0xff] %v429_v53  ;;  %v435_v56 = vld [vmem:[%s4210_s29 + $0xf00] sm:$0xff] }
  0x54   : > { %432 = vst [vmem:[%s4215_s30 + $0x3b0] sm:$0xff] %v431_v54  ;;  %434 = vst [vmem:[%s4215_s30 + $0x3b8] sm:$0xff] %v433_v55  ;;  %v437_v57 = vld [vmem:[%s4210_s29 + $0xf08] sm:$0xff]  ;;  %v439_v58 = vld [vmem:[%s4210_s29 + $0xf10] sm:$0xff] }
  0x55   : > { %436 = vst [vmem:[%s4215_s30 + $0x3c0] sm:$0xff] %v435_v56  ;;  %438 = vst [vmem:[%s4215_s30 + $0x3c8] sm:$0xff] %v437_v57  ;;  %v441_v59 = vld [vmem:[%s4210_s29 + $0xf60] sm:$0xff]  ;;  %v443_v60 = vld [vmem:[%s4210_s29 + $0xf68] sm:$0xff] }
  0x56   : > { %440 = vst [vmem:[%s4215_s30 + $0x3d0] sm:$0xff] %v439_v58  ;;  %v445_v61 = vld [vmem:[%s4210_s29 + $0xf70] sm:$0xff]  ;;  %442 = vst [vmem:[%s4215_s30 + $0x3d8] sm:$0xff] %v441_v59  ;;  %v447_v62 = vld [vmem:[%s4210_s29 + $0xfc0] sm:$0xff] }
  0x57   : > { %444 = vst [vmem:[%s4215_s30 + $0x3e0] sm:$0xff] %v443_v60  ;;  %446 = vst [vmem:[%s4215_s30 + $0x3e8] sm:$0xff] %v445_v61  ;;  %v449_v63 = vld [vmem:[%s4210_s29 + $0xfc8] sm:$0xff]  ;;  %v451_v0 = vld [vmem:[%s4210_s29 + $0xfd0] sm:$0xff] }
  0x58   : > { %448 = vst [vmem:[%s4215_s30 + $0x3f0] sm:$0xff] %v447_v62  ;;  %450 = vst [vmem:[%s4215_s30 + $0x3f8] sm:$0xff] %v449_v63  ;;  %v453_v1 = vld [vmem:[%s4210_s29 + $0x1020] sm:$0xff]  ;;  %v455_v2 = vld [vmem:[%s4210_s29 + $0x1028] sm:$0xff] }
  0x59   : > { %452 = vst [vmem:[%s4215_s30 + $0x400] sm:$0xff] %v451_v0  ;;  %v457_v3 = vld [vmem:[%s4210_s29 + $0x1030] sm:$0xff]  ;;  %454 = vst [vmem:[%s4215_s30 + $0x408] sm:$0xff] %v453_v1  ;;  %v459_v4 = vld [vmem:[%s4210_s29 + $0x1080] sm:$0xff] }
  0x5a   : > { %456 = vst [vmem:[%s4215_s30 + $0x410] sm:$0xff] %v455_v2  ;;  %458 = vst [vmem:[%s4215_s30 + $0x418] sm:$0xff] %v457_v3  ;;  %v461_v5 = vld [vmem:[%s4210_s29 + $0x1088] sm:$0xff]  ;;  %v463_v6 = vld [vmem:[%s4210_s29 + $0x1090] sm:$0xff] }
  0x5b   : > { %460 = vst [vmem:[%s4215_s30 + $0x420] sm:$0xff] %v459_v4  ;;  %462 = vst [vmem:[%s4215_s30 + $0x428] sm:$0xff] %v461_v5  ;;  %v465_v7 = vld [vmem:[%s4210_s29 + $0x10e0] sm:$0xff]  ;;  %v467_v8 = vld [vmem:[%s4210_s29 + $0x10e8] sm:$0xff] }
  0x5c   : > { %464 = vst [vmem:[%s4215_s30 + $0x430] sm:$0xff] %v463_v6  ;;  %v469_v9 = vld [vmem:[%s4210_s29 + $0x10f0] sm:$0xff]  ;;  %466 = vst [vmem:[%s4215_s30 + $0x438] sm:$0xff] %v465_v7  ;;  %v471_v10 = vld [vmem:[%s4210_s29 + $0x1140] sm:$0xff] }
  0x5d   : > { %468 = vst [vmem:[%s4215_s30 + $0x440] sm:$0xff] %v467_v8  ;;  %470 = vst [vmem:[%s4215_s30 + $0x448] sm:$0xff] %v469_v9  ;;  %v473_v11 = vld [vmem:[%s4210_s29 + $0x1148] sm:$0xff]  ;;  %v475_v12 = vld [vmem:[%s4210_s29 + $0x1150] sm:$0xff] }
  0x5e   : > { %472 = vst [vmem:[%s4215_s30 + $0x450] sm:$0xff] %v471_v10  ;;  %474 = vst [vmem:[%s4215_s30 + $0x458] sm:$0xff] %v473_v11  ;;  %v477_v13 = vld [vmem:[%s4210_s29 + $0x11a0] sm:$0xff]  ;;  %v479_v14 = vld [vmem:[%s4210_s29 + $0x11a8] sm:$0xff] }
  0x5f   : > { %476 = vst [vmem:[%s4215_s30 + $0x460] sm:$0xff] %v475_v12  ;;  %v481_v15 = vld [vmem:[%s4210_s29 + $0x11b0] sm:$0xff]  ;;  %478 = vst [vmem:[%s4215_s30 + $0x468] sm:$0xff] %v477_v13  ;;  %v483_v16 = vld [vmem:[%s4210_s29 + $0x1200] sm:$0xff] }
  0x60   : > { %480 = vst [vmem:[%s4215_s30 + $0x470] sm:$0xff] %v479_v14  ;;  %482 = vst [vmem:[%s4215_s30 + $0x478] sm:$0xff] %v481_v15  ;;  %v485_v17 = vld [vmem:[%s4210_s29 + $0x1208] sm:$0xff]  ;;  %v487_v18 = vld [vmem:[%s4210_s29 + $0x1210] sm:$0xff] }
  0x61   : > { %484 = vst [vmem:[%s4215_s30 + $0x480] sm:$0xff] %v483_v16  ;;  %486 = vst [vmem:[%s4215_s30 + $0x488] sm:$0xff] %v485_v17  ;;  %v489_v19 = vld [vmem:[%s4210_s29 + $0x1260] sm:$0xff]  ;;  %v491_v20 = vld [vmem:[%s4210_s29 + $0x1268] sm:$0xff] }
  0x62   : > { %488 = vst [vmem:[%s4215_s30 + $0x490] sm:$0xff] %v487_v18  ;;  %v493_v21 = vld [vmem:[%s4210_s29 + $0x1270] sm:$0xff]  ;;  %490 = vst [vmem:[%s4215_s30 + $0x498] sm:$0xff] %v489_v19  ;;  %v495_v22 = vld [vmem:[%s4210_s29 + $0x12c0] sm:$0xff] }
  0x63   : > { %492 = vst [vmem:[%s4215_s30 + $0x4a0] sm:$0xff] %v491_v20  ;;  %494 = vst [vmem:[%s4215_s30 + $0x4a8] sm:$0xff] %v493_v21  ;;  %v497_v23 = vld [vmem:[%s4210_s29 + $0x12c8] sm:$0xff]  ;;  %v499_v24 = vld [vmem:[%s4210_s29 + $0x12d0] sm:$0xff] }
  0x64   : > { %496 = vst [vmem:[%s4215_s30 + $0x4b0] sm:$0xff] %v495_v22  ;;  %498 = vst [vmem:[%s4215_s30 + $0x4b8] sm:$0xff] %v497_v23  ;;  %v501_v25 = vld [vmem:[%s4210_s29 + $0x1320] sm:$0xff]  ;;  %v503_v26 = vld [vmem:[%s4210_s29 + $0x1328] sm:$0xff] }
  0x65   : > { %500 = vst [vmem:[%s4215_s30 + $0x4c0] sm:$0xff] %v499_v24  ;;  %v505_v27 = vld [vmem:[%s4210_s29 + $0x1330] sm:$0xff]  ;;  %502 = vst [vmem:[%s4215_s30 + $0x4c8] sm:$0xff] %v501_v25  ;;  %v507_v28 = vld [vmem:[%s4210_s29 + $0x1380] sm:$0xff] }
  0x66   : > { %504 = vst [vmem:[%s4215_s30 + $0x4d0] sm:$0xff] %v503_v26  ;;  %506 = vst [vmem:[%s4215_s30 + $0x4d8] sm:$0xff] %v505_v27  ;;  %v509_v29 = vld [vmem:[%s4210_s29 + $0x1388] sm:$0xff]  ;;  %v511_v30 = vld [vmem:[%s4210_s29 + $0x1390] sm:$0xff] }
  0x67   : > { %508 = vst [vmem:[%s4215_s30 + $0x4e0] sm:$0xff] %v507_v28  ;;  %510 = vst [vmem:[%s4215_s30 + $0x4e8] sm:$0xff] %v509_v29  ;;  %v513_v31 = vld [vmem:[%s4210_s29 + $0x13e0] sm:$0xff]  ;;  %v515_v32 = vld [vmem:[%s4210_s29 + $0x13e8] sm:$0xff] }
  0x68   : > { %512 = vst [vmem:[%s4215_s30 + $0x4f0] sm:$0xff] %v511_v30  ;;  %v517_v33 = vld [vmem:[%s4210_s29 + $0x13f0] sm:$0xff]  ;;  %514 = vst [vmem:[%s4215_s30 + $0x4f8] sm:$0xff] %v513_v31  ;;  %v519_v34 = vld [vmem:[%s4210_s29 + $0x1440] sm:$0xff] }
  0x69   : > { %516 = vst [vmem:[%s4215_s30 + $0x500] sm:$0xff] %v515_v32  ;;  %518 = vst [vmem:[%s4215_s30 + $0x508] sm:$0xff] %v517_v33  ;;  %v521_v35 = vld [vmem:[%s4210_s29 + $0x1448] sm:$0xff]  ;;  %v523_v36 = vld [vmem:[%s4210_s29 + $0x1450] sm:$0xff] }
  0x6a   : > { %520 = vst [vmem:[%s4215_s30 + $0x510] sm:$0xff] %v519_v34  ;;  %522 = vst [vmem:[%s4215_s30 + $0x518] sm:$0xff] %v521_v35  ;;  %v525_v37 = vld [vmem:[%s4210_s29 + $0x14a0] sm:$0xff]  ;;  %v527_v38 = vld [vmem:[%s4210_s29 + $0x14a8] sm:$0xff] }
  0x6b   : > { %524 = vst [vmem:[%s4215_s30 + $0x520] sm:$0xff] %v523_v36  ;;  %v529_v39 = vld [vmem:[%s4210_s29 + $0x14b0] sm:$0xff]  ;;  %526 = vst [vmem:[%s4215_s30 + $0x528] sm:$0xff] %v525_v37  ;;  %v531_v40 = vld [vmem:[%s4210_s29 + $0x1500] sm:$0xff] }
  0x6c   : > { %528 = vst [vmem:[%s4215_s30 + $0x530] sm:$0xff] %v527_v38  ;;  %530 = vst [vmem:[%s4215_s30 + $0x538] sm:$0xff] %v529_v39  ;;  %v533_v41 = vld [vmem:[%s4210_s29 + $0x1508] sm:$0xff]  ;;  %v535_v42 = vld [vmem:[%s4210_s29 + $0x1510] sm:$0xff] }
  0x6d   : > { %532 = vst [vmem:[%s4215_s30 + $0x540] sm:$0xff] %v531_v40  ;;  %534 = vst [vmem:[%s4215_s30 + $0x548] sm:$0xff] %v533_v41  ;;  %v537_v43 = vld [vmem:[%s4210_s29 + $0x1560] sm:$0xff]  ;;  %v539_v44 = vld [vmem:[%s4210_s29 + $0x1568] sm:$0xff] }
  0x6e   : > { %536 = vst [vmem:[%s4215_s30 + $0x550] sm:$0xff] %v535_v42  ;;  %v541_v45 = vld [vmem:[%s4210_s29 + $0x1570] sm:$0xff]  ;;  %538 = vst [vmem:[%s4215_s30 + $0x558] sm:$0xff] %v537_v43  ;;  %v543_v46 = vld [vmem:[%s4210_s29 + $0x15c0] sm:$0xff] }
  0x6f   : > { %540 = vst [vmem:[%s4215_s30 + $0x560] sm:$0xff] %v539_v44  ;;  %542 = vst [vmem:[%s4215_s30 + $0x568] sm:$0xff] %v541_v45  ;;  %v545_v47 = vld [vmem:[%s4210_s29 + $0x15c8] sm:$0xff]  ;;  %v547_v48 = vld [vmem:[%s4210_s29 + $0x15d0] sm:$0xff] }
  0x70   : > { %544 = vst [vmem:[%s4215_s30 + $0x570] sm:$0xff] %v543_v46  ;;  %546 = vst [vmem:[%s4215_s30 + $0x578] sm:$0xff] %v545_v47  ;;  %v549_v49 = vld [vmem:[%s4210_s29 + $0x1620] sm:$0xff]  ;;  %v551_v50 = vld [vmem:[%s4210_s29 + $0x1628] sm:$0xff] }
  0x71   : > { %548 = vst [vmem:[%s4215_s30 + $0x580] sm:$0xff] %v547_v48  ;;  %v553_v51 = vld [vmem:[%s4210_s29 + $0x1630] sm:$0xff]  ;;  %550 = vst [vmem:[%s4215_s30 + $0x588] sm:$0xff] %v549_v49  ;;  %v555_v52 = vld [vmem:[%s4210_s29 + $0x1680] sm:$0xff] }
  0x72   : > { %552 = vst [vmem:[%s4215_s30 + $0x590] sm:$0xff] %v551_v50  ;;  %554 = vst [vmem:[%s4215_s30 + $0x598] sm:$0xff] %v553_v51  ;;  %v557_v53 = vld [vmem:[%s4210_s29 + $0x1688] sm:$0xff]  ;;  %v559_v54 = vld [vmem:[%s4210_s29 + $0x1690] sm:$0xff] }
  0x73   : > { %556 = vst [vmem:[%s4215_s30 + $0x5a0] sm:$0xff] %v555_v52  ;;  %558 = vst [vmem:[%s4215_s30 + $0x5a8] sm:$0xff] %v557_v53  ;;  %v561_v55 = vld [vmem:[%s4210_s29 + $0x16e0] sm:$0xff]  ;;  %v563_v56 = vld [vmem:[%s4210_s29 + $0x16e8] sm:$0xff] }
  0x74   : > { %560 = vst [vmem:[%s4215_s30 + $0x5b0] sm:$0xff] %v559_v54  ;;  %v565_v57 = vld [vmem:[%s4210_s29 + $0x16f0] sm:$0xff]  ;;  %562 = vst [vmem:[%s4215_s30 + $0x5b8] sm:$0xff] %v561_v55  ;;  %v567_v58 = vld [vmem:[%s4210_s29 + $0x1740] sm:$0xff] }
  0x75   : > { %564 = vst [vmem:[%s4215_s30 + $0x5c0] sm:$0xff] %v563_v56  ;;  %566 = vst [vmem:[%s4215_s30 + $0x5c8] sm:$0xff] %v565_v57  ;;  %v569_v59 = vld [vmem:[%s4210_s29 + $0x1748] sm:$0xff]  ;;  %v571_v60 = vld [vmem:[%s4210_s29 + $0x1750] sm:$0xff] }
  0x76   : > { %568 = vst [vmem:[%s4215_s30 + $0x5d0] sm:$0xff] %v567_v58  ;;  %570 = vst [vmem:[%s4215_s30 + $0x5d8] sm:$0xff] %v569_v59  ;;  %v573_v61 = vld [vmem:[%s4210_s29 + $0x17a0] sm:$0xff]  ;;  %v575_v62 = vld [vmem:[%s4210_s29 + $0x17a8] sm:$0xff] }
  0x77   : > { %572 = vst [vmem:[%s4215_s30 + $0x5e0] sm:$0xff] %v571_v60  ;;  %v577_v63 = vld [vmem:[%s4210_s29 + $0x17b0] sm:$0xff]  ;;  %574 = vst [vmem:[%s4215_s30 + $0x5e8] sm:$0xff] %v573_v61  ;;  %v579_v0 = vld [vmem:[%s4210_s29 + $0x1800] sm:$0xff] }
  0x78   : > { %576 = vst [vmem:[%s4215_s30 + $0x5f0] sm:$0xff] %v575_v62  ;;  %578 = vst [vmem:[%s4215_s30 + $0x5f8] sm:$0xff] %v577_v63  ;;  %v581_v1 = vld [vmem:[%s4210_s29 + $0x1808] sm:$0xff]  ;;  %v583_v2 = vld [vmem:[%s4210_s29 + $0x1810] sm:$0xff] }
  0x79   : > { %580 = vst [vmem:[%s4215_s30 + $0x600] sm:$0xff] %v579_v0  ;;  %582 = vst [vmem:[%s4215_s30 + $0x608] sm:$0xff] %v581_v1  ;;  %v585_v3 = vld [vmem:[%s4210_s29 + $0x1860] sm:$0xff]  ;;  %v587_v4 = vld [vmem:[%s4210_s29 + $0x1868] sm:$0xff] }
  0x7a   : > { %584 = vst [vmem:[%s4215_s30 + $0x610] sm:$0xff] %v583_v2  ;;  %v589_v5 = vld [vmem:[%s4210_s29 + $0x1870] sm:$0xff]  ;;  %586 = vst [vmem:[%s4215_s30 + $0x618] sm:$0xff] %v585_v3  ;;  %v591_v6 = vld [vmem:[%s4210_s29 + $0x18c0] sm:$0xff] }
  0x7b   : > { %588 = vst [vmem:[%s4215_s30 + $0x620] sm:$0xff] %v587_v4  ;;  %590 = vst [vmem:[%s4215_s30 + $0x628] sm:$0xff] %v589_v5  ;;  %v593_v7 = vld [vmem:[%s4210_s29 + $0x18c8] sm:$0xff]  ;;  %v595_v8 = vld [vmem:[%s4210_s29 + $0x18d0] sm:$0xff] }
  0x7c   : > { %592 = vst [vmem:[%s4215_s30 + $0x630] sm:$0xff] %v591_v6  ;;  %594 = vst [vmem:[%s4215_s30 + $0x638] sm:$0xff] %v593_v7  ;;  %v597_v9 = vld [vmem:[%s4210_s29 + $0x1920] sm:$0xff]  ;;  %v599_v10 = vld [vmem:[%s4210_s29 + $0x1928] sm:$0xff] }
  0x7d   : > { %596 = vst [vmem:[%s4215_s30 + $0x640] sm:$0xff] %v595_v8  ;;  %v601_v11 = vld [vmem:[%s4210_s29 + $0x1930] sm:$0xff]  ;;  %598 = vst [vmem:[%s4215_s30 + $0x648] sm:$0xff] %v597_v9  ;;  %v603_v12 = vld [vmem:[%s4210_s29 + $0x1980] sm:$0xff] }
  0x7e   : > { %600 = vst [vmem:[%s4215_s30 + $0x650] sm:$0xff] %v599_v10  ;;  %602 = vst [vmem:[%s4215_s30 + $0x658] sm:$0xff] %v601_v11  ;;  %v605_v13 = vld [vmem:[%s4210_s29 + $0x1988] sm:$0xff]  ;;  %v607_v14 = vld [vmem:[%s4210_s29 + $0x1990] sm:$0xff] }
  0x7f   : > { %604 = vst [vmem:[%s4215_s30 + $0x660] sm:$0xff] %v603_v12  ;;  %606 = vst [vmem:[%s4215_s30 + $0x668] sm:$0xff] %v605_v13  ;;  %v609_v15 = vld [vmem:[%s4210_s29 + $0x19e0] sm:$0xff]  ;;  %v611_v16 = vld [vmem:[%s4210_s29 + $0x19e8] sm:$0xff] }
  0x80   : > { %608 = vst [vmem:[%s4215_s30 + $0x670] sm:$0xff] %v607_v14  ;;  %v613_v17 = vld [vmem:[%s4210_s29 + $0x19f0] sm:$0xff]  ;;  %610 = vst [vmem:[%s4215_s30 + $0x678] sm:$0xff] %v609_v15  ;;  %v615_v18 = vld [vmem:[%s4210_s29 + $0x1a40] sm:$0xff] }
  0x81   : > { %612 = vst [vmem:[%s4215_s30 + $0x680] sm:$0xff] %v611_v16  ;;  %614 = vst [vmem:[%s4215_s30 + $0x688] sm:$0xff] %v613_v17  ;;  %v617_v19 = vld [vmem:[%s4210_s29 + $0x1a48] sm:$0xff]  ;;  %v619_v20 = vld [vmem:[%s4210_s29 + $0x1a50] sm:$0xff] }
  0x82   : > { %616 = vst [vmem:[%s4215_s30 + $0x690] sm:$0xff] %v615_v18  ;;  %618 = vst [vmem:[%s4215_s30 + $0x698] sm:$0xff] %v617_v19  ;;  %v621_v21 = vld [vmem:[%s4210_s29 + $0x1aa0] sm:$0xff]  ;;  %v623_v22 = vld [vmem:[%s4210_s29 + $0x1aa8] sm:$0xff] }
  0x83   : > { %620 = vst [vmem:[%s4215_s30 + $0x6a0] sm:$0xff] %v619_v20  ;;  %v625_v23 = vld [vmem:[%s4210_s29 + $0x1ab0] sm:$0xff]  ;;  %622 = vst [vmem:[%s4215_s30 + $0x6a8] sm:$0xff] %v621_v21  ;;  %v627_v24 = vld [vmem:[%s4210_s29 + $0x1b00] sm:$0xff] }
  0x84   : > { %624 = vst [vmem:[%s4215_s30 + $0x6b0] sm:$0xff] %v623_v22  ;;  %626 = vst [vmem:[%s4215_s30 + $0x6b8] sm:$0xff] %v625_v23  ;;  %v629_v25 = vld [vmem:[%s4210_s29 + $0x1b08] sm:$0xff]  ;;  %v631_v26 = vld [vmem:[%s4210_s29 + $0x1b10] sm:$0xff] }
  0x85   : > { %628 = vst [vmem:[%s4215_s30 + $0x6c0] sm:$0xff] %v627_v24  ;;  %630 = vst [vmem:[%s4215_s30 + $0x6c8] sm:$0xff] %v629_v25  ;;  %v633_v27 = vld [vmem:[%s4210_s29 + $0x1b60] sm:$0xff]  ;;  %v635_v28 = vld [vmem:[%s4210_s29 + $0x1b68] sm:$0xff] }
  0x86   : > { %632 = vst [vmem:[%s4215_s30 + $0x6d0] sm:$0xff] %v631_v26  ;;  %v637_v29 = vld [vmem:[%s4210_s29 + $0x1b70] sm:$0xff]  ;;  %634 = vst [vmem:[%s4215_s30 + $0x6d8] sm:$0xff] %v633_v27  ;;  %v639_v30 = vld [vmem:[%s4210_s29 + $0x1bc0] sm:$0xff] }
  0x87   : > { %636 = vst [vmem:[%s4215_s30 + $0x6e0] sm:$0xff] %v635_v28  ;;  %638 = vst [vmem:[%s4215_s30 + $0x6e8] sm:$0xff] %v637_v29  ;;  %v641_v31 = vld [vmem:[%s4210_s29 + $0x1bc8] sm:$0xff]  ;;  %v643_v32 = vld [vmem:[%s4210_s29 + $0x1bd0] sm:$0xff] }
  0x88   : > { %640 = vst [vmem:[%s4215_s30 + $0x6f0] sm:$0xff] %v639_v30  ;;  %642 = vst [vmem:[%s4215_s30 + $0x6f8] sm:$0xff] %v641_v31  ;;  %v645_v33 = vld [vmem:[%s4210_s29 + $0x1c20] sm:$0xff]  ;;  %v647_v34 = vld [vmem:[%s4210_s29 + $0x1c28] sm:$0xff] }
  0x89   : > { %644 = vst [vmem:[%s4215_s30 + $0x700] sm:$0xff] %v643_v32  ;;  %v649_v35 = vld [vmem:[%s4210_s29 + $0x1c30] sm:$0xff]  ;;  %646 = vst [vmem:[%s4215_s30 + $0x708] sm:$0xff] %v645_v33  ;;  %v651_v36 = vld [vmem:[%s4210_s29 + $0x1c80] sm:$0xff] }
  0x8a   : > { %648 = vst [vmem:[%s4215_s30 + $0x710] sm:$0xff] %v647_v34  ;;  %650 = vst [vmem:[%s4215_s30 + $0x718] sm:$0xff] %v649_v35  ;;  %v653_v37 = vld [vmem:[%s4210_s29 + $0x1c88] sm:$0xff]  ;;  %v655_v38 = vld [vmem:[%s4210_s29 + $0x1c90] sm:$0xff] }
  0x8b   : > { %652 = vst [vmem:[%s4215_s30 + $0x720] sm:$0xff] %v651_v36  ;;  %654 = vst [vmem:[%s4215_s30 + $0x728] sm:$0xff] %v653_v37  ;;  %v657_v39 = vld [vmem:[%s4210_s29 + $0x1ce0] sm:$0xff]  ;;  %v659_v40 = vld [vmem:[%s4210_s29 + $0x1ce8] sm:$0xff] }
  0x8c   : > { %656 = vst [vmem:[%s4215_s30 + $0x730] sm:$0xff] %v655_v38  ;;  %v661_v41 = vld [vmem:[%s4210_s29 + $0x1cf0] sm:$0xff]  ;;  %658 = vst [vmem:[%s4215_s30 + $0x738] sm:$0xff] %v657_v39  ;;  %v663_v42 = vld [vmem:[%s4210_s29 + $0x1d40] sm:$0xff] }
  0x8d   : > { %660 = vst [vmem:[%s4215_s30 + $0x740] sm:$0xff] %v659_v40  ;;  %662 = vst [vmem:[%s4215_s30 + $0x748] sm:$0xff] %v661_v41  ;;  %v665_v43 = vld [vmem:[%s4210_s29 + $0x1d48] sm:$0xff]  ;;  %v667_v44 = vld [vmem:[%s4210_s29 + $0x1d50] sm:$0xff] }
  0x8e   : > { %664 = vst [vmem:[%s4215_s30 + $0x750] sm:$0xff] %v663_v42  ;;  %666 = vst [vmem:[%s4215_s30 + $0x758] sm:$0xff] %v665_v43  ;;  %v669_v45 = vld [vmem:[%s4210_s29 + $0x1da0] sm:$0xff]  ;;  %v671_v46 = vld [vmem:[%s4210_s29 + $0x1da8] sm:$0xff] }
  0x8f   : > { %668 = vst [vmem:[%s4215_s30 + $0x760] sm:$0xff] %v667_v44  ;;  %v673_v47 = vld [vmem:[%s4210_s29 + $0x1db0] sm:$0xff]  ;;  %670 = vst [vmem:[%s4215_s30 + $0x768] sm:$0xff] %v669_v45  ;;  %v675_v48 = vld [vmem:[%s4210_s29 + $0x1e00] sm:$0xff] }
  0x90   : > { %672 = vst [vmem:[%s4215_s30 + $0x770] sm:$0xff] %v671_v46  ;;  %674 = vst [vmem:[%s4215_s30 + $0x778] sm:$0xff] %v673_v47  ;;  %v677_v49 = vld [vmem:[%s4210_s29 + $0x1e08] sm:$0xff]  ;;  %v679_v50 = vld [vmem:[%s4210_s29 + $0x1e10] sm:$0xff] }
  0x91   : > { %676 = vst [vmem:[%s4215_s30 + $0x780] sm:$0xff] %v675_v48  ;;  %678 = vst [vmem:[%s4215_s30 + $0x788] sm:$0xff] %v677_v49  ;;  %v681_v51 = vld [vmem:[%s4210_s29 + $0x1e60] sm:$0xff]  ;;  %v683_v52 = vld [vmem:[%s4210_s29 + $0x1e68] sm:$0xff] }
  0x92   : > { %680 = vst [vmem:[%s4215_s30 + $0x790] sm:$0xff] %v679_v50  ;;  %v685_v53 = vld [vmem:[%s4210_s29 + $0x1e70] sm:$0xff]  ;;  %682 = vst [vmem:[%s4215_s30 + $0x798] sm:$0xff] %v681_v51  ;;  %v687_v54 = vld [vmem:[%s4210_s29 + $0x1ec0] sm:$0xff] }
  0x93   : > { %684 = vst [vmem:[%s4215_s30 + $0x7a0] sm:$0xff] %v683_v52  ;;  %686 = vst [vmem:[%s4215_s30 + $0x7a8] sm:$0xff] %v685_v53  ;;  %v689_v55 = vld [vmem:[%s4210_s29 + $0x1ec8] sm:$0xff]  ;;  %v691_v56 = vld [vmem:[%s4210_s29 + $0x1ed0] sm:$0xff] }
  0x94   : > { %688 = vst [vmem:[%s4215_s30 + $0x7b0] sm:$0xff] %v687_v54  ;;  %690 = vst [vmem:[%s4215_s30 + $0x7b8] sm:$0xff] %v689_v55  ;;  %v693_v57 = vld [vmem:[%s4210_s29 + $0x1f20] sm:$0xff]  ;;  %v695_v58 = vld [vmem:[%s4210_s29 + $0x1f28] sm:$0xff] }
  0x95   : > { %692 = vst [vmem:[%s4215_s30 + $0x7c0] sm:$0xff] %v691_v56  ;;  %v697_v59 = vld [vmem:[%s4210_s29 + $0x1f30] sm:$0xff]  ;;  %694 = vst [vmem:[%s4215_s30 + $0x7c8] sm:$0xff] %v693_v57  ;;  %v699_v60 = vld [vmem:[%s4210_s29 + $0x1f80] sm:$0xff] }
  0x96   : > { %696 = vst [vmem:[%s4215_s30 + $0x7d0] sm:$0xff] %v695_v58  ;;  %698 = vst [vmem:[%s4215_s30 + $0x7d8] sm:$0xff] %v697_v59  ;;  %v701_v61 = vld [vmem:[%s4210_s29 + $0x1f88] sm:$0xff]  ;;  %v703_v62 = vld [vmem:[%s4210_s29 + $0x1f90] sm:$0xff] }
  0x97   : > { %700 = vst [vmem:[%s4215_s30 + $0x7e0] sm:$0xff] %v699_v60  ;;  %702 = vst [vmem:[%s4215_s30 + $0x7e8] sm:$0xff] %v701_v61  ;;  %v705_v63 = vld [vmem:[%s4210_s29 + $0x1fe0] sm:$0xff]  ;;  %v707_v0 = vld [vmem:[%s4210_s29 + $0x1fe8] sm:$0xff] }
  0x98   : > { %704 = vst [vmem:[%s4215_s30 + $0x7f0] sm:$0xff] %v703_v62  ;;  %v709_v1 = vld [vmem:[%s4210_s29 + $0x1ff0] sm:$0xff]  ;;  %706 = vst [vmem:[%s4215_s30 + $0x7f8] sm:$0xff] %v705_v63  ;;  %v711_v2 = vld [vmem:[%s4210_s29 + $0x2040] sm:$0xff] }
  0x99   : > { %708 = vst [vmem:[%s4215_s30 + $0x800] sm:$0xff] %v707_v0  ;;  %710 = vst [vmem:[%s4215_s30 + $0x808] sm:$0xff] %v709_v1  ;;  %v713_v3 = vld [vmem:[%s4210_s29 + $0x2048] sm:$0xff]  ;;  %v715_v4 = vld [vmem:[%s4210_s29 + $0x2050] sm:$0xff] }
  0x9a   : > { %712 = vst [vmem:[%s4215_s30 + $0x810] sm:$0xff] %v711_v2  ;;  %714 = vst [vmem:[%s4215_s30 + $0x818] sm:$0xff] %v713_v3  ;;  %v717_v5 = vld [vmem:[%s4210_s29 + $0x20a0] sm:$0xff]  ;;  %v719_v6 = vld [vmem:[%s4210_s29 + $0x20a8] sm:$0xff] }
  0x9b   : > { %716 = vst [vmem:[%s4215_s30 + $0x820] sm:$0xff] %v715_v4  ;;  %v721_v7 = vld [vmem:[%s4210_s29 + $0x20b0] sm:$0xff]  ;;  %718 = vst [vmem:[%s4215_s30 + $0x828] sm:$0xff] %v717_v5  ;;  %v723_v8 = vld [vmem:[%s4210_s29 + $0x2100] sm:$0xff] }
  0x9c   : > { %720 = vst [vmem:[%s4215_s30 + $0x830] sm:$0xff] %v719_v6  ;;  %722 = vst [vmem:[%s4215_s30 + $0x838] sm:$0xff] %v721_v7  ;;  %v725_v9 = vld [vmem:[%s4210_s29 + $0x2108] sm:$0xff]  ;;  %v727_v10 = vld [vmem:[%s4210_s29 + $0x2110] sm:$0xff] }
  0x9d   : > { %724 = vst [vmem:[%s4215_s30 + $0x840] sm:$0xff] %v723_v8  ;;  %726 = vst [vmem:[%s4215_s30 + $0x848] sm:$0xff] %v725_v9  ;;  %v729_v11 = vld [vmem:[%s4210_s29 + $0x2160] sm:$0xff]  ;;  %v731_v12 = vld [vmem:[%s4210_s29 + $0x2168] sm:$0xff] }
  0x9e   : > { %728 = vst [vmem:[%s4215_s30 + $0x850] sm:$0xff] %v727_v10  ;;  %v733_v13 = vld [vmem:[%s4210_s29 + $0x2170] sm:$0xff]  ;;  %730 = vst [vmem:[%s4215_s30 + $0x858] sm:$0xff] %v729_v11  ;;  %v735_v14 = vld [vmem:[%s4210_s29 + $0x21c0] sm:$0xff] }
  0x9f   : > { %732 = vst [vmem:[%s4215_s30 + $0x860] sm:$0xff] %v731_v12  ;;  %734 = vst [vmem:[%s4215_s30 + $0x868] sm:$0xff] %v733_v13  ;;  %v737_v15 = vld [vmem:[%s4210_s29 + $0x21c8] sm:$0xff]  ;;  %v739_v16 = vld [vmem:[%s4210_s29 + $0x21d0] sm:$0xff] }
  0xa0   : > { %736 = vst [vmem:[%s4215_s30 + $0x870] sm:$0xff] %v735_v14  ;;  %738 = vst [vmem:[%s4215_s30 + $0x878] sm:$0xff] %v737_v15  ;;  %v741_v17 = vld [vmem:[%s4210_s29 + $0x2220] sm:$0xff]  ;;  %v743_v18 = vld [vmem:[%s4210_s29 + $0x2228] sm:$0xff] }
  0xa1   : > { %740 = vst [vmem:[%s4215_s30 + $0x880] sm:$0xff] %v739_v16  ;;  %v745_v19 = vld [vmem:[%s4210_s29 + $0x2230] sm:$0xff]  ;;  %742 = vst [vmem:[%s4215_s30 + $0x888] sm:$0xff] %v741_v17  ;;  %v747_v20 = vld [vmem:[%s4210_s29 + $0x2280] sm:$0xff] }
  0xa2   : > { %744 = vst [vmem:[%s4215_s30 + $0x890] sm:$0xff] %v743_v18  ;;  %746 = vst [vmem:[%s4215_s30 + $0x898] sm:$0xff] %v745_v19  ;;  %v749_v21 = vld [vmem:[%s4210_s29 + $0x2288] sm:$0xff]  ;;  %v751_v22 = vld [vmem:[%s4210_s29 + $0x2290] sm:$0xff] }
  0xa3   : > { %748 = vst [vmem:[%s4215_s30 + $0x8a0] sm:$0xff] %v747_v20  ;;  %750 = vst [vmem:[%s4215_s30 + $0x8a8] sm:$0xff] %v749_v21  ;;  %v753_v23 = vld [vmem:[%s4210_s29 + $0x22e0] sm:$0xff]  ;;  %v755_v24 = vld [vmem:[%s4210_s29 + $0x22e8] sm:$0xff] }
  0xa4   : > { %752 = vst [vmem:[%s4215_s30 + $0x8b0] sm:$0xff] %v751_v22  ;;  %v757_v25 = vld [vmem:[%s4210_s29 + $0x22f0] sm:$0xff]  ;;  %754 = vst [vmem:[%s4215_s30 + $0x8b8] sm:$0xff] %v753_v23  ;;  %v759_v26 = vld [vmem:[%s4210_s29 + $0x2340] sm:$0xff] }
  0xa5   : > { %756 = vst [vmem:[%s4215_s30 + $0x8c0] sm:$0xff] %v755_v24  ;;  %758 = vst [vmem:[%s4215_s30 + $0x8c8] sm:$0xff] %v757_v25  ;;  %v761_v27 = vld [vmem:[%s4210_s29 + $0x2348] sm:$0xff]  ;;  %v763_v28 = vld [vmem:[%s4210_s29 + $0x2350] sm:$0xff] }
  0xa6   : > { %760 = vst [vmem:[%s4215_s30 + $0x8d0] sm:$0xff] %v759_v26  ;;  %762 = vst [vmem:[%s4215_s30 + $0x8d8] sm:$0xff] %v761_v27  ;;  %v765_v29 = vld [vmem:[%s4210_s29 + $0x23a0] sm:$0xff]  ;;  %v767_v30 = vld [vmem:[%s4210_s29 + $0x23a8] sm:$0xff] }
  0xa7   : > { %764 = vst [vmem:[%s4215_s30 + $0x8e0] sm:$0xff] %v763_v28  ;;  %v769_v31 = vld [vmem:[%s4210_s29 + $0x23b0] sm:$0xff]  ;;  %766 = vst [vmem:[%s4215_s30 + $0x8e8] sm:$0xff] %v765_v29 }
  0xa8   : > { %768 = vst [vmem:[%s4215_s30 + $0x8f0] sm:$0xff] %v767_v30  ;;  %770 = vst [vmem:[%s4215_s30 + $0x8f8] sm:$0xff] %v769_v31 }
  0xa9 PF: > { %p3262_p7 = scmp.ge.s32.totalorder %s4131_s18, 1  ;;  %p783_p8 = scmp.lt.s32.totalorder %s4131_s18, 9 }
  0xab   : > { %p784_p9 = pnand %p3262_p7, %p783_p8 }
  0xac   : > { %s790_s4 = sand.u32 (!%p784_p9), 1, %s4107_s12   ;;  %p831_p10 = scmp.lt.s32.totalorder (!%p784_p9), %s4119_s15, 1 }
  0xad   : > { %787 = sbr.rel (%p784_p9) target bundleno = 743 (0x2e7), region = 51 }
  0xae   : > { %s3569_s5 = smul.u32 (!%p784_p9), 2304, %s790_s4 }
  0xaf   : > { %s842_s11 = smul.u32 (!%p784_p9), 6, %s4115_s14 }
  0xb0   : > { %s4793_s6 = scalar_lea.vmem (!%p784_p9), [#allocation3], %s3569_s5 }
  0xb1   : > { %v3627_v32 = vld [vmem:[%s4793_s6 + $0x4] ss:$24 sps:$4 sm:$0xff] (!%p784_p9)   ;;  %v3631_v34 = vld [vmem:[%s4793_s6] ss:$24 sps:$4 sm:$0xff] (!%p784_p9)   ;;  %v3633_v36 = vld [vmem:[%s4793_s6 + $0x34] ss:$24 sps:$4 sm:$0xff] (!%p784_p9)  }
  0xb2   : > { %v3629_v33 = vld [vmem:[%s4793_s6 + $0x304] ss:$24 sps:$4 sm:$0xff] (!%p784_p9)   ;;  %2625 = vmatprep.subr.bf16.mxu0 (!%p784_p9), %v3627_v32  ;;  %v3632_v35 = vld [vmem:[%s4793_s6 + $0x300] ss:$24 sps:$4 sm:$0xff] (!%p784_p9)   ;;  %v3635_v37 = vld [vmem:[%s4793_s6 + $0x334] ss:$24 sps:$4 sm:$0xff] (!%p784_p9)  }
  0xb3   : > { %2666 = vmatprep.subr.bf16.mxu1 (!%p784_p9), %v3629_v33  ;;  %2626 = vmatpush1.bf16.msra.mxu0 (!%p784_p9), %v3631_v34  ;;  %v3637_v38 = vld [vmem:[%s4793_s6 + $0x30] ss:$24 sps:$4 sm:$0xff] (!%p784_p9)   ;;  %v3639_v40 = vld [vmem:[%s4793_s6 + $0x64] ss:$24 sps:$4 sm:$0xff] (!%p784_p9)   ;;  %v3643_v42 = vld [vmem:[%s4793_s6 + $0x60] ss:$24 sps:$4 sm:$0xff] (!%p784_p9)  }
  0xb4   : > { %2667 = vmatpush1.bf16.msra.mxu1 %v3632_v35  ;;  %2627 = vmatprep.subr.bf16.mxu0 %v3633_v36  ;;  %v3638_v39 = vld [vmem:[%s4793_s6 + $0x330] ss:$24 sps:$4 sm:$0xff]   ;;  %v3641_v41 = vld [vmem:[%s4793_s6 + $0x364] ss:$24 sps:$4 sm:$0xff]   ;;  %v3644_v43 = vld [vmem:[%s4793_s6 + $0x360] ss:$24 sps:$4 sm:$0xff]  }
  0xb5   : > { %2668 = vmatprep.subr.bf16.mxu1 %v3635_v37  ;;  %v3645_v44 = vld [vmem:[%s4793_s6 + $0x94] ss:$24 sps:$4 sm:$0xff]   ;;  %v3649_v46 = vld [vmem:[%s4793_s6 + $0x90] ss:$24 sps:$4 sm:$0xff]   ;;  %v3651_v48 = vld [vmem:[%s4793_s6 + $0xc4] ss:$24 sps:$4 sm:$0xff]  }
  0xb6   : > { %v3647_v45 = vld [vmem:[%s4793_s6 + $0x394] ss:$24 sps:$4 sm:$0xff]   ;;  %v3650_v47 = vld [vmem:[%s4793_s6 + $0x390] ss:$24 sps:$4 sm:$0xff]   ;;  %v3653_v49 = vld [vmem:[%s4793_s6 + $0x3c4] ss:$24 sps:$4 sm:$0xff]  }
  0xb7   : > { %2628 = vmatpush1.bf16.msra.mxu0 %v3637_v38  ;;  %v3655_v50 = vld [vmem:[%s4793_s6 + $0xc0] ss:$24 sps:$4 sm:$0xff]   ;;  %v3657_v52 = vld [vmem:[%s4793_s6 + $0xf4] ss:$24 sps:$4 sm:$0xff]   ;;  %v3661_v54 = vld [vmem:[%s4793_s6 + $0xf0] ss:$24 sps:$4 sm:$0xff]  }
  0xb8   : > { %2669 = vmatpush1.bf16.msra.mxu1 %v3638_v39  ;;  %2629 = vmatprep.subr.bf16.mxu0 %v3639_v40  ;;  %v3656_v51 = vld [vmem:[%s4793_s6 + $0x3c0] ss:$24 sps:$4 sm:$0xff]   ;;  %v3659_v53 = vld [vmem:[%s4793_s6 + $0x3f4] ss:$24 sps:$4 sm:$0xff]   ;;  %v3662_v55 = vld [vmem:[%s4793_s6 + $0x3f0] ss:$24 sps:$4 sm:$0xff]  }
  0xb9   : > { %2670 = vmatprep.subr.bf16.mxu1 %v3641_v41  ;;  %v3663_v56 = vld [vmem:[%s4793_s6 + $0x124] ss:$24 sps:$4 sm:$0xff]   ;;  %v3667_v58 = vld [vmem:[%s4793_s6 + $0x120] ss:$24 sps:$4 sm:$0xff]   ;;  %v3669_v60 = vld [vmem:[%s4793_s6 + $0x154] ss:$24 sps:$4 sm:$0xff]  }
  0xba   : > { %v3665_v57 = vld [vmem:[%s4793_s6 + $0x424] ss:$24 sps:$4 sm:$0xff]   ;;  %v3668_v59 = vld [vmem:[%s4793_s6 + $0x420] ss:$24 sps:$4 sm:$0xff]   ;;  %v3671_v61 = vld [vmem:[%s4793_s6 + $0x454] ss:$24 sps:$4 sm:$0xff]  }
  0xbb   : > { %2630 = vmatpush1.bf16.msra.mxu0 %v3643_v42  ;;  %v3673_v62 = vld [vmem:[%s4793_s6 + $0x150] ss:$24 sps:$4 sm:$0xff]   ;;  %v3675_v0 = vld [vmem:[%s4793_s6 + $0x184] ss:$24 sps:$4 sm:$0xff]   ;;  %v3679_v2 = vld [vmem:[%s4793_s6 + $0x180] ss:$24 sps:$4 sm:$0xff]  }
  0xbc   : > { %2671 = vmatpush1.bf16.msra.mxu1 %v3644_v43  ;;  %2631 = vmatprep.subr.bf16.mxu0 %v3645_v44  ;;  %v3674_v63 = vld [vmem:[%s4793_s6 + $0x450] ss:$24 sps:$4 sm:$0xff]   ;;  %v3677_v1 = vld [vmem:[%s4793_s6 + $0x484] ss:$24 sps:$4 sm:$0xff]   ;;  %v3680_v3 = vld [vmem:[%s4793_s6 + $0x480] ss:$24 sps:$4 sm:$0xff]  }
  0xbd   : > { %2672 = vmatprep.subr.bf16.mxu1 %v3647_v45  ;;  %s5206_s15 = smov (!%p831_p10, %s4119_s15), 1  ;;  %v3681_v4 = vld [vmem:[%s4793_s6 + $0x1b4] ss:$24 sps:$4 sm:$0xff]   ;;  %v3685_v6 = vld [vmem:[%s4793_s6 + $0x1b0] ss:$24 sps:$4 sm:$0xff]   ;;  %p843_p11 = scmp.lt.s32.totalorder %s842_s11, 23 }
  0xbe   : > { %v3683_v5 = vld [vmem:[%s4793_s6 + $0x4b4] ss:$24 sps:$4 sm:$0xff]   ;;  %s3570_s7 = smul.u32 24, %s5206_s15  ;;  %v3686_v7 = vld [vmem:[%s4793_s6 + $0x4b0] ss:$24 sps:$4 sm:$0xff]  }
  0xbf   : > { %2632 = vmatpush1.bf16.msra.mxu0 %v3649_v46  ;;  %v3687_v8 = vld [vmem:[%s4793_s6 + $0x1e4] ss:$24 sps:$4 sm:$0xff]   ;;  %v3691_v10 = vld [vmem:[%s4793_s6 + $0x1e0] ss:$24 sps:$4 sm:$0xff]   ;;  %v3693_v12 = vld [vmem:[%s4793_s6 + $0x214] ss:$24 sps:$4 sm:$0xff]  }
  0xc0   : > { %2673 = vmatpush1.bf16.msra.mxu1 %v3650_v47  ;;  %2633 = vmatprep.subr.bf16.mxu0 %v3651_v48  ;;  %v3689_v9 = vld [vmem:[%s4793_s6 + $0x4e4] ss:$24 sps:$4 sm:$0xff]   ;;  %v3692_v11 = vld [vmem:[%s4793_s6 + $0x4e0] ss:$24 sps:$4 sm:$0xff]   ;;  %s4849_s10 = scalar_lea.vmem %s5189_s0, %s3570_s7  ;;  %v3695_v13 = vld [vmem:[%s4793_s6 + $0x514] ss:$24 sps:$4 sm:$0xff]  }
  0xc1   : > { %2674 = vmatprep.subr.bf16.mxu1 %v3653_v49  ;;  %v873_v14 = vld [vmem:[%s4849_s10] sm:$0xff]  ;;  %v874_v16 = vld [vmem:[%s4849_s10 + $0x8] sm:$0xff]  ;;  %v3732_v37 = vld [vmem:[%s4793_s6 + $0xc] ss:$24 sps:$4 sm:$0xff]   ;;  %s5208_s11 = smov (!%p843_p11, %s842_s11), 23 }
  0xc2   : > { %v4854_v15 = vcombine.high %v873_v14, %v873_v14  ;;  %v3697_v17 = vld [vmem:[%s4793_s6 + $0x210] ss:$24 sps:$4 sm:$0xff]   ;;  %v4859_v19 = vcombine.high %v874_v16, %v874_v16  ;;  %v3699_v20 = vld [vmem:[%s4793_s6 + $0x244] ss:$24 sps:$4 sm:$0xff]   ;;  %v3703_v22 = vld [vmem:[%s4793_s6 + $0x240] ss:$24 sps:$4 sm:$0xff]   ;;  %v4881_v38 = vcombine.low %v873_v14, %v873_v14  ;;  %v4883_v39 = vcombine.low %v874_v16, %v874_v16  ;;  %s845_s22 = scalar_lea.vmem %s5191_s2, %s5208_s11  ;;  %s853_s14 = sadd.s32 %s3570_s7, %s5208_s11 }
  0xc3   : > { %2634 = vmatpush1.bf16.msra.mxu0 %v3655_v50  ;;  %v3698_v18 = vld [vmem:[%s4793_s6 + $0x510] ss:$24 sps:$4 sm:$0xff]   ;;  %v3701_v21 = vld [vmem:[%s4793_s6 + $0x544] ss:$24 sps:$4 sm:$0xff]   ;;  %v3704_v23 = vld [vmem:[%s4793_s6 + $0x540] ss:$24 sps:$4 sm:$0xff]  }
  0xc4   : > { %2675 = vmatpush1.bf16.msra.mxu1 %v3656_v51  ;;  %2635 = vmatprep.subr.bf16.mxu0 %v3657_v52  ;;  %v3705_v24 = vld [vmem:[%s4793_s6 + $0x274] ss:$24 sps:$4 sm:$0xff]   ;;  %v3709_v26 = vld [vmem:[%s4793_s6 + $0x270] ss:$24 sps:$4 sm:$0xff]   ;;  %v3711_v28 = vld [vmem:[%s4793_s6 + $0x2a4] ss:$24 sps:$4 sm:$0xff]  }
  0xc5   : > { %2676 = vmatprep.subr.bf16.mxu1 %v3659_v53  ;;  %2657 = vmatprep.mubr.bf16.mxu0 %v4854_v15  ;;  %v3707_v25 = vld [vmem:[%s4793_s6 + $0x574] ss:$24 sps:$4 sm:$0xff]   ;;  %v3710_v27 = vld [vmem:[%s4793_s6 + $0x570] ss:$24 sps:$4 sm:$0xff]   ;;  %v3713_v29 = vld [vmem:[%s4793_s6 + $0x5a4] ss:$24 sps:$4 sm:$0xff]  }
  0xc6   : > { %2698 = vmatprep.mubr.bf16.mxu1 %v4859_v19  ;;  %v3715_v30 = vld [vmem:[%s4793_s6 + $0x2a0] ss:$24 sps:$4 sm:$0xff]   ;;  %v3717_v32 = vld [vmem:[%s4793_s6 + $0x2d4] ss:$24 sps:$4 sm:$0xff]   ;;  %v3721_v34 = vld [vmem:[%s4793_s6 + $0x2d0] ss:$24 sps:$4 sm:$0xff]  }
  0xc7   : > { %2636 = vmatpush1.bf16.msra.mxu0 %v3661_v54  ;;  %v3716_v31 = vld [vmem:[%s4793_s6 + $0x5a0] ss:$24 sps:$4 sm:$0xff]   ;;  %v3719_v33 = vld [vmem:[%s4793_s6 + $0x5d4] ss:$24 sps:$4 sm:$0xff]   ;;  %v3722_v35 = vld [vmem:[%s4793_s6 + $0x5d0] ss:$24 sps:$4 sm:$0xff]  }
  0xc8   : > { %2677 = vmatpush1.bf16.msra.mxu1 %v3662_v55  ;;  %2637 = vmatprep.subr.bf16.mxu0 %v3663_v56  ;;  %v3729_v36 = vld [vmem:[%s4793_s6 + $0x604] ss:$24 sps:$4 sm:$0xff]   ;;  %v3727_v40 = vld [vmem:[%s4793_s6 + $0x600] ss:$24 sps:$4 sm:$0xff]   ;;  %v3735_v42 = vld [vmem:[%s4793_s6 + $0x634] ss:$24 sps:$4 sm:$0xff]  }
  0xc9   : > { %2678 = vmatprep.subr.bf16.mxu1 %v3665_v57  ;;  %v3730_v41 = vld [vmem:[%s4793_s6 + $0x8] ss:$24 sps:$4 sm:$0xff]   ;;  %v3738_v43 = vld [vmem:[%s4793_s6 + $0x3c] ss:$24 sps:$4 sm:$0xff]   ;;  %v3736_v45 = vld [vmem:[%s4793_s6 + $0x38] ss:$24 sps:$4 sm:$0xff]  }
  0xca   : > { %v3733_v44 = vld [vmem:[%s4793_s6 + $0x630] ss:$24 sps:$4 sm:$0xff]   ;;  %v3741_v46 = vld [vmem:[%s4793_s6 + $0x664] ss:$24 sps:$4 sm:$0xff]   ;;  %v3739_v48 = vld [vmem:[%s4793_s6 + $0x660] ss:$24 sps:$4 sm:$0xff]  }
  0xcb   : > { %2638 = vmatpush1.bf16.msra.mxu0 %v3667_v58  ;;  %v3744_v47 = vld [vmem:[%s4793_s6 + $0x6c] ss:$24 sps:$4 sm:$0xff]   ;;  %v3742_v49 = vld [vmem:[%s4793_s6 + $0x68] ss:$24 sps:$4 sm:$0xff]   ;;  %v3750_v51 = vld [vmem:[%s4793_s6 + $0x9c] ss:$24 sps:$4 sm:$0xff]  }
  0xcc   : > { %2679 = vmatpush1.bf16.msra.mxu1 %v3668_v59  ;;  %2639 = vmatprep.subr.bf16.mxu0 %v3669_v60  ;;  %v3747_v50 = vld [vmem:[%s4793_s6 + $0x694] ss:$24 sps:$4 sm:$0xff]   ;;  %v3745_v52 = vld [vmem:[%s4793_s6 + $0x690] ss:$24 sps:$4 sm:$0xff]   ;;  %v3753_v54 = vld [vmem:[%s4793_s6 + $0x6c4] ss:$24 sps:$4 sm:$0xff]  }
  0xcd   : > { %2680 = vmatprep.subr.bf16.mxu1 %v3671_v61  ;;  %v3748_v53 = vld [vmem:[%s4793_s6 + $0x98] ss:$24 sps:$4 sm:$0xff]   ;;  %v3756_v55 = vld [vmem:[%s4793_s6 + $0xcc] ss:$24 sps:$4 sm:$0xff]   ;;  %v3754_v57 = vld [vmem:[%s4793_s6 + $0xc8] ss:$24 sps:$4 sm:$0xff]  }
  0xce   : > { %v3751_v56 = vld [vmem:[%s4793_s6 + $0x6c0] ss:$24 sps:$4 sm:$0xff]   ;;  %v3759_v58 = vld [vmem:[%s4793_s6 + $0x6f4] ss:$24 sps:$4 sm:$0xff]   ;;  %v3757_v60 = vld [vmem:[%s4793_s6 + $0x6f0] ss:$24 sps:$4 sm:$0xff]  }
  0xcf   : > { %2640 = vmatpush1.bf16.msra.mxu0 %v3673_v62  ;;  %v3762_v59 = vld [vmem:[%s4793_s6 + $0xfc] ss:$24 sps:$4 sm:$0xff]   ;;  %v3760_v61 = vld [vmem:[%s4793_s6 + $0xf8] ss:$24 sps:$4 sm:$0xff]   ;;  %s3264_s24 = sshll.u32 %s853_s14, 2 }
  0xd0   : > { %2681 = vmatpush1.bf16.msra.mxu1 %v3674_v63  ;;  %2641 = vmatprep.subr.bf16.mxu0 %v3675_v0  ;;  %v3765_v62 = vld [vmem:[%s4793_s6 + $0x724] ss:$24 sps:$4 sm:$0xff]   ;;  %v3781_v14 = vld [vmem:[%s4793_s6 + $0x7b0] ss:$24 sps:$4 sm:$0xff]   ;;  %s5155_s27 = scalar_lea.vmem %s5192_s3, %s3264_s24 }
  0xd1   : > { %2682 = vmatprep.subr.bf16.mxu1 %v3677_v1  ;;  %v3768_v63 = vld [vmem:[%s4793_s6 + $0x12c] ss:$24 sps:$4 sm:$0xff]   ;;  %v3763_v1 = vld [vmem:[%s4793_s6 + $0x720] ss:$24 sps:$4 sm:$0xff]  }
  0xd2   : > { %v4913_v0 = vld [vmem:[%s4849_s10 + $0x10] sm:$0xff]  ;;  %v3784_v16 = vld [vmem:[%s4793_s6 + $0x1b8] ss:$24 sps:$4 sm:$0xff]  }
  0xd3   : > { %2642 = vmatpush1.bf16.msra.mxu0 %v3679_v2  ;;  %v4918_v2 = vcombine.high %v4913_v0, %v4913_v0 }
  0xd4   : > { %2683 = vmatpush1.bf16.msra.mxu1 %v3680_v3  ;;  %2643 = vmatprep.subr.bf16.mxu0 %v3681_v4  ;;  %v3766_v3 = vld [vmem:[%s4793_s6 + $0x128] ss:$24 sps:$4 sm:$0xff]   ;;  %v3771_v4 = vld [vmem:[%s4793_s6 + $0x754] ss:$24 sps:$4 sm:$0xff]  }
  0xd5   : > { %2684 = vmatprep.subr.bf16.mxu1 %v3683_v5  ;;  %v3774_v5 = vld [vmem:[%s4793_s6 + $0x15c] ss:$24 sps:$4 sm:$0xff]  }
  0xd7   : > { %2644 = vmatpush1.bf16.msra.mxu0 %v3685_v6  ;;  %v3769_v6 = vld [vmem:[%s4793_s6 + $0x750] ss:$24 sps:$4 sm:$0xff]  }
  0xd8   : > { %2685 = vmatpush1.bf16.msra.mxu1 %v3686_v7  ;;  %2645 = vmatprep.subr.bf16.mxu0 %v3687_v8  ;;  %v3772_v7 = vld [vmem:[%s4793_s6 + $0x158] ss:$24 sps:$4 sm:$0xff]   ;;  %v3777_v8 = vld [vmem:[%s4793_s6 + $0x784] ss:$24 sps:$4 sm:$0xff]  }
  0xd9   : > { %2686 = vmatprep.subr.bf16.mxu1 %v3689_v9  ;;  %v3780_v9 = vld [vmem:[%s4793_s6 + $0x18c] ss:$24 sps:$4 sm:$0xff]  }
  0xdb   : > { %2646 = vmatpush1.bf16.msra.mxu0 %v3691_v10  ;;  %v3775_v10 = vld [vmem:[%s4793_s6 + $0x780] ss:$24 sps:$4 sm:$0xff]  }
  0xdc   : > { %2687 = vmatpush1.bf16.msra.mxu1 %v3692_v11  ;;  %2647 = vmatprep.subr.bf16.mxu0 %v3693_v12  ;;  %v3778_v11 = vld [vmem:[%s4793_s6 + $0x188] ss:$24 sps:$4 sm:$0xff]   ;;  %v3783_v12 = vld [vmem:[%s4793_s6 + $0x7b4] ss:$24 sps:$4 sm:$0xff]  }
  0xdd   : > { %2688 = vmatprep.subr.bf16.mxu1 %v3695_v13  ;;  %v3786_v13 = vld [vmem:[%s4793_s6 + $0x1bc] ss:$24 sps:$4 sm:$0xff]  }
  0xdf   : > { %2648 = vmatpush1.bf16.msra.mxu0 %v3697_v17  ;;  %v3789_v17 = vld [vmem:[%s4793_s6 + $0x7e4] ss:$24 sps:$4 sm:$0xff]  }
  0xe0   : > { %2689 = vmatpush1.bf16.msra.mxu1 %v3698_v18  ;;  %2649 = vmatprep.subr.bf16.mxu0 %v3699_v20  ;;  %v3792_v18 = vld [vmem:[%s4793_s6 + $0x1ec] ss:$24 sps:$4 sm:$0xff]   ;;  %v3787_v20 = vld [vmem:[%s4793_s6 + $0x7e0] ss:$24 sps:$4 sm:$0xff]  }
  0xe1   : > { %2690 = vmatprep.subr.bf16.mxu1 %v3701_v21  ;;  %v3790_v21 = vld [vmem:[%s4793_s6 + $0x1e8] ss:$24 sps:$4 sm:$0xff]  }
  0xe3   : > { %2650 = vmatpush1.bf16.msra.mxu0 %v3703_v22  ;;  %v3795_v22 = vld [vmem:[%s4793_s6 + $0x814] ss:$24 sps:$4 sm:$0xff]  }
  0xe4   : > { %2691 = vmatpush1.bf16.msra.mxu1 %v3704_v23  ;;  %2651 = vmatprep.subr.bf16.mxu0 %v3705_v24  ;;  %v3798_v23 = vld [vmem:[%s4793_s6 + $0x21c] ss:$24 sps:$4 sm:$0xff]   ;;  %v3793_v24 = vld [vmem:[%s4793_s6 + $0x810] ss:$24 sps:$4 sm:$0xff]  }
  0xe5   : > { %2692 = vmatprep.subr.bf16.mxu1 %v3707_v25  ;;  %v3796_v25 = vld [vmem:[%s4793_s6 + $0x218] ss:$24 sps:$4 sm:$0xff]  }
  0xe7   : > { %2652 = vmatpush1.bf16.msra.mxu0 %v3709_v26  ;;  %v3801_v26 = vld [vmem:[%s4793_s6 + $0x844] ss:$24 sps:$4 sm:$0xff]  }
  0xe8   : > { %2693 = vmatpush1.bf16.msra.mxu1 %v3710_v27  ;;  %2653 = vmatprep.subr.bf16.mxu0 %v3711_v28  ;;  %v3804_v27 = vld [vmem:[%s4793_s6 + $0x24c] ss:$24 sps:$4 sm:$0xff]   ;;  %v3799_v28 = vld [vmem:[%s4793_s6 + $0x840] ss:$24 sps:$4 sm:$0xff]  }
  0xe9   : > { %2694 = vmatprep.subr.bf16.mxu1 %v3713_v29  ;;  %v3802_v29 = vld [vmem:[%s4793_s6 + $0x248] ss:$24 sps:$4 sm:$0xff]  }
  0xeb   : > { %2654 = vmatpush1.bf16.msra.mxu0 %v3715_v30  ;;  %v3807_v30 = vld [vmem:[%s4793_s6 + $0x874] ss:$24 sps:$4 sm:$0xff]  }
  0xec   : > { %2695 = vmatpush1.bf16.msra.mxu1 %v3716_v31  ;;  %2655 = vmatprep.subr.bf16.mxu0 %v3717_v32  ;;  %v3810_v31 = vld [vmem:[%s4793_s6 + $0x27c] ss:$24 sps:$4 sm:$0xff]   ;;  %v3805_v32 = vld [vmem:[%s4793_s6 + $0x870] ss:$24 sps:$4 sm:$0xff]  }
  0xed   : > { %2696 = vmatprep.subr.bf16.mxu1 %v3719_v33  ;;  %v3808_v33 = vld [vmem:[%s4793_s6 + $0x278] ss:$24 sps:$4 sm:$0xff]  }
  0xef   : > { %2656 = vmatpush1.bf16.msra.mxu0 %v3721_v34  ;;  %v3813_v34 = vld [vmem:[%s4793_s6 + $0x8a4] ss:$24 sps:$4 sm:$0xff]  }
  0xf0   : > { %2697 = vmatpush1.bf16.msra.mxu1 %v3722_v35  ;;  %2707 = vmatprep.subr.bf16.mxu0 %v3729_v36  ;;  %v3816_v35 = vld [vmem:[%s4793_s6 + $0x2ac] ss:$24 sps:$4 sm:$0xff]   ;;  %v3811_v36 = vld [vmem:[%s4793_s6 + $0x8a0] ss:$24 sps:$4 sm:$0xff]  }
  0xf1   : > { %2748 = vmatprep.subr.bf16.mxu1 %v3732_v37  ;;  %v3814_v37 = vld [vmem:[%s4793_s6 + $0x2a8] ss:$24 sps:$4 sm:$0xff]  }
  0xf2   : > { %2658 = vmatmul.mubr.bf16.vlgmr.msra.gmra.mrb[0].mxu0 %v4881_v38 }
  0xf3   : > { %2699 = vmatmul.mubr.bf16.vlgmr.msra.gmra.mrb[0].mxu1 %v4883_v39  ;;  %2708 = vmatpush1.bf16.msra.mxu0 %v3727_v40  ;;  %v3819_v40 = vld [vmem:[%s4793_s6 + $0x8d4] ss:$24 sps:$4 sm:$0xff]  }
  0xf4   : > { %2749 = vmatpush1.bf16.msra.mxu1 %v3730_v41  ;;  %2709 = vmatprep.subr.bf16.mxu0 %v3735_v42  ;;  %v3822_v41 = vld [vmem:[%s4793_s6 + $0x2dc] ss:$24 sps:$4 sm:$0xff]   ;;  %v3817_v42 = vld [vmem:[%s4793_s6 + $0x8d0] ss:$24 sps:$4 sm:$0xff]  }
  0xf5   : > { %2750 = vmatprep.subr.bf16.mxu1 %v3738_v43  ;;  %2780 = vmatprep.mubr.bf16.mxu1 %v4854_v15  ;;  %v3820_v43 = vld [vmem:[%s4793_s6 + $0x2d8] ss:$24 sps:$4 sm:$0xff]  }
  0xf6   : > { %2739 = vmatprep.mubr.bf16.mxu0 %v4918_v2 }
  0xf7   : > { %2710 = vmatpush1.bf16.msra.mxu0 %v3733_v44  ;;  %v3827_v44 = vld [vmem:[%s4793_s6 + $0x30c] ss:$24 sps:$4 sm:$0xff]  }
  0xf8   : > { %2751 = vmatpush1.bf16.msra.mxu1 %v3736_v45  ;;  %2711 = vmatprep.subr.bf16.mxu0 %v3741_v46  ;;  %v3830_v45 = vld [vmem:[%s4793_s6 + $0x60c] ss:$24 sps:$4 sm:$0xff]   ;;  %v4962_v46 = vcombine.low %v4913_v0, %v4913_v0  ;;  %v3852_v0 = vld [vmem:[%s4793_s6 + $0x6c8] ss:$24 sps:$4 sm:$0xff]  }
  0xf9   : > { %2752 = vmatprep.subr.bf16.mxu1 %v3744_v47  ;;  %v3825_v47 = vld [vmem:[%s4793_s6 + $0x308] ss:$24 sps:$4 sm:$0xff]  }
  0xfb   : > { %2712 = vmatpush1.bf16.msra.mxu0 %v3739_v48  ;;  %v3828_v48 = vld [vmem:[%s4793_s6 + $0x608] ss:$24 sps:$4 sm:$0xff]  }
  0xfc   : > { %2753 = vmatpush1.bf16.msra.mxu1 %v3742_v49  ;;  %2713 = vmatprep.subr.bf16.mxu0 %v3747_v50  ;;  %v3833_v49 = vld [vmem:[%s4793_s6 + $0x33c] ss:$24 sps:$4 sm:$0xff]  }
  0xfd   : > { %2754 = vmatprep.subr.bf16.mxu1 %v3750_v51  ;;  %v3836_v50 = vld [vmem:[%s4793_s6 + $0x63c] ss:$24 sps:$4 sm:$0xff]   ;;  %v3831_v51 = vld [vmem:[%s4793_s6 + $0x338] ss:$24 sps:$4 sm:$0xff]  }
  0xff   : > { %2714 = vmatpush1.bf16.msra.mxu0 %v3745_v52  ;;  %v3834_v52 = vld [vmem:[%s4793_s6 + $0x638] ss:$24 sps:$4 sm:$0xff]  }
 0x100   : > { %2755 = vmatpush1.bf16.msra.mxu1 %v3748_v53  ;;  %2715 = vmatprep.subr.bf16.mxu0 %v3753_v54  ;;  %v3839_v53 = vld [vmem:[%s4793_s6 + $0x36c] ss:$24 sps:$4 sm:$0xff]  }
 0x101   : > { %2756 = vmatprep.subr.bf16.mxu1 %v3756_v55  ;;  %v3842_v54 = vld [vmem:[%s4793_s6 + $0x66c] ss:$24 sps:$4 sm:$0xff]   ;;  %v3837_v55 = vld [vmem:[%s4793_s6 + $0x368] ss:$24 sps:$4 sm:$0xff]  }
 0x103   : > { %2716 = vmatpush1.bf16.msra.mxu0 %v3751_v56  ;;  %v3840_v56 = vld [vmem:[%s4793_s6 + $0x668] ss:$24 sps:$4 sm:$0xff]  }
 0x104   : > { %2757 = vmatpush1.bf16.msra.mxu1 %v3754_v57  ;;  %2717 = vmatprep.subr.bf16.mxu0 %v3759_v58  ;;  %v3845_v57 = vld [vmem:[%s4793_s6 + $0x39c] ss:$24 sps:$4 sm:$0xff]  }
 0x105   : > { %2758 = vmatprep.subr.bf16.mxu1 %v3762_v59  ;;  %v3848_v58 = vld [vmem:[%s4793_s6 + $0x69c] ss:$24 sps:$4 sm:$0xff]   ;;  %v3843_v59 = vld [vmem:[%s4793_s6 + $0x398] ss:$24 sps:$4 sm:$0xff]  }
 0x107   : > { %2718 = vmatpush1.bf16.msra.mxu0 %v3757_v60  ;;  %v3846_v60 = vld [vmem:[%s4793_s6 + $0x698] ss:$24 sps:$4 sm:$0xff]  }
 0x108   : > { %2759 = vmatpush1.bf16.msra.mxu1 %v3760_v61  ;;  %2719 = vmatprep.subr.bf16.mxu0 %v3765_v62  ;;  %v3851_v61 = vld [vmem:[%s4793_s6 + $0x3cc] ss:$24 sps:$4 sm:$0xff]  }
 0x109   : > { %2760 = vmatprep.subr.bf16.mxu1 %v3768_v63  ;;  %v3854_v62 = vld [vmem:[%s4793_s6 + $0x6cc] ss:$24 sps:$4 sm:$0xff]   ;;  %v3849_v63 = vld [vmem:[%s4793_s6 + $0x3c8] ss:$24 sps:$4 sm:$0xff]  }
 0x10b   : > { %2720 = vmatpush1.bf16.msra.mxu0 %v3763_v1  ;;  %v3857_v1 = vld [vmem:[%s4793_s6 + $0x3fc] ss:$24 sps:$4 sm:$0xff]  }
 0x10c   : > { %2761 = vmatpush1.bf16.msra.mxu1 %v3766_v3  ;;  %2721 = vmatprep.subr.bf16.mxu0 %v3771_v4  ;;  %v3860_v3 = vld [vmem:[%s4793_s6 + $0x6fc] ss:$24 sps:$4 sm:$0xff]   ;;  %v3855_v4 = vld [vmem:[%s4793_s6 + $0x3f8] ss:$24 sps:$4 sm:$0xff]  }
 0x10d   : > { %2762 = vmatprep.subr.bf16.mxu1 %v3774_v5  ;;  %v3858_v5 = vld [vmem:[%s4793_s6 + $0x6f8] ss:$24 sps:$4 sm:$0xff]  }
 0x10f   : > { %2722 = vmatpush1.bf16.msra.mxu0 %v3769_v6  ;;  %v3863_v6 = vld [vmem:[%s4793_s6 + $0x42c] ss:$24 sps:$4 sm:$0xff]  }
 0x110   : > { %2763 = vmatpush1.bf16.msra.mxu1 %v3772_v7  ;;  %2723 = vmatprep.subr.bf16.mxu0 %v3777_v8  ;;  %v3866_v7 = vld [vmem:[%s4793_s6 + $0x72c] ss:$24 sps:$4 sm:$0xff]   ;;  %v3861_v8 = vld [vmem:[%s4793_s6 + $0x428] ss:$24 sps:$4 sm:$0xff]  }
 0x111   : > { %2764 = vmatprep.subr.bf16.mxu1 %v3780_v9  ;;  %v3864_v9 = vld [vmem:[%s4793_s6 + $0x728] ss:$24 sps:$4 sm:$0xff]  }
 0x113   : > { %2724 = vmatpush1.bf16.msra.mxu0 %v3775_v10  ;;  %v3869_v10 = vld [vmem:[%s4793_s6 + $0x45c] ss:$24 sps:$4 sm:$0xff]  }
 0x114   : > { %2765 = vmatpush1.bf16.msra.mxu1 %v3778_v11  ;;  %2725 = vmatprep.subr.bf16.mxu0 %v3783_v12  ;;  %v3872_v11 = vld [vmem:[%s4793_s6 + $0x75c] ss:$24 sps:$4 sm:$0xff]   ;;  %v3867_v12 = vld [vmem:[%s4793_s6 + $0x458] ss:$24 sps:$4 sm:$0xff]  }
 0x115   : > { %2766 = vmatprep.subr.bf16.mxu1 %v3786_v13  ;;  %v3870_v13 = vld [vmem:[%s4793_s6 + $0x758] ss:$24 sps:$4 sm:$0xff]  }
 0x117   : > { %2726 = vmatpush1.bf16.msra.mxu0 %v3781_v14  ;;  %v3875_v14 = vld [vmem:[%s4793_s6 + $0x48c] ss:$24 sps:$4 sm:$0xff]  }
 0x118   : > { %2767 = vmatpush1.bf16.msra.mxu1 %v3784_v16  ;;  %2727 = vmatprep.subr.bf16.mxu0 %v3789_v17  ;;  %v3878_v16 = vld [vmem:[%s4793_s6 + $0x78c] ss:$24 sps:$4 sm:$0xff]   ;;  %v3873_v17 = vld [vmem:[%s4793_s6 + $0x488] ss:$24 sps:$4 sm:$0xff]  }
 0x119   : > { %2768 = vmatprep.subr.bf16.mxu1 %v3792_v18  ;;  %v3876_v18 = vld [vmem:[%s4793_s6 + $0x788] ss:$24 sps:$4 sm:$0xff]  }
 0x11b   : > { %2728 = vmatpush1.bf16.msra.mxu0 %v3787_v20  ;;  %v3881_v20 = vld [vmem:[%s4793_s6 + $0x4bc] ss:$24 sps:$4 sm:$0xff]  }
 0x11c   : > { %2769 = vmatpush1.bf16.msra.mxu1 %v3790_v21  ;;  %2729 = vmatprep.subr.bf16.mxu0 %v3795_v22  ;;  %v3884_v21 = vld [vmem:[%s4793_s6 + $0x7bc] ss:$24 sps:$4 sm:$0xff]   ;;  %v3879_v22 = vld [vmem:[%s4793_s6 + $0x4b8] ss:$24 sps:$4 sm:$0xff]  }
 0x11d   : > { %2770 = vmatprep.subr.bf16.mxu1 %v3798_v23  ;;  %v3882_v23 = vld [vmem:[%s4793_s6 + $0x7b8] ss:$24 sps:$4 sm:$0xff]  }
 0x11f   : > { %2730 = vmatpush1.bf16.msra.mxu0 %v3793_v24  ;;  %v3887_v24 = vld [vmem:[%s4793_s6 + $0x4ec] ss:$24 sps:$4 sm:$0xff]  }
 0x120   : > { %2771 = vmatpush1.bf16.msra.mxu1 %v3796_v25  ;;  %2731 = vmatprep.subr.bf16.mxu0 %v3801_v26  ;;  %v3890_v25 = vld [vmem:[%s4793_s6 + $0x7ec] ss:$24 sps:$4 sm:$0xff]   ;;  %v3885_v26 = vld [vmem:[%s4793_s6 + $0x4e8] ss:$24 sps:$4 sm:$0xff]  }
 0x121   : > { %2772 = vmatprep.subr.bf16.mxu1 %v3804_v27  ;;  %v3888_v27 = vld [vmem:[%s4793_s6 + $0x7e8] ss:$24 sps:$4 sm:$0xff]  }
 0x123   : > { %2732 = vmatpush1.bf16.msra.mxu0 %v3799_v28  ;;  %v3893_v28 = vld [vmem:[%s4793_s6 + $0x51c] ss:$24 sps:$4 sm:$0xff]  }
 0x124   : > { %2773 = vmatpush1.bf16.msra.mxu1 %v3802_v29  ;;  %2733 = vmatprep.subr.bf16.mxu0 %v3807_v30  ;;  %v3896_v29 = vld [vmem:[%s4793_s6 + $0x81c] ss:$24 sps:$4 sm:$0xff]   ;;  %v3891_v30 = vld [vmem:[%s4793_s6 + $0x518] ss:$24 sps:$4 sm:$0xff]  }
 0x125   : > { %2774 = vmatprep.subr.bf16.mxu1 %v3810_v31  ;;  %v3894_v31 = vld [vmem:[%s4793_s6 + $0x818] ss:$24 sps:$4 sm:$0xff]  }
 0x127   : > { %2734 = vmatpush1.bf16.msra.mxu0 %v3805_v32  ;;  %v3899_v32 = vld [vmem:[%s4793_s6 + $0x54c] ss:$24 sps:$4 sm:$0xff]  }
 0x128   : > { %2775 = vmatpush1.bf16.msra.mxu1 %v3808_v33  ;;  %2735 = vmatprep.subr.bf16.mxu0 %v3813_v34  ;;  %v3902_v33 = vld [vmem:[%s4793_s6 + $0x84c] ss:$24 sps:$4 sm:$0xff]   ;;  %v3897_v34 = vld [vmem:[%s4793_s6 + $0x548] ss:$24 sps:$4 sm:$0xff]  }
 0x129   : > { %2776 = vmatprep.subr.bf16.mxu1 %v3816_v35  ;;  %v3900_v35 = vld [vmem:[%s4793_s6 + $0x848] ss:$24 sps:$4 sm:$0xff]  }
 0x12b   : > { %2736 = vmatpush1.bf16.msra.mxu0 %v3811_v36  ;;  %v3905_v36 = vld [vmem:[%s4793_s6 + $0x57c] ss:$24 sps:$4 sm:$0xff]  }
 0x12c   : > { %2777 = vmatpush1.bf16.msra.mxu1 %v3814_v37  ;;  %2737 = vmatprep.subr.bf16.mxu0 %v3819_v40  ;;  %v3908_v37 = vld [vmem:[%s4793_s6 + $0x87c] ss:$24 sps:$4 sm:$0xff]   ;;  %v3903_v40 = vld [vmem:[%s4793_s6 + $0x578] ss:$24 sps:$4 sm:$0xff]  }
 0x12d   : > { %2778 = vmatprep.subr.bf16.mxu1 %v3822_v41  ;;  %v3906_v41 = vld [vmem:[%s4793_s6 + $0x878] ss:$24 sps:$4 sm:$0xff]  }
 0x12f   : > { %2738 = vmatpush1.bf16.msra.mxu0 %v3817_v42  ;;  %v3911_v42 = vld [vmem:[%s4793_s6 + $0x5ac] ss:$24 sps:$4 sm:$0xff]  }
 0x130   : > { %2779 = vmatpush1.bf16.msra.mxu1 %v3820_v43  ;;  %2789 = vmatprep.subr.bf16.mxu0 %v3827_v44  ;;  %v3914_v43 = vld [vmem:[%s4793_s6 + $0x8ac] ss:$24 sps:$4 sm:$0xff]   ;;  %v3909_v44 = vld [vmem:[%s4793_s6 + $0x5a8] ss:$24 sps:$4 sm:$0xff]  }
 0x131   : > { %2830 = vmatprep.subr.bf16.mxu1 %v3830_v45  ;;  %v3912_v45 = vld [vmem:[%s4793_s6 + $0x8a8] ss:$24 sps:$4 sm:$0xff]  }
 0x132   : > { %2740 = vmatmul.mubr.bf16.vlgmr.msra.gmra.mrb[4].mxu0 %v4962_v46 }
 0x133   : > { %2781 = vmatmul.mubr.bf16.vlgmr.msra.gmra.mrb[4].mxu1 %v4881_v38  ;;  %2790 = vmatpush1.bf16.msra.mxu0 %v3825_v47  ;;  %v3917_v47 = vld [vmem:[%s4793_s6 + $0x5dc] ss:$24 sps:$4 sm:$0xff]  }
 0x134   : > { %2831 = vmatpush1.bf16.msra.mxu1 %v3828_v48  ;;  %2791 = vmatprep.subr.bf16.mxu0 %v3833_v49  ;;  %v3920_v48 = vld [vmem:[%s4793_s6 + $0x8dc] ss:$24 sps:$4 sm:$0xff]   ;;  %v3915_v49 = vld [vmem:[%s4793_s6 + $0x5d8] ss:$24 sps:$4 sm:$0xff]  }
 0x135   : > { %2832 = vmatprep.subr.bf16.mxu1 %v3836_v50  ;;  %2821 = vmatprep.mubr.bf16.mxu0 %v4859_v19  ;;  %v3918_v50 = vld [vmem:[%s4793_s6 + $0x8d8] ss:$24 sps:$4 sm:$0xff]  }
 0x136   : > { %2862 = vmatprep.mubr.bf16.mxu1 %v4918_v2 }
 0x137   : > { %2792 = vmatpush1.bf16.msra.mxu0 %v3831_v51  ;;  %v3923_v51 = vld [vmem:[%s4793_s6 + $0x14] ss:$24 sps:$4 sm:$0xff]  }
 0x138   : > { %2833 = vmatpush1.bf16.msra.mxu1 %v3834_v52  ;;  %2793 = vmatprep.subr.bf16.mxu0 %v3839_v53  ;;  %v3926_v52 = vld [vmem:[%s4793_s6 + $0x314] ss:$24 sps:$4 sm:$0xff]   ;;  %v3921_v53 = vld [vmem:[%s4793_s6 + $0x10] ss:$24 sps:$4 sm:$0xff]  }
 0x139   : > { %2834 = vmatprep.subr.bf16.mxu1 %v3842_v54  ;;  %v3924_v54 = vld [vmem:[%s4793_s6 + $0x310] ss:$24 sps:$4 sm:$0xff]  }
 0x13b   : > { %2794 = vmatpush1.bf16.msra.mxu0 %v3837_v55  ;;  %v3929_v55 = vld [vmem:[%s4793_s6 + $0x44] ss:$24 sps:$4 sm:$0xff]  }
 0x13c   : > { %2835 = vmatpush1.bf16.msra.mxu1 %v3840_v56  ;;  %2795 = vmatprep.subr.bf16.mxu0 %v3845_v57  ;;  %v3932_v56 = vld [vmem:[%s4793_s6 + $0x344] ss:$24 sps:$4 sm:$0xff]   ;;  %v3927_v57 = vld [vmem:[%s4793_s6 + $0x40] ss:$24 sps:$4 sm:$0xff]  }
 0x13d   : > { %2836 = vmatprep.subr.bf16.mxu1 %v3848_v58  ;;  %v3930_v58 = vld [vmem:[%s4793_s6 + $0x340] ss:$24 sps:$4 sm:$0xff]  }
 0x13f   : > { %2796 = vmatpush1.bf16.msra.mxu0 %v3843_v59  ;;  %v3935_v59 = vld [vmem:[%s4793_s6 + $0x74] ss:$24 sps:$4 sm:$0xff]  }
 0x140   : > { %2837 = vmatpush1.bf16.msra.mxu1 %v3846_v60  ;;  %2797 = vmatprep.subr.bf16.mxu0 %v3851_v61  ;;  %v3938_v60 = vld [vmem:[%s4793_s6 + $0x374] ss:$24 sps:$4 sm:$0xff]   ;;  %v3933_v61 = vld [vmem:[%s4793_s6 + $0x70] ss:$24 sps:$4 sm:$0xff]  }
 0x141   : > { %2838 = vmatprep.subr.bf16.mxu1 %v3854_v62  ;;  %v3936_v62 = vld [vmem:[%s4793_s6 + $0x370] ss:$24 sps:$4 sm:$0xff]  }
 0x143   : > { %2798 = vmatpush1.bf16.msra.mxu0 %v3849_v63  ;;  %v3941_v63 = vld [vmem:[%s4793_s6 + $0xa4] ss:$24 sps:$4 sm:$0xff]  }
 0x144   : > { %2839 = vmatpush1.bf16.msra.mxu1 %v3852_v0  ;;  %2799 = vmatprep.subr.bf16.mxu0 %v3857_v1  ;;  %v3944_v0 = vld [vmem:[%s4793_s6 + $0x3a4] ss:$24 sps:$4 sm:$0xff]   ;;  %v3939_v1 = vld [vmem:[%s4793_s6 + $0xa0] ss:$24 sps:$4 sm:$0xff]  }
 0x145   : > { %2840 = vmatprep.subr.bf16.mxu1 %v3860_v3  ;;  %v3950_v3 = vld [vmem:[%s4793_s6 + $0x3d4] ss:$24 sps:$4 sm:$0xff]  }
 0x147   : > { %2800 = vmatpush1.bf16.msra.mxu0 %v3855_v4  ;;  %v3945_v4 = vld [vmem:[%s4793_s6 + $0xd0] ss:$24 sps:$4 sm:$0xff]  }
 0x148   : > { %2841 = vmatpush1.bf16.msra.mxu1 %v3858_v5  ;;  %2801 = vmatprep.subr.bf16.mxu0 %v3863_v6  ;;  %v3948_v5 = vld [vmem:[%s4793_s6 + $0x3d0] ss:$24 sps:$4 sm:$0xff]   ;;  %v3953_v6 = vld [vmem:[%s4793_s6 + $0x104] ss:$24 sps:$4 sm:$0xff]  }
 0x149   : > { %2842 = vmatprep.subr.bf16.mxu1 %v3866_v7  ;;  %v3956_v7 = vld [vmem:[%s4793_s6 + $0x404] ss:$24 sps:$4 sm:$0xff]  }
 0x14b   : > { %2802 = vmatpush1.bf16.msra.mxu0 %v3861_v8  ;;  %v3951_v8 = vld [vmem:[%s4793_s6 + $0x100] ss:$24 sps:$4 sm:$0xff]  }
 0x14c   : > { %2843 = vmatpush1.bf16.msra.mxu1 %v3864_v9  ;;  %2803 = vmatprep.subr.bf16.mxu0 %v3869_v10  ;;  %v3954_v9 = vld [vmem:[%s4793_s6 + $0x400] ss:$24 sps:$4 sm:$0xff]   ;;  %v3959_v10 = vld [vmem:[%s4793_s6 + $0x134] ss:$24 sps:$4 sm:$0xff]  }
 0x14d   : > { %2844 = vmatprep.subr.bf16.mxu1 %v3872_v11  ;;  %v3962_v11 = vld [vmem:[%s4793_s6 + $0x434] ss:$24 sps:$4 sm:$0xff]  }
 0x14f   : > { %2804 = vmatpush1.bf16.msra.mxu0 %v3867_v12  ;;  %v3957_v12 = vld [vmem:[%s4793_s6 + $0x130] ss:$24 sps:$4 sm:$0xff]  }
 0x150   : > { %2845 = vmatpush1.bf16.msra.mxu1 %v3870_v13  ;;  %2805 = vmatprep.subr.bf16.mxu0 %v3875_v14  ;;  %v3960_v13 = vld [vmem:[%s4793_s6 + $0x430] ss:$24 sps:$4 sm:$0xff]   ;;  %v3965_v14 = vld [vmem:[%s4793_s6 + $0x164] ss:$24 sps:$4 sm:$0xff]  }
 0x151   : > { %2846 = vmatprep.subr.bf16.mxu1 %v3878_v16  ;;  %v3968_v16 = vld [vmem:[%s4793_s6 + $0x464] ss:$24 sps:$4 sm:$0xff]  }
 0x153   : > { %2806 = vmatpush1.bf16.msra.mxu0 %v3873_v17  ;;  %v3963_v17 = vld [vmem:[%s4793_s6 + $0x160] ss:$24 sps:$4 sm:$0xff]  }
 0x154   : > { %2847 = vmatpush1.bf16.msra.mxu1 %v3876_v18  ;;  %2807 = vmatprep.subr.bf16.mxu0 %v3881_v20  ;;  %v3966_v18 = vld [vmem:[%s4793_s6 + $0x460] ss:$24 sps:$4 sm:$0xff]   ;;  %v3971_v20 = vld [vmem:[%s4793_s6 + $0x194] ss:$24 sps:$4 sm:$0xff]  }
 0x155   : > { %2848 = vmatprep.subr.bf16.mxu1 %v3884_v21  ;;  %v3974_v21 = vld [vmem:[%s4793_s6 + $0x494] ss:$24 sps:$4 sm:$0xff]  }
 0x157   : > { %2808 = vmatpush1.bf16.msra.mxu0 %v3879_v22  ;;  %v3969_v22 = vld [vmem:[%s4793_s6 + $0x190] ss:$24 sps:$4 sm:$0xff]  }
 0x158   : > { %2849 = vmatpush1.bf16.msra.mxu1 %v3882_v23  ;;  %2809 = vmatprep.subr.bf16.mxu0 %v3887_v24  ;;  %v3972_v23 = vld [vmem:[%s4793_s6 + $0x490] ss:$24 sps:$4 sm:$0xff]   ;;  %v3977_v24 = vld [vmem:[%s4793_s6 + $0x1c4] ss:$24 sps:$4 sm:$0xff]  }
 0x159   : > { %2850 = vmatprep.subr.bf16.mxu1 %v3890_v25  ;;  %v3980_v25 = vld [vmem:[%s4793_s6 + $0x4c4] ss:$24 sps:$4 sm:$0xff]  }
 0x15b   : > { %2810 = vmatpush1.bf16.msra.mxu0 %v3885_v26  ;;  %v3975_v26 = vld [vmem:[%s4793_s6 + $0x1c0] ss:$24 sps:$4 sm:$0xff]  }
 0x15c   : > { %2851 = vmatpush1.bf16.msra.mxu1 %v3888_v27  ;;  %2811 = vmatprep.subr.bf16.mxu0 %v3893_v28  ;;  %v3978_v27 = vld [vmem:[%s4793_s6 + $0x4c0] ss:$24 sps:$4 sm:$0xff]   ;;  %v3983_v28 = vld [vmem:[%s4793_s6 + $0x1f4] ss:$24 sps:$4 sm:$0xff]  }
 0x15d   : > { %2852 = vmatprep.subr.bf16.mxu1 %v3896_v29  ;;  %v3986_v29 = vld [vmem:[%s4793_s6 + $0x4f4] ss:$24 sps:$4 sm:$0xff]  }
 0x15f   : > { %2812 = vmatpush1.bf16.msra.mxu0 %v3891_v30  ;;  %v3981_v30 = vld [vmem:[%s4793_s6 + $0x1f0] ss:$24 sps:$4 sm:$0xff]  }
 0x160   : > { %2853 = vmatpush1.bf16.msra.mxu1 %v3894_v31  ;;  %2813 = vmatprep.subr.bf16.mxu0 %v3899_v32  ;;  %v3984_v31 = vld [vmem:[%s4793_s6 + $0x4f0] ss:$24 sps:$4 sm:$0xff]   ;;  %v3989_v32 = vld [vmem:[%s4793_s6 + $0x224] ss:$24 sps:$4 sm:$0xff]  }
 0x161   : > { %2854 = vmatprep.subr.bf16.mxu1 %v3902_v33  ;;  %v3992_v33 = vld [vmem:[%s4793_s6 + $0x524] ss:$24 sps:$4 sm:$0xff]  }
 0x163   : > { %2814 = vmatpush1.bf16.msra.mxu0 %v3897_v34  ;;  %v3987_v34 = vld [vmem:[%s4793_s6 + $0x220] ss:$24 sps:$4 sm:$0xff]  }
 0x164   : > { %2855 = vmatpush1.bf16.msra.mxu1 %v3900_v35  ;;  %2815 = vmatprep.subr.bf16.mxu0 %v3905_v36  ;;  %v3990_v35 = vld [vmem:[%s4793_s6 + $0x520] ss:$24 sps:$4 sm:$0xff]   ;;  %v3995_v36 = vld [vmem:[%s4793_s6 + $0x254] ss:$24 sps:$4 sm:$0xff]  }
 0x165   : > { %2856 = vmatprep.subr.bf16.mxu1 %v3908_v37  ;;  %v3998_v37 = vld [vmem:[%s4793_s6 + $0x554] ss:$24 sps:$4 sm:$0xff]  }
 0x167   : > { %2816 = vmatpush1.bf16.msra.mxu0 %v3903_v40  ;;  %v3993_v40 = vld [vmem:[%s4793_s6 + $0x250] ss:$24 sps:$4 sm:$0xff]  }
 0x168   : > { %2857 = vmatpush1.bf16.msra.mxu1 %v3906_v41  ;;  %2817 = vmatprep.subr.bf16.mxu0 %v3911_v42  ;;  %v3996_v41 = vld [vmem:[%s4793_s6 + $0x550] ss:$24 sps:$4 sm:$0xff]   ;;  %v4001_v42 = vld [vmem:[%s4793_s6 + $0x284] ss:$24 sps:$4 sm:$0xff]  }
 0x169   : > { %2858 = vmatprep.subr.bf16.mxu1 %v3914_v43  ;;  %v4004_v43 = vld [vmem:[%s4793_s6 + $0x584] ss:$24 sps:$4 sm:$0xff]  }
 0x16b   : > { %2818 = vmatpush1.bf16.msra.mxu0 %v3909_v44  ;;  %v3999_v44 = vld [vmem:[%s4793_s6 + $0x280] ss:$24 sps:$4 sm:$0xff]  }
 0x16c   : > { %2859 = vmatpush1.bf16.msra.mxu1 %v3912_v45  ;;  %2819 = vmatprep.subr.bf16.mxu0 %v3917_v47  ;;  %v4002_v45 = vld [vmem:[%s4793_s6 + $0x580] ss:$24 sps:$4 sm:$0xff]   ;;  %v4007_v47 = vld [vmem:[%s4793_s6 + $0x2b4] ss:$24 sps:$4 sm:$0xff]  }
 0x16d   : > { %2860 = vmatprep.subr.bf16.mxu1 %v3920_v48  ;;  %v4010_v48 = vld [vmem:[%s4793_s6 + $0x5b4] ss:$24 sps:$4 sm:$0xff]  }
 0x16f   : > { %2820 = vmatpush1.bf16.msra.mxu0 %v3915_v49  ;;  %v4005_v49 = vld [vmem:[%s4793_s6 + $0x2b0] ss:$24 sps:$4 sm:$0xff]  }
 0x170   : > { %2861 = vmatpush1.bf16.msra.mxu1 %v3918_v50  ;;  %2871 = vmatprep.subr.bf16.mxu0 %v3923_v51  ;;  %v4008_v50 = vld [vmem:[%s4793_s6 + $0x5b0] ss:$24 sps:$4 sm:$0xff]   ;;  %v4013_v51 = vld [vmem:[%s4793_s6 + $0x2e4] ss:$24 sps:$4 sm:$0xff]  }
 0x171   : > { %2912 = vmatprep.subr.bf16.mxu1 %v3926_v52  ;;  %v4016_v52 = vld [vmem:[%s4793_s6 + $0x5e4] ss:$24 sps:$4 sm:$0xff]  }
 0x172   : > { %2822 = vmatmul.mubr.bf16.vlgmr.msra.gmra.mrb[8].mxu0 %v4883_v39 }
 0x173   : > { %2863 = vmatmul.mubr.bf16.vlgmr.msra.gmra.mrb[8].mxu1 %v4962_v46  ;;  %2872 = vmatpush1.bf16.msra.mxu0 %v3921_v53  ;;  %v4011_v53 = vld [vmem:[%s4793_s6 + $0x2e0] ss:$24 sps:$4 sm:$0xff]  }
 0x174   : > { %2913 = vmatpush1.bf16.msra.mxu1 %v3924_v54  ;;  %2873 = vmatprep.subr.bf16.mxu0 %v3929_v55  ;;  %v4014_v54 = vld [vmem:[%s4793_s6 + $0x5e0] ss:$24 sps:$4 sm:$0xff]   ;;  %v4019_v55 = vld [vmem:[%s4793_s6 + $0x614] ss:$24 sps:$4 sm:$0xff]  }
 0x175   : > { %2914 = vmatprep.subr.bf16.mxu1 %v3932_v56  ;;  %2903 = vmatprep.mubr.bf16.mxu0 %v4854_v15  ;;  %v3942_v15 = vld [vmem:[%s4793_s6 + $0x3a0] ss:$24 sps:$4 sm:$0xff]   ;;  %v4017_v56 = vld [vmem:[%s4793_s6 + $0x610] ss:$24 sps:$4 sm:$0xff]  }
 0x176   : > { %2944 = vmatprep.mubr.bf16.mxu1 %v4859_v19  ;;  %v3947_v19 = vld [vmem:[%s4793_s6 + $0xd4] ss:$24 sps:$4 sm:$0xff]  }
 0x177   : > { %2874 = vmatpush1.bf16.msra.mxu0 %v3927_v57  ;;  %v4022_v57 = vld [vmem:[%s4793_s6 + $0x644] ss:$24 sps:$4 sm:$0xff]  }
 0x178   : > { %2915 = vmatpush1.bf16.msra.mxu1 %v3930_v58  ;;  %2875 = vmatprep.subr.bf16.mxu0 %v3935_v59  ;;  %v4020_v58 = vld [vmem:[%s4793_s6 + $0x640] ss:$24 sps:$4 sm:$0xff]   ;;  %v4025_v59 = vld [vmem:[%s4793_s6 + $0x674] ss:$24 sps:$4 sm:$0xff]  }
 0x179   : > { %2916 = vmatprep.subr.bf16.mxu1 %v3938_v60  ;;  %v4023_v60 = vld [vmem:[%s4793_s6 + $0x670] ss:$24 sps:$4 sm:$0xff]  }
 0x17b   : > { %2876 = vmatpush1.bf16.msra.mxu0 %v3933_v61  ;;  %v4028_v61 = vld [vmem:[%s4793_s6 + $0x6a4] ss:$24 sps:$4 sm:$0xff]  }
 0x17c   : > { %2917 = vmatpush1.bf16.msra.mxu1 %v3936_v62  ;;  %2877 = vmatprep.subr.bf16.mxu0 %v3941_v63  ;;  %v4026_v62 = vld [vmem:[%s4793_s6 + $0x6a0] ss:$24 sps:$4 sm:$0xff]   ;;  %v4034_v63 = vld [vmem:[%s4793_s6 + $0x704] ss:$24 sps:$4 sm:$0xff]  }
 0x17d   : > { %2918 = vmatprep.subr.bf16.mxu1 %v3944_v0  ;;  %v4037_v0 = vld [vmem:[%s4793_s6 + $0x734] ss:$24 sps:$4 sm:$0xff]  }
 0x17f   : > { %2878 = vmatpush1.bf16.msra.mxu0 %v3939_v1 }
 0x180   : > { %2919 = vmatpush1.bf16.msra.mxu1 %v3942_v15  ;;  %2879 = vmatprep.subr.bf16.mxu0 %v3947_v19 }
 0x181   : > { %2920 = vmatprep.subr.bf16.mxu1 %v3950_v3 }
 0x183   : > { %2880 = vmatpush1.bf16.msra.mxu0 %v3945_v4 }
 0x184   : > { %2921 = vmatpush1.bf16.msra.mxu1 %v3948_v5  ;;  %2881 = vmatprep.subr.bf16.mxu0 %v3953_v6 }
 0x185   : > { %2922 = vmatprep.subr.bf16.mxu1 %v3956_v7  ;;  %v4035_v7 = vld [vmem:[%s4793_s6 + $0x730] ss:$24 sps:$4 sm:$0xff]  }
 0x187   : > { %2882 = vmatpush1.bf16.msra.mxu0 %v3951_v8 }
 0x188   : > { %2923 = vmatpush1.bf16.msra.mxu1 %v3954_v9  ;;  %2883 = vmatprep.subr.bf16.mxu0 %v3959_v10  ;;  %v4040_v10 = vld [vmem:[%s4793_s6 + $0x764] ss:$24 sps:$4 sm:$0xff]  }
 0x189   : > { %2924 = vmatprep.subr.bf16.mxu1 %v3962_v11 }
 0x18b   : > { %2884 = vmatpush1.bf16.msra.mxu0 %v3957_v12  ;;  %v4038_v12 = vld [vmem:[%s4793_s6 + $0x760] ss:$24 sps:$4 sm:$0xff]  }
 0x18c   : > { %2925 = vmatpush1.bf16.msra.mxu1 %v3960_v13  ;;  %2885 = vmatprep.subr.bf16.mxu0 %v3965_v14  ;;  %v4043_v13 = vld [vmem:[%s4793_s6 + $0x794] ss:$24 sps:$4 sm:$0xff]   ;;  %v4041_v14 = vld [vmem:[%s4793_s6 + $0x790] ss:$24 sps:$4 sm:$0xff]  }
 0x18d   : > { %2926 = vmatprep.subr.bf16.mxu1 %v3968_v16  ;;  %v4046_v16 = vld [vmem:[%s4793_s6 + $0x7c4] ss:$24 sps:$4 sm:$0xff]  }
 0x18f   : > { %2886 = vmatpush1.bf16.msra.mxu0 %v3963_v17  ;;  %v4044_v17 = vld [vmem:[%s4793_s6 + $0x7c0] ss:$24 sps:$4 sm:$0xff]  }
 0x190   : > { %2927 = vmatpush1.bf16.msra.mxu1 %v3966_v18  ;;  %2887 = vmatprep.subr.bf16.mxu0 %v3971_v20  ;;  %v4049_v18 = vld [vmem:[%s4793_s6 + $0x7f4] ss:$24 sps:$4 sm:$0xff]   ;;  %v4047_v20 = vld [vmem:[%s4793_s6 + $0x7f0] ss:$24 sps:$4 sm:$0xff]  }
 0x191   : > { %2928 = vmatprep.subr.bf16.mxu1 %v3974_v21  ;;  %v4052_v21 = vld [vmem:[%s4793_s6 + $0x824] ss:$24 sps:$4 sm:$0xff]  }
 0x193   : > { %2888 = vmatpush1.bf16.msra.mxu0 %v3969_v22  ;;  %v4050_v22 = vld [vmem:[%s4793_s6 + $0x820] ss:$24 sps:$4 sm:$0xff]  }
 0x194   : > { %2929 = vmatpush1.bf16.msra.mxu1 %v3972_v23  ;;  %2889 = vmatprep.subr.bf16.mxu0 %v3977_v24  ;;  %v4055_v23 = vld [vmem:[%s4793_s6 + $0x854] ss:$24 sps:$4 sm:$0xff]   ;;  %v4053_v24 = vld [vmem:[%s4793_s6 + $0x850] ss:$24 sps:$4 sm:$0xff]  }
 0x195   : > { %2930 = vmatprep.subr.bf16.mxu1 %v3980_v25  ;;  %v4058_v25 = vld [vmem:[%s4793_s6 + $0x884] ss:$24 sps:$4 sm:$0xff]  }
 0x197   : > { %2890 = vmatpush1.bf16.msra.mxu0 %v3975_v26  ;;  %v4056_v26 = vld [vmem:[%s4793_s6 + $0x880] ss:$24 sps:$4 sm:$0xff]  }
 0x198   : > { %2931 = vmatpush1.bf16.msra.mxu1 %v3978_v27  ;;  %2891 = vmatprep.subr.bf16.mxu0 %v3983_v28  ;;  %v4061_v27 = vld [vmem:[%s4793_s6 + $0x8b4] ss:$24 sps:$4 sm:$0xff]   ;;  %v4059_v28 = vld [vmem:[%s4793_s6 + $0x8b0] ss:$24 sps:$4 sm:$0xff]  }
 0x199   : > { %2932 = vmatprep.subr.bf16.mxu1 %v3986_v29  ;;  %v4064_v29 = vld [vmem:[%s4793_s6 + $0x8e4] ss:$24 sps:$4 sm:$0xff]  }
 0x19b   : > { %2892 = vmatpush1.bf16.msra.mxu0 %v3981_v30  ;;  %v4062_v30 = vld [vmem:[%s4793_s6 + $0x8e0] ss:$24 sps:$4 sm:$0xff]  }
 0x19c   : > { %2933 = vmatpush1.bf16.msra.mxu1 %v3984_v31  ;;  %2893 = vmatprep.subr.bf16.mxu0 %v3989_v32  ;;  %v3017_v31 = vlaneseq }
 0x19d   : > { %2934 = vmatprep.subr.bf16.mxu1 %v3992_v33 }
 0x19e   : > { %v5137_v32 = vshrl.u32 %v3017_v31, 7 }
 0x19f   : > { %2894 = vmatpush1.bf16.msra.mxu0 %v3987_v34  ;;  %v5144_v34 = vld [vmem:[%s845_s22] sm:$0x3f] }
 0x1a0   : > { %2935 = vmatpush1.bf16.msra.mxu1 %v3990_v35  ;;  %2895 = vmatprep.subr.bf16.mxu0 %v3995_v36  ;;  %v3019_v33 = vsub.s32 0, %v5137_v32  ;;  %v3023_v35 = vsub.s32 1, %v5137_v32 }
 0x1a1   : > { %2936 = vmatprep.subr.bf16.mxu1 %v3998_v37 }
 0x1a2   : > { %v3020_v36 = vrot.slane %v5144_v34, %v3019_v33  ;;  %v3024_v37 = vrot.slane %v5144_v34, %v3023_v35 }
 0x1a3   : > { %2896 = vmatpush1.bf16.msra.mxu0 %v3993_v40 }
 0x1a4   : > { %2937 = vmatpush1.bf16.msra.mxu1 %v3996_v41  ;;  %2897 = vmatprep.subr.bf16.mxu0 %v4001_v42 }
 0x1a5   : > { %2938 = vmatprep.subr.bf16.mxu1 %v4004_v43 }
 0x1a7   : > { %2898 = vmatpush1.bf16.msra.mxu0 %v3999_v44 }
 0x1a8   : > { %2939 = vmatpush1.bf16.msra.mxu1 %v4002_v45  ;;  %2899 = vmatprep.subr.bf16.mxu0 %v4007_v47 }
 0x1a9   : > { %2940 = vmatprep.subr.bf16.mxu1 %v4010_v48 }
 0x1ab   : > { %2900 = vmatpush1.bf16.msra.mxu0 %v4005_v49 }
 0x1ac   : > { %2941 = vmatpush1.bf16.msra.mxu1 %v4008_v50  ;;  %2901 = vmatprep.subr.bf16.mxu0 %v4013_v51 }
 0x1ad   : > { %2942 = vmatprep.subr.bf16.mxu1 %v4016_v52 }
 0x1af   : > { %2902 = vmatpush1.bf16.msra.mxu0 %v4011_v53 }
 0x1b0   : > { %2943 = vmatpush1.bf16.msra.mxu1 %v4014_v54  ;;  %2953 = vmatprep.subr.bf16.mxu0 %v4019_v55 }
 0x1b2   : > { %2904 = vmatmul.mubr.bf16.vlgmr.msra.gmra.mrb[12].mxu0 %v4881_v38  ;;  %v4031_v38 = vld [vmem:[%s4793_s6 + $0x6d4] ss:$24 sps:$4 sm:$0xff]  }
 0x1b3   : > { %2945 = vmatmul.mubr.bf16.vlgmr.msra.gmra.mrb[12].mxu1 %v4883_v39  ;;  %2954 = vmatpush1.bf16.msra.mxu0 %v4017_v56  ;;  %v4029_v39 = vld [vmem:[%s4793_s6 + $0x6d0] ss:$24 sps:$4 sm:$0xff]  }
 0x1b4   : > { %2985 = vmatprep.mubr.bf16.mxu0 %v4918_v2  ;;  %2955 = vmatprep.subr.bf16.mxu0 %v4022_v57  ;;  %v4032_v2 = vld [vmem:[%s4793_s6 + $0x700] ss:$24 sps:$4 sm:$0xff]  }
 0x1b7   : > { %2956 = vmatpush1.bf16.msra.mxu0 %v4020_v58 }
 0x1b8   : > { %2957 = vmatprep.subr.bf16.mxu0 %v4025_v59 }
 0x1bb   : > { %2958 = vmatpush1.bf16.msra.mxu0 %v4023_v60 }
 0x1bc   : > { %2959 = vmatprep.subr.bf16.mxu0 %v4028_v61 }
 0x1bf   : > { %2960 = vmatpush1.bf16.msra.mxu0 %v4026_v62 }
 0x1c0   : > { %2961 = vmatprep.subr.bf16.mxu0 %v4031_v38 }
 0x1c3   : > { %2962 = vmatpush1.bf16.msra.mxu0 %v4029_v39 }
 0x1c4   : > { %2963 = vmatprep.subr.bf16.mxu0 %v4034_v63 }
 0x1c5   : > { %v2659_v1 = vpop.f32.mrb[0].mxu0 }
 0x1c6   : > { %v2700_v15 = vpop.f32.mrb[0].mxu1  ;;  %v2661_v3 = vpop.f32.mrb[1].mxu0 }
 0x1c7   : > { %v2701_v19 = vadd.f32 %v2700_v15, %v2659_v1  ;;  %v2702_v4 = vpop.f32.mrb[1].mxu1  ;;  %v2663_v6 = vpop.f32.mrb[2].mxu0  ;;  %2964 = vmatpush1.bf16.msra.mxu0 %v4032_v2 }
 0x1c8   : > { %v2703_v5 = vadd.f32 %v2702_v4, %v2661_v3  ;;  %v2704_v8 = vpop.f32.mrb[2].mxu1  ;;  %v2664_v9 = vpop.f32.mrb[3].mxu0  ;;  %2965 = vmatprep.subr.bf16.mxu0 %v4037_v0  ;;  %v3027_v3 = vsub.s32 2, %v5137_v32  ;;  %v3031_v4 = vsub.s32 3, %v5137_v32 }
 0x1c9   : > { %v2705_v11 = vpop.f32.mrb[3].mxu1 }
 0x1ca   : > { %v3028_v9 = vrot.slane %v5144_v34, %v3027_v3 }
 0x1cb   : > { %2966 = vmatpush1.bf16.msra.mxu0 %v4035_v7 }
 0x1cc   : > { %2967 = vmatprep.subr.bf16.mxu0 %v4040_v10 }
 0x1cf   : > { %2968 = vmatpush1.bf16.msra.mxu0 %v4038_v12 }
 0x1d0   : > { %2969 = vmatprep.subr.bf16.mxu0 %v4043_v13  ;;  %v3032_v13 = vrot.slane %v5144_v34, %v3031_v4 }
 0x1d3   : > { %2970 = vmatpush1.bf16.msra.mxu0 %v4041_v14 }
 0x1d4   : > { %2971 = vmatprep.subr.bf16.mxu0 %v4046_v16 }
 0x1d7   : > { %2972 = vmatpush1.bf16.msra.mxu0 %v4044_v17 }
 0x1d8   : > { %2973 = vmatprep.subr.bf16.mxu0 %v4049_v18 }
 0x1db   : > { %2974 = vmatpush1.bf16.msra.mxu0 %v4047_v20 }
 0x1dc   : > { %2975 = vmatprep.subr.bf16.mxu0 %v4052_v21 }
 0x1df   : > { %2976 = vmatpush1.bf16.msra.mxu0 %v4050_v22 }
 0x1e0   : > { %2977 = vmatprep.subr.bf16.mxu0 %v4055_v23 }
 0x1e3   : > { %2978 = vmatpush1.bf16.msra.mxu0 %v4053_v24 }
 0x1e4   : > { %2979 = vmatprep.subr.bf16.mxu0 %v4058_v25 }
 0x1e7   : > { %2980 = vmatpush1.bf16.msra.mxu0 %v4056_v26 }
 0x1e8   : > { %2981 = vmatprep.subr.bf16.mxu0 %v4061_v27 }
 0x1eb   : > { %2982 = vmatpush1.bf16.msra.mxu0 %v4059_v28 }
 0x1ec   : > { %2983 = vmatprep.subr.bf16.mxu0 %v4064_v29 }
 0x1ef   : > { %2984 = vmatpush1.bf16.msra.mxu0 %v4062_v30 }
 0x1f2   : > { %2986 = vmatmul.mubr.bf16.vlgmr.msra.gmra.mrb[16].mxu0 %v4962_v46 }
 0x205   : > { %v2741_v46 = vpop.f32.mrb[4].mxu0 }
 0x206   : > { %v2782_v40 = vpop.f32.mrb[4].mxu1  ;;  %v2742_v41 = vadd.f32 %v2741_v46, %v2701_v19  ;;  %v2743_v42 = vpop.f32.mrb[5].mxu0 }
 0x207   : > { %v2784_v43 = vpop.f32.mrb[5].mxu1  ;;  %v2744_v44 = vadd.f32 %v2743_v42, %v2703_v5  ;;  %v2745_v45 = vpop.f32.mrb[6].mxu0 }
 0x208   : > { %v2786_v47 = vpop.f32.mrb[6].mxu1  ;;  %v3047_v48 = vadd.f32 %v3020_v36, %v2742_v41  ;;  %v2746_v49 = vpop.f32.mrb[7].mxu0 }
 0x209   : > { %v2787_v50 = vpop.f32.mrb[7].mxu1  ;;  %v3048_v51 = vadd.f32 %v3024_v37, %v2744_v44 }
 0x20a   : > { %v3059_v52 = vmul.f32 0.044715, %v3047_v48  ;;  %v3053_v39 = vmul.f32 0.5, %v3047_v48 }
 0x20b   : > { %v3060_v53 = vmul.f32 0.044715, %v3048_v51  ;;  %v3054_v2 = vmul.f32 0.5, %v3048_v51 }
 0x20c   : > { %v3065_v54 = vmul.f32 %v3059_v52, %v3047_v48 }
 0x20d   : > { %v3066_v55 = vmul.f32 %v3060_v53, %v3048_v51 }
 0x20e   : > { %v3071_v56 = vmul.f32 %v3065_v54, %v3047_v48 }
 0x20f   : > { %v3072_v57 = vmul.f32 %v3066_v55, %v3048_v51 }
 0x210   : > { %v3077_v58 = vadd.f32 %v3071_v56, %v3047_v48  ;;  %v3035_v56 = vsub.s32 4, %v5137_v32 }
 0x211   : > { %v3078_v59 = vadd.f32 %v3072_v57, %v3048_v51  ;;  %v3039_v57 = vsub.s32 5, %v5137_v32 }
 0x212   : > { %v3083_v60 = vmul.f32 0.7978846, %v3077_v58  ;;  %v3036_v58 = vrot.slane %v5144_v34, %v3035_v56 }
 0x213   : > { %v3084_v61 = vmul.f32 0.7978846, %v3078_v59 }
 0x214   : > { %4065 = vtanh.f32 %v3083_v60  ;;  %v3040_v60 = vrot.slane %v5144_v34, %v3039_v57 }
 0x215   : > { %4067 = vtanh.f32 %v3084_v61 }
 0x21e   : > { %v4066_v62 = vpop.eup %4065 }
 0x21f   : > { %v4068_v38 = vpop.eup %4067  ;;  %v3095_v63 = vadd.f32 1.0, %v4066_v62 }
 0x220   : > { %v3096_v0 = vadd.f32 1.0, %v4068_v38 }
 0x221   : > { %v3101_v1 = vmul.f32 %v3095_v63, %v3053_v39 }
 0x222   : > { %v3102_v15 = vmul.f32 %v3096_v0, %v3054_v2 }
 0x224   : > { %v3565_v19 = vpack.c.bf16 %v3102_v15, %v3101_v1 }
 0x226   : > { %3131 = vst [vmem:[%s5155_s27] sm:$0xff] %v3565_v19 }
 0x245   : > { %v2823_v5 = vpop.f32.mrb[8].mxu0 }
 0x246   : > { %v2864_v6 = vpop.f32.mrb[8].mxu1  ;;  %v2824_v7 = vadd.f32 %v2823_v5, %v2782_v40  ;;  %v2825_v8 = vpop.f32.mrb[9].mxu0 }
 0x247   : > { %v2866_v10 = vpop.f32.mrb[9].mxu1  ;;  %v2826_v11 = vadd.f32 %v2825_v8, %v2784_v43  ;;  %v2827_v12 = vpop.f32.mrb[10].mxu0 }
 0x248   : > { %v2868_v14 = vpop.f32.mrb[10].mxu1  ;;  %v2865_v16 = vadd.f32 %v2864_v6, %v2824_v7  ;;  %v2828_v17 = vpop.f32.mrb[11].mxu0 }
 0x249   : > { %v2869_v18 = vpop.f32.mrb[11].mxu1  ;;  %v2867_v20 = vadd.f32 %v2866_v10, %v2826_v11 }
 0x24a   : > { %v3049_v21 = vadd.f32 %v3028_v9, %v2865_v16 }
 0x24b   : > { %v3050_v22 = vadd.f32 %v3032_v13, %v2867_v20 }
 0x24c   : > { %v3061_v23 = vmul.f32 0.044715, %v3049_v21  ;;  %v3055_v46 = vmul.f32 0.5, %v3049_v21 }
 0x24d   : > { %v3062_v24 = vmul.f32 0.044715, %v3050_v22  ;;  %v3056_v40 = vmul.f32 0.5, %v3050_v22 }
 0x24e   : > { %v3067_v25 = vmul.f32 %v3061_v23, %v3049_v21 }
 0x24f   : > { %v3068_v26 = vmul.f32 %v3062_v24, %v3050_v22 }
 0x250   : > { %v3073_v27 = vmul.f32 %v3067_v25, %v3049_v21 }
 0x251   : > { %v3074_v28 = vmul.f32 %v3068_v26, %v3050_v22 }
 0x252   : > { %v3079_v29 = vadd.f32 %v3073_v27, %v3049_v21 }
 0x253   : > { %v3080_v30 = vadd.f32 %v3074_v28, %v3050_v22 }
 0x254   : > { %v3085_v31 = vmul.f32 0.7978846, %v3079_v29 }
 0x255   : > { %v3086_v33 = vmul.f32 0.7978846, %v3080_v30 }
 0x256   : > { %4069 = vtanh.f32 %v3085_v31 }
 0x257   : > { %4071 = vtanh.f32 %v3086_v33 }
 0x260   : > { %v4070_v35 = vpop.eup %4069 }
 0x261   : > { %v4072_v36 = vpop.eup %4071  ;;  %v3097_v37 = vadd.f32 1.0, %v4070_v35 }
 0x262   : > { %v3098_v41 = vadd.f32 1.0, %v4072_v36 }
 0x263   : > { %v3103_v42 = vmul.f32 %v3097_v37, %v3055_v46 }
 0x264   : > { %v3104_v43 = vmul.f32 %v3098_v41, %v3056_v40 }
 0x266   : > { %v3566_v44 = vpack.c.bf16 %v3104_v43, %v3103_v42 }
 0x268   : > { %3132 = vst [vmem:[%s5155_s27 + $0x8] sm:$0xff] %v3566_v44 }
 0x285   : > { %v2905_v45 = vpop.f32.mrb[12].mxu0 }
 0x286   : > { %v2946_v47 = vpop.f32.mrb[12].mxu1  ;;  %v2907_v49 = vpop.f32.mrb[13].mxu0 }
 0x287   : > { %v2947_v48 = vadd.f32 %v2946_v47, %v2905_v45  ;;  %v2948_v50 = vpop.f32.mrb[13].mxu1  ;;  %v2909_v52 = vpop.f32.mrb[14].mxu0 }
 0x288   : > { %v2949_v51 = vadd.f32 %v2948_v50, %v2907_v49  ;;  %v2950_v53 = vpop.f32.mrb[14].mxu1  ;;  %v2910_v54 = vpop.f32.mrb[15].mxu0 }
 0x289   : > { %v2951_v55 = vpop.f32.mrb[15].mxu1 }
 0x2c5   : > { %v2987_v59 = vpop.f32.mrb[16].mxu0 }
 0x2c6   : > { %v2988_v61 = vadd.f32 %v2987_v59, %v2947_v48  ;;  %v2989_v62 = vpop.f32.mrb[17].mxu0 }
 0x2c7   : > { %v2990_v38 = vadd.f32 %v2989_v62, %v2949_v51  ;;  %v2991_v39 = vpop.f32.mrb[18].mxu0 }
 0x2c8   : > { %v3051_v63 = vadd.f32 %v3036_v58, %v2988_v61  ;;  %v2992_v2 = vpop.f32.mrb[19].mxu0 }
 0x2c9   : > { %v3052_v0 = vadd.f32 %v3040_v60, %v2990_v38 }
 0x2ca   : > { %v3063_v1 = vmul.f32 0.044715, %v3051_v63  ;;  %v3057_v10 = vmul.f32 0.5, %v3051_v63 }
 0x2cb   : > { %v3064_v15 = vmul.f32 0.044715, %v3052_v0  ;;  %v3058_v12 = vmul.f32 0.5, %v3052_v0 }
 0x2cc   : > { %v3069_v19 = vmul.f32 %v3063_v1, %v3051_v63 }
 0x2cd   : > { %v3070_v3 = vmul.f32 %v3064_v15, %v3052_v0 }
 0x2ce   : > { %v3075_v4 = vmul.f32 %v3069_v19, %v3051_v63 }
 0x2cf   : > { %v3076_v5 = vmul.f32 %v3070_v3, %v3052_v0 }
 0x2d0   : > { %v3081_v32 = vadd.f32 %v3075_v4, %v3051_v63 }
 0x2d1   : > { %v3082_v6 = vadd.f32 %v3076_v5, %v3052_v0 }
 0x2d2   : > { %v3087_v7 = vmul.f32 0.7978846, %v3081_v32 }
 0x2d3   : > { %v3088_v8 = vmul.f32 0.7978846, %v3082_v6 }
 0x2d4   : > { %4073 = vtanh.f32 %v3087_v7 }
 0x2d5   : > { %4075 = vtanh.f32 %v3088_v8 }
 0x2de   : > { %v4074_v34 = vpop.eup %4073 }
 0x2df   : > { %v4076_v9 = vpop.eup %4075  ;;  %v3099_v11 = vadd.f32 1.0, %v4074_v34 }
 0x2e0   : > { %v3100_v13 = vadd.f32 1.0, %v4076_v9 }
 0x2e1   : > { %v3105_v14 = vmul.f32 %v3099_v11, %v3057_v10 }
 0x2e2   : > { %v3106_v16 = vmul.f32 %v3100_v13, %v3058_v12 }
 0x2e4   : > { %v3567_v17 = vpack.c.bf16 %v3106_v16, %v3105_v14 }
 0x2e6   : > { %3133 = vst [vmem:[%s5155_s27 + $0x10] sm:$0xff] %v3567_v17 }
 0x2e7 PF: > { %s13_s18 = sadd.s32 1, %s4131_s18   ;;  %s5193_s12 = smov %s4111_s13 }
 0x2e8   : > { %p10_p12 = scmp.ge.s32.totalorder %s13_s18, 10   ;;  %s5194_s13 = smov %s4202_s23 }
 0x2e9   : > { %s5195_s14 = smov %s4123_s16  ;;  %s5196_s15 = smov %s4127_s17 }
 0x2ea   : > { %s5197_s16 = smov %s5200_s19  ;;  %s5198_s17 = smov %s5204_s20 }
 0x2eb   :  { %12 = sbr.rel (!%p10_p12) target bundleno = 4 (0x4), region = 104 }

// kernel: bert_with_regularization_forward.15
= control target key start
LH: loop header
LB: loop body
LE: loop exit
PB: predicated region body
PF: predicated region fallthrough
CT: control target
= control target key end

     0   :  { %s3608_s21 = smov 0   ;;  %s3610_s22 = smov 0   ;;  %s4597_s0 = inlined_call_operand.vmem [shape: bf16[16,768], index: 0, kind: input, shape index: {}]   ;;  %s4598_s1 = inlined_call_operand.vmem [shape: bf16[768,768], index: 1, kind: input, shape index: {}]   ;;  %s4599_s2 = inlined_call_operand.vmem [shape: f32[1,768], index: 2, kind: input, shape index: {}]   ;;  %s4600_s3 = inlined_call_operand.vmem [shape: bf16[16,768], index: 3, kind: input, shape index: {}]   ;;  %s4601_s4 = inlined_call_operand.vmem [shape: f32[1,768], index: 4, kind: input, shape index: {}]   ;;  %s4602_s5 = inlined_call_operand.vmem [shape: f32[1,768], index: 5, kind: input, shape index: {}]   ;;  %s4603_s6 = inlined_call_operand.vmem [shape: bf16[16,768], index: 6, kind: output, shape index: {}]  }
   0x1   :  { %s3612_s23 = smov 0  }
   0x2 LB: > { %s28_s24 = sadd.s32 1, %s3567_s22  ;;  %p2778_p0 = scmp.ge.s32.totalorder %s3571_s23, 1  ;;  %s3571_s23 = sphi %s3612_s23, %s16_s23   ;;  %s3567_s22 = sphi %s3610_s22, %s4605_s22   ;;  %s3563_s21 = sphi %s3608_s21, %s4604_s21  }
   0x3   : > { %p30_p1 = scmp.ge.s32.totalorder %s28_s24, 2  ;;  %p253_p2 = scmp.lt.s32.totalorder %s3571_s23, 3 }
   0x5   : > { %s4607_s24 = smov (%p30_p1, %s28_s24), 0  ;;  %p254_p3 = pnand %p2778_p0, %p253_p2 }
   0x6   : > { %v3109_v0 = vld [vmem:[%s4598_s1 + $0x4] ss:$24 sps:$4 sm:$0xff] (!%p254_p3)   ;;  %v3113_v2 = vld [vmem:[%s4598_s1] ss:$24 sps:$4 sm:$0xff] (!%p254_p3)   ;;  %v3115_v4 = vld [vmem:[%s4598_s1 + $0x34] ss:$24 sps:$4 sm:$0xff] (!%p254_p3)  }
   0x7   : > { %257 = sbr.rel (%p254_p3) target bundleno = 874 (0x36a), region = 44  ;;  %v3111_v1 = vld [vmem:[%s4598_s1 + $0x304] ss:$24 sps:$4 sm:$0xff] (!%p254_p3)   ;;  %2093 = vmatprep.subr.bf16.mxu0 (!%p254_p3), %v3109_v0  ;;  %v3114_v3 = vld [vmem:[%s4598_s1 + $0x300] ss:$24 sps:$4 sm:$0xff] (!%p254_p3)   ;;  %p299_p4 = scmp.lt.s32.totalorder (!%p254_p3), %s3563_s21, 1 }
   0x8   : > { %2134 = vmatprep.subr.bf16.mxu1 (!%p254_p3), %v3111_v1  ;;  %2094 = vmatpush1.bf16.msra.mxu0 (!%p254_p3), %v3113_v2  ;;  %v3117_v5 = vld [vmem:[%s4598_s1 + $0x334] ss:$24 sps:$4 sm:$0xff] (!%p254_p3)   ;;  %v3119_v6 = vld [vmem:[%s4598_s1 + $0x30] ss:$24 sps:$4 sm:$0xff] (!%p254_p3)   ;;  %v3121_v8 = vld [vmem:[%s4598_s1 + $0x64] ss:$24 sps:$4 sm:$0xff] (!%p254_p3)  }
   0x9   : > { %2135 = vmatpush1.bf16.msra.mxu1 (!%p254_p3), %v3114_v3  ;;  %2095 = vmatprep.subr.bf16.mxu0 (!%p254_p3), %v3115_v4  ;;  %v3120_v7 = vld [vmem:[%s4598_s1 + $0x330] ss:$24 sps:$4 sm:$0xff] (!%p254_p3)   ;;  %v3123_v9 = vld [vmem:[%s4598_s1 + $0x364] ss:$24 sps:$4 sm:$0xff] (!%p254_p3)   ;;  %v3125_v10 = vld [vmem:[%s4598_s1 + $0x60] ss:$24 sps:$4 sm:$0xff] (!%p254_p3)  }
   0xa   : > { %2136 = vmatprep.subr.bf16.mxu1 (!%p254_p3), %v3117_v5  ;;  %v3126_v11 = vld [vmem:[%s4598_s1 + $0x360] ss:$24 sps:$4 sm:$0xff] (!%p254_p3)   ;;  %v3127_v12 = vld [vmem:[%s4598_s1 + $0x94] ss:$24 sps:$4 sm:$0xff] (!%p254_p3)   ;;  %v3131_v14 = vld [vmem:[%s4598_s1 + $0x90] ss:$24 sps:$4 sm:$0xff] (!%p254_p3)  }
   0xb   : > { %v3129_v13 = vld [vmem:[%s4598_s1 + $0x394] ss:$24 sps:$4 sm:$0xff] (!%p254_p3)   ;;  %v3132_v15 = vld [vmem:[%s4598_s1 + $0x390] ss:$24 sps:$4 sm:$0xff] (!%p254_p3)   ;;  %v3133_v16 = vld [vmem:[%s4598_s1 + $0xc4] ss:$24 sps:$4 sm:$0xff] (!%p254_p3)  }
   0xc   : > { %2096 = vmatpush1.bf16.msra.mxu0 (!%p254_p3), %v3119_v6  ;;  %v3135_v17 = vld [vmem:[%s4598_s1 + $0x3c4] ss:$24 sps:$4 sm:$0xff] (!%p254_p3)   ;;  %v3137_v18 = vld [vmem:[%s4598_s1 + $0xc0] ss:$24 sps:$4 sm:$0xff] (!%p254_p3)   ;;  %v3139_v20 = vld [vmem:[%s4598_s1 + $0xf4] ss:$24 sps:$4 sm:$0xff] (!%p254_p3)  }
   0xd   : > { %2137 = vmatpush1.bf16.msra.mxu1 (!%p254_p3), %v3120_v7  ;;  %2097 = vmatprep.subr.bf16.mxu0 (!%p254_p3), %v3121_v8  ;;  %v3138_v19 = vld [vmem:[%s4598_s1 + $0x3c0] ss:$24 sps:$4 sm:$0xff] (!%p254_p3)   ;;  %v3141_v21 = vld [vmem:[%s4598_s1 + $0x3f4] ss:$24 sps:$4 sm:$0xff] (!%p254_p3)   ;;  %v3143_v22 = vld [vmem:[%s4598_s1 + $0xf0] ss:$24 sps:$4 sm:$0xff] (!%p254_p3)  }
   0xe   : > { %2138 = vmatprep.subr.bf16.mxu1 %v3123_v9  ;;  %v3144_v23 = vld [vmem:[%s4598_s1 + $0x3f0] ss:$24 sps:$4 sm:$0xff]   ;;  %v3145_v24 = vld [vmem:[%s4598_s1 + $0x124] ss:$24 sps:$4 sm:$0xff]   ;;  %v3149_v26 = vld [vmem:[%s4598_s1 + $0x120] ss:$24 sps:$4 sm:$0xff]  }
   0xf   : > { %v3147_v25 = vld [vmem:[%s4598_s1 + $0x424] ss:$24 sps:$4 sm:$0xff]   ;;  %v3150_v27 = vld [vmem:[%s4598_s1 + $0x420] ss:$24 sps:$4 sm:$0xff]   ;;  %v3151_v28 = vld [vmem:[%s4598_s1 + $0x154] ss:$24 sps:$4 sm:$0xff]  }
  0x10   : > { %2098 = vmatpush1.bf16.msra.mxu0 %v3125_v10  ;;  %v3153_v29 = vld [vmem:[%s4598_s1 + $0x454] ss:$24 sps:$4 sm:$0xff]   ;;  %v3155_v30 = vld [vmem:[%s4598_s1 + $0x150] ss:$24 sps:$4 sm:$0xff]   ;;  %v3157_v32 = vld [vmem:[%s4598_s1 + $0x184] ss:$24 sps:$4 sm:$0xff]  }
  0x11   : > { %2139 = vmatpush1.bf16.msra.mxu1 %v3126_v11  ;;  %2099 = vmatprep.subr.bf16.mxu0 %v3127_v12  ;;  %v3156_v31 = vld [vmem:[%s4598_s1 + $0x450] ss:$24 sps:$4 sm:$0xff]   ;;  %v3159_v33 = vld [vmem:[%s4598_s1 + $0x484] ss:$24 sps:$4 sm:$0xff]   ;;  %v3161_v34 = vld [vmem:[%s4598_s1 + $0x180] ss:$24 sps:$4 sm:$0xff]  }
  0x12   : > { %2140 = vmatprep.subr.bf16.mxu1 %v3129_v13  ;;  %v3162_v35 = vld [vmem:[%s4598_s1 + $0x480] ss:$24 sps:$4 sm:$0xff]   ;;  %s4609_s21 = smov (!%p299_p4, %s3563_s21), 1  ;;  %v3163_v36 = vld [vmem:[%s4598_s1 + $0x1b4] ss:$24 sps:$4 sm:$0xff]  }
  0x13   : > { %v3165_v37 = vld [vmem:[%s4598_s1 + $0x4b4] ss:$24 sps:$4 sm:$0xff]   ;;  %v3167_v38 = vld [vmem:[%s4598_s1 + $0x1b0] ss:$24 sps:$4 sm:$0xff]   ;;  %s3747_s19 = smul.u32 24, %s4609_s21 }
  0x14   : > { %2100 = vmatpush1.bf16.msra.mxu0 %v3131_v14  ;;  %v3168_v39 = vld [vmem:[%s4598_s1 + $0x4b0] ss:$24 sps:$4 sm:$0xff]   ;;  %v3169_v40 = vld [vmem:[%s4598_s1 + $0x1e4] ss:$24 sps:$4 sm:$0xff]   ;;  %v3173_v42 = vld [vmem:[%s4598_s1 + $0x1e0] ss:$24 sps:$4 sm:$0xff]  }
  0x15   : > { %2141 = vmatpush1.bf16.msra.mxu1 %v3132_v15  ;;  %2101 = vmatprep.subr.bf16.mxu0 %v3133_v16  ;;  %v3171_v41 = vld [vmem:[%s4598_s1 + $0x4e4] ss:$24 sps:$4 sm:$0xff]   ;;  %v3174_v43 = vld [vmem:[%s4598_s1 + $0x4e0] ss:$24 sps:$4 sm:$0xff]   ;;  %s3768_s11 = scalar_lea.vmem %s4597_s0, %s3747_s19  ;;  %v3175_v44 = vld [vmem:[%s4598_s1 + $0x214] ss:$24 sps:$4 sm:$0xff]   ;;  %s319_s8 = scalar_lea.vmem %s4600_s3, %s3747_s19 }
  0x16   : > { %2142 = vmatprep.subr.bf16.mxu1 %v3135_v17  ;;  %v3177_v45 = vld [vmem:[%s4598_s1 + $0x514] ss:$24 sps:$4 sm:$0xff]   ;;  %v341_v46 = vld [vmem:[%s3768_s11] sm:$0xff]  ;;  %v3179_v49 = vld [vmem:[%s4598_s1 + $0x210] ss:$24 sps:$4 sm:$0xff]   ;;  %s324_s15 = scalar_lea.vmem %s4603_s6, %s3747_s19 }
  0x17   : > { %v3777_v47 = vcombine.high %v341_v46, %v341_v46  ;;  %v342_v48 = vld [vmem:[%s3768_s11 + $0x8] sm:$0xff]  ;;  %v3181_v52 = vld [vmem:[%s4598_s1 + $0x244] ss:$24 sps:$4 sm:$0xff]   ;;  %v3185_v54 = vld [vmem:[%s4598_s1 + $0x240] ss:$24 sps:$4 sm:$0xff]   ;;  %v3844_v6 = vcombine.low %v341_v46, %v341_v46 }
  0x18   : > { %2102 = vmatpush1.bf16.msra.mxu0 %v3137_v18  ;;  %v3180_v50 = vld [vmem:[%s4598_s1 + $0x510] ss:$24 sps:$4 sm:$0xff]   ;;  %v3786_v51 = vcombine.high %v342_v48, %v342_v48  ;;  %v3183_v53 = vld [vmem:[%s4598_s1 + $0x544] ss:$24 sps:$4 sm:$0xff]   ;;  %v3186_v55 = vld [vmem:[%s4598_s1 + $0x540] ss:$24 sps:$4 sm:$0xff]   ;;  %v3846_v7 = vcombine.low %v342_v48, %v342_v48 }
  0x19   : > { %2143 = vmatpush1.bf16.msra.mxu1 %v3138_v19  ;;  %2103 = vmatprep.subr.bf16.mxu0 %v3139_v20  ;;  %v3187_v56 = vld [vmem:[%s4598_s1 + $0x274] ss:$24 sps:$4 sm:$0xff]   ;;  %v3191_v58 = vld [vmem:[%s4598_s1 + $0x270] ss:$24 sps:$4 sm:$0xff]   ;;  %v3193_v60 = vld [vmem:[%s4598_s1 + $0x2a4] ss:$24 sps:$4 sm:$0xff]  }
  0x1a   : > { %2144 = vmatprep.subr.bf16.mxu1 %v3141_v21  ;;  %2125 = vmatprep.mubr.bf16.mxu0 %v3777_v47  ;;  %v3189_v57 = vld [vmem:[%s4598_s1 + $0x574] ss:$24 sps:$4 sm:$0xff]   ;;  %v3192_v59 = vld [vmem:[%s4598_s1 + $0x570] ss:$24 sps:$4 sm:$0xff]   ;;  %v3195_v61 = vld [vmem:[%s4598_s1 + $0x5a4] ss:$24 sps:$4 sm:$0xff]  }
  0x1b   : > { %2166 = vmatprep.mubr.bf16.mxu1 %v3786_v51  ;;  %v3197_v62 = vld [vmem:[%s4598_s1 + $0x2a0] ss:$24 sps:$4 sm:$0xff]   ;;  %v3199_v0 = vld [vmem:[%s4598_s1 + $0x2d4] ss:$24 sps:$4 sm:$0xff]   ;;  %v3203_v2 = vld [vmem:[%s4598_s1 + $0x2d0] ss:$24 sps:$4 sm:$0xff]  }
  0x1c   : > { %2104 = vmatpush1.bf16.msra.mxu0 %v3143_v22  ;;  %v3198_v63 = vld [vmem:[%s4598_s1 + $0x5a0] ss:$24 sps:$4 sm:$0xff]   ;;  %v3201_v1 = vld [vmem:[%s4598_s1 + $0x5d4] ss:$24 sps:$4 sm:$0xff]   ;;  %v3204_v3 = vld [vmem:[%s4598_s1 + $0x5d0] ss:$24 sps:$4 sm:$0xff]  }
  0x1d   : > { %2145 = vmatpush1.bf16.msra.mxu1 %v3144_v23  ;;  %2105 = vmatprep.subr.bf16.mxu0 %v3145_v24  ;;  %v3211_v4 = vld [vmem:[%s4598_s1 + $0x604] ss:$24 sps:$4 sm:$0xff]   ;;  %v3209_v8 = vld [vmem:[%s4598_s1 + $0x600] ss:$24 sps:$4 sm:$0xff]   ;;  %v3217_v10 = vld [vmem:[%s4598_s1 + $0x634] ss:$24 sps:$4 sm:$0xff]  }
  0x1e   : > { %2146 = vmatprep.subr.bf16.mxu1 %v3147_v25  ;;  %v3214_v5 = vld [vmem:[%s4598_s1 + $0xc] ss:$24 sps:$4 sm:$0xff]   ;;  %v3212_v9 = vld [vmem:[%s4598_s1 + $0x8] ss:$24 sps:$4 sm:$0xff]   ;;  %v3220_v11 = vld [vmem:[%s4598_s1 + $0x3c] ss:$24 sps:$4 sm:$0xff]  }
  0x1f   : > { %v3215_v12 = vld [vmem:[%s4598_s1 + $0x630] ss:$24 sps:$4 sm:$0xff]   ;;  %v3223_v14 = vld [vmem:[%s4598_s1 + $0x664] ss:$24 sps:$4 sm:$0xff]   ;;  %v3221_v16 = vld [vmem:[%s4598_s1 + $0x660] ss:$24 sps:$4 sm:$0xff]  }
  0x20   : > { %2106 = vmatpush1.bf16.msra.mxu0 %v3149_v26  ;;  %v3218_v13 = vld [vmem:[%s4598_s1 + $0x38] ss:$24 sps:$4 sm:$0xff]   ;;  %v3226_v15 = vld [vmem:[%s4598_s1 + $0x6c] ss:$24 sps:$4 sm:$0xff]   ;;  %v3224_v17 = vld [vmem:[%s4598_s1 + $0x68] ss:$24 sps:$4 sm:$0xff]  }
  0x21   : > { %2147 = vmatpush1.bf16.msra.mxu1 %v3150_v27  ;;  %2107 = vmatprep.subr.bf16.mxu0 %v3151_v28  ;;  %v3229_v18 = vld [vmem:[%s4598_s1 + $0x694] ss:$24 sps:$4 sm:$0xff]   ;;  %v3227_v20 = vld [vmem:[%s4598_s1 + $0x690] ss:$24 sps:$4 sm:$0xff]   ;;  %v3235_v22 = vld [vmem:[%s4598_s1 + $0x6c4] ss:$24 sps:$4 sm:$0xff]  }
  0x22   : > { %2148 = vmatprep.subr.bf16.mxu1 %v3153_v29  ;;  %v3232_v19 = vld [vmem:[%s4598_s1 + $0x9c] ss:$24 sps:$4 sm:$0xff]   ;;  %v3230_v21 = vld [vmem:[%s4598_s1 + $0x98] ss:$24 sps:$4 sm:$0xff]   ;;  %v3238_v23 = vld [vmem:[%s4598_s1 + $0xcc] ss:$24 sps:$4 sm:$0xff]  }
  0x23   : > { %v3233_v24 = vld [vmem:[%s4598_s1 + $0x6c0] ss:$24 sps:$4 sm:$0xff]   ;;  %v3241_v26 = vld [vmem:[%s4598_s1 + $0x6f4] ss:$24 sps:$4 sm:$0xff]   ;;  %v3239_v28 = vld [vmem:[%s4598_s1 + $0x6f0] ss:$24 sps:$4 sm:$0xff]  }
  0x24   : > { %2108 = vmatpush1.bf16.msra.mxu0 %v3155_v30  ;;  %v3236_v25 = vld [vmem:[%s4598_s1 + $0xc8] ss:$24 sps:$4 sm:$0xff]   ;;  %v3244_v27 = vld [vmem:[%s4598_s1 + $0xfc] ss:$24 sps:$4 sm:$0xff]   ;;  %v3242_v29 = vld [vmem:[%s4598_s1 + $0xf8] ss:$24 sps:$4 sm:$0xff]  }
  0x25   : > { %2149 = vmatpush1.bf16.msra.mxu1 %v3156_v31  ;;  %2109 = vmatprep.subr.bf16.mxu0 %v3157_v32  ;;  %v3247_v30 = vld [vmem:[%s4598_s1 + $0x724] ss:$24 sps:$4 sm:$0xff]   ;;  %v3924_v32 = vld [vmem:[%s3768_s11 + $0x10] sm:$0xff] }
  0x26   : > { %2150 = vmatprep.subr.bf16.mxu1 %v3159_v33  ;;  %v3250_v31 = vld [vmem:[%s4598_s1 + $0x12c] ss:$24 sps:$4 sm:$0xff]   ;;  %v3245_v33 = vld [vmem:[%s4598_s1 + $0x720] ss:$24 sps:$4 sm:$0xff]   ;;  %v3263_v46 = vld [vmem:[%s4598_s1 + $0x7b0] ss:$24 sps:$4 sm:$0xff]  }
  0x27   : > { %v3266_v48 = vld [vmem:[%s4598_s1 + $0x1b8] ss:$24 sps:$4 sm:$0xff]  }
  0x28   : > { %2110 = vmatpush1.bf16.msra.mxu0 %v3161_v34  ;;  %v3931_v34 = vcombine.high %v3924_v32, %v3924_v32 }
  0x29   : > { %2151 = vmatpush1.bf16.msra.mxu1 %v3162_v35  ;;  %2111 = vmatprep.subr.bf16.mxu0 %v3163_v36  ;;  %v3248_v35 = vld [vmem:[%s4598_s1 + $0x128] ss:$24 sps:$4 sm:$0xff]   ;;  %v3253_v36 = vld [vmem:[%s4598_s1 + $0x754] ss:$24 sps:$4 sm:$0xff]  }
  0x2a   : > { %2152 = vmatprep.subr.bf16.mxu1 %v3165_v37  ;;  %v3256_v37 = vld [vmem:[%s4598_s1 + $0x15c] ss:$24 sps:$4 sm:$0xff]  }
  0x2c   : > { %2112 = vmatpush1.bf16.msra.mxu0 %v3167_v38  ;;  %v3251_v38 = vld [vmem:[%s4598_s1 + $0x750] ss:$24 sps:$4 sm:$0xff]  }
  0x2d   : > { %2153 = vmatpush1.bf16.msra.mxu1 %v3168_v39  ;;  %2113 = vmatprep.subr.bf16.mxu0 %v3169_v40  ;;  %v3254_v39 = vld [vmem:[%s4598_s1 + $0x158] ss:$24 sps:$4 sm:$0xff]   ;;  %v3259_v40 = vld [vmem:[%s4598_s1 + $0x784] ss:$24 sps:$4 sm:$0xff]  }
  0x2e   : > { %2154 = vmatprep.subr.bf16.mxu1 %v3171_v41  ;;  %v3262_v41 = vld [vmem:[%s4598_s1 + $0x18c] ss:$24 sps:$4 sm:$0xff]  }
  0x30   : > { %2114 = vmatpush1.bf16.msra.mxu0 %v3173_v42  ;;  %v3257_v42 = vld [vmem:[%s4598_s1 + $0x780] ss:$24 sps:$4 sm:$0xff]  }
  0x31   : > { %2155 = vmatpush1.bf16.msra.mxu1 %v3174_v43  ;;  %2115 = vmatprep.subr.bf16.mxu0 %v3175_v44  ;;  %v3260_v43 = vld [vmem:[%s4598_s1 + $0x188] ss:$24 sps:$4 sm:$0xff]   ;;  %v3265_v44 = vld [vmem:[%s4598_s1 + $0x7b4] ss:$24 sps:$4 sm:$0xff]  }
  0x32   : > { %2156 = vmatprep.subr.bf16.mxu1 %v3177_v45  ;;  %v3268_v45 = vld [vmem:[%s4598_s1 + $0x1bc] ss:$24 sps:$4 sm:$0xff]  }
  0x34   : > { %2116 = vmatpush1.bf16.msra.mxu0 %v3179_v49  ;;  %v3271_v49 = vld [vmem:[%s4598_s1 + $0x7e4] ss:$24 sps:$4 sm:$0xff]  }
  0x35   : > { %2157 = vmatpush1.bf16.msra.mxu1 %v3180_v50  ;;  %2117 = vmatprep.subr.bf16.mxu0 %v3181_v52  ;;  %v3274_v50 = vld [vmem:[%s4598_s1 + $0x1ec] ss:$24 sps:$4 sm:$0xff]   ;;  %v3269_v52 = vld [vmem:[%s4598_s1 + $0x7e0] ss:$24 sps:$4 sm:$0xff]  }
  0x36   : > { %2158 = vmatprep.subr.bf16.mxu1 %v3183_v53  ;;  %v3272_v53 = vld [vmem:[%s4598_s1 + $0x1e8] ss:$24 sps:$4 sm:$0xff]  }
  0x38   : > { %2118 = vmatpush1.bf16.msra.mxu0 %v3185_v54  ;;  %v3277_v54 = vld [vmem:[%s4598_s1 + $0x814] ss:$24 sps:$4 sm:$0xff]  }
  0x39   : > { %2159 = vmatpush1.bf16.msra.mxu1 %v3186_v55  ;;  %2119 = vmatprep.subr.bf16.mxu0 %v3187_v56  ;;  %v3280_v55 = vld [vmem:[%s4598_s1 + $0x21c] ss:$24 sps:$4 sm:$0xff]   ;;  %v3275_v56 = vld [vmem:[%s4598_s1 + $0x810] ss:$24 sps:$4 sm:$0xff]  }
  0x3a   : > { %2160 = vmatprep.subr.bf16.mxu1 %v3189_v57  ;;  %v3278_v57 = vld [vmem:[%s4598_s1 + $0x218] ss:$24 sps:$4 sm:$0xff]  }
  0x3c   : > { %2120 = vmatpush1.bf16.msra.mxu0 %v3191_v58  ;;  %v3283_v58 = vld [vmem:[%s4598_s1 + $0x844] ss:$24 sps:$4 sm:$0xff]  }
  0x3d   : > { %2161 = vmatpush1.bf16.msra.mxu1 %v3192_v59  ;;  %2121 = vmatprep.subr.bf16.mxu0 %v3193_v60  ;;  %v3286_v59 = vld [vmem:[%s4598_s1 + $0x24c] ss:$24 sps:$4 sm:$0xff]   ;;  %v3281_v60 = vld [vmem:[%s4598_s1 + $0x840] ss:$24 sps:$4 sm:$0xff]  }
  0x3e   : > { %2162 = vmatprep.subr.bf16.mxu1 %v3195_v61  ;;  %v3284_v61 = vld [vmem:[%s4598_s1 + $0x248] ss:$24 sps:$4 sm:$0xff]  }
  0x40   : > { %2122 = vmatpush1.bf16.msra.mxu0 %v3197_v62  ;;  %v3289_v62 = vld [vmem:[%s4598_s1 + $0x874] ss:$24 sps:$4 sm:$0xff]  }
  0x41   : > { %2163 = vmatpush1.bf16.msra.mxu1 %v3198_v63  ;;  %2123 = vmatprep.subr.bf16.mxu0 %v3199_v0  ;;  %v3292_v63 = vld [vmem:[%s4598_s1 + $0x27c] ss:$24 sps:$4 sm:$0xff]   ;;  %v3287_v0 = vld [vmem:[%s4598_s1 + $0x870] ss:$24 sps:$4 sm:$0xff]  }
  0x42   : > { %2164 = vmatprep.subr.bf16.mxu1 %v3201_v1  ;;  %v3290_v1 = vld [vmem:[%s4598_s1 + $0x278] ss:$24 sps:$4 sm:$0xff]  }
  0x44   : > { %2124 = vmatpush1.bf16.msra.mxu0 %v3203_v2  ;;  %v3295_v2 = vld [vmem:[%s4598_s1 + $0x8a4] ss:$24 sps:$4 sm:$0xff]  }
  0x45   : > { %2165 = vmatpush1.bf16.msra.mxu1 %v3204_v3  ;;  %2175 = vmatprep.subr.bf16.mxu0 %v3211_v4  ;;  %v3298_v3 = vld [vmem:[%s4598_s1 + $0x2ac] ss:$24 sps:$4 sm:$0xff]   ;;  %v3293_v4 = vld [vmem:[%s4598_s1 + $0x8a0] ss:$24 sps:$4 sm:$0xff]  }
  0x46   : > { %2216 = vmatprep.subr.bf16.mxu1 %v3214_v5  ;;  %v3296_v5 = vld [vmem:[%s4598_s1 + $0x2a8] ss:$24 sps:$4 sm:$0xff]  }
  0x47   : > { %2126 = vmatmul.mubr.bf16.vlgmr.msra.gmra.mrb[0].mxu0 %v3844_v6 }
  0x48   : > { %2167 = vmatmul.mubr.bf16.vlgmr.msra.gmra.mrb[0].mxu1 %v3846_v7  ;;  %2176 = vmatpush1.bf16.msra.mxu0 %v3209_v8  ;;  %v3301_v8 = vld [vmem:[%s4598_s1 + $0x8d4] ss:$24 sps:$4 sm:$0xff]  }
  0x49   : > { %2217 = vmatpush1.bf16.msra.mxu1 %v3212_v9  ;;  %2177 = vmatprep.subr.bf16.mxu0 %v3217_v10  ;;  %v3304_v9 = vld [vmem:[%s4598_s1 + $0x2dc] ss:$24 sps:$4 sm:$0xff]   ;;  %v3299_v10 = vld [vmem:[%s4598_s1 + $0x8d0] ss:$24 sps:$4 sm:$0xff]  }
  0x4a   : > { %2218 = vmatprep.subr.bf16.mxu1 %v3220_v11  ;;  %2248 = vmatprep.mubr.bf16.mxu1 %v3777_v47  ;;  %v3302_v11 = vld [vmem:[%s4598_s1 + $0x2d8] ss:$24 sps:$4 sm:$0xff]  }
  0x4b   : > { %2207 = vmatprep.mubr.bf16.mxu0 %v3931_v34 }
  0x4c   : > { %2178 = vmatpush1.bf16.msra.mxu0 %v3215_v12  ;;  %v3309_v12 = vld [vmem:[%s4598_s1 + $0x30c] ss:$24 sps:$4 sm:$0xff]  }
  0x4d   : > { %2219 = vmatpush1.bf16.msra.mxu1 %v3218_v13  ;;  %2179 = vmatprep.subr.bf16.mxu0 %v3223_v14  ;;  %v3312_v13 = vld [vmem:[%s4598_s1 + $0x60c] ss:$24 sps:$4 sm:$0xff]   ;;  %v4053_v14 = vcombine.low %v3924_v32, %v3924_v32  ;;  %v3334_v32 = vld [vmem:[%s4598_s1 + $0x6c8] ss:$24 sps:$4 sm:$0xff]  }
  0x4e   : > { %2220 = vmatprep.subr.bf16.mxu1 %v3226_v15  ;;  %v3307_v15 = vld [vmem:[%s4598_s1 + $0x308] ss:$24 sps:$4 sm:$0xff]  }
  0x50   : > { %2180 = vmatpush1.bf16.msra.mxu0 %v3221_v16  ;;  %v3310_v16 = vld [vmem:[%s4598_s1 + $0x608] ss:$24 sps:$4 sm:$0xff]  }
  0x51   : > { %2221 = vmatpush1.bf16.msra.mxu1 %v3224_v17  ;;  %2181 = vmatprep.subr.bf16.mxu0 %v3229_v18  ;;  %v3315_v17 = vld [vmem:[%s4598_s1 + $0x33c] ss:$24 sps:$4 sm:$0xff]  }
  0x52   : > { %2222 = vmatprep.subr.bf16.mxu1 %v3232_v19  ;;  %v3318_v18 = vld [vmem:[%s4598_s1 + $0x63c] ss:$24 sps:$4 sm:$0xff]   ;;  %v3313_v19 = vld [vmem:[%s4598_s1 + $0x338] ss:$24 sps:$4 sm:$0xff]  }
  0x54   : > { %2182 = vmatpush1.bf16.msra.mxu0 %v3227_v20  ;;  %v3316_v20 = vld [vmem:[%s4598_s1 + $0x638] ss:$24 sps:$4 sm:$0xff]  }
  0x55   : > { %2223 = vmatpush1.bf16.msra.mxu1 %v3230_v21  ;;  %2183 = vmatprep.subr.bf16.mxu0 %v3235_v22  ;;  %v3321_v21 = vld [vmem:[%s4598_s1 + $0x36c] ss:$24 sps:$4 sm:$0xff]  }
  0x56   : > { %2224 = vmatprep.subr.bf16.mxu1 %v3238_v23  ;;  %v3324_v22 = vld [vmem:[%s4598_s1 + $0x66c] ss:$24 sps:$4 sm:$0xff]   ;;  %v3319_v23 = vld [vmem:[%s4598_s1 + $0x368] ss:$24 sps:$4 sm:$0xff]  }
  0x58   : > { %2184 = vmatpush1.bf16.msra.mxu0 %v3233_v24  ;;  %v3322_v24 = vld [vmem:[%s4598_s1 + $0x668] ss:$24 sps:$4 sm:$0xff]  }
  0x59   : > { %2225 = vmatpush1.bf16.msra.mxu1 %v3236_v25  ;;  %2185 = vmatprep.subr.bf16.mxu0 %v3241_v26  ;;  %v3327_v25 = vld [vmem:[%s4598_s1 + $0x39c] ss:$24 sps:$4 sm:$0xff]  }
  0x5a   : > { %2226 = vmatprep.subr.bf16.mxu1 %v3244_v27  ;;  %v3330_v26 = vld [vmem:[%s4598_s1 + $0x69c] ss:$24 sps:$4 sm:$0xff]   ;;  %v3325_v27 = vld [vmem:[%s4598_s1 + $0x398] ss:$24 sps:$4 sm:$0xff]  }
  0x5c   : > { %2186 = vmatpush1.bf16.msra.mxu0 %v3239_v28  ;;  %v3328_v28 = vld [vmem:[%s4598_s1 + $0x698] ss:$24 sps:$4 sm:$0xff]  }
  0x5d   : > { %2227 = vmatpush1.bf16.msra.mxu1 %v3242_v29  ;;  %2187 = vmatprep.subr.bf16.mxu0 %v3247_v30  ;;  %v3333_v29 = vld [vmem:[%s4598_s1 + $0x3cc] ss:$24 sps:$4 sm:$0xff]  }
  0x5e   : > { %2228 = vmatprep.subr.bf16.mxu1 %v3250_v31  ;;  %v3336_v30 = vld [vmem:[%s4598_s1 + $0x6cc] ss:$24 sps:$4 sm:$0xff]   ;;  %v3331_v31 = vld [vmem:[%s4598_s1 + $0x3c8] ss:$24 sps:$4 sm:$0xff]  }
  0x60   : > { %2188 = vmatpush1.bf16.msra.mxu0 %v3245_v33  ;;  %v3339_v33 = vld [vmem:[%s4598_s1 + $0x3fc] ss:$24 sps:$4 sm:$0xff]  }
  0x61   : > { %2229 = vmatpush1.bf16.msra.mxu1 %v3248_v35  ;;  %2189 = vmatprep.subr.bf16.mxu0 %v3253_v36  ;;  %v3342_v35 = vld [vmem:[%s4598_s1 + $0x6fc] ss:$24 sps:$4 sm:$0xff]   ;;  %v3337_v36 = vld [vmem:[%s4598_s1 + $0x3f8] ss:$24 sps:$4 sm:$0xff]  }
  0x62   : > { %2230 = vmatprep.subr.bf16.mxu1 %v3256_v37  ;;  %v3340_v37 = vld [vmem:[%s4598_s1 + $0x6f8] ss:$24 sps:$4 sm:$0xff]  }
  0x64   : > { %2190 = vmatpush1.bf16.msra.mxu0 %v3251_v38  ;;  %v3345_v38 = vld [vmem:[%s4598_s1 + $0x42c] ss:$24 sps:$4 sm:$0xff]  }
  0x65   : > { %2231 = vmatpush1.bf16.msra.mxu1 %v3254_v39  ;;  %2191 = vmatprep.subr.bf16.mxu0 %v3259_v40  ;;  %v3348_v39 = vld [vmem:[%s4598_s1 + $0x72c] ss:$24 sps:$4 sm:$0xff]   ;;  %v3343_v40 = vld [vmem:[%s4598_s1 + $0x428] ss:$24 sps:$4 sm:$0xff]  }
  0x66   : > { %2232 = vmatprep.subr.bf16.mxu1 %v3262_v41  ;;  %v3346_v41 = vld [vmem:[%s4598_s1 + $0x728] ss:$24 sps:$4 sm:$0xff]  }
  0x68   : > { %2192 = vmatpush1.bf16.msra.mxu0 %v3257_v42  ;;  %v3351_v42 = vld [vmem:[%s4598_s1 + $0x45c] ss:$24 sps:$4 sm:$0xff]  }
  0x69   : > { %2233 = vmatpush1.bf16.msra.mxu1 %v3260_v43  ;;  %2193 = vmatprep.subr.bf16.mxu0 %v3265_v44  ;;  %v3354_v43 = vld [vmem:[%s4598_s1 + $0x75c] ss:$24 sps:$4 sm:$0xff]   ;;  %v3349_v44 = vld [vmem:[%s4598_s1 + $0x458] ss:$24 sps:$4 sm:$0xff]  }
  0x6a   : > { %2234 = vmatprep.subr.bf16.mxu1 %v3268_v45  ;;  %v3352_v45 = vld [vmem:[%s4598_s1 + $0x758] ss:$24 sps:$4 sm:$0xff]  }
  0x6c   : > { %2194 = vmatpush1.bf16.msra.mxu0 %v3263_v46  ;;  %v3357_v46 = vld [vmem:[%s4598_s1 + $0x48c] ss:$24 sps:$4 sm:$0xff]  }
  0x6d   : > { %2235 = vmatpush1.bf16.msra.mxu1 %v3266_v48  ;;  %2195 = vmatprep.subr.bf16.mxu0 %v3271_v49  ;;  %v3360_v48 = vld [vmem:[%s4598_s1 + $0x78c] ss:$24 sps:$4 sm:$0xff]   ;;  %v3355_v49 = vld [vmem:[%s4598_s1 + $0x488] ss:$24 sps:$4 sm:$0xff]  }
  0x6e   : > { %2236 = vmatprep.subr.bf16.mxu1 %v3274_v50  ;;  %v3358_v50 = vld [vmem:[%s4598_s1 + $0x788] ss:$24 sps:$4 sm:$0xff]  }
  0x70   : > { %2196 = vmatpush1.bf16.msra.mxu0 %v3269_v52  ;;  %v3363_v52 = vld [vmem:[%s4598_s1 + $0x4bc] ss:$24 sps:$4 sm:$0xff]  }
  0x71   : > { %2237 = vmatpush1.bf16.msra.mxu1 %v3272_v53  ;;  %2197 = vmatprep.subr.bf16.mxu0 %v3277_v54  ;;  %v3366_v53 = vld [vmem:[%s4598_s1 + $0x7bc] ss:$24 sps:$4 sm:$0xff]   ;;  %v3361_v54 = vld [vmem:[%s4598_s1 + $0x4b8] ss:$24 sps:$4 sm:$0xff]  }
  0x72   : > { %2238 = vmatprep.subr.bf16.mxu1 %v3280_v55  ;;  %v3364_v55 = vld [vmem:[%s4598_s1 + $0x7b8] ss:$24 sps:$4 sm:$0xff]  }
  0x74   : > { %2198 = vmatpush1.bf16.msra.mxu0 %v3275_v56  ;;  %v3369_v56 = vld [vmem:[%s4598_s1 + $0x4ec] ss:$24 sps:$4 sm:$0xff]  }
  0x75   : > { %2239 = vmatpush1.bf16.msra.mxu1 %v3278_v57  ;;  %2199 = vmatprep.subr.bf16.mxu0 %v3283_v58  ;;  %v3372_v57 = vld [vmem:[%s4598_s1 + $0x7ec] ss:$24 sps:$4 sm:$0xff]   ;;  %v3367_v58 = vld [vmem:[%s4598_s1 + $0x4e8] ss:$24 sps:$4 sm:$0xff]  }
  0x76   : > { %2240 = vmatprep.subr.bf16.mxu1 %v3286_v59  ;;  %v3370_v59 = vld [vmem:[%s4598_s1 + $0x7e8] ss:$24 sps:$4 sm:$0xff]  }
  0x78   : > { %2200 = vmatpush1.bf16.msra.mxu0 %v3281_v60  ;;  %v3375_v60 = vld [vmem:[%s4598_s1 + $0x51c] ss:$24 sps:$4 sm:$0xff]  }
  0x79   : > { %2241 = vmatpush1.bf16.msra.mxu1 %v3284_v61  ;;  %2201 = vmatprep.subr.bf16.mxu0 %v3289_v62  ;;  %v3378_v61 = vld [vmem:[%s4598_s1 + $0x81c] ss:$24 sps:$4 sm:$0xff]   ;;  %v3373_v62 = vld [vmem:[%s4598_s1 + $0x518] ss:$24 sps:$4 sm:$0xff]  }
  0x7a   : > { %2242 = vmatprep.subr.bf16.mxu1 %v3292_v63  ;;  %v3376_v63 = vld [vmem:[%s4598_s1 + $0x818] ss:$24 sps:$4 sm:$0xff]  }
  0x7c   : > { %2202 = vmatpush1.bf16.msra.mxu0 %v3287_v0  ;;  %v3381_v0 = vld [vmem:[%s4598_s1 + $0x54c] ss:$24 sps:$4 sm:$0xff]  }
  0x7d   : > { %2243 = vmatpush1.bf16.msra.mxu1 %v3290_v1  ;;  %2203 = vmatprep.subr.bf16.mxu0 %v3295_v2  ;;  %v3384_v1 = vld [vmem:[%s4598_s1 + $0x84c] ss:$24 sps:$4 sm:$0xff]   ;;  %v3379_v2 = vld [vmem:[%s4598_s1 + $0x548] ss:$24 sps:$4 sm:$0xff]  }
  0x7e   : > { %2244 = vmatprep.subr.bf16.mxu1 %v3298_v3  ;;  %v3382_v3 = vld [vmem:[%s4598_s1 + $0x848] ss:$24 sps:$4 sm:$0xff]  }
  0x80   : > { %2204 = vmatpush1.bf16.msra.mxu0 %v3293_v4  ;;  %v3387_v4 = vld [vmem:[%s4598_s1 + $0x57c] ss:$24 sps:$4 sm:$0xff]  }
  0x81   : > { %2245 = vmatpush1.bf16.msra.mxu1 %v3296_v5  ;;  %2205 = vmatprep.subr.bf16.mxu0 %v3301_v8  ;;  %v3390_v5 = vld [vmem:[%s4598_s1 + $0x87c] ss:$24 sps:$4 sm:$0xff]   ;;  %v3385_v8 = vld [vmem:[%s4598_s1 + $0x578] ss:$24 sps:$4 sm:$0xff]  }
  0x82   : > { %2246 = vmatprep.subr.bf16.mxu1 %v3304_v9  ;;  %v3388_v9 = vld [vmem:[%s4598_s1 + $0x878] ss:$24 sps:$4 sm:$0xff]  }
  0x84   : > { %2206 = vmatpush1.bf16.msra.mxu0 %v3299_v10  ;;  %v3393_v10 = vld [vmem:[%s4598_s1 + $0x5ac] ss:$24 sps:$4 sm:$0xff]  }
  0x85   : > { %2247 = vmatpush1.bf16.msra.mxu1 %v3302_v11  ;;  %2257 = vmatprep.subr.bf16.mxu0 %v3309_v12  ;;  %v3396_v11 = vld [vmem:[%s4598_s1 + $0x8ac] ss:$24 sps:$4 sm:$0xff]   ;;  %v3391_v12 = vld [vmem:[%s4598_s1 + $0x5a8] ss:$24 sps:$4 sm:$0xff]  }
  0x86   : > { %2298 = vmatprep.subr.bf16.mxu1 %v3312_v13  ;;  %v3394_v13 = vld [vmem:[%s4598_s1 + $0x8a8] ss:$24 sps:$4 sm:$0xff]  }
  0x87   : > { %2208 = vmatmul.mubr.bf16.vlgmr.msra.gmra.mrb[4].mxu0 %v4053_v14 }
  0x88   : > { %2249 = vmatmul.mubr.bf16.vlgmr.msra.gmra.mrb[4].mxu1 %v3844_v6  ;;  %2258 = vmatpush1.bf16.msra.mxu0 %v3307_v15  ;;  %v3399_v15 = vld [vmem:[%s4598_s1 + $0x5dc] ss:$24 sps:$4 sm:$0xff]  }
  0x89   : > { %2299 = vmatpush1.bf16.msra.mxu1 %v3310_v16  ;;  %2259 = vmatprep.subr.bf16.mxu0 %v3315_v17  ;;  %v3402_v16 = vld [vmem:[%s4598_s1 + $0x8dc] ss:$24 sps:$4 sm:$0xff]   ;;  %v3397_v17 = vld [vmem:[%s4598_s1 + $0x5d8] ss:$24 sps:$4 sm:$0xff]  }
  0x8a   : > { %2300 = vmatprep.subr.bf16.mxu1 %v3318_v18  ;;  %2289 = vmatprep.mubr.bf16.mxu0 %v3786_v51  ;;  %v3400_v18 = vld [vmem:[%s4598_s1 + $0x8d8] ss:$24 sps:$4 sm:$0xff]  }
  0x8b   : > { %2330 = vmatprep.mubr.bf16.mxu1 %v3931_v34 }
  0x8c   : > { %2260 = vmatpush1.bf16.msra.mxu0 %v3313_v19  ;;  %v3405_v19 = vld [vmem:[%s4598_s1 + $0x14] ss:$24 sps:$4 sm:$0xff]  }
  0x8d   : > { %2301 = vmatpush1.bf16.msra.mxu1 %v3316_v20  ;;  %2261 = vmatprep.subr.bf16.mxu0 %v3321_v21  ;;  %v3408_v20 = vld [vmem:[%s4598_s1 + $0x314] ss:$24 sps:$4 sm:$0xff]   ;;  %v3403_v21 = vld [vmem:[%s4598_s1 + $0x10] ss:$24 sps:$4 sm:$0xff]  }
  0x8e   : > { %2302 = vmatprep.subr.bf16.mxu1 %v3324_v22  ;;  %v3406_v22 = vld [vmem:[%s4598_s1 + $0x310] ss:$24 sps:$4 sm:$0xff]  }
  0x90   : > { %2262 = vmatpush1.bf16.msra.mxu0 %v3319_v23  ;;  %v3411_v23 = vld [vmem:[%s4598_s1 + $0x44] ss:$24 sps:$4 sm:$0xff]  }
  0x91   : > { %2303 = vmatpush1.bf16.msra.mxu1 %v3322_v24  ;;  %2263 = vmatprep.subr.bf16.mxu0 %v3327_v25  ;;  %v3414_v24 = vld [vmem:[%s4598_s1 + $0x344] ss:$24 sps:$4 sm:$0xff]   ;;  %v3409_v25 = vld [vmem:[%s4598_s1 + $0x40] ss:$24 sps:$4 sm:$0xff]  }
  0x92   : > { %2304 = vmatprep.subr.bf16.mxu1 %v3330_v26  ;;  %v3412_v26 = vld [vmem:[%s4598_s1 + $0x340] ss:$24 sps:$4 sm:$0xff]  }
  0x94   : > { %2264 = vmatpush1.bf16.msra.mxu0 %v3325_v27  ;;  %v3417_v27 = vld [vmem:[%s4598_s1 + $0x74] ss:$24 sps:$4 sm:$0xff]  }
  0x95   : > { %2305 = vmatpush1.bf16.msra.mxu1 %v3328_v28  ;;  %2265 = vmatprep.subr.bf16.mxu0 %v3333_v29  ;;  %v3420_v28 = vld [vmem:[%s4598_s1 + $0x374] ss:$24 sps:$4 sm:$0xff]   ;;  %v3415_v29 = vld [vmem:[%s4598_s1 + $0x70] ss:$24 sps:$4 sm:$0xff]  }
  0x96   : > { %2306 = vmatprep.subr.bf16.mxu1 %v3336_v30  ;;  %v3418_v30 = vld [vmem:[%s4598_s1 + $0x370] ss:$24 sps:$4 sm:$0xff]  }
  0x98   : > { %2266 = vmatpush1.bf16.msra.mxu0 %v3331_v31  ;;  %v3423_v31 = vld [vmem:[%s4598_s1 + $0xa4] ss:$24 sps:$4 sm:$0xff]  }
  0x99   : > { %2307 = vmatpush1.bf16.msra.mxu1 %v3334_v32  ;;  %2267 = vmatprep.subr.bf16.mxu0 %v3339_v33  ;;  %v3424_v32 = vld [vmem:[%s4598_s1 + $0x3a0] ss:$24 sps:$4 sm:$0xff]   ;;  %v3429_v33 = vld [vmem:[%s4598_s1 + $0xd4] ss:$24 sps:$4 sm:$0xff]  }
  0x9a   : > { %2308 = vmatprep.subr.bf16.mxu1 %v3342_v35  ;;  %v3432_v35 = vld [vmem:[%s4598_s1 + $0x3d4] ss:$24 sps:$4 sm:$0xff]  }
  0x9c   : > { %2268 = vmatpush1.bf16.msra.mxu0 %v3337_v36  ;;  %v3427_v36 = vld [vmem:[%s4598_s1 + $0xd0] ss:$24 sps:$4 sm:$0xff]  }
  0x9d   : > { %2309 = vmatpush1.bf16.msra.mxu1 %v3340_v37  ;;  %2269 = vmatprep.subr.bf16.mxu0 %v3345_v38  ;;  %v3430_v37 = vld [vmem:[%s4598_s1 + $0x3d0] ss:$24 sps:$4 sm:$0xff]   ;;  %v3435_v38 = vld [vmem:[%s4598_s1 + $0x104] ss:$24 sps:$4 sm:$0xff]  }
  0x9e   : > { %2310 = vmatprep.subr.bf16.mxu1 %v3348_v39  ;;  %v3438_v39 = vld [vmem:[%s4598_s1 + $0x404] ss:$24 sps:$4 sm:$0xff]  }
  0xa0   : > { %2270 = vmatpush1.bf16.msra.mxu0 %v3343_v40  ;;  %v3433_v40 = vld [vmem:[%s4598_s1 + $0x100] ss:$24 sps:$4 sm:$0xff]  }
  0xa1   : > { %2311 = vmatpush1.bf16.msra.mxu1 %v3346_v41  ;;  %2271 = vmatprep.subr.bf16.mxu0 %v3351_v42  ;;  %v3436_v41 = vld [vmem:[%s4598_s1 + $0x400] ss:$24 sps:$4 sm:$0xff]   ;;  %v3441_v42 = vld [vmem:[%s4598_s1 + $0x134] ss:$24 sps:$4 sm:$0xff]  }
  0xa2   : > { %2312 = vmatprep.subr.bf16.mxu1 %v3354_v43  ;;  %v3444_v43 = vld [vmem:[%s4598_s1 + $0x434] ss:$24 sps:$4 sm:$0xff]  }
  0xa4   : > { %2272 = vmatpush1.bf16.msra.mxu0 %v3349_v44  ;;  %v3439_v44 = vld [vmem:[%s4598_s1 + $0x130] ss:$24 sps:$4 sm:$0xff]  }
  0xa5   : > { %2313 = vmatpush1.bf16.msra.mxu1 %v3352_v45  ;;  %2273 = vmatprep.subr.bf16.mxu0 %v3357_v46  ;;  %v3442_v45 = vld [vmem:[%s4598_s1 + $0x430] ss:$24 sps:$4 sm:$0xff]   ;;  %v3447_v46 = vld [vmem:[%s4598_s1 + $0x164] ss:$24 sps:$4 sm:$0xff]  }
  0xa6   : > { %2314 = vmatprep.subr.bf16.mxu1 %v3360_v48  ;;  %v3450_v48 = vld [vmem:[%s4598_s1 + $0x464] ss:$24 sps:$4 sm:$0xff]  }
  0xa8   : > { %2274 = vmatpush1.bf16.msra.mxu0 %v3355_v49  ;;  %v3445_v49 = vld [vmem:[%s4598_s1 + $0x160] ss:$24 sps:$4 sm:$0xff]  }
  0xa9   : > { %2315 = vmatpush1.bf16.msra.mxu1 %v3358_v50  ;;  %2275 = vmatprep.subr.bf16.mxu0 %v3363_v52  ;;  %v3448_v50 = vld [vmem:[%s4598_s1 + $0x460] ss:$24 sps:$4 sm:$0xff]   ;;  %v3453_v52 = vld [vmem:[%s4598_s1 + $0x194] ss:$24 sps:$4 sm:$0xff]  }
  0xaa   : > { %2316 = vmatprep.subr.bf16.mxu1 %v3366_v53  ;;  %v3456_v53 = vld [vmem:[%s4598_s1 + $0x494] ss:$24 sps:$4 sm:$0xff]  }
  0xac   : > { %2276 = vmatpush1.bf16.msra.mxu0 %v3361_v54  ;;  %v3451_v54 = vld [vmem:[%s4598_s1 + $0x190] ss:$24 sps:$4 sm:$0xff]  }
  0xad   : > { %2317 = vmatpush1.bf16.msra.mxu1 %v3364_v55  ;;  %2277 = vmatprep.subr.bf16.mxu0 %v3369_v56  ;;  %v3454_v55 = vld [vmem:[%s4598_s1 + $0x490] ss:$24 sps:$4 sm:$0xff]   ;;  %v3459_v56 = vld [vmem:[%s4598_s1 + $0x1c4] ss:$24 sps:$4 sm:$0xff]  }
  0xae   : > { %2318 = vmatprep.subr.bf16.mxu1 %v3372_v57  ;;  %v3462_v57 = vld [vmem:[%s4598_s1 + $0x4c4] ss:$24 sps:$4 sm:$0xff]  }
  0xb0   : > { %2278 = vmatpush1.bf16.msra.mxu0 %v3367_v58  ;;  %v3457_v58 = vld [vmem:[%s4598_s1 + $0x1c0] ss:$24 sps:$4 sm:$0xff]  }
  0xb1   : > { %2319 = vmatpush1.bf16.msra.mxu1 %v3370_v59  ;;  %2279 = vmatprep.subr.bf16.mxu0 %v3375_v60  ;;  %v3460_v59 = vld [vmem:[%s4598_s1 + $0x4c0] ss:$24 sps:$4 sm:$0xff]   ;;  %v3465_v60 = vld [vmem:[%s4598_s1 + $0x1f4] ss:$24 sps:$4 sm:$0xff]  }
  0xb2   : > { %2320 = vmatprep.subr.bf16.mxu1 %v3378_v61  ;;  %v3468_v61 = vld [vmem:[%s4598_s1 + $0x4f4] ss:$24 sps:$4 sm:$0xff]  }
  0xb4   : > { %2280 = vmatpush1.bf16.msra.mxu0 %v3373_v62  ;;  %v3463_v62 = vld [vmem:[%s4598_s1 + $0x1f0] ss:$24 sps:$4 sm:$0xff]  }
  0xb5   : > { %2321 = vmatpush1.bf16.msra.mxu1 %v3376_v63  ;;  %2281 = vmatprep.subr.bf16.mxu0 %v3381_v0  ;;  %v3466_v63 = vld [vmem:[%s4598_s1 + $0x4f0] ss:$24 sps:$4 sm:$0xff]   ;;  %v3471_v0 = vld [vmem:[%s4598_s1 + $0x224] ss:$24 sps:$4 sm:$0xff]  }
  0xb6   : > { %2322 = vmatprep.subr.bf16.mxu1 %v3384_v1  ;;  %v3474_v1 = vld [vmem:[%s4598_s1 + $0x524] ss:$24 sps:$4 sm:$0xff]  }
  0xb8   : > { %2282 = vmatpush1.bf16.msra.mxu0 %v3379_v2  ;;  %v3469_v2 = vld [vmem:[%s4598_s1 + $0x220] ss:$24 sps:$4 sm:$0xff]  }
  0xb9   : > { %2323 = vmatpush1.bf16.msra.mxu1 %v3382_v3  ;;  %2283 = vmatprep.subr.bf16.mxu0 %v3387_v4  ;;  %v3472_v3 = vld [vmem:[%s4598_s1 + $0x520] ss:$24 sps:$4 sm:$0xff]   ;;  %v3477_v4 = vld [vmem:[%s4598_s1 + $0x254] ss:$24 sps:$4 sm:$0xff]  }
  0xba   : > { %2324 = vmatprep.subr.bf16.mxu1 %v3390_v5  ;;  %v3480_v5 = vld [vmem:[%s4598_s1 + $0x554] ss:$24 sps:$4 sm:$0xff]  }
  0xbc   : > { %2284 = vmatpush1.bf16.msra.mxu0 %v3385_v8  ;;  %v3475_v8 = vld [vmem:[%s4598_s1 + $0x250] ss:$24 sps:$4 sm:$0xff]  }
  0xbd   : > { %2325 = vmatpush1.bf16.msra.mxu1 %v3388_v9  ;;  %2285 = vmatprep.subr.bf16.mxu0 %v3393_v10  ;;  %v3478_v9 = vld [vmem:[%s4598_s1 + $0x550] ss:$24 sps:$4 sm:$0xff]   ;;  %v3483_v10 = vld [vmem:[%s4598_s1 + $0x284] ss:$24 sps:$4 sm:$0xff]  }
  0xbe   : > { %2326 = vmatprep.subr.bf16.mxu1 %v3396_v11  ;;  %v3486_v11 = vld [vmem:[%s4598_s1 + $0x584] ss:$24 sps:$4 sm:$0xff]  }
  0xc0   : > { %2286 = vmatpush1.bf16.msra.mxu0 %v3391_v12  ;;  %v3481_v12 = vld [vmem:[%s4598_s1 + $0x280] ss:$24 sps:$4 sm:$0xff]  }
  0xc1   : > { %2327 = vmatpush1.bf16.msra.mxu1 %v3394_v13  ;;  %2287 = vmatprep.subr.bf16.mxu0 %v3399_v15  ;;  %v3484_v13 = vld [vmem:[%s4598_s1 + $0x580] ss:$24 sps:$4 sm:$0xff]   ;;  %v3489_v15 = vld [vmem:[%s4598_s1 + $0x2b4] ss:$24 sps:$4 sm:$0xff]  }
  0xc2   : > { %2328 = vmatprep.subr.bf16.mxu1 %v3402_v16  ;;  %v3492_v16 = vld [vmem:[%s4598_s1 + $0x5b4] ss:$24 sps:$4 sm:$0xff]  }
  0xc4   : > { %2288 = vmatpush1.bf16.msra.mxu0 %v3397_v17  ;;  %v3487_v17 = vld [vmem:[%s4598_s1 + $0x2b0] ss:$24 sps:$4 sm:$0xff]  }
  0xc5   : > { %2329 = vmatpush1.bf16.msra.mxu1 %v3400_v18  ;;  %2339 = vmatprep.subr.bf16.mxu0 %v3405_v19  ;;  %v3490_v18 = vld [vmem:[%s4598_s1 + $0x5b0] ss:$24 sps:$4 sm:$0xff]   ;;  %v3495_v19 = vld [vmem:[%s4598_s1 + $0x2e4] ss:$24 sps:$4 sm:$0xff]  }
  0xc6   : > { %2380 = vmatprep.subr.bf16.mxu1 %v3408_v20  ;;  %v3498_v20 = vld [vmem:[%s4598_s1 + $0x5e4] ss:$24 sps:$4 sm:$0xff]  }
  0xc7   : > { %2290 = vmatmul.mubr.bf16.vlgmr.msra.gmra.mrb[8].mxu0 %v3846_v7 }
  0xc8   : > { %2331 = vmatmul.mubr.bf16.vlgmr.msra.gmra.mrb[8].mxu1 %v4053_v14  ;;  %2340 = vmatpush1.bf16.msra.mxu0 %v3403_v21  ;;  %v3493_v21 = vld [vmem:[%s4598_s1 + $0x2e0] ss:$24 sps:$4 sm:$0xff]  }
  0xc9   : > { %2381 = vmatpush1.bf16.msra.mxu1 %v3406_v22  ;;  %2341 = vmatprep.subr.bf16.mxu0 %v3411_v23  ;;  %v3496_v22 = vld [vmem:[%s4598_s1 + $0x5e0] ss:$24 sps:$4 sm:$0xff]   ;;  %v3501_v23 = vld [vmem:[%s4598_s1 + $0x614] ss:$24 sps:$4 sm:$0xff]  }
  0xca   : > { %2382 = vmatprep.subr.bf16.mxu1 %v3414_v24  ;;  %2371 = vmatprep.mubr.bf16.mxu0 %v3777_v47  ;;  %v3426_v47 = vld [vmem:[%s4598_s1 + $0x3a4] ss:$24 sps:$4 sm:$0xff]   ;;  %v3499_v24 = vld [vmem:[%s4598_s1 + $0x610] ss:$24 sps:$4 sm:$0xff]  }
  0xcb   : > { %2412 = vmatprep.mubr.bf16.mxu1 %v3786_v51  ;;  %v3421_v51 = vld [vmem:[%s4598_s1 + $0xa0] ss:$24 sps:$4 sm:$0xff]  }
  0xcc   : > { %2342 = vmatpush1.bf16.msra.mxu0 %v3409_v25  ;;  %v3504_v25 = vld [vmem:[%s4598_s1 + $0x644] ss:$24 sps:$4 sm:$0xff]  }
  0xcd   : > { %2383 = vmatpush1.bf16.msra.mxu1 %v3412_v26  ;;  %2343 = vmatprep.subr.bf16.mxu0 %v3417_v27  ;;  %v3502_v26 = vld [vmem:[%s4598_s1 + $0x640] ss:$24 sps:$4 sm:$0xff]   ;;  %v3507_v27 = vld [vmem:[%s4598_s1 + $0x674] ss:$24 sps:$4 sm:$0xff]  }
  0xce   : > { %2384 = vmatprep.subr.bf16.mxu1 %v3420_v28  ;;  %v3505_v28 = vld [vmem:[%s4598_s1 + $0x670] ss:$24 sps:$4 sm:$0xff]  }
  0xd0   : > { %2344 = vmatpush1.bf16.msra.mxu0 %v3415_v29  ;;  %v3511_v29 = vld [vmem:[%s4598_s1 + $0x6d0] ss:$24 sps:$4 sm:$0xff]  }
  0xd1   : > { %2385 = vmatpush1.bf16.msra.mxu1 %v3418_v30  ;;  %2345 = vmatprep.subr.bf16.mxu0 %v3423_v31  ;;  %v3516_v30 = vld [vmem:[%s4598_s1 + $0x704] ss:$24 sps:$4 sm:$0xff]   ;;  %v3514_v31 = vld [vmem:[%s4598_s1 + $0x700] ss:$24 sps:$4 sm:$0xff]  }
  0xd2   : > { %2386 = vmatprep.subr.bf16.mxu1 %v3426_v47  ;;  %v3519_v47 = vld [vmem:[%s4598_s1 + $0x734] ss:$24 sps:$4 sm:$0xff]  }
  0xd4   : > { %2346 = vmatpush1.bf16.msra.mxu0 %v3421_v51 }
  0xd5   : > { %2387 = vmatpush1.bf16.msra.mxu1 %v3424_v32  ;;  %2347 = vmatprep.subr.bf16.mxu0 %v3429_v33 }
  0xd6   : > { %2388 = vmatprep.subr.bf16.mxu1 %v3432_v35 }
  0xd8   : > { %2348 = vmatpush1.bf16.msra.mxu0 %v3427_v36 }
  0xd9   : > { %2389 = vmatpush1.bf16.msra.mxu1 %v3430_v37  ;;  %2349 = vmatprep.subr.bf16.mxu0 %v3435_v38 }
  0xda   : > { %2390 = vmatprep.subr.bf16.mxu1 %v3438_v39  ;;  %v3517_v39 = vld [vmem:[%s4598_s1 + $0x730] ss:$24 sps:$4 sm:$0xff]  }
  0xdc   : > { %2350 = vmatpush1.bf16.msra.mxu0 %v3433_v40 }
  0xdd   : > { %2391 = vmatpush1.bf16.msra.mxu1 %v3436_v41  ;;  %2351 = vmatprep.subr.bf16.mxu0 %v3441_v42  ;;  %v3522_v42 = vld [vmem:[%s4598_s1 + $0x764] ss:$24 sps:$4 sm:$0xff]  }
  0xde   : > { %2392 = vmatprep.subr.bf16.mxu1 %v3444_v43 }
  0xe0   : > { %2352 = vmatpush1.bf16.msra.mxu0 %v3439_v44  ;;  %v3520_v44 = vld [vmem:[%s4598_s1 + $0x760] ss:$24 sps:$4 sm:$0xff]  }
  0xe1   : > { %2393 = vmatpush1.bf16.msra.mxu1 %v3442_v45  ;;  %2353 = vmatprep.subr.bf16.mxu0 %v3447_v46  ;;  %v3525_v45 = vld [vmem:[%s4598_s1 + $0x794] ss:$24 sps:$4 sm:$0xff]   ;;  %v3523_v46 = vld [vmem:[%s4598_s1 + $0x790] ss:$24 sps:$4 sm:$0xff]  }
  0xe2   : > { %2394 = vmatprep.subr.bf16.mxu1 %v3450_v48  ;;  %v3528_v48 = vld [vmem:[%s4598_s1 + $0x7c4] ss:$24 sps:$4 sm:$0xff]  }
  0xe4   : > { %2354 = vmatpush1.bf16.msra.mxu0 %v3445_v49  ;;  %v3526_v49 = vld [vmem:[%s4598_s1 + $0x7c0] ss:$24 sps:$4 sm:$0xff]  }
  0xe5   : > { %2395 = vmatpush1.bf16.msra.mxu1 %v3448_v50  ;;  %2355 = vmatprep.subr.bf16.mxu0 %v3453_v52  ;;  %v3531_v50 = vld [vmem:[%s4598_s1 + $0x7f4] ss:$24 sps:$4 sm:$0xff]   ;;  %v3529_v52 = vld [vmem:[%s4598_s1 + $0x7f0] ss:$24 sps:$4 sm:$0xff]  }
  0xe6   : > { %2396 = vmatprep.subr.bf16.mxu1 %v3456_v53  ;;  %v3534_v53 = vld [vmem:[%s4598_s1 + $0x824] ss:$24 sps:$4 sm:$0xff]  }
  0xe8   : > { %2356 = vmatpush1.bf16.msra.mxu0 %v3451_v54  ;;  %v3532_v54 = vld [vmem:[%s4598_s1 + $0x820] ss:$24 sps:$4 sm:$0xff]  }
  0xe9   : > { %2397 = vmatpush1.bf16.msra.mxu1 %v3454_v55  ;;  %2357 = vmatprep.subr.bf16.mxu0 %v3459_v56  ;;  %v3537_v55 = vld [vmem:[%s4598_s1 + $0x854] ss:$24 sps:$4 sm:$0xff]   ;;  %v3535_v56 = vld [vmem:[%s4598_s1 + $0x850] ss:$24 sps:$4 sm:$0xff]  }
  0xea   : > { %2398 = vmatprep.subr.bf16.mxu1 %v3462_v57  ;;  %v3540_v57 = vld [vmem:[%s4598_s1 + $0x884] ss:$24 sps:$4 sm:$0xff]  }
  0xec   : > { %2358 = vmatpush1.bf16.msra.mxu0 %v3457_v58  ;;  %v3538_v58 = vld [vmem:[%s4598_s1 + $0x880] ss:$24 sps:$4 sm:$0xff]  }
  0xed   : > { %2399 = vmatpush1.bf16.msra.mxu1 %v3460_v59  ;;  %2359 = vmatprep.subr.bf16.mxu0 %v3465_v60  ;;  %v3543_v59 = vld [vmem:[%s4598_s1 + $0x8b4] ss:$24 sps:$4 sm:$0xff]   ;;  %v3541_v60 = vld [vmem:[%s4598_s1 + $0x8b0] ss:$24 sps:$4 sm:$0xff]  }
  0xee   : > { %2400 = vmatprep.subr.bf16.mxu1 %v3468_v61  ;;  %v3546_v61 = vld [vmem:[%s4598_s1 + $0x8e4] ss:$24 sps:$4 sm:$0xff]  }
  0xf0   : > { %2360 = vmatpush1.bf16.msra.mxu0 %v3463_v62  ;;  %v3544_v62 = vld [vmem:[%s4598_s1 + $0x8e0] ss:$24 sps:$4 sm:$0xff]  }
  0xf1   : > { %2401 = vmatpush1.bf16.msra.mxu1 %v3466_v63  ;;  %2361 = vmatprep.subr.bf16.mxu0 %v3471_v0 }
  0xf2   : > { %2402 = vmatprep.subr.bf16.mxu1 %v3474_v1 }
  0xf4   : > { %2362 = vmatpush1.bf16.msra.mxu0 %v3469_v2 }
  0xf5   : > { %2403 = vmatpush1.bf16.msra.mxu1 %v3472_v3  ;;  %2363 = vmatprep.subr.bf16.mxu0 %v3477_v4 }
  0xf6   : > { %2404 = vmatprep.subr.bf16.mxu1 %v3480_v5 }
  0xf8   : > { %2364 = vmatpush1.bf16.msra.mxu0 %v3475_v8 }
  0xf9   : > { %2405 = vmatpush1.bf16.msra.mxu1 %v3478_v9  ;;  %2365 = vmatprep.subr.bf16.mxu0 %v3483_v10 }
  0xfa   : > { %2406 = vmatprep.subr.bf16.mxu1 %v3486_v11 }
  0xfc   : > { %2366 = vmatpush1.bf16.msra.mxu0 %v3481_v12 }
  0xfd   : > { %2407 = vmatpush1.bf16.msra.mxu1 %v3484_v13  ;;  %2367 = vmatprep.subr.bf16.mxu0 %v3489_v15 }
  0xfe   : > { %2408 = vmatprep.subr.bf16.mxu1 %v3492_v16 }
 0x100   : > { %2368 = vmatpush1.bf16.msra.mxu0 %v3487_v17 }
 0x101   : > { %2409 = vmatpush1.bf16.msra.mxu1 %v3490_v18  ;;  %2369 = vmatprep.subr.bf16.mxu0 %v3495_v19 }
 0x102   : > { %2410 = vmatprep.subr.bf16.mxu1 %v3498_v20 }
 0x104   : > { %2370 = vmatpush1.bf16.msra.mxu0 %v3493_v21 }
 0x105   : > { %2411 = vmatpush1.bf16.msra.mxu1 %v3496_v22  ;;  %2421 = vmatprep.subr.bf16.mxu0 %v3501_v23 }
 0x107   : > { %2372 = vmatmul.mubr.bf16.vlgmr.msra.gmra.mrb[12].mxu0 %v3844_v6  ;;  %v3510_v6 = vld [vmem:[%s4598_s1 + $0x6a4] ss:$24 sps:$4 sm:$0xff]  }
 0x108   : > { %2413 = vmatmul.mubr.bf16.vlgmr.msra.gmra.mrb[12].mxu1 %v3846_v7  ;;  %2422 = vmatpush1.bf16.msra.mxu0 %v3499_v24  ;;  %v3508_v7 = vld [vmem:[%s4598_s1 + $0x6a0] ss:$24 sps:$4 sm:$0xff]  }
 0x109   : > { %2453 = vmatprep.mubr.bf16.mxu0 %v3931_v34  ;;  %2423 = vmatprep.subr.bf16.mxu0 %v3504_v25  ;;  %v3513_v34 = vld [vmem:[%s4598_s1 + $0x6d4] ss:$24 sps:$4 sm:$0xff]  }
 0x10c   : > { %2424 = vmatpush1.bf16.msra.mxu0 %v3502_v26 }
 0x10d   : > { %2425 = vmatprep.subr.bf16.mxu0 %v3507_v27 }
 0x110   : > { %2426 = vmatpush1.bf16.msra.mxu0 %v3505_v28 }
 0x111   : > { %2427 = vmatprep.subr.bf16.mxu0 %v3510_v6 }
 0x114   : > { %2428 = vmatpush1.bf16.msra.mxu0 %v3508_v7 }
 0x115   : > { %2429 = vmatprep.subr.bf16.mxu0 %v3513_v34 }
 0x118   : > { %2430 = vmatpush1.bf16.msra.mxu0 %v3511_v29 }
 0x119   : > { %2431 = vmatprep.subr.bf16.mxu0 %v3516_v30  ;;  %v2485_v30 = vlaneseq }
 0x11a   : > { %v2127_v51 = vpop.f32.mrb[0].mxu0 }
 0x11b   : > { %v2168_v32 = vpop.f32.mrb[0].mxu1  ;;  %v2129_v35 = vpop.f32.mrb[1].mxu0 }
 0x11c   : > { %v2169_v33 = vadd.f32 %v2168_v32, %v2127_v51  ;;  %v2170_v36 = vpop.f32.mrb[1].mxu1  ;;  %v2131_v38 = vpop.f32.mrb[2].mxu0  ;;  %2432 = vmatpush1.bf16.msra.mxu0 %v3514_v31  ;;  %v2486_v31 = vshrl.u32 %v2485_v30, 7  ;;  %v2483_v32 = vld [vmem:[%s4599_s2] sm:$0x3f] }
 0x11d   : > { %v2171_v37 = vadd.f32 %v2170_v36, %v2129_v35  ;;  %v2172_v40 = vpop.f32.mrb[2].mxu1  ;;  %v2132_v41 = vpop.f32.mrb[3].mxu0  ;;  %2433 = vmatprep.subr.bf16.mxu0 %v3519_v47 }
 0x11e   : > { %v2173_v43 = vpop.f32.mrb[3].mxu1  ;;  %v4541_v47 = vsub.s32 0, %v2486_v31  ;;  %v4543_v51 = vsub.s32 1, %v2486_v31  ;;  %v2522_v40 = vld [vmem:[%s319_s8 + $0x8] sm:$0xff] }
 0x120   : > { %2434 = vmatpush1.bf16.msra.mxu0 %v3517_v39  ;;  %v2488_v35 = vrot.slane %v2483_v32, %v4541_v47  ;;  %v2492_v36 = vrot.slane %v2483_v32, %v4543_v51  ;;  %v4557_v39 = vsub.s32 3, %v2486_v31 }
 0x121   : > { %2435 = vmatprep.subr.bf16.mxu0 %v3522_v42 }
 0x124   : > { %2436 = vmatpush1.bf16.msra.mxu0 %v3520_v44 }
 0x125   : > { %2437 = vmatprep.subr.bf16.mxu0 %v3525_v45 }
 0x128   : > { %2438 = vmatpush1.bf16.msra.mxu0 %v3523_v46  ;;  %v2526_v46 = vunpack.c.l.bf16 %v2522_v40 }
 0x129   : > { %2439 = vmatprep.subr.bf16.mxu0 %v3528_v48  ;;  %v2500_v48 = vrot.slane %v2483_v32, %v4557_v39 }
 0x12c   : > { %2440 = vmatpush1.bf16.msra.mxu0 %v3526_v49 }
 0x12d   : > { %2441 = vmatprep.subr.bf16.mxu0 %v3531_v50 }
 0x130   : > { %2442 = vmatpush1.bf16.msra.mxu0 %v3529_v52  ;;  %v4560_v52 = vsub.s32 4, %v2486_v31 }
 0x131   : > { %2443 = vmatprep.subr.bf16.mxu0 %v3534_v53  ;;  %v4562_v53 = vsub.s32 5, %v2486_v31 }
 0x134   : > { %2444 = vmatpush1.bf16.msra.mxu0 %v3532_v54 }
 0x135   : > { %2445 = vmatprep.subr.bf16.mxu0 %v3537_v55 }
 0x138   : > { %2446 = vmatpush1.bf16.msra.mxu0 %v3535_v56  ;;  %v2527_v56 = vunpack.c.h.bf16 %v2522_v40 }
 0x139   : > { %2447 = vmatprep.subr.bf16.mxu0 %v3540_v57  ;;  %v2523_v57 = vld [vmem:[%s319_s8 + $0x10] sm:$0xff] }
 0x13c   : > { %2448 = vmatpush1.bf16.msra.mxu0 %v3538_v58 }
 0x13d   : > { %2449 = vmatprep.subr.bf16.mxu0 %v3543_v59  ;;  %v2504_v59 = vrot.slane %v2483_v32, %v4560_v52 }
 0x140   : > { %2450 = vmatpush1.bf16.msra.mxu0 %v3541_v60 }
 0x141   : > { %2451 = vmatprep.subr.bf16.mxu0 %v3546_v61  ;;  %v2508_v61 = vrot.slane %v2483_v32, %v4562_v53 }
 0x144   : > { %2452 = vmatpush1.bf16.msra.mxu0 %v3544_v62 }
 0x147   : > { %2454 = vmatmul.mubr.bf16.vlgmr.msra.gmra.mrb[16].mxu0 %v4053_v14 }
 0x15a   : > { %v2209_v63 = vpop.f32.mrb[4].mxu0 }
 0x15b   : > { %v2250_v0 = vpop.f32.mrb[4].mxu1  ;;  %v2210_v1 = vadd.f32 %v2209_v63, %v2169_v33  ;;  %v2211_v2 = vpop.f32.mrb[5].mxu0  ;;  %v4552_v33 = vsub.s32 2, %v2486_v31 }
 0x15c   : > { %v2252_v3 = vpop.f32.mrb[5].mxu1  ;;  %v2212_v4 = vadd.f32 %v2211_v2, %v2171_v37  ;;  %v2213_v5 = vpop.f32.mrb[6].mxu0  ;;  %v2521_v37 = vld [vmem:[%s319_s8] sm:$0xff] }
 0x15d   : > { %v2254_v8 = vpop.f32.mrb[6].mxu1  ;;  %v2214_v9 = vpop.f32.mrb[7].mxu0  ;;  %v2496_v38 = vrot.slane %v2483_v32, %v4552_v33  ;;  %v2515_v41 = vadd.f32 %v2488_v35, %v2210_v1  ;;  %v2524_v42 = vunpack.c.l.bf16 %v2521_v37  ;;  %v2525_v44 = vunpack.c.h.bf16 %v2521_v37  ;;  %v2573_v37 = vld [vmem:[%s4601_s4] sm:$0x3f] }
 0x15e   : > { %v2255_v10 = vpop.f32.mrb[7].mxu1  ;;  %v2516_v43 = vadd.f32 %v2492_v36, %v2212_v4  ;;  %v2528_v1 = vunpack.c.l.bf16 %v2523_v57  ;;  %v2529_v5 = vunpack.c.h.bf16 %v2523_v57  ;;  %v2578_v40 = vrot.slane %v2573_v37, %v4541_v47 }
 0x15f   : > { %v2530_v49 = vadd.f32 %v2524_v42, %v2515_v41  ;;  %v2582_v42 = vrot.slane %v2573_v37, %v4543_v51 }
 0x160   : > { %v2531_v50 = vadd.f32 %v2525_v44, %v2516_v43  ;;  %v2586_v44 = vrot.slane %v2573_v37, %v4552_v33 }
 0x162   : > { %v2536_v58 = vadd.f32 %v2531_v50, %v2530_v49 }
 0x19a   : > { %v2291_v11 = vpop.f32.mrb[8].mxu0 }
 0x19b   : > { %v2332_v12 = vpop.f32.mrb[8].mxu1  ;;  %v2292_v13 = vadd.f32 %v2291_v11, %v2250_v0  ;;  %v2293_v15 = vpop.f32.mrb[9].mxu0 }
 0x19c   : > { %v2334_v16 = vpop.f32.mrb[9].mxu1  ;;  %v2294_v17 = vadd.f32 %v2293_v15, %v2252_v3  ;;  %v2295_v18 = vpop.f32.mrb[10].mxu0 }
 0x19d   : > { %v2336_v19 = vpop.f32.mrb[10].mxu1  ;;  %v2333_v20 = vadd.f32 %v2332_v12, %v2292_v13  ;;  %v2296_v14 = vpop.f32.mrb[11].mxu0 }
 0x19e   : > { %v2337_v21 = vpop.f32.mrb[11].mxu1  ;;  %v2335_v22 = vadd.f32 %v2334_v16, %v2294_v17 }
 0x19f   : > { %v2517_v45 = vadd.f32 %v2496_v38, %v2333_v20  ;;  %v2611_v38 = vld [vmem:[%s4602_s5] sm:$0x3f] }
 0x1a0   : > { %v2518_v55 = vadd.f32 %v2500_v48, %v2335_v22  ;;  %v2616_v41 = vrot.slane %v2611_v38, %v4541_v47  ;;  %v2620_v43 = vrot.slane %v2611_v38, %v4543_v51  ;;  %v2624_v48 = vrot.slane %v2611_v38, %v4552_v33 }
 0x1a1   : > { %v2532_v54 = vadd.f32 %v2526_v46, %v2517_v45  ;;  %v2590_v45 = vrot.slane %v2573_v37, %v4557_v39  ;;  %v2632_v51 = vrot.slane %v2611_v38, %v4560_v52 }
 0x1a2   : > { %v2533_v62 = vadd.f32 %v2527_v56, %v2518_v55 }
 0x1a3   : > { %v2537_v2 = vadd.f32 %v2536_v58, %v2532_v54  ;;  %v2636_v58 = vrot.slane %v2611_v38, %v4562_v53 }
 0x1a5   : > { %v2538_v12 = vadd.f32 %v2537_v2, %v2533_v62 }
 0x1da   : > { %v2373_v23 = vpop.f32.mrb[12].mxu0 }
 0x1db   : > { %v2414_v24 = vpop.f32.mrb[12].mxu1  ;;  %v2375_v26 = vpop.f32.mrb[13].mxu0 }
 0x1dc   : > { %v2415_v25 = vadd.f32 %v2414_v24, %v2373_v23  ;;  %v2416_v27 = vpop.f32.mrb[13].mxu1  ;;  %v2377_v6 = vpop.f32.mrb[14].mxu0 }
 0x1dd   : > { %v2417_v28 = vadd.f32 %v2416_v27, %v2375_v26  ;;  %v2418_v7 = vpop.f32.mrb[14].mxu1  ;;  %v2378_v34 = vpop.f32.mrb[15].mxu0 }
 0x1de   : > { %v2419_v29 = vpop.f32.mrb[15].mxu1 }
 0x21a   : > { %v2455_v60 = vpop.f32.mrb[16].mxu0 }
 0x21b   : > { %v2456_v63 = vadd.f32 %v2455_v60, %v2415_v25  ;;  %v2457_v0 = vpop.f32.mrb[17].mxu0 }
 0x21c   : > { %v2458_v3 = vadd.f32 %v2457_v0, %v2417_v28  ;;  %v2459_v4 = vpop.f32.mrb[18].mxu0 }
 0x21d   : > { %v2519_v8 = vadd.f32 %v2504_v59, %v2456_v63  ;;  %v2460_v9 = vpop.f32.mrb[19].mxu0 }
 0x21e   : > { %v2520_v10 = vadd.f32 %v2508_v61, %v2458_v3 }
 0x21f   : > { %v2534_v11 = vadd.f32 %v2528_v1, %v2519_v8 }
 0x220   : > { %v2535_v13 = vadd.f32 %v2529_v5, %v2520_v10 }
 0x221   : > { %v2539_v15 = vadd.f32 %v2538_v12, %v2534_v11 }
 0x223   : > { %v2540_v16 = vadd.f32 %v2539_v15, %v2535_v13 }
 0x225   : > { %2541 = vadd.xlane.f32.xlu0 %v2540_v16 }
 0x2b2   : > { %v2542_v17 = vpop.xlane.xlu0 %2541 }
 0x2b3   : > { %v2544_v18 = vmul.f32 0.0013020834, %v2542_v17 }
 0x2b5   : > { %v2545_v19 = vsub.f32 %v2530_v49, %v2544_v18  ;;  %v2546_v20 = vsub.f32 %v2531_v50, %v2544_v18  ;;  %v2547_v14 = vsub.f32 %v2532_v54, %v2544_v18  ;;  %v2548_v21 = vsub.f32 %v2533_v62, %v2544_v18 }
 0x2b6   : > { %v2549_v24 = vsub.f32 %v2534_v11, %v2544_v18  ;;  %v2550_v27 = vsub.f32 %v2535_v13, %v2544_v18  ;;  %v2628_v49 = vrot.slane %v2611_v38, %v4557_v39  ;;  %v2594_v50 = vrot.slane %v2573_v37, %v4560_v52 }
 0x2b7   : > { %v2551_v22 = vmul.f32 %v2545_v19, %v2545_v19  ;;  %v2552_v23 = vmul.f32 %v2546_v20, %v2546_v20  ;;  %v2553_v25 = vmul.f32 %v2547_v14, %v2547_v14  ;;  %v2554_v28 = vmul.f32 %v2548_v21, %v2548_v21 }
 0x2b8   : > { %v2555_v7 = vmul.f32 %v2549_v24, %v2549_v24  ;;  %v2556_v29 = vmul.f32 %v2550_v27, %v2550_v27  ;;  %v2598_v54 = vrot.slane %v2573_v37, %v4562_v53 }
 0x2b9   : > { %v2557_v26 = vadd.f32 %v2552_v23, %v2551_v22 }
 0x2bb   : > { %v2558_v6 = vadd.f32 %v2557_v26, %v2553_v25 }
 0x2bd   : > { %v2559_v34 = vadd.f32 %v2558_v6, %v2554_v28 }
 0x2bf   : > { %v2560_v30 = vadd.f32 %v2559_v34, %v2555_v7 }
 0x2c1   : > { %v2561_v31 = vadd.f32 %v2560_v30, %v2556_v29 }
 0x2c3   : > { %2562 = vadd.xlane.f32.xlu0 %v2561_v31 }
 0x350   : > { %v2563_v32 = vpop.xlane.xlu0 %2562 }
 0x351   : > { %v2564_v35 = vmul.f32 0.0013020834, %v2563_v32 }
 0x353   : > { %v2565_v36 = vadd.f32 1e-12, %v2564_v35 }
 0x355   : > { %3547 = vrsqrt.f32 %v2565_v36 }
 0x35f   : > { %v3548_v46 = vpop.eup %3547 }
 0x360   : > { %v2567_v55 = vmul.f32 %v3548_v46, %v2545_v19  ;;  %v2568_v56 = vmul.f32 %v3548_v46, %v2546_v20  ;;  %v2569_v47 = vmul.f32 %v3548_v46, %v2547_v14  ;;  %v2570_v57 = vmul.f32 %v3548_v46, %v2548_v21 }
 0x361   : > { %v2571_v59 = vmul.f32 %v3548_v46, %v2549_v24  ;;  %v2572_v60 = vmul.f32 %v3548_v46, %v2550_v27 }
 0x362   : > { %v2605_v61 = vmul.f32 %v2578_v40, %v2567_v55  ;;  %v2606_v62 = vmul.f32 %v2582_v42, %v2568_v56  ;;  %v2607_v33 = vmul.f32 %v2586_v44, %v2569_v47  ;;  %v2608_v63 = vmul.f32 %v2590_v45, %v2570_v57 }
 0x363   : > { %v2609_v39 = vmul.f32 %v2594_v50, %v2571_v59  ;;  %v2610_v0 = vmul.f32 %v2598_v54, %v2572_v60 }
 0x364   : > { %v2643_v1 = vadd.f32 %v2616_v41, %v2605_v61  ;;  %v2644_v2 = vadd.f32 %v2620_v43, %v2606_v62  ;;  %v2645_v3 = vadd.f32 %v2624_v48, %v2607_v33  ;;  %v2646_v4 = vadd.f32 %v2628_v49, %v2608_v63 }
 0x365   : > { %v2647_v5 = vadd.f32 %v2632_v51, %v2609_v39  ;;  %v2648_v52 = vadd.f32 %v2636_v58, %v2610_v0 }
 0x366   : > { %v3081_v8 = vpack.c.bf16 %v2644_v2, %v2643_v1  ;;  %v3082_v53 = vpack.c.bf16 %v2646_v4, %v2645_v3 }
 0x367   : > { %v3083_v9 = vpack.c.bf16 %v2648_v52, %v2647_v5 }
 0x368   : > { %2673 = vst [vmem:[%s324_s15] sm:$0xff] %v3081_v8  ;;  %2674 = vst [vmem:[%s324_s15 + $0x8] sm:$0xff] %v3082_v53 }
 0x369   : > { %2675 = vst [vmem:[%s324_s15 + $0x10] sm:$0xff] %v3083_v9 }
 0x36a PF: > { %s16_s23 = sadd.s32 1, %s3571_s23   ;;  %s4604_s21 = smov %s3567_s22 }
 0x36b   : > { %p13_p5 = scmp.ge.s32.totalorder %s16_s23, 4   ;;  %s4605_s22 = smov %s4607_s24 }
 0x36d   :  { %15 = sbr.rel (!%p13_p5) target bundleno = 2 (0x2), region = 88 }

// kernel: bert_with_regularization_forward.17
= control target key start
LH: loop header
LB: loop body
LE: loop exit
PB: predicated region body
PF: predicated region fallthrough
CT: control target
= control target key end

     0   :  { %s3645_s21 = smov 0   ;;  %s3647_s22 = smov 0   ;;  %s4088_s0 = inlined_call_operand.vmem [shape: bf16[16,3072], index: 0, kind: input, shape index: {}]   ;;  %s4089_s1 = inlined_call_operand.vmem [shape: bf16[3072,768], index: 1, kind: input, shape index: {}]   ;;  %s4090_s2 = inlined_call_operand.vmem [shape: f32[1,768], index: 2, kind: input, shape index: {}]   ;;  %s4091_s3 = inlined_call_operand.vmem [shape: bf16[16,768], index: 3, kind: input, shape index: {}]   ;;  %s4092_s4 = inlined_call_operand.vmem [shape: f32[1,768], index: 4, kind: input, shape index: {}]   ;;  %s4093_s5 = inlined_call_operand.vmem [shape: f32[1,768], index: 5, kind: input, shape index: {}]   ;;  %s4094_s6 = inlined_call_operand.vmem [shape: bf16[16,768], index: 6, kind: output, shape index: {}]  }
   0x1   :  { %s3649_s23 = smov 0   ;;  %s3651_s24 = smov 0  }
   0x2   :  { %s3653_s25 = smov 0  }
   0x3 LB: > { %s25_s26 = sadd.s32 1, %s3599_s23  ;;  %s28_s27 = sadd.s32 1, %s3603_s24  ;;  %s3607_s25 = sphi %s3653_s25, %s16_s25   ;;  %s3603_s24 = sphi %s3651_s24, %s4098_s24   ;;  %s3599_s23 = sphi %s3649_s23, %s4097_s23   ;;  %s3595_s22 = sphi %s3647_s22, %s4096_s22   ;;  %s3591_s21 = sphi %s3645_s21, %s4095_s21  }
   0x4   : > { %p26_p0 = scmp.ge.s32.totalorder %s25_s26, 4  ;;  %p2777_p1 = scmp.ge.s32.totalorder %s3607_s25, 1 }
   0x5   : > { %p253_p2 = scmp.lt.s32.totalorder %s3607_s25, 9 }
   0x6   : > { %s4100_s26 = smov (%p26_p0, %s25_s26), 0  ;;  %s4102_s27 = smov (!%p26_p0, %s28_s27), %s3603_s24 }
   0x7   : > { %p254_p3 = pnand %p2777_p1, %p253_p2  ;;  %p30_p4 = scmp.ge.s32.totalorder %s4102_s27, 2 }
   0x8   : > { %s298_s28 = smul.u32 (!%p254_p3), 6, %s3591_s21  ;;  %p299_p5 = scmp.lt.s32.totalorder (!%p254_p3), %s3595_s22, 1 }
   0x9   : > { %s4104_s27 = smov (%p30_p4, %s4102_s27), 0  ;;  %257 = sbr.rel (%p254_p3) target bundleno = 907 (0x38b), region = 44 }
   0xa   : > { %s308_s29 = smul.u32 (!%p254_p3), 96, %s3591_s21  ;;  %p301_p6 = scmp.lt.s32.totalorder (!%p254_p3), %s298_s28, 23 }
   0xb   : > { %p2782_p8 = scmp.ne.s32.totalorder (!%p254_p3), %s3591_s21, 0 }
   0xc   : > { %p309_p7 = scmp.lt.s32.totalorder (!%p254_p3), %s308_s29, 383 }
  0x10   : > { %s4106_s22 = smov (!%p299_p5, %s3595_s22), 1  ;;  %s4108_s28 = smov (!%p301_p6, %s298_s28), 23 }
  0x11   : > { %s3086_s30 = smul.u32 24, %s4106_s22  ;;  %s4110_s29 = smov (!%p309_p7, %s308_s29), 383  ;;  %v3609_v0 = vmov (!%p2782_p8), 0.0  }
  0x12   : > { %s3087_s12 = smul.u32 24, %s4110_s29  ;;  %329 = vst [vmem:[#allocation2] sm:$0xff] (!%p2782_p8), %v3609_v0  ;;  %330 = vst [vmem:[#allocation2 + $0x8] sm:$0xff] (!%p2782_p8), %v3609_v0 }
  0x13   : > { %s304_s7 = sadd.s32 %s3086_s30, %s4108_s28  ;;  %s3682_s10 = scalar_lea.vmem %s4091_s3, %s3086_s30  ;;  %331 = vst [vmem:[#allocation2 + $0x10] sm:$0xff] (!%p2782_p8), %v3609_v0  ;;  %332 = vst [vmem:[#allocation2 + $0x18] sm:$0xff] (!%p2782_p8), %v3609_v0 }
  0x14   : > { %s2778_s11 = sshll.u32 %s304_s7, 2  ;;  %s3692_s18 = scalar_lea.vmem %s4094_s6, %s3086_s30  ;;  %333 = vst [vmem:[#allocation2 + $0x20] sm:$0xff] (!%p2782_p8), %v3609_v0  ;;  %334 = vst [vmem:[#allocation2 + $0x28] sm:$0xff] (!%p2782_p8), %v3609_v0 }
  0x15   : > { %s3687_s15 = scalar_lea.vmem %s4088_s0, %s2778_s11  ;;  %s3697_s22 = scalar_lea.vmem %s4089_s1, %s3087_s12 }
  0x16   : > { %328 = sbr.rel (%p2782_p8) target bundleno = 29 (0x1d), region = 48 }
  0x1d PF: > { %v3129_v1 = vld [vmem:[%s3697_s22 + $0x4] ss:$24 sps:$4 sm:$0xff]   ;;  %v3133_v3 = vld [vmem:[%s3697_s22] ss:$24 sps:$4 sm:$0xff]   ;;  %v3135_v5 = vld [vmem:[%s3697_s22 + $0x34] ss:$24 sps:$4 sm:$0xff]  }
  0x1e   : > { %v3131_v2 = vld [vmem:[%s3697_s22 + $0x304] ss:$24 sps:$4 sm:$0xff]   ;;  %2093 = vmatprep.subr.bf16.mxu0 %v3129_v1  ;;  %v3134_v4 = vld [vmem:[%s3697_s22 + $0x300] ss:$24 sps:$4 sm:$0xff]   ;;  %v3137_v6 = vld [vmem:[%s3697_s22 + $0x334] ss:$24 sps:$4 sm:$0xff]  }
  0x1f   : > { %2134 = vmatprep.subr.bf16.mxu1 %v3131_v2  ;;  %2094 = vmatpush1.bf16.msra.mxu0 %v3133_v3  ;;  %v3139_v7 = vld [vmem:[%s3697_s22 + $0x30] ss:$24 sps:$4 sm:$0xff]   ;;  %v3141_v9 = vld [vmem:[%s3697_s22 + $0x64] ss:$24 sps:$4 sm:$0xff]   ;;  %v3145_v11 = vld [vmem:[%s3697_s22 + $0x60] ss:$24 sps:$4 sm:$0xff]  }
  0x20   : > { %2135 = vmatpush1.bf16.msra.mxu1 %v3134_v4  ;;  %2095 = vmatprep.subr.bf16.mxu0 %v3135_v5  ;;  %v3140_v8 = vld [vmem:[%s3697_s22 + $0x330] ss:$24 sps:$4 sm:$0xff]   ;;  %v3143_v10 = vld [vmem:[%s3697_s22 + $0x364] ss:$24 sps:$4 sm:$0xff]   ;;  %v3146_v12 = vld [vmem:[%s3697_s22 + $0x360] ss:$24 sps:$4 sm:$0xff]  }
  0x21   : > { %2136 = vmatprep.subr.bf16.mxu1 %v3137_v6  ;;  %v3147_v13 = vld [vmem:[%s3697_s22 + $0x94] ss:$24 sps:$4 sm:$0xff]   ;;  %v3151_v15 = vld [vmem:[%s3697_s22 + $0x90] ss:$24 sps:$4 sm:$0xff]   ;;  %v3153_v17 = vld [vmem:[%s3697_s22 + $0xc4] ss:$24 sps:$4 sm:$0xff]  }
  0x22   : > { %v3149_v14 = vld [vmem:[%s3697_s22 + $0x394] ss:$24 sps:$4 sm:$0xff]   ;;  %v3152_v16 = vld [vmem:[%s3697_s22 + $0x390] ss:$24 sps:$4 sm:$0xff]   ;;  %v3155_v18 = vld [vmem:[%s3697_s22 + $0x3c4] ss:$24 sps:$4 sm:$0xff]  }
  0x23   : > { %2096 = vmatpush1.bf16.msra.mxu0 %v3139_v7  ;;  %v3157_v19 = vld [vmem:[%s3697_s22 + $0xc0] ss:$24 sps:$4 sm:$0xff]   ;;  %v3159_v21 = vld [vmem:[%s3697_s22 + $0xf4] ss:$24 sps:$4 sm:$0xff]   ;;  %v3163_v23 = vld [vmem:[%s3697_s22 + $0xf0] ss:$24 sps:$4 sm:$0xff]  }
  0x24   : > { %2137 = vmatpush1.bf16.msra.mxu1 %v3140_v8  ;;  %2097 = vmatprep.subr.bf16.mxu0 %v3141_v9  ;;  %v3158_v20 = vld [vmem:[%s3697_s22 + $0x3c0] ss:$24 sps:$4 sm:$0xff]   ;;  %v3161_v22 = vld [vmem:[%s3697_s22 + $0x3f4] ss:$24 sps:$4 sm:$0xff]   ;;  %v3164_v24 = vld [vmem:[%s3697_s22 + $0x3f0] ss:$24 sps:$4 sm:$0xff]  }
  0x25   : > { %2138 = vmatprep.subr.bf16.mxu1 %v3143_v10  ;;  %v3165_v25 = vld [vmem:[%s3697_s22 + $0x124] ss:$24 sps:$4 sm:$0xff]   ;;  %v3169_v27 = vld [vmem:[%s3697_s22 + $0x120] ss:$24 sps:$4 sm:$0xff]   ;;  %v3171_v29 = vld [vmem:[%s3697_s22 + $0x154] ss:$24 sps:$4 sm:$0xff]  }
  0x26   : > { %v3167_v26 = vld [vmem:[%s3697_s22 + $0x424] ss:$24 sps:$4 sm:$0xff]   ;;  %v3170_v28 = vld [vmem:[%s3697_s22 + $0x420] ss:$24 sps:$4 sm:$0xff]   ;;  %v3173_v30 = vld [vmem:[%s3697_s22 + $0x454] ss:$24 sps:$4 sm:$0xff]  }
  0x27   : > { %2098 = vmatpush1.bf16.msra.mxu0 %v3145_v11  ;;  %v3175_v31 = vld [vmem:[%s3697_s22 + $0x150] ss:$24 sps:$4 sm:$0xff]   ;;  %v3177_v33 = vld [vmem:[%s3697_s22 + $0x184] ss:$24 sps:$4 sm:$0xff]   ;;  %v3181_v35 = vld [vmem:[%s3697_s22 + $0x180] ss:$24 sps:$4 sm:$0xff]  }
  0x28   : > { %2139 = vmatpush1.bf16.msra.mxu1 %v3146_v12  ;;  %2099 = vmatprep.subr.bf16.mxu0 %v3147_v13  ;;  %v3176_v32 = vld [vmem:[%s3697_s22 + $0x450] ss:$24 sps:$4 sm:$0xff]   ;;  %v3179_v34 = vld [vmem:[%s3697_s22 + $0x484] ss:$24 sps:$4 sm:$0xff]   ;;  %v3182_v36 = vld [vmem:[%s3697_s22 + $0x480] ss:$24 sps:$4 sm:$0xff]  }
  0x29   : > { %2140 = vmatprep.subr.bf16.mxu1 %v3149_v14  ;;  %v3183_v37 = vld [vmem:[%s3697_s22 + $0x1b4] ss:$24 sps:$4 sm:$0xff]   ;;  %v3187_v39 = vld [vmem:[%s3697_s22 + $0x1b0] ss:$24 sps:$4 sm:$0xff]   ;;  %v3189_v41 = vld [vmem:[%s3697_s22 + $0x1e4] ss:$24 sps:$4 sm:$0xff]  }
  0x2a   : > { %v3185_v38 = vld [vmem:[%s3697_s22 + $0x4b4] ss:$24 sps:$4 sm:$0xff]   ;;  %v3188_v40 = vld [vmem:[%s3697_s22 + $0x4b0] ss:$24 sps:$4 sm:$0xff]   ;;  %v3191_v42 = vld [vmem:[%s3697_s22 + $0x4e4] ss:$24 sps:$4 sm:$0xff]  }
  0x2b   : > { %2100 = vmatpush1.bf16.msra.mxu0 %v3151_v15  ;;  %v3193_v43 = vld [vmem:[%s3697_s22 + $0x1e0] ss:$24 sps:$4 sm:$0xff]   ;;  %v3195_v45 = vld [vmem:[%s3697_s22 + $0x214] ss:$24 sps:$4 sm:$0xff]   ;;  %v3199_v50 = vld [vmem:[%s3697_s22 + $0x210] ss:$24 sps:$4 sm:$0xff]  }
  0x2c   : > { %2141 = vmatpush1.bf16.msra.mxu1 %v3152_v16  ;;  %2101 = vmatprep.subr.bf16.mxu0 %v3153_v17  ;;  %v3194_v44 = vld [vmem:[%s3697_s22 + $0x4e0] ss:$24 sps:$4 sm:$0xff]   ;;  %v3197_v46 = vld [vmem:[%s3697_s22 + $0x514] ss:$24 sps:$4 sm:$0xff]   ;;  %v3200_v51 = vld [vmem:[%s3697_s22 + $0x510] ss:$24 sps:$4 sm:$0xff]  }
  0x2d   : > { %2142 = vmatprep.subr.bf16.mxu1 %v3155_v18  ;;  %v341_v47 = vld [vmem:[%s3687_s15] sm:$0xff]  ;;  %v342_v49 = vld [vmem:[%s3687_s15 + $0x8] sm:$0xff]  ;;  %v3240_v12 = vld [vmem:[%s3697_s22 + $0x3c] ss:$24 sps:$4 sm:$0xff]   ;;  %p3077_p9 = scmp.ne.s32.totalorder %s3591_s21, 3 }
  0x2e   : > { %v3747_v48 = vcombine.high %v341_v47, %v341_v47  ;;  %v3752_v52 = vcombine.high %v342_v49, %v342_v49  ;;  %v3201_v53 = vld [vmem:[%s3697_s22 + $0x244] ss:$24 sps:$4 sm:$0xff]   ;;  %v3205_v55 = vld [vmem:[%s3697_s22 + $0x240] ss:$24 sps:$4 sm:$0xff]   ;;  %v3207_v57 = vld [vmem:[%s3697_s22 + $0x274] ss:$24 sps:$4 sm:$0xff]   ;;  %v3774_v7 = vcombine.low %v341_v47, %v341_v47  ;;  %v3776_v8 = vcombine.low %v342_v49, %v342_v49 }
  0x2f   : > { %2102 = vmatpush1.bf16.msra.mxu0 %v3157_v19  ;;  %v3203_v54 = vld [vmem:[%s3697_s22 + $0x544] ss:$24 sps:$4 sm:$0xff]   ;;  %v3206_v56 = vld [vmem:[%s3697_s22 + $0x540] ss:$24 sps:$4 sm:$0xff]   ;;  %v3209_v58 = vld [vmem:[%s3697_s22 + $0x574] ss:$24 sps:$4 sm:$0xff]  }
  0x30   : > { %2143 = vmatpush1.bf16.msra.mxu1 %v3158_v20  ;;  %2103 = vmatprep.subr.bf16.mxu0 %v3159_v21  ;;  %v3211_v59 = vld [vmem:[%s3697_s22 + $0x270] ss:$24 sps:$4 sm:$0xff]   ;;  %v3213_v61 = vld [vmem:[%s3697_s22 + $0x2a4] ss:$24 sps:$4 sm:$0xff]   ;;  %v3217_v63 = vld [vmem:[%s3697_s22 + $0x2a0] ss:$24 sps:$4 sm:$0xff]  }
  0x31   : > { %2144 = vmatprep.subr.bf16.mxu1 %v3161_v22  ;;  %2125 = vmatprep.mubr.bf16.mxu0 %v3747_v48  ;;  %v3212_v60 = vld [vmem:[%s3697_s22 + $0x570] ss:$24 sps:$4 sm:$0xff]   ;;  %v3215_v62 = vld [vmem:[%s3697_s22 + $0x5a4] ss:$24 sps:$4 sm:$0xff]   ;;  %v3218_v0 = vld [vmem:[%s3697_s22 + $0x5a0] ss:$24 sps:$4 sm:$0xff]  }
  0x32   : > { %2166 = vmatprep.mubr.bf16.mxu1 %v3752_v52  ;;  %v3219_v1 = vld [vmem:[%s3697_s22 + $0x2d4] ss:$24 sps:$4 sm:$0xff]   ;;  %v3223_v3 = vld [vmem:[%s3697_s22 + $0x2d0] ss:$24 sps:$4 sm:$0xff]   ;;  %v3231_v5 = vld [vmem:[%s3697_s22 + $0x604] ss:$24 sps:$4 sm:$0xff]  }
  0x33   : > { %2104 = vmatpush1.bf16.msra.mxu0 %v3163_v23  ;;  %v3221_v2 = vld [vmem:[%s3697_s22 + $0x5d4] ss:$24 sps:$4 sm:$0xff]   ;;  %v3224_v4 = vld [vmem:[%s3697_s22 + $0x5d0] ss:$24 sps:$4 sm:$0xff]   ;;  %v3229_v9 = vld [vmem:[%s3697_s22 + $0x600] ss:$24 sps:$4 sm:$0xff]  }
  0x34   : > { %2145 = vmatpush1.bf16.msra.mxu1 %v3164_v24  ;;  %2105 = vmatprep.subr.bf16.mxu0 %v3165_v25  ;;  %v3234_v6 = vld [vmem:[%s3697_s22 + $0xc] ss:$24 sps:$4 sm:$0xff]   ;;  %v3232_v10 = vld [vmem:[%s3697_s22 + $0x8] ss:$24 sps:$4 sm:$0xff]   ;;  %v3238_v14 = vld [vmem:[%s3697_s22 + $0x38] ss:$24 sps:$4 sm:$0xff]  }
  0x35   : > { %2146 = vmatprep.subr.bf16.mxu1 %v3167_v26  ;;  %v3237_v11 = vld [vmem:[%s3697_s22 + $0x634] ss:$24 sps:$4 sm:$0xff]   ;;  %v3235_v13 = vld [vmem:[%s3697_s22 + $0x630] ss:$24 sps:$4 sm:$0xff]   ;;  %v3243_v15 = vld [vmem:[%s3697_s22 + $0x664] ss:$24 sps:$4 sm:$0xff]  }
  0x36   : > { %v3246_v16 = vld [vmem:[%s3697_s22 + $0x6c] ss:$24 sps:$4 sm:$0xff]   ;;  %v3241_v17 = vld [vmem:[%s3697_s22 + $0x660] ss:$24 sps:$4 sm:$0xff]   ;;  %v3252_v20 = vld [vmem:[%s3697_s22 + $0x9c] ss:$24 sps:$4 sm:$0xff]  }
  0x37   : > { %2106 = vmatpush1.bf16.msra.mxu0 %v3169_v27  ;;  %v3244_v18 = vld [vmem:[%s3697_s22 + $0x68] ss:$24 sps:$4 sm:$0xff]   ;;  %v3249_v19 = vld [vmem:[%s3697_s22 + $0x694] ss:$24 sps:$4 sm:$0xff]   ;;  %v3250_v22 = vld [vmem:[%s3697_s22 + $0x98] ss:$24 sps:$4 sm:$0xff]  }
  0x38   : > { %2147 = vmatpush1.bf16.msra.mxu1 %v3170_v28  ;;  %2107 = vmatprep.subr.bf16.mxu0 %v3171_v29  ;;  %v3247_v21 = vld [vmem:[%s3697_s22 + $0x690] ss:$24 sps:$4 sm:$0xff]   ;;  %v3255_v23 = vld [vmem:[%s3697_s22 + $0x6c4] ss:$24 sps:$4 sm:$0xff]   ;;  %v3253_v25 = vld [vmem:[%s3697_s22 + $0x6c0] ss:$24 sps:$4 sm:$0xff]  }
  0x39   : > { %2148 = vmatprep.subr.bf16.mxu1 %v3173_v30  ;;  %v3258_v24 = vld [vmem:[%s3697_s22 + $0xcc] ss:$24 sps:$4 sm:$0xff]   ;;  %v3256_v26 = vld [vmem:[%s3697_s22 + $0xc8] ss:$24 sps:$4 sm:$0xff]   ;;  %v3264_v28 = vld [vmem:[%s3697_s22 + $0xfc] ss:$24 sps:$4 sm:$0xff]  }
  0x3a   : > { %v3261_v27 = vld [vmem:[%s3697_s22 + $0x6f4] ss:$24 sps:$4 sm:$0xff]   ;;  %v3259_v29 = vld [vmem:[%s3697_s22 + $0x6f0] ss:$24 sps:$4 sm:$0xff]  }
  0x3b   : > { %2108 = vmatpush1.bf16.msra.mxu0 %v3175_v31  ;;  %v3262_v30 = vld [vmem:[%s3697_s22 + $0xf8] ss:$24 sps:$4 sm:$0xff]   ;;  %v3267_v31 = vld [vmem:[%s3697_s22 + $0x724] ss:$24 sps:$4 sm:$0xff]  }
  0x3c   : > { %2149 = vmatpush1.bf16.msra.mxu1 %v3176_v32  ;;  %2109 = vmatprep.subr.bf16.mxu0 %v3177_v33  ;;  %v3270_v32 = vld [vmem:[%s3697_s22 + $0x12c] ss:$24 sps:$4 sm:$0xff]   ;;  %v3806_v33 = vld [vmem:[%s3687_s15 + $0x10] sm:$0xff] }
  0x3d   : > { %2150 = vmatprep.subr.bf16.mxu1 %v3179_v34  ;;  %v3265_v34 = vld [vmem:[%s3697_s22 + $0x720] ss:$24 sps:$4 sm:$0xff]   ;;  %v3283_v47 = vld [vmem:[%s3697_s22 + $0x7b0] ss:$24 sps:$4 sm:$0xff]  }
  0x3e   : > { %v3286_v49 = vld [vmem:[%s3697_s22 + $0x1b8] ss:$24 sps:$4 sm:$0xff]  }
  0x3f   : > { %2110 = vmatpush1.bf16.msra.mxu0 %v3181_v35  ;;  %v3811_v35 = vcombine.high %v3806_v33, %v3806_v33 }
  0x40   : > { %2151 = vmatpush1.bf16.msra.mxu1 %v3182_v36  ;;  %2111 = vmatprep.subr.bf16.mxu0 %v3183_v37  ;;  %v3268_v36 = vld [vmem:[%s3697_s22 + $0x128] ss:$24 sps:$4 sm:$0xff]   ;;  %v3273_v37 = vld [vmem:[%s3697_s22 + $0x754] ss:$24 sps:$4 sm:$0xff]  }
  0x41   : > { %2152 = vmatprep.subr.bf16.mxu1 %v3185_v38  ;;  %v3276_v38 = vld [vmem:[%s3697_s22 + $0x15c] ss:$24 sps:$4 sm:$0xff]  }
  0x43   : > { %2112 = vmatpush1.bf16.msra.mxu0 %v3187_v39  ;;  %v3271_v39 = vld [vmem:[%s3697_s22 + $0x750] ss:$24 sps:$4 sm:$0xff]  }
  0x44   : > { %2153 = vmatpush1.bf16.msra.mxu1 %v3188_v40  ;;  %2113 = vmatprep.subr.bf16.mxu0 %v3189_v41  ;;  %v3274_v40 = vld [vmem:[%s3697_s22 + $0x158] ss:$24 sps:$4 sm:$0xff]   ;;  %v3279_v41 = vld [vmem:[%s3697_s22 + $0x784] ss:$24 sps:$4 sm:$0xff]  }
  0x45   : > { %2154 = vmatprep.subr.bf16.mxu1 %v3191_v42  ;;  %v3282_v42 = vld [vmem:[%s3697_s22 + $0x18c] ss:$24 sps:$4 sm:$0xff]  }
  0x47   : > { %2114 = vmatpush1.bf16.msra.mxu0 %v3193_v43  ;;  %v3277_v43 = vld [vmem:[%s3697_s22 + $0x780] ss:$24 sps:$4 sm:$0xff]  }
  0x48   : > { %2155 = vmatpush1.bf16.msra.mxu1 %v3194_v44  ;;  %2115 = vmatprep.subr.bf16.mxu0 %v3195_v45  ;;  %v3280_v44 = vld [vmem:[%s3697_s22 + $0x188] ss:$24 sps:$4 sm:$0xff]   ;;  %v3285_v45 = vld [vmem:[%s3697_s22 + $0x7b4] ss:$24 sps:$4 sm:$0xff]  }
  0x49   : > { %2156 = vmatprep.subr.bf16.mxu1 %v3197_v46  ;;  %v3288_v46 = vld [vmem:[%s3697_s22 + $0x1bc] ss:$24 sps:$4 sm:$0xff]  }
  0x4b   : > { %2116 = vmatpush1.bf16.msra.mxu0 %v3199_v50  ;;  %v3291_v50 = vld [vmem:[%s3697_s22 + $0x7e4] ss:$24 sps:$4 sm:$0xff]  }
  0x4c   : > { %2157 = vmatpush1.bf16.msra.mxu1 %v3200_v51  ;;  %2117 = vmatprep.subr.bf16.mxu0 %v3201_v53  ;;  %v3294_v51 = vld [vmem:[%s3697_s22 + $0x1ec] ss:$24 sps:$4 sm:$0xff]   ;;  %v3289_v53 = vld [vmem:[%s3697_s22 + $0x7e0] ss:$24 sps:$4 sm:$0xff]  }
  0x4d   : > { %2158 = vmatprep.subr.bf16.mxu1 %v3203_v54  ;;  %v3292_v54 = vld [vmem:[%s3697_s22 + $0x1e8] ss:$24 sps:$4 sm:$0xff]  }
  0x4f   : > { %2118 = vmatpush1.bf16.msra.mxu0 %v3205_v55  ;;  %v3297_v55 = vld [vmem:[%s3697_s22 + $0x814] ss:$24 sps:$4 sm:$0xff]  }
  0x50   : > { %2159 = vmatpush1.bf16.msra.mxu1 %v3206_v56  ;;  %2119 = vmatprep.subr.bf16.mxu0 %v3207_v57  ;;  %v3300_v56 = vld [vmem:[%s3697_s22 + $0x21c] ss:$24 sps:$4 sm:$0xff]   ;;  %v3295_v57 = vld [vmem:[%s3697_s22 + $0x810] ss:$24 sps:$4 sm:$0xff]  }
  0x51   : > { %2160 = vmatprep.subr.bf16.mxu1 %v3209_v58  ;;  %v3298_v58 = vld [vmem:[%s3697_s22 + $0x218] ss:$24 sps:$4 sm:$0xff]  }
  0x53   : > { %2120 = vmatpush1.bf16.msra.mxu0 %v3211_v59  ;;  %v3303_v59 = vld [vmem:[%s3697_s22 + $0x844] ss:$24 sps:$4 sm:$0xff]  }
  0x54   : > { %2161 = vmatpush1.bf16.msra.mxu1 %v3212_v60  ;;  %2121 = vmatprep.subr.bf16.mxu0 %v3213_v61  ;;  %v3306_v60 = vld [vmem:[%s3697_s22 + $0x24c] ss:$24 sps:$4 sm:$0xff]   ;;  %v3301_v61 = vld [vmem:[%s3697_s22 + $0x840] ss:$24 sps:$4 sm:$0xff]  }
  0x55   : > { %2162 = vmatprep.subr.bf16.mxu1 %v3215_v62  ;;  %v3304_v62 = vld [vmem:[%s3697_s22 + $0x248] ss:$24 sps:$4 sm:$0xff]  }
  0x57   : > { %2122 = vmatpush1.bf16.msra.mxu0 %v3217_v63  ;;  %v3309_v63 = vld [vmem:[%s3697_s22 + $0x874] ss:$24 sps:$4 sm:$0xff]  }
  0x58   : > { %2163 = vmatpush1.bf16.msra.mxu1 %v3218_v0  ;;  %2123 = vmatprep.subr.bf16.mxu0 %v3219_v1  ;;  %v3312_v0 = vld [vmem:[%s3697_s22 + $0x27c] ss:$24 sps:$4 sm:$0xff]   ;;  %v3307_v1 = vld [vmem:[%s3697_s22 + $0x870] ss:$24 sps:$4 sm:$0xff]  }
  0x59   : > { %2164 = vmatprep.subr.bf16.mxu1 %v3221_v2  ;;  %v3310_v2 = vld [vmem:[%s3697_s22 + $0x278] ss:$24 sps:$4 sm:$0xff]  }
  0x5b   : > { %2124 = vmatpush1.bf16.msra.mxu0 %v3223_v3  ;;  %v3315_v3 = vld [vmem:[%s3697_s22 + $0x8a4] ss:$24 sps:$4 sm:$0xff]  }
  0x5c   : > { %2165 = vmatpush1.bf16.msra.mxu1 %v3224_v4  ;;  %2175 = vmatprep.subr.bf16.mxu0 %v3231_v5  ;;  %v3318_v4 = vld [vmem:[%s3697_s22 + $0x2ac] ss:$24 sps:$4 sm:$0xff]   ;;  %v3313_v5 = vld [vmem:[%s3697_s22 + $0x8a0] ss:$24 sps:$4 sm:$0xff]  }
  0x5d   : > { %2216 = vmatprep.subr.bf16.mxu1 %v3234_v6  ;;  %v3316_v6 = vld [vmem:[%s3697_s22 + $0x2a8] ss:$24 sps:$4 sm:$0xff]  }
  0x5e   : > { %2126 = vmatmul.mubr.bf16.vlgmr.msra.gmra.mrb[0].mxu0 %v3774_v7 }
  0x5f   : > { %2167 = vmatmul.mubr.bf16.vlgmr.msra.gmra.mrb[0].mxu1 %v3776_v8  ;;  %2176 = vmatpush1.bf16.msra.mxu0 %v3229_v9  ;;  %v3321_v9 = vld [vmem:[%s3697_s22 + $0x8d4] ss:$24 sps:$4 sm:$0xff]  }
  0x60   : > { %2217 = vmatpush1.bf16.msra.mxu1 %v3232_v10  ;;  %2177 = vmatprep.subr.bf16.mxu0 %v3237_v11  ;;  %v3324_v10 = vld [vmem:[%s3697_s22 + $0x2dc] ss:$24 sps:$4 sm:$0xff]   ;;  %v3319_v11 = vld [vmem:[%s3697_s22 + $0x8d0] ss:$24 sps:$4 sm:$0xff]  }
  0x61   : > { %2218 = vmatprep.subr.bf16.mxu1 %v3240_v12  ;;  %2248 = vmatprep.mubr.bf16.mxu1 %v3747_v48  ;;  %v3322_v12 = vld [vmem:[%s3697_s22 + $0x2d8] ss:$24 sps:$4 sm:$0xff]  }
  0x62   : > { %2207 = vmatprep.mubr.bf16.mxu0 %v3811_v35 }
  0x63   : > { %2178 = vmatpush1.bf16.msra.mxu0 %v3235_v13  ;;  %v3329_v13 = vld [vmem:[%s3697_s22 + $0x30c] ss:$24 sps:$4 sm:$0xff]  }
  0x64   : > { %2219 = vmatpush1.bf16.msra.mxu1 %v3238_v14  ;;  %2179 = vmatprep.subr.bf16.mxu0 %v3243_v15  ;;  %v3332_v14 = vld [vmem:[%s3697_s22 + $0x60c] ss:$24 sps:$4 sm:$0xff]   ;;  %v3855_v15 = vcombine.low %v3806_v33, %v3806_v33  ;;  %v3354_v33 = vld [vmem:[%s3697_s22 + $0x6c8] ss:$24 sps:$4 sm:$0xff]  }
  0x65   : > { %2220 = vmatprep.subr.bf16.mxu1 %v3246_v16  ;;  %v3327_v16 = vld [vmem:[%s3697_s22 + $0x308] ss:$24 sps:$4 sm:$0xff]  }
  0x67   : > { %2180 = vmatpush1.bf16.msra.mxu0 %v3241_v17  ;;  %v3330_v17 = vld [vmem:[%s3697_s22 + $0x608] ss:$24 sps:$4 sm:$0xff]  }
  0x68   : > { %2221 = vmatpush1.bf16.msra.mxu1 %v3244_v18  ;;  %2181 = vmatprep.subr.bf16.mxu0 %v3249_v19  ;;  %v3335_v18 = vld [vmem:[%s3697_s22 + $0x33c] ss:$24 sps:$4 sm:$0xff]  }
  0x69   : > { %2222 = vmatprep.subr.bf16.mxu1 %v3252_v20  ;;  %v3338_v19 = vld [vmem:[%s3697_s22 + $0x63c] ss:$24 sps:$4 sm:$0xff]   ;;  %v3333_v20 = vld [vmem:[%s3697_s22 + $0x338] ss:$24 sps:$4 sm:$0xff]  }
  0x6b   : > { %2182 = vmatpush1.bf16.msra.mxu0 %v3247_v21  ;;  %v3336_v21 = vld [vmem:[%s3697_s22 + $0x638] ss:$24 sps:$4 sm:$0xff]  }
  0x6c   : > { %2223 = vmatpush1.bf16.msra.mxu1 %v3250_v22  ;;  %2183 = vmatprep.subr.bf16.mxu0 %v3255_v23  ;;  %v3341_v22 = vld [vmem:[%s3697_s22 + $0x36c] ss:$24 sps:$4 sm:$0xff]  }
  0x6d   : > { %2224 = vmatprep.subr.bf16.mxu1 %v3258_v24  ;;  %v3344_v23 = vld [vmem:[%s3697_s22 + $0x66c] ss:$24 sps:$4 sm:$0xff]   ;;  %v3339_v24 = vld [vmem:[%s3697_s22 + $0x368] ss:$24 sps:$4 sm:$0xff]  }
  0x6f   : > { %2184 = vmatpush1.bf16.msra.mxu0 %v3253_v25  ;;  %v3342_v25 = vld [vmem:[%s3697_s22 + $0x668] ss:$24 sps:$4 sm:$0xff]  }
  0x70   : > { %2225 = vmatpush1.bf16.msra.mxu1 %v3256_v26  ;;  %2185 = vmatprep.subr.bf16.mxu0 %v3261_v27  ;;  %v3347_v26 = vld [vmem:[%s3697_s22 + $0x39c] ss:$24 sps:$4 sm:$0xff]  }
  0x71   : > { %2226 = vmatprep.subr.bf16.mxu1 %v3264_v28  ;;  %v3350_v27 = vld [vmem:[%s3697_s22 + $0x69c] ss:$24 sps:$4 sm:$0xff]   ;;  %v3345_v28 = vld [vmem:[%s3697_s22 + $0x398] ss:$24 sps:$4 sm:$0xff]  }
  0x73   : > { %2186 = vmatpush1.bf16.msra.mxu0 %v3259_v29  ;;  %v3348_v29 = vld [vmem:[%s3697_s22 + $0x698] ss:$24 sps:$4 sm:$0xff]  }
  0x74   : > { %2227 = vmatpush1.bf16.msra.mxu1 %v3262_v30  ;;  %2187 = vmatprep.subr.bf16.mxu0 %v3267_v31  ;;  %v3353_v30 = vld [vmem:[%s3697_s22 + $0x3cc] ss:$24 sps:$4 sm:$0xff]  }
  0x75   : > { %2228 = vmatprep.subr.bf16.mxu1 %v3270_v32  ;;  %v3356_v31 = vld [vmem:[%s3697_s22 + $0x6cc] ss:$24 sps:$4 sm:$0xff]   ;;  %v3351_v32 = vld [vmem:[%s3697_s22 + $0x3c8] ss:$24 sps:$4 sm:$0xff]  }
  0x77   : > { %2188 = vmatpush1.bf16.msra.mxu0 %v3265_v34  ;;  %v3359_v34 = vld [vmem:[%s3697_s22 + $0x3fc] ss:$24 sps:$4 sm:$0xff]  }
  0x78   : > { %2229 = vmatpush1.bf16.msra.mxu1 %v3268_v36  ;;  %2189 = vmatprep.subr.bf16.mxu0 %v3273_v37  ;;  %v3362_v36 = vld [vmem:[%s3697_s22 + $0x6fc] ss:$24 sps:$4 sm:$0xff]   ;;  %v3357_v37 = vld [vmem:[%s3697_s22 + $0x3f8] ss:$24 sps:$4 sm:$0xff]  }
  0x79   : > { %2230 = vmatprep.subr.bf16.mxu1 %v3276_v38  ;;  %v3360_v38 = vld [vmem:[%s3697_s22 + $0x6f8] ss:$24 sps:$4 sm:$0xff]  }
  0x7b   : > { %2190 = vmatpush1.bf16.msra.mxu0 %v3271_v39  ;;  %v3365_v39 = vld [vmem:[%s3697_s22 + $0x42c] ss:$24 sps:$4 sm:$0xff]  }
  0x7c   : > { %2231 = vmatpush1.bf16.msra.mxu1 %v3274_v40  ;;  %2191 = vmatprep.subr.bf16.mxu0 %v3279_v41  ;;  %v3368_v40 = vld [vmem:[%s3697_s22 + $0x72c] ss:$24 sps:$4 sm:$0xff]   ;;  %v3363_v41 = vld [vmem:[%s3697_s22 + $0x428] ss:$24 sps:$4 sm:$0xff]  }
  0x7d   : > { %2232 = vmatprep.subr.bf16.mxu1 %v3282_v42  ;;  %v3366_v42 = vld [vmem:[%s3697_s22 + $0x728] ss:$24 sps:$4 sm:$0xff]  }
  0x7f   : > { %2192 = vmatpush1.bf16.msra.mxu0 %v3277_v43  ;;  %v3371_v43 = vld [vmem:[%s3697_s22 + $0x45c] ss:$24 sps:$4 sm:$0xff]  }
  0x80   : > { %2233 = vmatpush1.bf16.msra.mxu1 %v3280_v44  ;;  %2193 = vmatprep.subr.bf16.mxu0 %v3285_v45  ;;  %v3374_v44 = vld [vmem:[%s3697_s22 + $0x75c] ss:$24 sps:$4 sm:$0xff]   ;;  %v3369_v45 = vld [vmem:[%s3697_s22 + $0x458] ss:$24 sps:$4 sm:$0xff]  }
  0x81   : > { %2234 = vmatprep.subr.bf16.mxu1 %v3288_v46  ;;  %v3372_v46 = vld [vmem:[%s3697_s22 + $0x758] ss:$24 sps:$4 sm:$0xff]  }
  0x83   : > { %2194 = vmatpush1.bf16.msra.mxu0 %v3283_v47  ;;  %v3377_v47 = vld [vmem:[%s3697_s22 + $0x48c] ss:$24 sps:$4 sm:$0xff]  }
  0x84   : > { %2235 = vmatpush1.bf16.msra.mxu1 %v3286_v49  ;;  %2195 = vmatprep.subr.bf16.mxu0 %v3291_v50  ;;  %v3380_v49 = vld [vmem:[%s3697_s22 + $0x78c] ss:$24 sps:$4 sm:$0xff]   ;;  %v3375_v50 = vld [vmem:[%s3697_s22 + $0x488] ss:$24 sps:$4 sm:$0xff]  }
  0x85   : > { %2236 = vmatprep.subr.bf16.mxu1 %v3294_v51  ;;  %v3378_v51 = vld [vmem:[%s3697_s22 + $0x788] ss:$24 sps:$4 sm:$0xff]  }
  0x87   : > { %2196 = vmatpush1.bf16.msra.mxu0 %v3289_v53  ;;  %v3383_v53 = vld [vmem:[%s3697_s22 + $0x4bc] ss:$24 sps:$4 sm:$0xff]  }
  0x88   : > { %2237 = vmatpush1.bf16.msra.mxu1 %v3292_v54  ;;  %2197 = vmatprep.subr.bf16.mxu0 %v3297_v55  ;;  %v3386_v54 = vld [vmem:[%s3697_s22 + $0x7bc] ss:$24 sps:$4 sm:$0xff]   ;;  %v3381_v55 = vld [vmem:[%s3697_s22 + $0x4b8] ss:$24 sps:$4 sm:$0xff]  }
  0x89   : > { %2238 = vmatprep.subr.bf16.mxu1 %v3300_v56  ;;  %v3384_v56 = vld [vmem:[%s3697_s22 + $0x7b8] ss:$24 sps:$4 sm:$0xff]  }
  0x8b   : > { %2198 = vmatpush1.bf16.msra.mxu0 %v3295_v57  ;;  %v3389_v57 = vld [vmem:[%s3697_s22 + $0x4ec] ss:$24 sps:$4 sm:$0xff]  }
  0x8c   : > { %2239 = vmatpush1.bf16.msra.mxu1 %v3298_v58  ;;  %2199 = vmatprep.subr.bf16.mxu0 %v3303_v59  ;;  %v3392_v58 = vld [vmem:[%s3697_s22 + $0x7ec] ss:$24 sps:$4 sm:$0xff]   ;;  %v3387_v59 = vld [vmem:[%s3697_s22 + $0x4e8] ss:$24 sps:$4 sm:$0xff]  }
  0x8d   : > { %2240 = vmatprep.subr.bf16.mxu1 %v3306_v60  ;;  %v3390_v60 = vld [vmem:[%s3697_s22 + $0x7e8] ss:$24 sps:$4 sm:$0xff]  }
  0x8f   : > { %2200 = vmatpush1.bf16.msra.mxu0 %v3301_v61  ;;  %v3395_v61 = vld [vmem:[%s3697_s22 + $0x51c] ss:$24 sps:$4 sm:$0xff]  }
  0x90   : > { %2241 = vmatpush1.bf16.msra.mxu1 %v3304_v62  ;;  %2201 = vmatprep.subr.bf16.mxu0 %v3309_v63  ;;  %v3398_v62 = vld [vmem:[%s3697_s22 + $0x81c] ss:$24 sps:$4 sm:$0xff]   ;;  %v3393_v63 = vld [vmem:[%s3697_s22 + $0x518] ss:$24 sps:$4 sm:$0xff]  }
  0x91   : > { %2242 = vmatprep.subr.bf16.mxu1 %v3312_v0  ;;  %v3396_v0 = vld [vmem:[%s3697_s22 + $0x818] ss:$24 sps:$4 sm:$0xff]  }
  0x93   : > { %2202 = vmatpush1.bf16.msra.mxu0 %v3307_v1  ;;  %v3401_v1 = vld [vmem:[%s3697_s22 + $0x54c] ss:$24 sps:$4 sm:$0xff]  }
  0x94   : > { %2243 = vmatpush1.bf16.msra.mxu1 %v3310_v2  ;;  %2203 = vmatprep.subr.bf16.mxu0 %v3315_v3  ;;  %v3404_v2 = vld [vmem:[%s3697_s22 + $0x84c] ss:$24 sps:$4 sm:$0xff]   ;;  %v3399_v3 = vld [vmem:[%s3697_s22 + $0x548] ss:$24 sps:$4 sm:$0xff]  }
  0x95   : > { %2244 = vmatprep.subr.bf16.mxu1 %v3318_v4  ;;  %v3402_v4 = vld [vmem:[%s3697_s22 + $0x848] ss:$24 sps:$4 sm:$0xff]  }
  0x97   : > { %2204 = vmatpush1.bf16.msra.mxu0 %v3313_v5  ;;  %v3407_v5 = vld [vmem:[%s3697_s22 + $0x57c] ss:$24 sps:$4 sm:$0xff]  }
  0x98   : > { %2245 = vmatpush1.bf16.msra.mxu1 %v3316_v6  ;;  %2205 = vmatprep.subr.bf16.mxu0 %v3321_v9  ;;  %v3410_v6 = vld [vmem:[%s3697_s22 + $0x87c] ss:$24 sps:$4 sm:$0xff]   ;;  %v3405_v9 = vld [vmem:[%s3697_s22 + $0x578] ss:$24 sps:$4 sm:$0xff]  }
  0x99   : > { %2246 = vmatprep.subr.bf16.mxu1 %v3324_v10  ;;  %v3408_v10 = vld [vmem:[%s3697_s22 + $0x878] ss:$24 sps:$4 sm:$0xff]  }
  0x9b   : > { %2206 = vmatpush1.bf16.msra.mxu0 %v3319_v11  ;;  %v3413_v11 = vld [vmem:[%s3697_s22 + $0x5ac] ss:$24 sps:$4 sm:$0xff]  }
  0x9c   : > { %2247 = vmatpush1.bf16.msra.mxu1 %v3322_v12  ;;  %2257 = vmatprep.subr.bf16.mxu0 %v3329_v13  ;;  %v3416_v12 = vld [vmem:[%s3697_s22 + $0x8ac] ss:$24 sps:$4 sm:$0xff]   ;;  %v3411_v13 = vld [vmem:[%s3697_s22 + $0x5a8] ss:$24 sps:$4 sm:$0xff]  }
  0x9d   : > { %2298 = vmatprep.subr.bf16.mxu1 %v3332_v14  ;;  %v3414_v14 = vld [vmem:[%s3697_s22 + $0x8a8] ss:$24 sps:$4 sm:$0xff]  }
  0x9e   : > { %2208 = vmatmul.mubr.bf16.vlgmr.msra.gmra.mrb[4].mxu0 %v3855_v15 }
  0x9f   : > { %2249 = vmatmul.mubr.bf16.vlgmr.msra.gmra.mrb[4].mxu1 %v3774_v7  ;;  %2258 = vmatpush1.bf16.msra.mxu0 %v3327_v16  ;;  %v3419_v16 = vld [vmem:[%s3697_s22 + $0x5dc] ss:$24 sps:$4 sm:$0xff]  }
  0xa0   : > { %2299 = vmatpush1.bf16.msra.mxu1 %v3330_v17  ;;  %2259 = vmatprep.subr.bf16.mxu0 %v3335_v18  ;;  %v3422_v17 = vld [vmem:[%s3697_s22 + $0x8dc] ss:$24 sps:$4 sm:$0xff]   ;;  %v3417_v18 = vld [vmem:[%s3697_s22 + $0x5d8] ss:$24 sps:$4 sm:$0xff]  }
  0xa1   : > { %2300 = vmatprep.subr.bf16.mxu1 %v3338_v19  ;;  %2289 = vmatprep.mubr.bf16.mxu0 %v3752_v52  ;;  %v3420_v19 = vld [vmem:[%s3697_s22 + $0x8d8] ss:$24 sps:$4 sm:$0xff]  }
  0xa2   : > { %2330 = vmatprep.mubr.bf16.mxu1 %v3811_v35 }
  0xa3   : > { %2260 = vmatpush1.bf16.msra.mxu0 %v3333_v20  ;;  %v3425_v20 = vld [vmem:[%s3697_s22 + $0x14] ss:$24 sps:$4 sm:$0xff]  }
  0xa4   : > { %2301 = vmatpush1.bf16.msra.mxu1 %v3336_v21  ;;  %2261 = vmatprep.subr.bf16.mxu0 %v3341_v22  ;;  %v3428_v21 = vld [vmem:[%s3697_s22 + $0x314] ss:$24 sps:$4 sm:$0xff]   ;;  %v3423_v22 = vld [vmem:[%s3697_s22 + $0x10] ss:$24 sps:$4 sm:$0xff]  }
  0xa5   : > { %2302 = vmatprep.subr.bf16.mxu1 %v3344_v23  ;;  %v3426_v23 = vld [vmem:[%s3697_s22 + $0x310] ss:$24 sps:$4 sm:$0xff]  }
  0xa7   : > { %2262 = vmatpush1.bf16.msra.mxu0 %v3339_v24  ;;  %v3431_v24 = vld [vmem:[%s3697_s22 + $0x44] ss:$24 sps:$4 sm:$0xff]  }
  0xa8   : > { %2303 = vmatpush1.bf16.msra.mxu1 %v3342_v25  ;;  %2263 = vmatprep.subr.bf16.mxu0 %v3347_v26  ;;  %v3434_v25 = vld [vmem:[%s3697_s22 + $0x344] ss:$24 sps:$4 sm:$0xff]   ;;  %v3429_v26 = vld [vmem:[%s3697_s22 + $0x40] ss:$24 sps:$4 sm:$0xff]  }
  0xa9   : > { %2304 = vmatprep.subr.bf16.mxu1 %v3350_v27  ;;  %v3432_v27 = vld [vmem:[%s3697_s22 + $0x340] ss:$24 sps:$4 sm:$0xff]  }
  0xab   : > { %2264 = vmatpush1.bf16.msra.mxu0 %v3345_v28  ;;  %v3437_v28 = vld [vmem:[%s3697_s22 + $0x74] ss:$24 sps:$4 sm:$0xff]  }
  0xac   : > { %2305 = vmatpush1.bf16.msra.mxu1 %v3348_v29  ;;  %2265 = vmatprep.subr.bf16.mxu0 %v3353_v30  ;;  %v3440_v29 = vld [vmem:[%s3697_s22 + $0x374] ss:$24 sps:$4 sm:$0xff]   ;;  %v3435_v30 = vld [vmem:[%s3697_s22 + $0x70] ss:$24 sps:$4 sm:$0xff]  }
  0xad   : > { %2306 = vmatprep.subr.bf16.mxu1 %v3356_v31  ;;  %v3438_v31 = vld [vmem:[%s3697_s22 + $0x370] ss:$24 sps:$4 sm:$0xff]  }
  0xaf   : > { %2266 = vmatpush1.bf16.msra.mxu0 %v3351_v32  ;;  %v3443_v32 = vld [vmem:[%s3697_s22 + $0xa4] ss:$24 sps:$4 sm:$0xff]  }
  0xb0   : > { %2307 = vmatpush1.bf16.msra.mxu1 %v3354_v33  ;;  %2267 = vmatprep.subr.bf16.mxu0 %v3359_v34  ;;  %v3446_v33 = vld [vmem:[%s3697_s22 + $0x3a4] ss:$24 sps:$4 sm:$0xff]   ;;  %v3441_v34 = vld [vmem:[%s3697_s22 + $0xa0] ss:$24 sps:$4 sm:$0xff]  }
  0xb1   : > { %2308 = vmatprep.subr.bf16.mxu1 %v3362_v36  ;;  %v3452_v36 = vld [vmem:[%s3697_s22 + $0x3d4] ss:$24 sps:$4 sm:$0xff]  }
  0xb3   : > { %2268 = vmatpush1.bf16.msra.mxu0 %v3357_v37  ;;  %v3447_v37 = vld [vmem:[%s3697_s22 + $0xd0] ss:$24 sps:$4 sm:$0xff]  }
  0xb4   : > { %2309 = vmatpush1.bf16.msra.mxu1 %v3360_v38  ;;  %2269 = vmatprep.subr.bf16.mxu0 %v3365_v39  ;;  %v3450_v38 = vld [vmem:[%s3697_s22 + $0x3d0] ss:$24 sps:$4 sm:$0xff]   ;;  %v3455_v39 = vld [vmem:[%s3697_s22 + $0x104] ss:$24 sps:$4 sm:$0xff]  }
  0xb5   : > { %2310 = vmatprep.subr.bf16.mxu1 %v3368_v40  ;;  %v3458_v40 = vld [vmem:[%s3697_s22 + $0x404] ss:$24 sps:$4 sm:$0xff]  }
  0xb7   : > { %2270 = vmatpush1.bf16.msra.mxu0 %v3363_v41  ;;  %v3453_v41 = vld [vmem:[%s3697_s22 + $0x100] ss:$24 sps:$4 sm:$0xff]  }
  0xb8   : > { %2311 = vmatpush1.bf16.msra.mxu1 %v3366_v42  ;;  %2271 = vmatprep.subr.bf16.mxu0 %v3371_v43  ;;  %v3456_v42 = vld [vmem:[%s3697_s22 + $0x400] ss:$24 sps:$4 sm:$0xff]   ;;  %v3461_v43 = vld [vmem:[%s3697_s22 + $0x134] ss:$24 sps:$4 sm:$0xff]  }
  0xb9   : > { %2312 = vmatprep.subr.bf16.mxu1 %v3374_v44  ;;  %v3464_v44 = vld [vmem:[%s3697_s22 + $0x434] ss:$24 sps:$4 sm:$0xff]  }
  0xbb   : > { %2272 = vmatpush1.bf16.msra.mxu0 %v3369_v45  ;;  %v3459_v45 = vld [vmem:[%s3697_s22 + $0x130] ss:$24 sps:$4 sm:$0xff]  }
  0xbc   : > { %2313 = vmatpush1.bf16.msra.mxu1 %v3372_v46  ;;  %2273 = vmatprep.subr.bf16.mxu0 %v3377_v47  ;;  %v3462_v46 = vld [vmem:[%s3697_s22 + $0x430] ss:$24 sps:$4 sm:$0xff]   ;;  %v3467_v47 = vld [vmem:[%s3697_s22 + $0x164] ss:$24 sps:$4 sm:$0xff]  }
  0xbd   : > { %2314 = vmatprep.subr.bf16.mxu1 %v3380_v49  ;;  %v3470_v49 = vld [vmem:[%s3697_s22 + $0x464] ss:$24 sps:$4 sm:$0xff]  }
  0xbf   : > { %2274 = vmatpush1.bf16.msra.mxu0 %v3375_v50  ;;  %v3465_v50 = vld [vmem:[%s3697_s22 + $0x160] ss:$24 sps:$4 sm:$0xff]  }
  0xc0   : > { %2315 = vmatpush1.bf16.msra.mxu1 %v3378_v51  ;;  %2275 = vmatprep.subr.bf16.mxu0 %v3383_v53  ;;  %v3468_v51 = vld [vmem:[%s3697_s22 + $0x460] ss:$24 sps:$4 sm:$0xff]   ;;  %v3473_v53 = vld [vmem:[%s3697_s22 + $0x194] ss:$24 sps:$4 sm:$0xff]  }
  0xc1   : > { %2316 = vmatprep.subr.bf16.mxu1 %v3386_v54  ;;  %v3476_v54 = vld [vmem:[%s3697_s22 + $0x494] ss:$24 sps:$4 sm:$0xff]  }
  0xc3   : > { %2276 = vmatpush1.bf16.msra.mxu0 %v3381_v55  ;;  %v3471_v55 = vld [vmem:[%s3697_s22 + $0x190] ss:$24 sps:$4 sm:$0xff]  }
  0xc4   : > { %2317 = vmatpush1.bf16.msra.mxu1 %v3384_v56  ;;  %2277 = vmatprep.subr.bf16.mxu0 %v3389_v57  ;;  %v3474_v56 = vld [vmem:[%s3697_s22 + $0x490] ss:$24 sps:$4 sm:$0xff]   ;;  %v3479_v57 = vld [vmem:[%s3697_s22 + $0x1c4] ss:$24 sps:$4 sm:$0xff]  }
  0xc5   : > { %2318 = vmatprep.subr.bf16.mxu1 %v3392_v58  ;;  %v3482_v58 = vld [vmem:[%s3697_s22 + $0x4c4] ss:$24 sps:$4 sm:$0xff]  }
  0xc7   : > { %2278 = vmatpush1.bf16.msra.mxu0 %v3387_v59  ;;  %v3477_v59 = vld [vmem:[%s3697_s22 + $0x1c0] ss:$24 sps:$4 sm:$0xff]  }
  0xc8   : > { %2319 = vmatpush1.bf16.msra.mxu1 %v3390_v60  ;;  %2279 = vmatprep.subr.bf16.mxu0 %v3395_v61  ;;  %v3480_v60 = vld [vmem:[%s3697_s22 + $0x4c0] ss:$24 sps:$4 sm:$0xff]   ;;  %v3485_v61 = vld [vmem:[%s3697_s22 + $0x1f4] ss:$24 sps:$4 sm:$0xff]  }
  0xc9   : > { %2320 = vmatprep.subr.bf16.mxu1 %v3398_v62  ;;  %v3488_v62 = vld [vmem:[%s3697_s22 + $0x4f4] ss:$24 sps:$4 sm:$0xff]  }
  0xcb   : > { %2280 = vmatpush1.bf16.msra.mxu0 %v3393_v63  ;;  %v3483_v63 = vld [vmem:[%s3697_s22 + $0x1f0] ss:$24 sps:$4 sm:$0xff]  }
  0xcc   : > { %2321 = vmatpush1.bf16.msra.mxu1 %v3396_v0  ;;  %2281 = vmatprep.subr.bf16.mxu0 %v3401_v1  ;;  %v3486_v0 = vld [vmem:[%s3697_s22 + $0x4f0] ss:$24 sps:$4 sm:$0xff]   ;;  %v3491_v1 = vld [vmem:[%s3697_s22 + $0x224] ss:$24 sps:$4 sm:$0xff]  }
  0xcd   : > { %2322 = vmatprep.subr.bf16.mxu1 %v3404_v2  ;;  %v3494_v2 = vld [vmem:[%s3697_s22 + $0x524] ss:$24 sps:$4 sm:$0xff]  }
  0xcf   : > { %2282 = vmatpush1.bf16.msra.mxu0 %v3399_v3  ;;  %v3489_v3 = vld [vmem:[%s3697_s22 + $0x220] ss:$24 sps:$4 sm:$0xff]  }
  0xd0   : > { %2323 = vmatpush1.bf16.msra.mxu1 %v3402_v4  ;;  %2283 = vmatprep.subr.bf16.mxu0 %v3407_v5  ;;  %v3492_v4 = vld [vmem:[%s3697_s22 + $0x520] ss:$24 sps:$4 sm:$0xff]   ;;  %v3497_v5 = vld [vmem:[%s3697_s22 + $0x254] ss:$24 sps:$4 sm:$0xff]  }
  0xd1   : > { %2324 = vmatprep.subr.bf16.mxu1 %v3410_v6  ;;  %v3500_v6 = vld [vmem:[%s3697_s22 + $0x554] ss:$24 sps:$4 sm:$0xff]  }
  0xd3   : > { %2284 = vmatpush1.bf16.msra.mxu0 %v3405_v9  ;;  %v3495_v9 = vld [vmem:[%s3697_s22 + $0x250] ss:$24 sps:$4 sm:$0xff]  }
  0xd4   : > { %2325 = vmatpush1.bf16.msra.mxu1 %v3408_v10  ;;  %2285 = vmatprep.subr.bf16.mxu0 %v3413_v11  ;;  %v3498_v10 = vld [vmem:[%s3697_s22 + $0x550] ss:$24 sps:$4 sm:$0xff]   ;;  %v3503_v11 = vld [vmem:[%s3697_s22 + $0x284] ss:$24 sps:$4 sm:$0xff]  }
  0xd5   : > { %2326 = vmatprep.subr.bf16.mxu1 %v3416_v12  ;;  %v3506_v12 = vld [vmem:[%s3697_s22 + $0x584] ss:$24 sps:$4 sm:$0xff]  }
  0xd7   : > { %2286 = vmatpush1.bf16.msra.mxu0 %v3411_v13  ;;  %v3501_v13 = vld [vmem:[%s3697_s22 + $0x280] ss:$24 sps:$4 sm:$0xff]  }
  0xd8   : > { %2327 = vmatpush1.bf16.msra.mxu1 %v3414_v14  ;;  %2287 = vmatprep.subr.bf16.mxu0 %v3419_v16  ;;  %v3504_v14 = vld [vmem:[%s3697_s22 + $0x580] ss:$24 sps:$4 sm:$0xff]   ;;  %v3509_v16 = vld [vmem:[%s3697_s22 + $0x2b4] ss:$24 sps:$4 sm:$0xff]  }
  0xd9   : > { %2328 = vmatprep.subr.bf16.mxu1 %v3422_v17  ;;  %v3512_v17 = vld [vmem:[%s3697_s22 + $0x5b4] ss:$24 sps:$4 sm:$0xff]  }
  0xdb   : > { %2288 = vmatpush1.bf16.msra.mxu0 %v3417_v18  ;;  %v3507_v18 = vld [vmem:[%s3697_s22 + $0x2b0] ss:$24 sps:$4 sm:$0xff]  }
  0xdc   : > { %2329 = vmatpush1.bf16.msra.mxu1 %v3420_v19  ;;  %2339 = vmatprep.subr.bf16.mxu0 %v3425_v20  ;;  %v3510_v19 = vld [vmem:[%s3697_s22 + $0x5b0] ss:$24 sps:$4 sm:$0xff]   ;;  %v3515_v20 = vld [vmem:[%s3697_s22 + $0x2e4] ss:$24 sps:$4 sm:$0xff]  }
  0xdd   : > { %2380 = vmatprep.subr.bf16.mxu1 %v3428_v21  ;;  %v3518_v21 = vld [vmem:[%s3697_s22 + $0x5e4] ss:$24 sps:$4 sm:$0xff]  }
  0xde   : > { %2290 = vmatmul.mubr.bf16.vlgmr.msra.gmra.mrb[8].mxu0 %v3776_v8 }
  0xdf   : > { %2331 = vmatmul.mubr.bf16.vlgmr.msra.gmra.mrb[8].mxu1 %v3855_v15  ;;  %2340 = vmatpush1.bf16.msra.mxu0 %v3423_v22  ;;  %v3513_v22 = vld [vmem:[%s3697_s22 + $0x2e0] ss:$24 sps:$4 sm:$0xff]  }
  0xe0   : > { %2381 = vmatpush1.bf16.msra.mxu1 %v3426_v23  ;;  %2341 = vmatprep.subr.bf16.mxu0 %v3431_v24  ;;  %v3516_v23 = vld [vmem:[%s3697_s22 + $0x5e0] ss:$24 sps:$4 sm:$0xff]   ;;  %v3521_v24 = vld [vmem:[%s3697_s22 + $0x614] ss:$24 sps:$4 sm:$0xff]  }
  0xe1   : > { %2382 = vmatprep.subr.bf16.mxu1 %v3434_v25  ;;  %2371 = vmatprep.mubr.bf16.mxu0 %v3747_v48  ;;  %v3444_v48 = vld [vmem:[%s3697_s22 + $0x3a0] ss:$24 sps:$4 sm:$0xff]   ;;  %v3519_v25 = vld [vmem:[%s3697_s22 + $0x610] ss:$24 sps:$4 sm:$0xff]  }
  0xe2   : > { %2412 = vmatprep.mubr.bf16.mxu1 %v3752_v52  ;;  %v3449_v52 = vld [vmem:[%s3697_s22 + $0xd4] ss:$24 sps:$4 sm:$0xff]  }
  0xe3   : > { %2342 = vmatpush1.bf16.msra.mxu0 %v3429_v26  ;;  %v3524_v26 = vld [vmem:[%s3697_s22 + $0x644] ss:$24 sps:$4 sm:$0xff]  }
  0xe4   : > { %2383 = vmatpush1.bf16.msra.mxu1 %v3432_v27  ;;  %2343 = vmatprep.subr.bf16.mxu0 %v3437_v28  ;;  %v3522_v27 = vld [vmem:[%s3697_s22 + $0x640] ss:$24 sps:$4 sm:$0xff]   ;;  %v3527_v28 = vld [vmem:[%s3697_s22 + $0x674] ss:$24 sps:$4 sm:$0xff]  }
  0xe5   : > { %2384 = vmatprep.subr.bf16.mxu1 %v3440_v29  ;;  %v3525_v29 = vld [vmem:[%s3697_s22 + $0x670] ss:$24 sps:$4 sm:$0xff]  }
  0xe7   : > { %2344 = vmatpush1.bf16.msra.mxu0 %v3435_v30  ;;  %v3530_v30 = vld [vmem:[%s3697_s22 + $0x6a4] ss:$24 sps:$4 sm:$0xff]  }
  0xe8   : > { %2385 = vmatpush1.bf16.msra.mxu1 %v3438_v31  ;;  %2345 = vmatprep.subr.bf16.mxu0 %v3443_v32  ;;  %v3528_v31 = vld [vmem:[%s3697_s22 + $0x6a0] ss:$24 sps:$4 sm:$0xff]   ;;  %v3536_v32 = vld [vmem:[%s3697_s22 + $0x704] ss:$24 sps:$4 sm:$0xff]  }
  0xe9   : > { %2386 = vmatprep.subr.bf16.mxu1 %v3446_v33  ;;  %v3539_v33 = vld [vmem:[%s3697_s22 + $0x734] ss:$24 sps:$4 sm:$0xff]  }
  0xeb   : > { %2346 = vmatpush1.bf16.msra.mxu0 %v3441_v34 }
  0xec   : > { %2387 = vmatpush1.bf16.msra.mxu1 %v3444_v48  ;;  %2347 = vmatprep.subr.bf16.mxu0 %v3449_v52 }
  0xed   : > { %2388 = vmatprep.subr.bf16.mxu1 %v3452_v36 }
  0xef   : > { %2348 = vmatpush1.bf16.msra.mxu0 %v3447_v37 }
  0xf0   : > { %2389 = vmatpush1.bf16.msra.mxu1 %v3450_v38  ;;  %2349 = vmatprep.subr.bf16.mxu0 %v3455_v39 }
  0xf1   : > { %2390 = vmatprep.subr.bf16.mxu1 %v3458_v40  ;;  %v3537_v40 = vld [vmem:[%s3697_s22 + $0x730] ss:$24 sps:$4 sm:$0xff]  }
  0xf3   : > { %2350 = vmatpush1.bf16.msra.mxu0 %v3453_v41 }
  0xf4   : > { %2391 = vmatpush1.bf16.msra.mxu1 %v3456_v42  ;;  %2351 = vmatprep.subr.bf16.mxu0 %v3461_v43  ;;  %v3542_v43 = vld [vmem:[%s3697_s22 + $0x764] ss:$24 sps:$4 sm:$0xff]  }
  0xf5   : > { %2392 = vmatprep.subr.bf16.mxu1 %v3464_v44 }
  0xf7   : > { %2352 = vmatpush1.bf16.msra.mxu0 %v3459_v45  ;;  %v3540_v45 = vld [vmem:[%s3697_s22 + $0x760] ss:$24 sps:$4 sm:$0xff]  }
  0xf8   : > { %2393 = vmatpush1.bf16.msra.mxu1 %v3462_v46  ;;  %2353 = vmatprep.subr.bf16.mxu0 %v3467_v47  ;;  %v3545_v46 = vld [vmem:[%s3697_s22 + $0x794] ss:$24 sps:$4 sm:$0xff]   ;;  %v3543_v47 = vld [vmem:[%s3697_s22 + $0x790] ss:$24 sps:$4 sm:$0xff]  }
  0xf9   : > { %2394 = vmatprep.subr.bf16.mxu1 %v3470_v49  ;;  %v3548_v49 = vld [vmem:[%s3697_s22 + $0x7c4] ss:$24 sps:$4 sm:$0xff]  }
  0xfb   : > { %2354 = vmatpush1.bf16.msra.mxu0 %v3465_v50  ;;  %v3546_v50 = vld [vmem:[%s3697_s22 + $0x7c0] ss:$24 sps:$4 sm:$0xff]  }
  0xfc   : > { %2395 = vmatpush1.bf16.msra.mxu1 %v3468_v51  ;;  %2355 = vmatprep.subr.bf16.mxu0 %v3473_v53  ;;  %v3551_v51 = vld [vmem:[%s3697_s22 + $0x7f4] ss:$24 sps:$4 sm:$0xff]   ;;  %v3549_v53 = vld [vmem:[%s3697_s22 + $0x7f0] ss:$24 sps:$4 sm:$0xff]  }
  0xfd   : > { %2396 = vmatprep.subr.bf16.mxu1 %v3476_v54  ;;  %v3554_v54 = vld [vmem:[%s3697_s22 + $0x824] ss:$24 sps:$4 sm:$0xff]  }
  0xff   : > { %2356 = vmatpush1.bf16.msra.mxu0 %v3471_v55  ;;  %v3552_v55 = vld [vmem:[%s3697_s22 + $0x820] ss:$24 sps:$4 sm:$0xff]  }
 0x100   : > { %2397 = vmatpush1.bf16.msra.mxu1 %v3474_v56  ;;  %2357 = vmatprep.subr.bf16.mxu0 %v3479_v57  ;;  %v3557_v56 = vld [vmem:[%s3697_s22 + $0x854] ss:$24 sps:$4 sm:$0xff]   ;;  %v3555_v57 = vld [vmem:[%s3697_s22 + $0x850] ss:$24 sps:$4 sm:$0xff]  }
 0x101   : > { %2398 = vmatprep.subr.bf16.mxu1 %v3482_v58  ;;  %v3560_v58 = vld [vmem:[%s3697_s22 + $0x884] ss:$24 sps:$4 sm:$0xff]  }
 0x103   : > { %2358 = vmatpush1.bf16.msra.mxu0 %v3477_v59  ;;  %v3558_v59 = vld [vmem:[%s3697_s22 + $0x880] ss:$24 sps:$4 sm:$0xff]  }
 0x104   : > { %2399 = vmatpush1.bf16.msra.mxu1 %v3480_v60  ;;  %2359 = vmatprep.subr.bf16.mxu0 %v3485_v61  ;;  %v3563_v60 = vld [vmem:[%s3697_s22 + $0x8b4] ss:$24 sps:$4 sm:$0xff]   ;;  %v3561_v61 = vld [vmem:[%s3697_s22 + $0x8b0] ss:$24 sps:$4 sm:$0xff]  }
 0x105   : > { %2400 = vmatprep.subr.bf16.mxu1 %v3488_v62  ;;  %v3566_v62 = vld [vmem:[%s3697_s22 + $0x8e4] ss:$24 sps:$4 sm:$0xff]  }
 0x107   : > { %2360 = vmatpush1.bf16.msra.mxu0 %v3483_v63  ;;  %v3564_v63 = vld [vmem:[%s3697_s22 + $0x8e0] ss:$24 sps:$4 sm:$0xff]  }
 0x108   : > { %2401 = vmatpush1.bf16.msra.mxu1 %v3486_v0  ;;  %2361 = vmatprep.subr.bf16.mxu0 %v3491_v1  ;;  %v335_v0 = vld [vmem:[#allocation2] sm:$0xff] }
 0x109   : > { %2402 = vmatprep.subr.bf16.mxu1 %v3494_v2 }
 0x10b   : > { %2362 = vmatpush1.bf16.msra.mxu0 %v3489_v3 }
 0x10c   : > { %2403 = vmatpush1.bf16.msra.mxu1 %v3492_v4  ;;  %2363 = vmatprep.subr.bf16.mxu0 %v3497_v5  ;;  %v336_v4 = vld [vmem:[#allocation2 + $0x8] sm:$0xff] }
 0x10d   : > { %2404 = vmatprep.subr.bf16.mxu1 %v3500_v6 }
 0x10f   : > { %2364 = vmatpush1.bf16.msra.mxu0 %v3495_v9 }
 0x110   : > { %2405 = vmatpush1.bf16.msra.mxu1 %v3498_v10  ;;  %2365 = vmatprep.subr.bf16.mxu0 %v3503_v11 }
 0x111   : > { %2406 = vmatprep.subr.bf16.mxu1 %v3506_v12 }
 0x113   : > { %2366 = vmatpush1.bf16.msra.mxu0 %v3501_v13 }
 0x114   : > { %2407 = vmatpush1.bf16.msra.mxu1 %v3504_v14  ;;  %2367 = vmatprep.subr.bf16.mxu0 %v3509_v16 }
 0x115   : > { %2408 = vmatprep.subr.bf16.mxu1 %v3512_v17 }
 0x117   : > { %2368 = vmatpush1.bf16.msra.mxu0 %v3507_v18 }
 0x118   : > { %2409 = vmatpush1.bf16.msra.mxu1 %v3510_v19  ;;  %2369 = vmatprep.subr.bf16.mxu0 %v3515_v20 }
 0x119   : > { %2410 = vmatprep.subr.bf16.mxu1 %v3518_v21 }
 0x11b   : > { %2370 = vmatpush1.bf16.msra.mxu0 %v3513_v22 }
 0x11c   : > { %2411 = vmatpush1.bf16.msra.mxu1 %v3516_v23  ;;  %2421 = vmatprep.subr.bf16.mxu0 %v3521_v24  ;;  %v337_v23 = vld [vmem:[#allocation2 + $0x10] sm:$0xff] }
 0x11e   : > { %2372 = vmatmul.mubr.bf16.vlgmr.msra.gmra.mrb[12].mxu0 %v3774_v7  ;;  %v3533_v7 = vld [vmem:[%s3697_s22 + $0x6d4] ss:$24 sps:$4 sm:$0xff]  }
 0x11f   : > { %2413 = vmatmul.mubr.bf16.vlgmr.msra.gmra.mrb[12].mxu1 %v3776_v8  ;;  %2422 = vmatpush1.bf16.msra.mxu0 %v3519_v25  ;;  %v3531_v8 = vld [vmem:[%s3697_s22 + $0x6d0] ss:$24 sps:$4 sm:$0xff]  }
 0x120   : > { %2453 = vmatprep.mubr.bf16.mxu0 %v3811_v35  ;;  %2423 = vmatprep.subr.bf16.mxu0 %v3524_v26  ;;  %v3534_v35 = vld [vmem:[%s3697_s22 + $0x700] ss:$24 sps:$4 sm:$0xff]  }
 0x123   : > { %2424 = vmatpush1.bf16.msra.mxu0 %v3522_v27  ;;  %v338_v27 = vld [vmem:[#allocation2 + $0x18] sm:$0xff] }
 0x124   : > { %2425 = vmatprep.subr.bf16.mxu0 %v3527_v28 }
 0x127   : > { %2426 = vmatpush1.bf16.msra.mxu0 %v3525_v29 }
 0x128   : > { %2427 = vmatprep.subr.bf16.mxu0 %v3530_v30 }
 0x12b   : > { %2428 = vmatpush1.bf16.msra.mxu0 %v3528_v31 }
 0x12c   : > { %2429 = vmatprep.subr.bf16.mxu0 %v3533_v7 }
 0x12f   : > { %2430 = vmatpush1.bf16.msra.mxu0 %v3531_v8 }
 0x130   : > { %2431 = vmatprep.subr.bf16.mxu0 %v3536_v32 }
 0x131   : > { %v2127_v34 = vpop.f32.mrb[0].mxu0 }
 0x132   : > { %v2168_v48 = vpop.f32.mrb[0].mxu1  ;;  %v2129_v36 = vpop.f32.mrb[1].mxu0 }
 0x133   : > { %v2169_v52 = vadd.f32 %v2168_v48, %v2127_v34  ;;  %v2170_v37 = vpop.f32.mrb[1].mxu1  ;;  %v2131_v39 = vpop.f32.mrb[2].mxu0  ;;  %2432 = vmatpush1.bf16.msra.mxu0 %v3534_v35 }
 0x134   : > { %v2171_v38 = vadd.f32 %v2170_v37, %v2129_v36  ;;  %v2172_v41 = vpop.f32.mrb[2].mxu1  ;;  %v2132_v42 = vpop.f32.mrb[3].mxu0  ;;  %2433 = vmatprep.subr.bf16.mxu0 %v3539_v33 }
 0x135   : > { %v2173_v44 = vpop.f32.mrb[3].mxu1  ;;  %v340_v41 = vld [vmem:[#allocation2 + $0x28] sm:$0xff] }
 0x137   : > { %2434 = vmatpush1.bf16.msra.mxu0 %v3537_v40 }
 0x138   : > { %2435 = vmatprep.subr.bf16.mxu0 %v3542_v43 }
 0x13b   : > { %2436 = vmatpush1.bf16.msra.mxu0 %v3540_v45 }
 0x13c   : > { %2437 = vmatprep.subr.bf16.mxu0 %v3545_v46 }
 0x13f   : > { %2438 = vmatpush1.bf16.msra.mxu0 %v3543_v47 }
 0x140   : > { %2439 = vmatprep.subr.bf16.mxu0 %v3548_v49  ;;  %v2486_v49 = vlaneseq (!%p3077_p9) }
 0x143   : > { %2440 = vmatpush1.bf16.msra.mxu0 %v3546_v50  ;;  %v2487_v50 = vshrl.u32 (!%p3077_p9), %v2486_v49, 7 }
 0x144   : > { %2441 = vmatprep.subr.bf16.mxu0 %v3551_v51  ;;  %v2522_v51 = vld [vmem:[%s3682_s10] sm:$0xff] (!%p3077_p9) }
 0x147   : > { %2442 = vmatpush1.bf16.msra.mxu0 %v3549_v53  ;;  %v2523_v53 = vld [vmem:[%s3682_s10 + $0x8] sm:$0xff] (!%p3077_p9) }
 0x148   : > { %2443 = vmatprep.subr.bf16.mxu0 %v3554_v54  ;;  %v2484_v54 = vld [vmem:[%s4090_s2] sm:$0x3f] (!%p3077_p9) }
 0x14b   : > { %2444 = vmatpush1.bf16.msra.mxu0 %v3552_v55  ;;  %v2525_v55 = vunpack.c.l.bf16 (!%p3077_p9), %v2522_v51 }
 0x14c   : > { %2445 = vmatprep.subr.bf16.mxu0 %v3557_v56 }
 0x14f   : > { %2446 = vmatpush1.bf16.msra.mxu0 %v3555_v57  ;;  %v4033_v57 = vsub.s32 (!%p3077_p9), 0, %v2487_v50 }
 0x150   : > { %2447 = vmatprep.subr.bf16.mxu0 %v3560_v58  ;;  %v4035_v58 = vsub.s32 (!%p3077_p9), 1, %v2487_v50 }
 0x153   : > { %2448 = vmatpush1.bf16.msra.mxu0 %v3558_v59  ;;  %v4037_v59 = vsub.s32 (!%p3077_p9), 2, %v2487_v50 }
 0x154   : > { %2449 = vmatprep.subr.bf16.mxu0 %v3563_v60  ;;  %v4039_v60 = vsub.s32 (!%p3077_p9), 3, %v2487_v50 }
 0x157   : > { %2450 = vmatpush1.bf16.msra.mxu0 %v3561_v61 }
 0x158   : > { %2451 = vmatprep.subr.bf16.mxu0 %v3566_v62 }
 0x15b   : > { %2452 = vmatpush1.bf16.msra.mxu0 %v3564_v63 }
 0x15e   : > { %2454 = vmatmul.mubr.bf16.vlgmr.msra.gmra.mrb[16].mxu0 %v3855_v15 }
 0x171   : > { %v2209_v1 = vpop.f32.mrb[4].mxu0 }
 0x172   : > { %v2250_v2 = vpop.f32.mrb[4].mxu1  ;;  %v2210_v3 = vadd.f32 %v2209_v1, %v2169_v52  ;;  %v2211_v5 = vpop.f32.mrb[5].mxu0  ;;  %v4043_v1 = vsub.s32 (!%p3077_p9), 5, %v2487_v50 }
 0x173   : > { %v2252_v6 = vpop.f32.mrb[5].mxu1  ;;  %v2212_v9 = vadd.f32 %v2211_v5, %v2171_v38  ;;  %v2213_v10 = vpop.f32.mrb[6].mxu0  ;;  %v339_v38 = vld [vmem:[#allocation2 + $0x20] sm:$0xff]  ;;  %v2493_v5 = vrot.slane (!%p3077_p9), %v2484_v54, %v4035_v58 }
 0x174   : > { %v2254_v11 = vpop.f32.mrb[6].mxu1  ;;  %v2462_v12 = vadd.f32 %v2210_v3, %v335_v0  ;;  %v2214_v13 = vpop.f32.mrb[7].mxu0  ;;  %v4041_v0 = vsub.s32 (!%p3077_p9), 4, %v2487_v50  ;;  %v2527_v3 = vunpack.c.l.bf16 (!%p3077_p9), %v2523_v53  ;;  %v2524_v10 = vld [vmem:[%s3682_s10 + $0x10] sm:$0xff] (!%p3077_p9) }
 0x175   : > { %v2255_v14 = vpop.f32.mrb[7].mxu1  ;;  %v2463_v16 = vadd.f32 %v2212_v9, %v336_v4  ;;  %v2489_v4 = vrot.slane (!%p3077_p9), %v2484_v54, %v4033_v57  ;;  %v2501_v9 = vrot.slane (!%p3077_p9), %v2484_v54, %v4039_v60  ;;  %v2509_v13 = vrot.slane (!%p3077_p9), %v2484_v54, %v4043_v1 }
 0x176   : > { %2468 = vst [vmem:[#allocation2] sm:$0xff] %v2462_v12  ;;  %v2505_v12 = vrot.slane (!%p3077_p9), %v2484_v54, %v4041_v0  ;;  %v2528_v14 = vunpack.c.h.bf16 (!%p3077_p9), %v2523_v53 }
 0x177   : > { %2469 = vst [vmem:[#allocation2 + $0x8] sm:$0xff] %v2463_v16 }
 0x17d   : > { %v2478_v56 = vld [vmem:[#allocation2] sm:$0xff] (!%p3077_p9) }
 0x17e   : > { %v2479_v61 = vld [vmem:[#allocation2 + $0x8] sm:$0xff] (!%p3077_p9)  ;;  %v2516_v16 = vadd.f32 (!%p3077_p9), %v2489_v4, %v2478_v56  ;;  %v2612_v56 = vld [vmem:[%s4093_s5] sm:$0x3f] (!%p3077_p9) }
 0x1b1   : > { %v2291_v17 = vpop.f32.mrb[8].mxu0 }
 0x1b2   : > { %v2332_v18 = vpop.f32.mrb[8].mxu1  ;;  %v2292_v19 = vadd.f32 %v2291_v17, %v2250_v2  ;;  %v2293_v15 = vpop.f32.mrb[9].mxu0  ;;  %v2526_v2 = vunpack.c.h.bf16 (!%p3077_p9), %v2522_v51  ;;  %v2517_v17 = vadd.f32 (!%p3077_p9), %v2493_v5, %v2479_v61 }
 0x1b3   : > { %v2334_v20 = vpop.f32.mrb[9].mxu1  ;;  %v2294_v21 = vadd.f32 %v2293_v15, %v2252_v6  ;;  %v2295_v22 = vpop.f32.mrb[10].mxu0  ;;  %v2497_v6 = vrot.slane (!%p3077_p9), %v2484_v54, %v4037_v59 }
 0x1b4   : > { %v2336_v24 = vpop.f32.mrb[10].mxu1  ;;  %v2333_v25 = vadd.f32 %v2332_v18, %v2292_v19  ;;  %v2296_v26 = vpop.f32.mrb[11].mxu0  ;;  %v2531_v22 = vadd.f32 (!%p3077_p9), %v2525_v55, %v2516_v16  ;;  %v2574_v55 = vld [vmem:[%s4092_s4] sm:$0x3f] (!%p3077_p9) }
 0x1b5   : > { %v2337_v28 = vpop.f32.mrb[11].mxu1  ;;  %v2335_v29 = vadd.f32 %v2334_v20, %v2294_v21  ;;  %v2529_v20 = vunpack.c.l.bf16 (!%p3077_p9), %v2524_v10  ;;  %v2530_v26 = vunpack.c.h.bf16 (!%p3077_p9), %v2524_v10  ;;  %v2579_v61 = vrot.slane (!%p3077_p9), %v2574_v55, %v4033_v57 }
 0x1b6   : > { %v2464_v30 = vadd.f32 %v2333_v25, %v337_v23  ;;  %v2532_v23 = vadd.f32 (!%p3077_p9), %v2526_v2, %v2517_v17  ;;  %v2591_v2 = vrot.slane (!%p3077_p9), %v2574_v55, %v4039_v60  ;;  %v2599_v4 = vrot.slane (!%p3077_p9), %v2574_v55, %v4043_v1 }
 0x1b7   : > { %v2465_v31 = vadd.f32 %v2335_v29, %v338_v27  ;;  %v2625_v10 = vrot.slane (!%p3077_p9), %v2612_v56, %v4037_v59  ;;  %v2633_v17 = vrot.slane (!%p3077_p9), %v2612_v56, %v4041_v0 }
 0x1b8   : > { %2470 = vst [vmem:[#allocation2 + $0x10] sm:$0xff] %v2464_v30  ;;  %v2537_v28 = vadd.f32 (!%p3077_p9), %v2532_v23, %v2531_v22 }
 0x1b9   : > { %2471 = vst [vmem:[#allocation2 + $0x18] sm:$0xff] %v2465_v31 }
 0x1bf   : > { %v2480_v62 = vld [vmem:[#allocation2 + $0x10] sm:$0xff] (!%p3077_p9) }
 0x1c0   : > { %v2481_v63 = vld [vmem:[#allocation2 + $0x18] sm:$0xff] (!%p3077_p9)  ;;  %v2518_v18 = vadd.f32 (!%p3077_p9), %v2497_v6, %v2480_v62  ;;  %v2583_v62 = vrot.slane (!%p3077_p9), %v2574_v55, %v4035_v58  ;;  %v2617_v6 = vrot.slane (!%p3077_p9), %v2612_v56, %v4033_v57 }
 0x1c1   : > { %v2519_v19 = vadd.f32 (!%p3077_p9), %v2501_v9, %v2481_v63  ;;  %v2587_v63 = vrot.slane (!%p3077_p9), %v2574_v55, %v4037_v59  ;;  %v2621_v9 = vrot.slane (!%p3077_p9), %v2612_v56, %v4035_v58 }
 0x1c2   : > { %v2533_v24 = vadd.f32 (!%p3077_p9), %v2527_v3, %v2518_v18  ;;  %v2595_v3 = vrot.slane (!%p3077_p9), %v2574_v55, %v4041_v0  ;;  %v2637_v18 = vrot.slane (!%p3077_p9), %v2612_v56, %v4043_v1 }
 0x1c3   : > { %v2534_v27 = vadd.f32 (!%p3077_p9), %v2528_v14, %v2519_v19 }
 0x1c4   : > { %v2538_v30 = vadd.f32 (!%p3077_p9), %v2537_v28, %v2533_v24 }
 0x1f1   : > { %v2373_v7 = vpop.f32.mrb[12].mxu0 }
 0x1f2   : > { %v2414_v8 = vpop.f32.mrb[12].mxu1  ;;  %v2375_v35 = vpop.f32.mrb[13].mxu0 }
 0x1f3   : > { %v2415_v32 = vadd.f32 %v2414_v8, %v2373_v7  ;;  %v2416_v33 = vpop.f32.mrb[13].mxu1  ;;  %v2377_v48 = vpop.f32.mrb[14].mxu0  ;;  %v2539_v7 = vadd.f32 (!%p3077_p9), %v2538_v30, %v2534_v27 }
 0x1f4   : > { %v2417_v34 = vadd.f32 %v2416_v33, %v2375_v35  ;;  %v2418_v52 = vpop.f32.mrb[14].mxu1  ;;  %v2378_v36 = vpop.f32.mrb[15].mxu0 }
 0x1f5   : > { %v2419_v37 = vpop.f32.mrb[15].mxu1 }
 0x231   : > { %v2455_v39 = vpop.f32.mrb[16].mxu0  ;;  %2477 = sbr.rel (%p3077_p9) target bundleno = 907 (0x38b), region = 52 }
 0x232   : > { %v2456_v40 = vadd.f32 %v2455_v39, %v2415_v32  ;;  %v2457_v42 = vpop.f32.mrb[17].mxu0 }
 0x233   : > { %v2458_v43 = vadd.f32 %v2457_v42, %v2417_v34  ;;  %v2459_v44 = vpop.f32.mrb[18].mxu0 }
 0x234   : > { %v2466_v45 = vadd.f32 %v2456_v40, %v339_v38  ;;  %v2460_v46 = vpop.f32.mrb[19].mxu0 }
 0x235   : > { %v2467_v47 = vadd.f32 %v2458_v43, %v340_v41 }
 0x236   : > { %2472 = vst [vmem:[#allocation2 + $0x20] sm:$0xff] %v2466_v45 }
 0x237   : > { %2473 = vst [vmem:[#allocation2 + $0x28] sm:$0xff] %v2467_v47 }
 0x23d   : > { %v2482_v11 = vld [vmem:[#allocation2 + $0x20] sm:$0xff] }
 0x23e   : > { %v2483_v15 = vld [vmem:[#allocation2 + $0x28] sm:$0xff]  ;;  %v2520_v21 = vadd.f32 %v2505_v12, %v2482_v11  ;;  %v2629_v11 = vrot.slane %v2612_v56, %v4039_v60 }
 0x23f   : > { %v2521_v25 = vadd.f32 %v2509_v13, %v2483_v15 }
 0x240   : > { %v2535_v29 = vadd.f32 %v2529_v20, %v2520_v21 }
 0x241   : > { %v2536_v31 = vadd.f32 %v2530_v26, %v2521_v25 }
 0x242   : > { %v2540_v8 = vadd.f32 %v2539_v7, %v2535_v29 }
 0x244   : > { %v2541_v32 = vadd.f32 %v2540_v8, %v2536_v31 }
 0x246   : > { %2542 = vadd.xlane.f32.xlu0 %v2541_v32 }
 0x2d3   : > { %v2543_v35 = vpop.xlane.xlu0 %2542 }
 0x2d4   : > { %v2545_v33 = vmul.f32 0.0013020834, %v2543_v35 }
 0x2d6   : > { %v2546_v34 = vsub.f32 %v2531_v22, %v2545_v33  ;;  %v2547_v48 = vsub.f32 %v2532_v23, %v2545_v33  ;;  %v2548_v52 = vsub.f32 %v2533_v24, %v2545_v33  ;;  %v2549_v36 = vsub.f32 %v2534_v27, %v2545_v33 }
 0x2d7   : > { %v2550_v39 = vsub.f32 %v2535_v29, %v2545_v33  ;;  %v2551_v42 = vsub.f32 %v2536_v31, %v2545_v33 }
 0x2d8   : > { %v2552_v37 = vmul.f32 %v2546_v34, %v2546_v34  ;;  %v2553_v38 = vmul.f32 %v2547_v48, %v2547_v48  ;;  %v2554_v40 = vmul.f32 %v2548_v52, %v2548_v52  ;;  %v2555_v43 = vmul.f32 %v2549_v36, %v2549_v36 }
 0x2d9   : > { %v2556_v45 = vmul.f32 %v2550_v39, %v2550_v39  ;;  %v2557_v47 = vmul.f32 %v2551_v42, %v2551_v42 }
 0x2da   : > { %v2558_v41 = vadd.f32 %v2553_v38, %v2552_v37 }
 0x2dc   : > { %v2559_v44 = vadd.f32 %v2558_v41, %v2554_v40 }
 0x2de   : > { %v2560_v46 = vadd.f32 %v2559_v44, %v2555_v43 }
 0x2e0   : > { %v2561_v49 = vadd.f32 %v2560_v46, %v2556_v45 }
 0x2e2   : > { %v2562_v50 = vadd.f32 %v2561_v49, %v2557_v47 }
 0x2e4   : > { %2563 = vadd.xlane.f32.xlu0 %v2562_v50 }
 0x371   : > { %v2564_v51 = vpop.xlane.xlu0 %2563 }
 0x372   : > { %v2565_v53 = vmul.f32 0.0013020834, %v2564_v51 }
 0x374   : > { %v2566_v54 = vadd.f32 1e-12, %v2565_v53 }
 0x376   : > { %3567 = vrsqrt.f32 %v2566_v54 }
 0x380   : > { %v3568_v5 = vpop.eup %3567 }
 0x381   : > { %v2568_v12 = vmul.f32 %v3568_v5, %v2546_v34  ;;  %v2569_v13 = vmul.f32 %v3568_v5, %v2547_v48  ;;  %v2570_v14 = vmul.f32 %v3568_v5, %v2548_v52  ;;  %v2571_v16 = vmul.f32 %v3568_v5, %v2549_v36 }
 0x382   : > { %v2572_v19 = vmul.f32 %v3568_v5, %v2550_v39  ;;  %v2573_v15 = vmul.f32 %v3568_v5, %v2551_v42 }
 0x383   : > { %v2606_v20 = vmul.f32 %v2579_v61, %v2568_v12  ;;  %v2607_v57 = vmul.f32 %v2583_v62, %v2569_v13  ;;  %v2608_v58 = vmul.f32 %v2587_v63, %v2570_v14  ;;  %v2609_v21 = vmul.f32 %v2591_v2, %v2571_v16 }
 0x384   : > { %v2610_v59 = vmul.f32 %v2595_v3, %v2572_v19  ;;  %v2611_v22 = vmul.f32 %v2599_v4, %v2573_v15 }
 0x385   : > { %v2644_v60 = vadd.f32 %v2617_v6, %v2606_v20  ;;  %v2645_v23 = vadd.f32 %v2621_v9, %v2607_v57  ;;  %v2646_v24 = vadd.f32 %v2625_v10, %v2608_v58  ;;  %v2647_v25 = vadd.f32 %v2629_v11, %v2609_v21 }
 0x386   : > { %v2648_v26 = vadd.f32 %v2633_v17, %v2610_v59  ;;  %v2649_v27 = vadd.f32 %v2637_v18, %v2611_v22 }
 0x387   : > { %v3083_v0 = vpack.c.bf16 %v2645_v23, %v2644_v60  ;;  %v3084_v28 = vpack.c.bf16 %v2647_v25, %v2646_v24 }
 0x388   : > { %v3085_v1 = vpack.c.bf16 %v2649_v27, %v2648_v26 }
 0x389   : > { %2674 = vst [vmem:[%s3692_s18] sm:$0xff] %v3083_v0  ;;  %2675 = vst [vmem:[%s3692_s18 + $0x8] sm:$0xff] %v3084_v28 }
 0x38a   : > { %2676 = vst [vmem:[%s3692_s18 + $0x10] sm:$0xff] %v3085_v1 }
 0x38b PF: > { %s16_s25 = sadd.s32 1, %s3607_s25   ;;  %s4095_s21 = smov %s3599_s23 }
 0x38c   : > { %p13_p10 = scmp.ge.s32.totalorder %s16_s25, 10   ;;  %s4096_s22 = smov %s3603_s24 }
 0x38d   : > { %s4097_s23 = smov %s4100_s26  ;;  %s4098_s24 = smov %s4104_s27 }
 0x38e   :  { %15 = sbr.rel (!%p13_p10) target bundleno = 3 (0x3), region = 88 }

// kernel: bert_with_regularization_forward.23
= control target key start
LH: loop header
LB: loop body
LE: loop exit
PB: predicated region body
PF: predicated region fallthrough
CT: control target
= control target key end

     0   :  { %v324_v36 = vlaneseq  ;;  %v3696_v37 = vmov 1966171168   ;;  %s5030_s0 = inlined_call_operand.vmem [shape: bf16[2,768], index: 0, kind: input, shape index: {}]   ;;  %s5031_s1 = inlined_call_operand.vmem [shape: bf16[768,768], index: 1, kind: input, shape index: {}]   ;;  %s5032_s2 = inlined_call_operand.vmem [shape: f32[1,768], index: 2, kind: input, shape index: {}]   ;;  %s5033_s3 = inlined_call_operand.vmem [shape: f32[1,768], index: 3, kind: input, shape index: {}]   ;;  %s5034_s4 = inlined_call_operand.vmem [shape: f32[1,768], index: 4, kind: input, shape index: {}]   ;;  %s5035_s5 = inlined_call_operand.vmem [shape: f32[1,768], index: 5, kind: input, shape index: {}]   ;;  %s5036_s6 = inlined_call_operand.vmem [shape: f32[1,768], index: 6, kind: input, shape index: {}]   ;;  %s5037_s7 = inlined_call_operand.vmem [shape: f32[768,128], index: 7, kind: input, shape index: {}]   ;;  %s5038_s8 = inlined_call_operand.vmem [shape: f32[1,128], index: 8, kind: input, shape index: {}]   ;;  %s5039_s9 = inlined_call_operand.hbm [shape: f32[2,128], index: 9, kind: output, shape index: {}]  }
   0x1   :  { %v3225_v0 = vld [vmem:[%s5031_s1 + $0x4] ss:$24 sps:$4 sm:$0xff]   ;;  %v3229_v2 = vld [vmem:[%s5031_s1] ss:$24 sps:$4 sm:$0xff]   ;;  %v3231_v4 = vld [vmem:[%s5031_s1 + $0x34] ss:$24 sps:$4 sm:$0xff]   ;;  %v357_v38 = vunpack.c.l.s4 %v3696_v37 }
   0x2   :  { %v3227_v1 = vld [vmem:[%s5031_s1 + $0x304] ss:$24 sps:$4 sm:$0xff]   ;;  %1848 = vmatprep.subr.bf16.mxu1 %v3225_v0  ;;  %v3230_v3 = vld [vmem:[%s5031_s1 + $0x300] ss:$24 sps:$4 sm:$0xff]   ;;  %v3233_v5 = vld [vmem:[%s5031_s1 + $0x334] ss:$24 sps:$4 sm:$0xff]  }
   0x3   :  { %1889 = vmatprep.subr.bf16.mxu0 %v3227_v1  ;;  %1849 = vmatpush1.bf16.msra.mxu1 %v3229_v2  ;;  %v3235_v6 = vld [vmem:[%s5031_s1 + $0x30] ss:$24 sps:$4 sm:$0xff]   ;;  %v3237_v8 = vld [vmem:[%s5031_s1 + $0x64] ss:$24 sps:$4 sm:$0xff]   ;;  %v3241_v10 = vld [vmem:[%s5031_s1 + $0x60] ss:$24 sps:$4 sm:$0xff]   ;;  %v358_v43 = vunpack.c.0.s8 %v357_v38 }
   0x4   :  { %1890 = vmatpush1.bf16.msra.mxu0 %v3230_v3  ;;  %1850 = vmatprep.subr.bf16.mxu1 %v3231_v4  ;;  %v3236_v7 = vld [vmem:[%s5031_s1 + $0x330] ss:$24 sps:$4 sm:$0xff]   ;;  %v3239_v9 = vld [vmem:[%s5031_s1 + $0x364] ss:$24 sps:$4 sm:$0xff]   ;;  %v3242_v11 = vld [vmem:[%s5031_s1 + $0x360] ss:$24 sps:$4 sm:$0xff]  }
   0x5   :  { %1891 = vmatprep.subr.bf16.mxu0 %v3233_v5  ;;  %v3243_v12 = vld [vmem:[%s5031_s1 + $0x94] ss:$24 sps:$4 sm:$0xff]   ;;  %v3247_v14 = vld [vmem:[%s5031_s1 + $0x90] ss:$24 sps:$4 sm:$0xff]   ;;  %v3249_v16 = vld [vmem:[%s5031_s1 + $0xc4] ss:$24 sps:$4 sm:$0xff]  }
   0x6   :  { %v3245_v13 = vld [vmem:[%s5031_s1 + $0x394] ss:$24 sps:$4 sm:$0xff]   ;;  %v3248_v15 = vld [vmem:[%s5031_s1 + $0x390] ss:$24 sps:$4 sm:$0xff]   ;;  %v3251_v17 = vld [vmem:[%s5031_s1 + $0x3c4] ss:$24 sps:$4 sm:$0xff]  }
   0x7   :  { %1851 = vmatpush1.bf16.msra.mxu1 %v3235_v6  ;;  %v3253_v18 = vld [vmem:[%s5031_s1 + $0xc0] ss:$24 sps:$4 sm:$0xff]   ;;  %v3255_v20 = vld [vmem:[%s5031_s1 + $0xf4] ss:$24 sps:$4 sm:$0xff]   ;;  %v3259_v22 = vld [vmem:[%s5031_s1 + $0xf0] ss:$24 sps:$4 sm:$0xff]  }
   0x8   :  { %1892 = vmatpush1.bf16.msra.mxu0 %v3236_v7  ;;  %1852 = vmatprep.subr.bf16.mxu1 %v3237_v8  ;;  %v3254_v19 = vld [vmem:[%s5031_s1 + $0x3c0] ss:$24 sps:$4 sm:$0xff]   ;;  %v3257_v21 = vld [vmem:[%s5031_s1 + $0x3f4] ss:$24 sps:$4 sm:$0xff]   ;;  %v3260_v23 = vld [vmem:[%s5031_s1 + $0x3f0] ss:$24 sps:$4 sm:$0xff]  }
   0x9   :  { %1893 = vmatprep.subr.bf16.mxu0 %v3239_v9  ;;  %v3261_v24 = vld [vmem:[%s5031_s1 + $0x124] ss:$24 sps:$4 sm:$0xff]   ;;  %v3265_v26 = vld [vmem:[%s5031_s1 + $0x120] ss:$24 sps:$4 sm:$0xff]   ;;  %v3267_v28 = vld [vmem:[%s5031_s1 + $0x154] ss:$24 sps:$4 sm:$0xff]  }
   0xa   :  { %v3263_v25 = vld [vmem:[%s5031_s1 + $0x424] ss:$24 sps:$4 sm:$0xff]   ;;  %v3266_v27 = vld [vmem:[%s5031_s1 + $0x420] ss:$24 sps:$4 sm:$0xff]   ;;  %v3269_v29 = vld [vmem:[%s5031_s1 + $0x454] ss:$24 sps:$4 sm:$0xff]  }
   0xb   :  { %1853 = vmatpush1.bf16.msra.mxu1 %v3241_v10  ;;  %v3271_v30 = vld [vmem:[%s5031_s1 + $0x150] ss:$24 sps:$4 sm:$0xff]   ;;  %v3273_v32 = vld [vmem:[%s5031_s1 + $0x184] ss:$24 sps:$4 sm:$0xff]   ;;  %v3277_v34 = vld [vmem:[%s5031_s1 + $0x180] ss:$24 sps:$4 sm:$0xff]  }
   0xc   :  { %1894 = vmatpush1.bf16.msra.mxu0 %v3242_v11  ;;  %1854 = vmatprep.subr.bf16.mxu1 %v3243_v12  ;;  %v3272_v31 = vld [vmem:[%s5031_s1 + $0x450] ss:$24 sps:$4 sm:$0xff]   ;;  %v3275_v33 = vld [vmem:[%s5031_s1 + $0x484] ss:$24 sps:$4 sm:$0xff]   ;;  %v3278_v35 = vld [vmem:[%s5031_s1 + $0x480] ss:$24 sps:$4 sm:$0xff]  }
   0xd   :  { %1895 = vmatprep.subr.bf16.mxu0 %v3245_v13  ;;  %v3279_v39 = vld [vmem:[%s5031_s1 + $0x1b4] ss:$24 sps:$4 sm:$0xff]   ;;  %v3283_v41 = vld [vmem:[%s5031_s1 + $0x1b0] ss:$24 sps:$4 sm:$0xff]   ;;  %v3865_v42 = vshrl.u32 %v324_v36, 7 }
   0xe   :  { %v3281_v40 = vld [vmem:[%s5031_s1 + $0x4b4] ss:$24 sps:$4 sm:$0xff]   ;;  %v3284_v44 = vld [vmem:[%s5031_s1 + $0x4b0] ss:$24 sps:$4 sm:$0xff]   ;;  %v3285_v45 = vld [vmem:[%s5031_s1 + $0x1e4] ss:$24 sps:$4 sm:$0xff]  }
   0xf   :  { %1855 = vmatpush1.bf16.msra.mxu1 %v3247_v14  ;;  %v3287_v46 = vld [vmem:[%s5031_s1 + $0x4e4] ss:$24 sps:$4 sm:$0xff]   ;;  %v3289_v47 = vld [vmem:[%s5031_s1 + $0x1e0] ss:$24 sps:$4 sm:$0xff]   ;;  %v3883_v49 = vsub.s32 %v358_v43, %v3865_v42  ;;  %v3291_v50 = vld [vmem:[%s5031_s1 + $0x214] ss:$24 sps:$4 sm:$0xff]  }
  0x10   :  { %1896 = vmatpush1.bf16.msra.mxu0 %v3248_v15  ;;  %1856 = vmatprep.subr.bf16.mxu1 %v3249_v16  ;;  %v3290_v48 = vld [vmem:[%s5031_s1 + $0x4e0] ss:$24 sps:$4 sm:$0xff]   ;;  %v3293_v51 = vld [vmem:[%s5031_s1 + $0x514] ss:$24 sps:$4 sm:$0xff]   ;;  %v3295_v53 = vld [vmem:[%s5031_s1 + $0x210] ss:$24 sps:$4 sm:$0xff]  }
  0x11   :  { %1897 = vmatprep.subr.bf16.mxu0 %v3251_v17  ;;  %v33_v52 = vld [vmem:[%s5030_s0] sm:$0x3f]  ;;  %v3296_v56 = vld [vmem:[%s5031_s1 + $0x510] ss:$24 sps:$4 sm:$0xff]   ;;  %v3303_v1 = vld [vmem:[%s5031_s1 + $0x274] ss:$24 sps:$4 sm:$0xff]  }
  0x12   :  { %v362_v54 = vrot.slane %v33_v52, %v3883_v49  ;;  %v355_v55 = vcombine.high %v33_v52, %v33_v52  ;;  %v3297_v57 = vld [vmem:[%s5031_s1 + $0x244] ss:$24 sps:$4 sm:$0xff]   ;;  %v3301_v61 = vld [vmem:[%s5031_s1 + $0x240] ss:$24 sps:$4 sm:$0xff]   ;;  %v3305_v2 = vld [vmem:[%s5031_s1 + $0x574] ss:$24 sps:$4 sm:$0xff]  }
  0x13   :  { %1857 = vmatpush1.bf16.msra.mxu1 %v3253_v18  ;;  %v3299_v58 = vld [vmem:[%s5031_s1 + $0x544] ss:$24 sps:$4 sm:$0xff]   ;;  %v3302_v0 = vld [vmem:[%s5031_s1 + $0x540] ss:$24 sps:$4 sm:$0xff]   ;;  %v3307_v4 = vld [vmem:[%s5031_s1 + $0x270] ss:$24 sps:$4 sm:$0xff]  }
  0x14   :  { %1898 = vmatpush1.bf16.msra.mxu0 %v3254_v19  ;;  %1858 = vmatprep.subr.bf16.mxu1 %v3255_v20  ;;  %v370_v59 = vcombine.high %v362_v54, %v362_v54  ;;  %v369_v60 = vrot.slane %v355_v55, %v3883_v49  ;;  %v3308_v5 = vld [vmem:[%s5031_s1 + $0x570] ss:$24 sps:$4 sm:$0xff]   ;;  %v3309_v6 = vld [vmem:[%s5031_s1 + $0x2a4] ss:$24 sps:$4 sm:$0xff]   ;;  %v3313_v8 = vld [vmem:[%s5031_s1 + $0x2a0] ss:$24 sps:$4 sm:$0xff]   ;;  %v3960_v13 = vrot.slane %v362_v54, %v3883_v49 }
  0x15   :  { %1899 = vmatprep.subr.bf16.mxu0 %v3257_v21  ;;  %v3311_v7 = vld [vmem:[%s5031_s1 + $0x5a4] ss:$24 sps:$4 sm:$0xff]   ;;  %v3314_v9 = vld [vmem:[%s5031_s1 + $0x5a0] ss:$24 sps:$4 sm:$0xff]   ;;  %v3315_v10 = vld [vmem:[%s5031_s1 + $0x2d4] ss:$24 sps:$4 sm:$0xff]  }
  0x16   :  { %v3912_v62 = vrot.slane %v370_v59, %v3883_v49  ;;  %v3915_v63 = vrot.slane %v369_v60, %v3883_v49  ;;  %v3317_v11 = vld [vmem:[%s5031_s1 + $0x5d4] ss:$24 sps:$4 sm:$0xff]   ;;  %v3319_v12 = vld [vmem:[%s5031_s1 + $0x2d0] ss:$24 sps:$4 sm:$0xff]   ;;  %v3323_v15 = vld [vmem:[%s5031_s1 + $0x604] ss:$24 sps:$4 sm:$0xff]   ;;  %v371_v17 = vcombine.high %v369_v60, %v369_v60  ;;  %v3976_v19 = vcombine.high %v3960_v13, %v3960_v13 }
  0x17   :  { %1859 = vmatpush1.bf16.msra.mxu1 %v3259_v22  ;;  %v3320_v14 = vld [vmem:[%s5031_s1 + $0x5d0] ss:$24 sps:$4 sm:$0xff]   ;;  %v3326_v16 = vld [vmem:[%s5031_s1 + $0xc] ss:$24 sps:$4 sm:$0xff]   ;;  %v3321_v18 = vld [vmem:[%s5031_s1 + $0x600] ss:$24 sps:$4 sm:$0xff]  }
  0x18   :  { %1900 = vmatpush1.bf16.msra.mxu0 %v3260_v23  ;;  %1860 = vmatprep.subr.bf16.mxu1 %v3261_v24  ;;  %v3928_v3 = vcombine.high %v3912_v62, %v3912_v62  ;;  %v3324_v20 = vld [vmem:[%s5031_s1 + $0x8] ss:$24 sps:$4 sm:$0xff]   ;;  %v3329_v21 = vld [vmem:[%s5031_s1 + $0x634] ss:$24 sps:$4 sm:$0xff]   ;;  %v3988_v23 = vrot.slane %v371_v17, %v3883_v49  ;;  %v3359_v43 = vld [vmem:[%s5031_s1 + $0x724] ss:$24 sps:$4 sm:$0xff]  }
  0x19   :  { %1901 = vmatprep.subr.bf16.mxu0 %v3263_v25  ;;  %1880 = vmatprep.mubr.bf16.mxu1 %v3912_v62  ;;  %v3332_v22 = vld [vmem:[%s5031_s1 + $0x3c] ss:$24 sps:$4 sm:$0xff]   ;;  %v3327_v24 = vld [vmem:[%s5031_s1 + $0x630] ss:$24 sps:$4 sm:$0xff]   ;;  %v3345_v36 = vld [vmem:[%s5031_s1 + $0x6c0] ss:$24 sps:$4 sm:$0xff]  }
  0x1a   :  { %1921 = vmatprep.mubr.bf16.mxu0 %v3928_v3  ;;  %v3330_v25 = vld [vmem:[%s5031_s1 + $0x38] ss:$24 sps:$4 sm:$0xff]   ;;  %v3348_v37 = vld [vmem:[%s5031_s1 + $0xc8] ss:$24 sps:$4 sm:$0xff]   ;;  %v3353_v38 = vld [vmem:[%s5031_s1 + $0x6f4] ss:$24 sps:$4 sm:$0xff]  }
  0x1b   :  { %1861 = vmatpush1.bf16.msra.mxu1 %v3265_v26  ;;  %v3335_v26 = vld [vmem:[%s5031_s1 + $0x664] ss:$24 sps:$4 sm:$0xff]   ;;  %v3363_v49 = vld [vmem:[%s5031_s1 + $0x750] ss:$24 sps:$4 sm:$0xff]   ;;  %v3377_v55 = vld [vmem:[%s5031_s1 + $0x7b4] ss:$24 sps:$4 sm:$0xff]  }
  0x1c   :  { %1902 = vmatpush1.bf16.msra.mxu0 %v3266_v27  ;;  %1862 = vmatprep.subr.bf16.mxu1 %v3267_v28  ;;  %v3338_v27 = vld [vmem:[%s5031_s1 + $0x6c] ss:$24 sps:$4 sm:$0xff]   ;;  %v3333_v28 = vld [vmem:[%s5031_s1 + $0x660] ss:$24 sps:$4 sm:$0xff]  }
  0x1d   :  { %1903 = vmatprep.subr.bf16.mxu0 %v3269_v29  ;;  %v3336_v29 = vld [vmem:[%s5031_s1 + $0x68] ss:$24 sps:$4 sm:$0xff]   ;;  %v3374_v52 = vld [vmem:[%s5031_s1 + $0x18c] ss:$24 sps:$4 sm:$0xff]  }
  0x1e   :  { %v3372_v54 = vld [vmem:[%s5031_s1 + $0x188] ss:$24 sps:$4 sm:$0xff]   ;;  %v3383_v59 = vld [vmem:[%s5031_s1 + $0x7e4] ss:$24 sps:$4 sm:$0xff]  }
  0x1f   :  { %1863 = vmatpush1.bf16.msra.mxu1 %v3271_v30  ;;  %v3341_v30 = vld [vmem:[%s5031_s1 + $0x694] ss:$24 sps:$4 sm:$0xff]   ;;  %v3405_v17 = vld [vmem:[%s5031_s1 + $0x8a0] ss:$24 sps:$4 sm:$0xff]  }
  0x20   :  { %1904 = vmatpush1.bf16.msra.mxu0 %v3272_v31  ;;  %1864 = vmatprep.subr.bf16.mxu1 %v3273_v32  ;;  %v3344_v31 = vld [vmem:[%s5031_s1 + $0x9c] ss:$24 sps:$4 sm:$0xff]   ;;  %v3339_v32 = vld [vmem:[%s5031_s1 + $0x690] ss:$24 sps:$4 sm:$0xff]   ;;  %v3386_v60 = vld [vmem:[%s5031_s1 + $0x1ec] ss:$24 sps:$4 sm:$0xff]  }
  0x21   :  { %1905 = vmatprep.subr.bf16.mxu0 %v3275_v33  ;;  %v3342_v33 = vld [vmem:[%s5031_s1 + $0x98] ss:$24 sps:$4 sm:$0xff]  }
  0x23   :  { %1865 = vmatpush1.bf16.msra.mxu1 %v3277_v34  ;;  %v3347_v34 = vld [vmem:[%s5031_s1 + $0x6c4] ss:$24 sps:$4 sm:$0xff]  }
  0x24   :  { %1906 = vmatpush1.bf16.msra.mxu0 %v3278_v35  ;;  %1866 = vmatprep.subr.bf16.mxu1 %v3279_v39  ;;  %v3350_v35 = vld [vmem:[%s5031_s1 + $0xcc] ss:$24 sps:$4 sm:$0xff]   ;;  %v3356_v39 = vld [vmem:[%s5031_s1 + $0xfc] ss:$24 sps:$4 sm:$0xff]  }
  0x25   :  { %1907 = vmatprep.subr.bf16.mxu0 %v3281_v40  ;;  %v3351_v40 = vld [vmem:[%s5031_s1 + $0x6f0] ss:$24 sps:$4 sm:$0xff]  }
  0x27   :  { %1867 = vmatpush1.bf16.msra.mxu1 %v3283_v41  ;;  %v3354_v41 = vld [vmem:[%s5031_s1 + $0xf8] ss:$24 sps:$4 sm:$0xff]  }
  0x28   :  { %1908 = vmatpush1.bf16.msra.mxu0 %v3284_v44  ;;  %1868 = vmatprep.subr.bf16.mxu1 %v3285_v45  ;;  %v3362_v44 = vld [vmem:[%s5031_s1 + $0x12c] ss:$24 sps:$4 sm:$0xff]   ;;  %v3357_v45 = vld [vmem:[%s5031_s1 + $0x720] ss:$24 sps:$4 sm:$0xff]  }
  0x29   :  { %1909 = vmatprep.subr.bf16.mxu0 %v3287_v46  ;;  %v3360_v46 = vld [vmem:[%s5031_s1 + $0x128] ss:$24 sps:$4 sm:$0xff]  }
  0x2b   :  { %1869 = vmatpush1.bf16.msra.mxu1 %v3289_v47  ;;  %v3365_v47 = vld [vmem:[%s5031_s1 + $0x754] ss:$24 sps:$4 sm:$0xff]  }
  0x2c   :  { %1910 = vmatpush1.bf16.msra.mxu0 %v3290_v48  ;;  %1870 = vmatprep.subr.bf16.mxu1 %v3291_v50  ;;  %v3368_v48 = vld [vmem:[%s5031_s1 + $0x15c] ss:$24 sps:$4 sm:$0xff]   ;;  %v3366_v50 = vld [vmem:[%s5031_s1 + $0x158] ss:$24 sps:$4 sm:$0xff]  }
  0x2d   :  { %1911 = vmatprep.subr.bf16.mxu0 %v3293_v51  ;;  %v3371_v51 = vld [vmem:[%s5031_s1 + $0x784] ss:$24 sps:$4 sm:$0xff]  }
  0x2f   :  { %1871 = vmatpush1.bf16.msra.mxu1 %v3295_v53  ;;  %v3369_v53 = vld [vmem:[%s5031_s1 + $0x780] ss:$24 sps:$4 sm:$0xff]  }
  0x30   :  { %1912 = vmatpush1.bf16.msra.mxu0 %v3296_v56  ;;  %1872 = vmatprep.subr.bf16.mxu1 %v3297_v57  ;;  %v3380_v56 = vld [vmem:[%s5031_s1 + $0x1bc] ss:$24 sps:$4 sm:$0xff]   ;;  %v3375_v57 = vld [vmem:[%s5031_s1 + $0x7b0] ss:$24 sps:$4 sm:$0xff]  }
  0x31   :  { %1913 = vmatprep.subr.bf16.mxu0 %v3299_v58  ;;  %v3378_v58 = vld [vmem:[%s5031_s1 + $0x1b8] ss:$24 sps:$4 sm:$0xff]  }
  0x33   :  { %1873 = vmatpush1.bf16.msra.mxu1 %v3301_v61  ;;  %v3381_v61 = vld [vmem:[%s5031_s1 + $0x7e0] ss:$24 sps:$4 sm:$0xff]  }
  0x34   :  { %1914 = vmatpush1.bf16.msra.mxu0 %v3302_v0  ;;  %1874 = vmatprep.subr.bf16.mxu1 %v3303_v1  ;;  %v3384_v0 = vld [vmem:[%s5031_s1 + $0x1e8] ss:$24 sps:$4 sm:$0xff]   ;;  %v3389_v1 = vld [vmem:[%s5031_s1 + $0x814] ss:$24 sps:$4 sm:$0xff]  }
  0x35   :  { %1915 = vmatprep.subr.bf16.mxu0 %v3305_v2  ;;  %v3392_v2 = vld [vmem:[%s5031_s1 + $0x21c] ss:$24 sps:$4 sm:$0xff]  }
  0x37   :  { %1875 = vmatpush1.bf16.msra.mxu1 %v3307_v4  ;;  %v3387_v4 = vld [vmem:[%s5031_s1 + $0x810] ss:$24 sps:$4 sm:$0xff]  }
  0x38   :  { %1916 = vmatpush1.bf16.msra.mxu0 %v3308_v5  ;;  %1876 = vmatprep.subr.bf16.mxu1 %v3309_v6  ;;  %v3390_v5 = vld [vmem:[%s5031_s1 + $0x218] ss:$24 sps:$4 sm:$0xff]   ;;  %v3395_v6 = vld [vmem:[%s5031_s1 + $0x844] ss:$24 sps:$4 sm:$0xff]  }
  0x39   :  { %1917 = vmatprep.subr.bf16.mxu0 %v3311_v7  ;;  %v3398_v7 = vld [vmem:[%s5031_s1 + $0x24c] ss:$24 sps:$4 sm:$0xff]  }
  0x3b   :  { %1877 = vmatpush1.bf16.msra.mxu1 %v3313_v8  ;;  %v3393_v8 = vld [vmem:[%s5031_s1 + $0x840] ss:$24 sps:$4 sm:$0xff]  }
  0x3c   :  { %1918 = vmatpush1.bf16.msra.mxu0 %v3314_v9  ;;  %1878 = vmatprep.subr.bf16.mxu1 %v3315_v10  ;;  %v3396_v9 = vld [vmem:[%s5031_s1 + $0x248] ss:$24 sps:$4 sm:$0xff]   ;;  %v3401_v10 = vld [vmem:[%s5031_s1 + $0x874] ss:$24 sps:$4 sm:$0xff]  }
  0x3d   :  { %1919 = vmatprep.subr.bf16.mxu0 %v3317_v11  ;;  %v3404_v11 = vld [vmem:[%s5031_s1 + $0x27c] ss:$24 sps:$4 sm:$0xff]  }
  0x3f   :  { %1879 = vmatpush1.bf16.msra.mxu1 %v3319_v12  ;;  %v3399_v12 = vld [vmem:[%s5031_s1 + $0x870] ss:$24 sps:$4 sm:$0xff]  }
  0x40   :  { %1920 = vmatpush1.bf16.msra.mxu0 %v3320_v14  ;;  %1971 = vmatprep.subr.bf16.mxu1 %v3326_v16  ;;  %v3402_v14 = vld [vmem:[%s5031_s1 + $0x278] ss:$24 sps:$4 sm:$0xff]   ;;  %v3410_v16 = vld [vmem:[%s5031_s1 + $0x2ac] ss:$24 sps:$4 sm:$0xff]  }
  0x41   :  { %1930 = vmatprep.subr.bf16.mxu0 %v3323_v15  ;;  %v3407_v15 = vld [vmem:[%s5031_s1 + $0x8a4] ss:$24 sps:$4 sm:$0xff]  }
  0x42   :  { %1881 = vmatmul.mubr.bf16.vlgmr.msra.gmra.mrb[0].mxu1 %v3960_v13 }
  0x43   :  { %1922 = vmatmul.mubr.bf16.vlgmr.msra.gmra.mrb[0].mxu0 %v3976_v19  ;;  %1972 = vmatpush1.bf16.msra.mxu1 %v3324_v20  ;;  %v3413_v20 = vld [vmem:[%s5031_s1 + $0x8d4] ss:$24 sps:$4 sm:$0xff]  }
  0x44   :  { %1931 = vmatpush1.bf16.msra.mxu0 %v3321_v18  ;;  %1973 = vmatprep.subr.bf16.mxu1 %v3332_v22  ;;  %v3408_v18 = vld [vmem:[%s5031_s1 + $0x2a8] ss:$24 sps:$4 sm:$0xff]  }
  0x45   :  { %1932 = vmatprep.subr.bf16.mxu0 %v3329_v21  ;;  %1962 = vmatprep.mubr.bf16.mxu0 %v3988_v23  ;;  %v3416_v21 = vld [vmem:[%s5031_s1 + $0x2dc] ss:$24 sps:$4 sm:$0xff]   ;;  %v3411_v22 = vld [vmem:[%s5031_s1 + $0x8d0] ss:$24 sps:$4 sm:$0xff]  }
  0x46   :  { %2003 = vmatprep.mubr.bf16.mxu1 %v3912_v62 }
  0x47   :  { %1974 = vmatpush1.bf16.msra.mxu1 %v3330_v25  ;;  %v3420_v25 = vld [vmem:[%s5031_s1 + $0x30c] ss:$24 sps:$4 sm:$0xff]  }
  0x48   :  { %1933 = vmatpush1.bf16.msra.mxu0 %v3327_v24  ;;  %1975 = vmatprep.subr.bf16.mxu1 %v3338_v27  ;;  %v3414_v24 = vld [vmem:[%s5031_s1 + $0x2d8] ss:$24 sps:$4 sm:$0xff]   ;;  %v3418_v27 = vld [vmem:[%s5031_s1 + $0x308] ss:$24 sps:$4 sm:$0xff]  }
  0x49   :  { %1934 = vmatprep.subr.bf16.mxu0 %v3335_v26  ;;  %v3423_v26 = vld [vmem:[%s5031_s1 + $0x14] ss:$24 sps:$4 sm:$0xff]  }
  0x4b   :  { %1976 = vmatpush1.bf16.msra.mxu1 %v3336_v29  ;;  %v3426_v29 = vld [vmem:[%s5031_s1 + $0x33c] ss:$24 sps:$4 sm:$0xff]  }
  0x4c   :  { %1935 = vmatpush1.bf16.msra.mxu0 %v3333_v28  ;;  %1977 = vmatprep.subr.bf16.mxu1 %v3344_v31  ;;  %v3421_v28 = vld [vmem:[%s5031_s1 + $0x10] ss:$24 sps:$4 sm:$0xff]  }
  0x4d   :  { %1936 = vmatprep.subr.bf16.mxu0 %v3341_v30  ;;  %v3429_v30 = vld [vmem:[%s5031_s1 + $0x44] ss:$24 sps:$4 sm:$0xff]   ;;  %v3424_v31 = vld [vmem:[%s5031_s1 + $0x338] ss:$24 sps:$4 sm:$0xff]  }
  0x4f   :  { %1978 = vmatpush1.bf16.msra.mxu1 %v3342_v33  ;;  %v3432_v33 = vld [vmem:[%s5031_s1 + $0x36c] ss:$24 sps:$4 sm:$0xff]  }
  0x50   :  { %1937 = vmatpush1.bf16.msra.mxu0 %v3339_v32  ;;  %1979 = vmatprep.subr.bf16.mxu1 %v3350_v35  ;;  %v3427_v32 = vld [vmem:[%s5031_s1 + $0x40] ss:$24 sps:$4 sm:$0xff]  }
  0x51   :  { %1938 = vmatprep.subr.bf16.mxu0 %v3347_v34  ;;  %v3435_v34 = vld [vmem:[%s5031_s1 + $0x74] ss:$24 sps:$4 sm:$0xff]   ;;  %v3430_v35 = vld [vmem:[%s5031_s1 + $0x368] ss:$24 sps:$4 sm:$0xff]  }
  0x53   :  { %1980 = vmatpush1.bf16.msra.mxu1 %v3348_v37  ;;  %v3438_v37 = vld [vmem:[%s5031_s1 + $0x39c] ss:$24 sps:$4 sm:$0xff]  }
  0x54   :  { %1939 = vmatpush1.bf16.msra.mxu0 %v3345_v36  ;;  %1981 = vmatprep.subr.bf16.mxu1 %v3356_v39  ;;  %v3433_v36 = vld [vmem:[%s5031_s1 + $0x70] ss:$24 sps:$4 sm:$0xff]   ;;  %v3439_v39 = vld [vmem:[%s5031_s1 + $0xa0] ss:$24 sps:$4 sm:$0xff]  }
  0x55   :  { %1940 = vmatprep.subr.bf16.mxu0 %v3353_v38  ;;  %v3436_v38 = vld [vmem:[%s5031_s1 + $0x398] ss:$24 sps:$4 sm:$0xff]  }
  0x57   :  { %1982 = vmatpush1.bf16.msra.mxu1 %v3354_v41  ;;  %v3447_v41 = vld [vmem:[%s5031_s1 + $0xd4] ss:$24 sps:$4 sm:$0xff]  }
  0x58   :  { %1941 = vmatpush1.bf16.msra.mxu0 %v3351_v40  ;;  %1983 = vmatprep.subr.bf16.mxu1 %v3362_v44  ;;  %v3444_v40 = vld [vmem:[%s5031_s1 + $0x3cc] ss:$24 sps:$4 sm:$0xff]   ;;  %v3445_v44 = vld [vmem:[%s5031_s1 + $0xd0] ss:$24 sps:$4 sm:$0xff]  }
  0x59   :  { %1942 = vmatprep.subr.bf16.mxu0 %v3359_v43  ;;  %v3442_v43 = vld [vmem:[%s5031_s1 + $0x3c8] ss:$24 sps:$4 sm:$0xff]  }
  0x5b   :  { %1984 = vmatpush1.bf16.msra.mxu1 %v3360_v46  ;;  %v3453_v46 = vld [vmem:[%s5031_s1 + $0x104] ss:$24 sps:$4 sm:$0xff]  }
  0x5c   :  { %1943 = vmatpush1.bf16.msra.mxu0 %v3357_v45  ;;  %1985 = vmatprep.subr.bf16.mxu1 %v3368_v48  ;;  %v3450_v45 = vld [vmem:[%s5031_s1 + $0x3fc] ss:$24 sps:$4 sm:$0xff]   ;;  %v3451_v48 = vld [vmem:[%s5031_s1 + $0x100] ss:$24 sps:$4 sm:$0xff]  }
  0x5d   :  { %1944 = vmatprep.subr.bf16.mxu0 %v3365_v47  ;;  %v3448_v47 = vld [vmem:[%s5031_s1 + $0x3f8] ss:$24 sps:$4 sm:$0xff]  }
  0x5f   :  { %1986 = vmatpush1.bf16.msra.mxu1 %v3366_v50  ;;  %v3459_v50 = vld [vmem:[%s5031_s1 + $0x134] ss:$24 sps:$4 sm:$0xff]  }
  0x60   :  { %1945 = vmatpush1.bf16.msra.mxu0 %v3363_v49  ;;  %1987 = vmatprep.subr.bf16.mxu1 %v3374_v52  ;;  %v3456_v49 = vld [vmem:[%s5031_s1 + $0x42c] ss:$24 sps:$4 sm:$0xff]   ;;  %v3457_v52 = vld [vmem:[%s5031_s1 + $0x130] ss:$24 sps:$4 sm:$0xff]  }
  0x61   :  { %1946 = vmatprep.subr.bf16.mxu0 %v3371_v51  ;;  %v3454_v51 = vld [vmem:[%s5031_s1 + $0x428] ss:$24 sps:$4 sm:$0xff]  }
  0x63   :  { %1988 = vmatpush1.bf16.msra.mxu1 %v3372_v54  ;;  %v3465_v54 = vld [vmem:[%s5031_s1 + $0x164] ss:$24 sps:$4 sm:$0xff]  }
  0x64   :  { %1947 = vmatpush1.bf16.msra.mxu0 %v3369_v53  ;;  %1989 = vmatprep.subr.bf16.mxu1 %v3380_v56  ;;  %v3462_v53 = vld [vmem:[%s5031_s1 + $0x45c] ss:$24 sps:$4 sm:$0xff]   ;;  %v3463_v56 = vld [vmem:[%s5031_s1 + $0x160] ss:$24 sps:$4 sm:$0xff]  }
  0x65   :  { %1948 = vmatprep.subr.bf16.mxu0 %v3377_v55  ;;  %v3460_v55 = vld [vmem:[%s5031_s1 + $0x458] ss:$24 sps:$4 sm:$0xff]  }
  0x67   :  { %1990 = vmatpush1.bf16.msra.mxu1 %v3378_v58  ;;  %v3471_v58 = vld [vmem:[%s5031_s1 + $0x194] ss:$24 sps:$4 sm:$0xff]  }
  0x68   :  { %1949 = vmatpush1.bf16.msra.mxu0 %v3375_v57  ;;  %1991 = vmatprep.subr.bf16.mxu1 %v3386_v60  ;;  %v3468_v57 = vld [vmem:[%s5031_s1 + $0x48c] ss:$24 sps:$4 sm:$0xff]   ;;  %v3469_v60 = vld [vmem:[%s5031_s1 + $0x190] ss:$24 sps:$4 sm:$0xff]  }
  0x69   :  { %1950 = vmatprep.subr.bf16.mxu0 %v3383_v59  ;;  %v3466_v59 = vld [vmem:[%s5031_s1 + $0x488] ss:$24 sps:$4 sm:$0xff]  }
  0x6b   :  { %1992 = vmatpush1.bf16.msra.mxu1 %v3384_v0  ;;  %v3477_v0 = vld [vmem:[%s5031_s1 + $0x1c4] ss:$24 sps:$4 sm:$0xff]  }
  0x6c   :  { %1951 = vmatpush1.bf16.msra.mxu0 %v3381_v61  ;;  %1993 = vmatprep.subr.bf16.mxu1 %v3392_v2  ;;  %v3474_v61 = vld [vmem:[%s5031_s1 + $0x4bc] ss:$24 sps:$4 sm:$0xff]   ;;  %v3475_v2 = vld [vmem:[%s5031_s1 + $0x1c0] ss:$24 sps:$4 sm:$0xff]  }
  0x6d   :  { %1952 = vmatprep.subr.bf16.mxu0 %v3389_v1  ;;  %v3472_v1 = vld [vmem:[%s5031_s1 + $0x4b8] ss:$24 sps:$4 sm:$0xff]  }
  0x6f   :  { %1994 = vmatpush1.bf16.msra.mxu1 %v3390_v5  ;;  %v3483_v5 = vld [vmem:[%s5031_s1 + $0x1f4] ss:$24 sps:$4 sm:$0xff]  }
  0x70   :  { %1953 = vmatpush1.bf16.msra.mxu0 %v3387_v4  ;;  %1995 = vmatprep.subr.bf16.mxu1 %v3398_v7  ;;  %v3480_v4 = vld [vmem:[%s5031_s1 + $0x4ec] ss:$24 sps:$4 sm:$0xff]   ;;  %v3481_v7 = vld [vmem:[%s5031_s1 + $0x1f0] ss:$24 sps:$4 sm:$0xff]  }
  0x71   :  { %1954 = vmatprep.subr.bf16.mxu0 %v3395_v6  ;;  %v3478_v6 = vld [vmem:[%s5031_s1 + $0x4e8] ss:$24 sps:$4 sm:$0xff]  }
  0x73   :  { %1996 = vmatpush1.bf16.msra.mxu1 %v3396_v9  ;;  %v3489_v9 = vld [vmem:[%s5031_s1 + $0x224] ss:$24 sps:$4 sm:$0xff]  }
  0x74   :  { %1955 = vmatpush1.bf16.msra.mxu0 %v3393_v8  ;;  %1997 = vmatprep.subr.bf16.mxu1 %v3404_v11  ;;  %v3486_v8 = vld [vmem:[%s5031_s1 + $0x51c] ss:$24 sps:$4 sm:$0xff]   ;;  %v3487_v11 = vld [vmem:[%s5031_s1 + $0x220] ss:$24 sps:$4 sm:$0xff]  }
  0x75   :  { %1956 = vmatprep.subr.bf16.mxu0 %v3401_v10  ;;  %v3484_v10 = vld [vmem:[%s5031_s1 + $0x518] ss:$24 sps:$4 sm:$0xff]  }
  0x77   :  { %1998 = vmatpush1.bf16.msra.mxu1 %v3402_v14  ;;  %v3495_v14 = vld [vmem:[%s5031_s1 + $0x254] ss:$24 sps:$4 sm:$0xff]  }
  0x78   :  { %1957 = vmatpush1.bf16.msra.mxu0 %v3399_v12  ;;  %1999 = vmatprep.subr.bf16.mxu1 %v3410_v16  ;;  %v3492_v12 = vld [vmem:[%s5031_s1 + $0x54c] ss:$24 sps:$4 sm:$0xff]   ;;  %v3493_v16 = vld [vmem:[%s5031_s1 + $0x250] ss:$24 sps:$4 sm:$0xff]  }
  0x79   :  { %1958 = vmatprep.subr.bf16.mxu0 %v3407_v15  ;;  %v3490_v15 = vld [vmem:[%s5031_s1 + $0x548] ss:$24 sps:$4 sm:$0xff]  }
  0x7b   :  { %2000 = vmatpush1.bf16.msra.mxu1 %v3408_v18  ;;  %v3501_v18 = vld [vmem:[%s5031_s1 + $0x284] ss:$24 sps:$4 sm:$0xff]  }
  0x7c   :  { %1959 = vmatpush1.bf16.msra.mxu0 %v3405_v17  ;;  %2001 = vmatprep.subr.bf16.mxu1 %v3416_v21  ;;  %v3498_v17 = vld [vmem:[%s5031_s1 + $0x57c] ss:$24 sps:$4 sm:$0xff]   ;;  %v3499_v21 = vld [vmem:[%s5031_s1 + $0x280] ss:$24 sps:$4 sm:$0xff]  }
  0x7d   :  { %1960 = vmatprep.subr.bf16.mxu0 %v3413_v20  ;;  %v3496_v20 = vld [vmem:[%s5031_s1 + $0x578] ss:$24 sps:$4 sm:$0xff]  }
  0x7f   :  { %2002 = vmatpush1.bf16.msra.mxu1 %v3414_v24  ;;  %v3507_v24 = vld [vmem:[%s5031_s1 + $0x2b4] ss:$24 sps:$4 sm:$0xff]  }
  0x80   :  { %1961 = vmatpush1.bf16.msra.mxu0 %v3411_v22  ;;  %2012 = vmatprep.subr.bf16.mxu1 %v3420_v25  ;;  %v3504_v22 = vld [vmem:[%s5031_s1 + $0x5ac] ss:$24 sps:$4 sm:$0xff]   ;;  %v3502_v25 = vld [vmem:[%s5031_s1 + $0x5a8] ss:$24 sps:$4 sm:$0xff]  }
  0x81   :  { %2094 = vmatprep.subr.bf16.mxu0 %v3423_v26  ;;  %v3505_v26 = vld [vmem:[%s5031_s1 + $0x2b0] ss:$24 sps:$4 sm:$0xff]  }
  0x82   :  { %2004 = vmatmul.mubr.bf16.vlgmr.msra.gmra.mrb[4].mxu1 %v3960_v13 }
  0x83   :  { %1963 = vmatmul.mubr.bf16.vlgmr.msra.gmra.mrb[0].mxu0 %v3915_v63  ;;  %2013 = vmatpush1.bf16.msra.mxu1 %v3418_v27  ;;  %v3510_v27 = vld [vmem:[%s5031_s1 + $0x5dc] ss:$24 sps:$4 sm:$0xff]  }
  0x84   :  { %2095 = vmatpush1.bf16.msra.mxu0 %v3421_v28  ;;  %2014 = vmatprep.subr.bf16.mxu1 %v3426_v29  ;;  %v3513_v28 = vld [vmem:[%s5031_s1 + $0x2e4] ss:$24 sps:$4 sm:$0xff]   ;;  %v3508_v29 = vld [vmem:[%s5031_s1 + $0x5d8] ss:$24 sps:$4 sm:$0xff]  }
  0x85   :  { %2096 = vmatprep.subr.bf16.mxu0 %v3429_v30  ;;  %2044 = vmatprep.mubr.bf16.mxu1 %v3928_v3  ;;  %v3511_v30 = vld [vmem:[%s5031_s1 + $0x2e0] ss:$24 sps:$4 sm:$0xff]  }
  0x86   :  { %2126 = vmatprep.mubr.bf16.mxu0 %v3912_v62  ;;  %v3441_v62 = vld [vmem:[%s5031_s1 + $0xa4] ss:$24 sps:$4 sm:$0xff]  }
  0x87   :  { %2015 = vmatpush1.bf16.msra.mxu1 %v3424_v31  ;;  %v3516_v31 = vld [vmem:[%s5031_s1 + $0x60c] ss:$24 sps:$4 sm:$0xff]  }
  0x88   :  { %2097 = vmatpush1.bf16.msra.mxu0 %v3427_v32  ;;  %2016 = vmatprep.subr.bf16.mxu1 %v3432_v33  ;;  %v3519_v32 = vld [vmem:[%s5031_s1 + $0x314] ss:$24 sps:$4 sm:$0xff]   ;;  %v3514_v33 = vld [vmem:[%s5031_s1 + $0x608] ss:$24 sps:$4 sm:$0xff]  }
  0x89   :  { %2098 = vmatprep.subr.bf16.mxu0 %v3435_v34  ;;  %v3517_v34 = vld [vmem:[%s5031_s1 + $0x310] ss:$24 sps:$4 sm:$0xff]  }
  0x8b   :  { %2017 = vmatpush1.bf16.msra.mxu1 %v3430_v35 }
  0x8c   :  { %2099 = vmatpush1.bf16.msra.mxu0 %v3433_v36  ;;  %2018 = vmatprep.subr.bf16.mxu1 %v3438_v37 }
  0x8d   :  { %2100 = vmatprep.subr.bf16.mxu0 %v3441_v62 }
  0x8f   :  { %2019 = vmatpush1.bf16.msra.mxu1 %v3436_v38 }
  0x90   :  { %2101 = vmatpush1.bf16.msra.mxu0 %v3439_v39  ;;  %2020 = vmatprep.subr.bf16.mxu1 %v3444_v40 }
  0x91   :  { %2102 = vmatprep.subr.bf16.mxu0 %v3447_v41 }
  0x93   :  { %2021 = vmatpush1.bf16.msra.mxu1 %v3442_v43 }
  0x94   :  { %2103 = vmatpush1.bf16.msra.mxu0 %v3445_v44  ;;  %2022 = vmatprep.subr.bf16.mxu1 %v3450_v45 }
  0x95   :  { %2104 = vmatprep.subr.bf16.mxu0 %v3453_v46 }
  0x97   :  { %2023 = vmatpush1.bf16.msra.mxu1 %v3448_v47 }
  0x98   :  { %2105 = vmatpush1.bf16.msra.mxu0 %v3451_v48  ;;  %2024 = vmatprep.subr.bf16.mxu1 %v3456_v49 }
  0x99   :  { %2106 = vmatprep.subr.bf16.mxu0 %v3459_v50 }
  0x9b   :  { %2025 = vmatpush1.bf16.msra.mxu1 %v3454_v51 }
  0x9c   :  { %2107 = vmatpush1.bf16.msra.mxu0 %v3457_v52  ;;  %2026 = vmatprep.subr.bf16.mxu1 %v3462_v53 }
  0x9d   :  { %2108 = vmatprep.subr.bf16.mxu0 %v3465_v54 }
  0x9f   :  { %2027 = vmatpush1.bf16.msra.mxu1 %v3460_v55 }
  0xa0   :  { %2109 = vmatpush1.bf16.msra.mxu0 %v3463_v56  ;;  %2028 = vmatprep.subr.bf16.mxu1 %v3468_v57 }
  0xa1   :  { %2110 = vmatprep.subr.bf16.mxu0 %v3471_v58 }
  0xa3   :  { %2029 = vmatpush1.bf16.msra.mxu1 %v3466_v59 }
  0xa4   :  { %2111 = vmatpush1.bf16.msra.mxu0 %v3469_v60  ;;  %2030 = vmatprep.subr.bf16.mxu1 %v3474_v61 }
  0xa5   :  { %2112 = vmatprep.subr.bf16.mxu0 %v3477_v0 }
  0xa7   :  { %2031 = vmatpush1.bf16.msra.mxu1 %v3472_v1 }
  0xa8   :  { %2113 = vmatpush1.bf16.msra.mxu0 %v3475_v2  ;;  %2032 = vmatprep.subr.bf16.mxu1 %v3480_v4 }
  0xa9   :  { %2114 = vmatprep.subr.bf16.mxu0 %v3483_v5 }
  0xab   :  { %2033 = vmatpush1.bf16.msra.mxu1 %v3478_v6 }
  0xac   :  { %2115 = vmatpush1.bf16.msra.mxu0 %v3481_v7  ;;  %2034 = vmatprep.subr.bf16.mxu1 %v3486_v8 }
  0xad   :  { %2116 = vmatprep.subr.bf16.mxu0 %v3489_v9 }
  0xaf   :  { %2035 = vmatpush1.bf16.msra.mxu1 %v3484_v10 }
  0xb0   :  { %2117 = vmatpush1.bf16.msra.mxu0 %v3487_v11  ;;  %2036 = vmatprep.subr.bf16.mxu1 %v3492_v12 }
  0xb1   :  { %2118 = vmatprep.subr.bf16.mxu0 %v3495_v14 }
  0xb3   :  { %2037 = vmatpush1.bf16.msra.mxu1 %v3490_v15 }
  0xb4   :  { %2119 = vmatpush1.bf16.msra.mxu0 %v3493_v16  ;;  %2038 = vmatprep.subr.bf16.mxu1 %v3498_v17 }
  0xb5   :  { %2120 = vmatprep.subr.bf16.mxu0 %v3501_v18 }
  0xb7   :  { %2039 = vmatpush1.bf16.msra.mxu1 %v3496_v20 }
  0xb8   :  { %2121 = vmatpush1.bf16.msra.mxu0 %v3499_v21  ;;  %2040 = vmatprep.subr.bf16.mxu1 %v3504_v22 }
  0xb9   :  { %2122 = vmatprep.subr.bf16.mxu0 %v3507_v24 }
  0xbb   :  { %2041 = vmatpush1.bf16.msra.mxu1 %v3502_v25 }
  0xbc   :  { %2123 = vmatpush1.bf16.msra.mxu0 %v3505_v26  ;;  %2042 = vmatprep.subr.bf16.mxu1 %v3510_v27 }
  0xbd   :  { %2124 = vmatprep.subr.bf16.mxu0 %v3513_v28 }
  0xbf   :  { %2043 = vmatpush1.bf16.msra.mxu1 %v3508_v29 }
  0xc0   :  { %2125 = vmatpush1.bf16.msra.mxu0 %v3511_v30 }
  0xc1   :  { %14 = vsyncpa [#allocation3], 0  ;;  %2053 = vmatprep.subr.bf16.mxu1 %v3516_v31  ;;  %2135 = vmatprep.subr.bf16.mxu0 %v3519_v32  ;;  %v3522_v35 = vld [vmem:[%s5031_s1 + $0x63c] ss:$24 sps:$4 sm:$0xff]   ;;  %v3520_v37 = vld [vmem:[%s5031_s1 + $0x638] ss:$24 sps:$4 sm:$0xff]  }
  0xc2   :  { %v3525_v36 = vld [vmem:[%s5031_s1 + $0x344] ss:$24 sps:$4 sm:$0xff]   ;;  %2045 = vmatmul.mubr.bf16.vlgmr.msra.gmra.mrb[4].mxu1 %v3976_v19  ;;  %v3523_v62 = vld [vmem:[%s5031_s1 + $0x340] ss:$24 sps:$4 sm:$0xff]   ;;  %v3529_v40 = vld [vmem:[%s5031_s1 + $0x370] ss:$24 sps:$4 sm:$0xff]  }
  0xc3   :  { %2127 = vmatmul.mubr.bf16.vlgmr.msra.gmra.mrb[4].mxu0 %v3960_v13  ;;  %2054 = vmatpush1.bf16.msra.mxu1 %v3514_v33  ;;  %v3528_v38 = vld [vmem:[%s5031_s1 + $0x66c] ss:$24 sps:$4 sm:$0xff]   ;;  %v3526_v39 = vld [vmem:[%s5031_s1 + $0x668] ss:$24 sps:$4 sm:$0xff]   ;;  %v3534_v41 = vld [vmem:[%s5031_s1 + $0x69c] ss:$24 sps:$4 sm:$0xff]  }
  0xc4   :  { %2136 = vmatpush1.bf16.msra.mxu0 %v3517_v34  ;;  %2055 = vmatprep.subr.bf16.mxu1 %v3522_v35  ;;  %v3531_v13 = vld [vmem:[%s5031_s1 + $0x374] ss:$24 sps:$4 sm:$0xff]   ;;  %v3532_v43 = vld [vmem:[%s5031_s1 + $0x698] ss:$24 sps:$4 sm:$0xff]   ;;  %v3538_v47 = vld [vmem:[%s5031_s1 + $0x6c8] ss:$24 sps:$4 sm:$0xff]  }
  0xc5   :  { %2137 = vmatprep.subr.bf16.mxu0 %v3525_v36  ;;  %2085 = vmatprep.mubr.bf16.mxu1 %v3988_v23  ;;  %v3535_v44 = vld [vmem:[%s5031_s1 + $0x3a0] ss:$24 sps:$4 sm:$0xff]   ;;  %v3540_v45 = vld [vmem:[%s5031_s1 + $0x6cc] ss:$24 sps:$4 sm:$0xff]   ;;  %v3541_v48 = vld [vmem:[%s5031_s1 + $0x3d0] ss:$24 sps:$4 sm:$0xff]  }
  0xc6   :  { %2167 = vmatprep.mubr.bf16.mxu0 %v3928_v3  ;;  %v3537_v3 = vld [vmem:[%s5031_s1 + $0x3a4] ss:$24 sps:$4 sm:$0xff]   ;;  %v3543_v46 = vld [vmem:[%s5031_s1 + $0x3d4] ss:$24 sps:$4 sm:$0xff]   ;;  %v3544_v51 = vld [vmem:[%s5031_s1 + $0x6f8] ss:$24 sps:$4 sm:$0xff]  }
  0xc7   :  { %2056 = vmatpush1.bf16.msra.mxu1 %v3520_v37  ;;  %v3546_v49 = vld [vmem:[%s5031_s1 + $0x6fc] ss:$24 sps:$4 sm:$0xff]   ;;  %v3547_v52 = vld [vmem:[%s5031_s1 + $0x400] ss:$24 sps:$4 sm:$0xff]   ;;  %v3552_v53 = vld [vmem:[%s5031_s1 + $0x72c] ss:$24 sps:$4 sm:$0xff]  }
  0xc8   :  { %2138 = vmatpush1.bf16.msra.mxu0 %v3523_v62  ;;  %2057 = vmatprep.subr.bf16.mxu1 %v3528_v38  ;;  %v3549_v50 = vld [vmem:[%s5031_s1 + $0x404] ss:$24 sps:$4 sm:$0xff]   ;;  %v3555_v54 = vld [vmem:[%s5031_s1 + $0x434] ss:$24 sps:$4 sm:$0xff]   ;;  %v3550_v55 = vld [vmem:[%s5031_s1 + $0x728] ss:$24 sps:$4 sm:$0xff]  }
  0xc9   :  { %2139 = vmatprep.subr.bf16.mxu0 %v3531_v13  ;;  %v3553_v56 = vld [vmem:[%s5031_s1 + $0x430] ss:$24 sps:$4 sm:$0xff]   ;;  %v3558_v57 = vld [vmem:[%s5031_s1 + $0x75c] ss:$24 sps:$4 sm:$0xff]   ;;  %v3559_v60 = vld [vmem:[%s5031_s1 + $0x460] ss:$24 sps:$4 sm:$0xff]  }
  0xca   :  { %v3561_v58 = vld [vmem:[%s5031_s1 + $0x464] ss:$24 sps:$4 sm:$0xff]   ;;  %v3556_v59 = vld [vmem:[%s5031_s1 + $0x758] ss:$24 sps:$4 sm:$0xff]   ;;  %v3567_v0 = vld [vmem:[%s5031_s1 + $0x494] ss:$24 sps:$4 sm:$0xff]  }
  0xcb   :  { %2058 = vmatpush1.bf16.msra.mxu1 %v3526_v39  ;;  %v3564_v61 = vld [vmem:[%s5031_s1 + $0x78c] ss:$24 sps:$4 sm:$0xff]   ;;  %v3562_v1 = vld [vmem:[%s5031_s1 + $0x788] ss:$24 sps:$4 sm:$0xff]   ;;  %v3570_v4 = vld [vmem:[%s5031_s1 + $0x7bc] ss:$24 sps:$4 sm:$0xff]  }
  0xcc   :  { %2140 = vmatpush1.bf16.msra.mxu0 %v3529_v40  ;;  %2059 = vmatprep.subr.bf16.mxu1 %v3534_v41  ;;  %v3565_v2 = vld [vmem:[%s5031_s1 + $0x490] ss:$24 sps:$4 sm:$0xff]   ;;  %v3573_v5 = vld [vmem:[%s5031_s1 + $0x4c4] ss:$24 sps:$4 sm:$0xff]   ;;  %v3571_v7 = vld [vmem:[%s5031_s1 + $0x4c0] ss:$24 sps:$4 sm:$0xff]  }
  0xcd   :  { %2141 = vmatprep.subr.bf16.mxu0 %v3537_v3  ;;  %v3568_v6 = vld [vmem:[%s5031_s1 + $0x7b8] ss:$24 sps:$4 sm:$0xff]   ;;  %v3576_v8 = vld [vmem:[%s5031_s1 + $0x7ec] ss:$24 sps:$4 sm:$0xff]   ;;  %v3574_v10 = vld [vmem:[%s5031_s1 + $0x7e8] ss:$24 sps:$4 sm:$0xff]  }
  0xce   :  { %v3579_v9 = vld [vmem:[%s5031_s1 + $0x4f4] ss:$24 sps:$4 sm:$0xff]   ;;  %v3577_v11 = vld [vmem:[%s5031_s1 + $0x4f0] ss:$24 sps:$4 sm:$0xff]   ;;  %v3585_v14 = vld [vmem:[%s5031_s1 + $0x524] ss:$24 sps:$4 sm:$0xff]  }
  0xcf   :  { %2060 = vmatpush1.bf16.msra.mxu1 %v3532_v43  ;;  %v3582_v12 = vld [vmem:[%s5031_s1 + $0x81c] ss:$24 sps:$4 sm:$0xff]   ;;  %v3580_v15 = vld [vmem:[%s5031_s1 + $0x818] ss:$24 sps:$4 sm:$0xff]   ;;  %v3588_v17 = vld [vmem:[%s5031_s1 + $0x84c] ss:$24 sps:$4 sm:$0xff]  }
  0xd0   :  { %2142 = vmatpush1.bf16.msra.mxu0 %v3535_v44  ;;  %2061 = vmatprep.subr.bf16.mxu1 %v3540_v45  ;;  %v3583_v16 = vld [vmem:[%s5031_s1 + $0x520] ss:$24 sps:$4 sm:$0xff]   ;;  %v3591_v18 = vld [vmem:[%s5031_s1 + $0x554] ss:$24 sps:$4 sm:$0xff]   ;;  %v3589_v21 = vld [vmem:[%s5031_s1 + $0x550] ss:$24 sps:$4 sm:$0xff]  }
  0xd1   :  { %2143 = vmatprep.subr.bf16.mxu0 %v3543_v46  ;;  %v3586_v20 = vld [vmem:[%s5031_s1 + $0x848] ss:$24 sps:$4 sm:$0xff]   ;;  %v3594_v22 = vld [vmem:[%s5031_s1 + $0x87c] ss:$24 sps:$4 sm:$0xff]   ;;  %v3592_v25 = vld [vmem:[%s5031_s1 + $0x878] ss:$24 sps:$4 sm:$0xff]  }
  0xd2   :  { %v3597_v24 = vld [vmem:[%s5031_s1 + $0x584] ss:$24 sps:$4 sm:$0xff]   ;;  %v3595_v26 = vld [vmem:[%s5031_s1 + $0x580] ss:$24 sps:$4 sm:$0xff]   ;;  %v3603_v28 = vld [vmem:[%s5031_s1 + $0x5b4] ss:$24 sps:$4 sm:$0xff]  }
  0xd3   :  { %2062 = vmatpush1.bf16.msra.mxu1 %v3538_v47  ;;  %v3600_v27 = vld [vmem:[%s5031_s1 + $0x8ac] ss:$24 sps:$4 sm:$0xff]   ;;  %v3598_v29 = vld [vmem:[%s5031_s1 + $0x8a8] ss:$24 sps:$4 sm:$0xff]   ;;  %v3606_v31 = vld [vmem:[%s5031_s1 + $0x8dc] ss:$24 sps:$4 sm:$0xff]  }
  0xd4   :  { %2144 = vmatpush1.bf16.msra.mxu0 %v3541_v48  ;;  %2063 = vmatprep.subr.bf16.mxu1 %v3546_v49  ;;  %v3601_v30 = vld [vmem:[%s5031_s1 + $0x5b0] ss:$24 sps:$4 sm:$0xff]   ;;  %v3609_v32 = vld [vmem:[%s5031_s1 + $0x5e4] ss:$24 sps:$4 sm:$0xff]   ;;  %v3607_v36 = vld [vmem:[%s5031_s1 + $0x5e0] ss:$24 sps:$4 sm:$0xff]  }
  0xd5   :  { %2145 = vmatprep.subr.bf16.mxu0 %v3549_v50  ;;  %v2393_v33 = vld [vmem:[%s5037_s7 + $0x80] sm:$0xff]  ;;  %v2394_v34 = vld [vmem:[%s5037_s7 + $0x88] sm:$0xff]  ;;  %v3604_v35 = vld [vmem:[%s5031_s1 + $0x8d8] ss:$24 sps:$4 sm:$0xff]   ;;  %s3697_s16 = smov [#allocation2]  }
  0xd6   :  { %v3612_v37 = vld [vmem:[%s5031_s1 + $0x614] ss:$24 sps:$4 sm:$0xff]   ;;  %v3099_v62 = vpack.c.bf16 %v2394_v34, %v2393_v33  ;;  %v2377_v38 = vld [vmem:[%s5037_s7] sm:$0xff]  ;;  %v2396_v40 = vld [vmem:[%s5037_s7 + $0x98] sm:$0xff]  ;;  %s2697_s17 = sshll.u32 %s3697_s16, 4  ;;  %s2698_s17 = int_to_ptr.vmem [resolvable:$true] %s2697_s17 }
  0xd7   :  { %2064 = vmatpush1.bf16.msra.mxu1 %v3544_v51  ;;  %v2378_v13 = vld [vmem:[%s5037_s7 + $0x8] sm:$0xff]  ;;  %v2395_v39 = vld [vmem:[%s5037_s7 + $0x90] sm:$0xff]  ;;  %v3615_v3 = vld [vmem:[%s5031_s1 + $0x644] ss:$24 sps:$4 sm:$0xff]   ;;  %s3672_s18 = scalar_lea.vmem %s2698_s17, 32  ;;  %p3677_p1 = scmp.lt.s32.totalorder %s2698_s17, %s2698_s17 }
  0xd8   :  { %2146 = vmatpush1.bf16.msra.mxu0 %v3547_v52  ;;  %2065 = vmatprep.subr.bf16.mxu1 %v3552_v53  ;;  %v3610_v41 = vld [vmem:[%s5031_s1 + $0x610] ss:$24 sps:$4 sm:$0xff]   ;;  %v3101_v43 = vpack.c.bf16 %v2378_v13, %v2377_v38  ;;  %v3103_v44 = vpack.c.bf16 %v2396_v40, %v2395_v39  ;;  %v2380_v46 = vld [vmem:[%s5037_s7 + $0x18] sm:$0xff]  ;;  %v2397_v47 = vld [vmem:[%s5037_s7 + $0xa0] sm:$0xff]  ;;  %p3673_p0 = scmp.ne.s32.totalorder %s2698_s17, %s3672_s18  ;;  %p3678_p2 = scmp.lt.s32.totalorder %s3672_s18, %s3672_s18 }
  0xd9   :  { %2147 = vmatprep.subr.bf16.mxu0 %v3555_v54  ;;  %v2379_v45 = vld [vmem:[%s5037_s7 + $0x10] sm:$0xff]  ;;  %v2398_v48 = vld [vmem:[%s5037_s7 + $0xa8] sm:$0xff]  ;;  %v3613_v49 = vld [vmem:[%s5031_s1 + $0x640] ss:$24 sps:$4 sm:$0xff]  }
  0xda   :  { %v3105_v50 = vpack.c.bf16 %v2380_v46, %v2379_v45  ;;  %v3107_v51 = vpack.c.bf16 %v2398_v48, %v2397_v47  ;;  %v2381_v52 = vld [vmem:[%s5037_s7 + $0x20] sm:$0xff]  ;;  %v2382_v53 = vld [vmem:[%s5037_s7 + $0x28] sm:$0xff]  ;;  %v2400_v54 = vld [vmem:[%s5037_s7 + $0xb8] sm:$0xff]  ;;  %p3679_p3 = por %p3678_p2, %p3677_p1 }
  0xdb   :  { %2066 = vmatpush1.bf16.msra.mxu1 %v3550_v55  ;;  %v3616_v55 = vld [vmem:[%s5031_s1 + $0x670] ss:$24 sps:$4 sm:$0xff]   ;;  %v3633_v33 = vld [vmem:[%s5031_s1 + $0x764] ss:$24 sps:$4 sm:$0xff]   ;;  %v3631_v39 = vld [vmem:[%s5031_s1 + $0x760] ss:$24 sps:$4 sm:$0xff]  }
  0xdc   :  { %2148 = vmatpush1.bf16.msra.mxu0 %v3553_v56  ;;  %2067 = vmatprep.subr.bf16.mxu1 %v3558_v57  ;;  %v3621_v56 = vld [vmem:[%s5031_s1 + $0x6a4] ss:$24 sps:$4 sm:$0xff]   ;;  %v3109_v57 = vpack.c.bf16 %v2382_v53, %v2381_v52  ;;  %v2426_v13 = vld [vmem:[%s5037_s7 + $0x188] sm:$0xff]  ;;  %v3637_v45 = vld [vmem:[%s5031_s1 + $0x7c0] ss:$24 sps:$4 sm:$0xff]   ;;  %p3680_p4 = pnand %p3679_p3, %p3673_p0 }
  0xdd   :  { %2149 = vmatprep.subr.bf16.mxu0 %v3561_v58  ;;  %v2425_v38 = vld [vmem:[%s5037_s7 + $0x180] sm:$0xff]  ;;  %v3636_v40 = vld [vmem:[%s5031_s1 + $0x794] ss:$24 sps:$4 sm:$0xff]   ;;  %v3640_v47 = vld [vmem:[%s5031_s1 + $0x7f0] ss:$24 sps:$4 sm:$0xff]  }
  0xde   :  { %v3642_v46 = vld [vmem:[%s5031_s1 + $0x7f4] ss:$24 sps:$4 sm:$0xff]   ;;  %v3645_v48 = vld [vmem:[%s5031_s1 + $0x824] ss:$24 sps:$4 sm:$0xff]   ;;  %v3649_v52 = vld [vmem:[%s5031_s1 + $0x880] ss:$24 sps:$4 sm:$0xff]  }
  0xdf   :  { %2068 = vmatpush1.bf16.msra.mxu1 %v3556_v59  ;;  %v2383_v59 = vld [vmem:[%s5037_s7 + $0x30] sm:$0xff] }
  0xe0   :  { %2150 = vmatpush1.bf16.msra.mxu0 %v3559_v60  ;;  %2069 = vmatprep.subr.bf16.mxu1 %v3564_v61  ;;  %v2384_v60 = vld [vmem:[%s5037_s7 + $0x38] sm:$0xff]  ;;  %v2401_v61 = vld [vmem:[%s5037_s7 + $0xc0] sm:$0xff]  ;;  %v3654_v53 = vld [vmem:[%s5031_s1 + $0x8b4] ss:$24 sps:$4 sm:$0xff]  }
  0xe1   :  { %2151 = vmatprep.subr.bf16.mxu0 %v3567_v0  ;;  %v2402_v0 = vld [vmem:[%s5037_s7 + $0xc8] sm:$0xff] }
  0xe3   :  { %2070 = vmatpush1.bf16.msra.mxu1 %v3562_v1  ;;  %v3619_v1 = vld [vmem:[%s5031_s1 + $0x6a0] ss:$24 sps:$4 sm:$0xff]  }
  0xe4   :  { %2152 = vmatpush1.bf16.msra.mxu0 %v3565_v2  ;;  %2071 = vmatprep.subr.bf16.mxu1 %v3570_v4  ;;  %v3624_v2 = vld [vmem:[%s5031_s1 + $0x6d4] ss:$24 sps:$4 sm:$0xff]   ;;  %v3113_v4 = vpack.c.bf16 %v2384_v60, %v2383_v59  ;;  %v2261_v59 = vld [vmem:[%s5036_s6] sm:$0x3f] }
  0xe5   :  { %2153 = vmatprep.subr.bf16.mxu0 %v3573_v5  ;;  %v3115_v5 = vpack.c.bf16 %v2402_v0, %v2401_v61  ;;  %v2262_v61 = vadd.f32 1e-05, %v2261_v59 }
  0xe7   :  { %2072 = vmatpush1.bf16.msra.mxu1 %v3568_v6  ;;  %v2385_v6 = vld [vmem:[%s5037_s7 + $0x40] sm:$0xff]  ;;  %3658 = vrsqrt.f32 %v2262_v61  ;;  %v2419_v61 = vld [vmem:[%s5037_s7 + $0x150] sm:$0xff] }
  0xe8   :  { %2154 = vmatpush1.bf16.msra.mxu0 %v3571_v7  ;;  %2073 = vmatprep.subr.bf16.mxu1 %v3576_v8  ;;  %v2386_v7 = vld [vmem:[%s5037_s7 + $0x48] sm:$0xff]  ;;  %v2403_v8 = vld [vmem:[%s5037_s7 + $0xd0] sm:$0xff] }
  0xe9   :  { %2155 = vmatprep.subr.bf16.mxu0 %v3579_v9  ;;  %v2404_v9 = vld [vmem:[%s5037_s7 + $0xd8] sm:$0xff] }
  0xeb   :  { %2074 = vmatpush1.bf16.msra.mxu1 %v3574_v10  ;;  %v3622_v10 = vld [vmem:[%s5031_s1 + $0x6d0] ss:$24 sps:$4 sm:$0xff]  }
  0xec   :  { %2156 = vmatpush1.bf16.msra.mxu0 %v3577_v11  ;;  %2075 = vmatprep.subr.bf16.mxu1 %v3582_v12  ;;  %v3627_v11 = vld [vmem:[%s5031_s1 + $0x704] ss:$24 sps:$4 sm:$0xff]   ;;  %v3117_v12 = vpack.c.bf16 %v2386_v7, %v2385_v6 }
  0xed   :  { %2157 = vmatprep.subr.bf16.mxu0 %v3585_v14  ;;  %v3119_v14 = vpack.c.bf16 %v2404_v9, %v2403_v8  ;;  %v4783_v9 = vld [vmem:[%s5035_s5] sm:$0x3f] }
  0xef   :  { %2076 = vmatpush1.bf16.msra.mxu1 %v3580_v15  ;;  %v2387_v15 = vld [vmem:[%s5037_s7 + $0x50] sm:$0xff] }
  0xf0   :  { %2158 = vmatpush1.bf16.msra.mxu0 %v3583_v16  ;;  %2077 = vmatprep.subr.bf16.mxu1 %v3588_v17  ;;  %v2388_v16 = vld [vmem:[%s5037_s7 + $0x58] sm:$0xff]  ;;  %v2405_v17 = vld [vmem:[%s5037_s7 + $0xe0] sm:$0xff] }
  0xf1   :  { %2159 = vmatprep.subr.bf16.mxu0 %v3591_v18  ;;  %v2406_v18 = vld [vmem:[%s5037_s7 + $0xe8] sm:$0xff] }
  0xf3   :  { %2078 = vmatpush1.bf16.msra.mxu1 %v3586_v20  ;;  %v3625_v20 = vld [vmem:[%s5031_s1 + $0x700] ss:$24 sps:$4 sm:$0xff]  }
  0xf4   :  { %2160 = vmatpush1.bf16.msra.mxu0 %v3589_v21  ;;  %2079 = vmatprep.subr.bf16.mxu1 %v3594_v22  ;;  %v3630_v21 = vld [vmem:[%s5031_s1 + $0x734] ss:$24 sps:$4 sm:$0xff]   ;;  %v3121_v22 = vpack.c.bf16 %v2388_v16, %v2387_v15 }
  0xf5   :  { %2161 = vmatprep.subr.bf16.mxu0 %v3597_v24 }
  0xf7   :  { %2080 = vmatpush1.bf16.msra.mxu1 %v3592_v25  ;;  %v3123_v25 = vpack.c.bf16 %v2406_v18, %v2405_v17 }
  0xf8   :  { %2162 = vmatpush1.bf16.msra.mxu0 %v3595_v26  ;;  %2081 = vmatprep.subr.bf16.mxu1 %v3600_v27  ;;  %v2389_v26 = vld [vmem:[%s5037_s7 + $0x60] sm:$0xff]  ;;  %v2390_v27 = vld [vmem:[%s5037_s7 + $0x68] sm:$0xff] }
  0xf9   :  { %2163 = vmatprep.subr.bf16.mxu0 %v3603_v28 }
  0xfb   :  { %2082 = vmatpush1.bf16.msra.mxu1 %v3598_v29  ;;  %v2407_v29 = vld [vmem:[%s5037_s7 + $0xf0] sm:$0xff] }
  0xfc   :  { %2164 = vmatpush1.bf16.msra.mxu0 %v3601_v30  ;;  %2083 = vmatprep.subr.bf16.mxu1 %v3606_v31  ;;  %v2408_v30 = vld [vmem:[%s5037_s7 + $0xf8] sm:$0xff]  ;;  %v3628_v31 = vld [vmem:[%s5031_s1 + $0x730] ss:$24 sps:$4 sm:$0xff]  }
  0xfd   :  { %2165 = vmatprep.subr.bf16.mxu0 %v3609_v32 }
  0xff   :  { %2084 = vmatpush1.bf16.msra.mxu1 %v3604_v35  ;;  %v3125_v35 = vpack.c.bf16 %v2390_v27, %v2389_v26 }
 0x100   :  { %2166 = vmatpush1.bf16.msra.mxu0 %v3607_v36  ;;  %3100 = vmatprep.subr.bf16.mxu1 %v3099_v62  ;;  %v3127_v36 = vpack.c.bf16 %v2408_v30, %v2407_v29  ;;  %v2392_v62 = vld [vmem:[%s5037_s7 + $0x78] sm:$0xff] }
 0x101   :  { %2176 = vmatprep.subr.bf16.mxu0 %v3612_v37  ;;  %v2391_v37 = vld [vmem:[%s5037_s7 + $0x70] sm:$0xff] }
 0x102   :  { %2086 = vmatmul.mubr.bf16.vlgmr.msra.gmra.mrb[4].mxu1 %v3915_v63 }
 0x103   :  { %2168 = vmatmul.mubr.bf16.vlgmr.msra.gmra.mrb[4].mxu0 %v3976_v19  ;;  %v3618_v19 = vld [vmem:[%s5031_s1 + $0x674] ss:$24 sps:$4 sm:$0xff]   ;;  %3102 = vmatpush3.bf16.msra.mxu1 %v3101_v43  ;;  %v3634_v43 = vld [vmem:[%s5031_s1 + $0x790] ss:$24 sps:$4 sm:$0xff]  }
 0x104   :  { %2177 = vmatpush1.bf16.msra.mxu0 %v3610_v41  ;;  %2208 = vmatprep.mubr.bf16.mxu0 %v3988_v23  ;;  %v2399_v23 = vld [vmem:[%s5037_s7 + $0xb0] sm:$0xff]  ;;  %v3129_v41 = vpack.c.bf16 %v2392_v62, %v2391_v37 }
 0x105   :  { %2178 = vmatprep.subr.bf16.mxu0 %v3615_v3  ;;  %3104 = vmatprep.subr.bf16.mxu1 %v3103_v44  ;;  %v3111_v58 = vpack.c.bf16 %v2400_v54, %v2399_v23  ;;  %v3131_v3 = vpack.c.bf16 %v2426_v13, %v2425_v38  ;;  %v3639_v44 = vld [vmem:[%s5031_s1 + $0x7c4] ss:$24 sps:$4 sm:$0xff]   ;;  %v3652_v23 = vld [vmem:[%s5031_s1 + $0x8b0] ss:$24 sps:$4 sm:$0xff]  }
 0x106   :  { %v3657_v54 = vld [vmem:[%s5031_s1 + $0x8e4] ss:$24 sps:$4 sm:$0xff]   ;;  %v2411_v13 = vld [vmem:[%s5037_s7 + $0x110] sm:$0xff] }
 0x107   :  { %3106 = vmatpush3.bf16.msra.mxu1 %v3105_v50  ;;  %v3646_v50 = vld [vmem:[%s5031_s1 + $0x850] ss:$24 sps:$4 sm:$0xff]  }
 0x108   :  { %2179 = vmatpush1.bf16.msra.mxu0 %v3613_v49  ;;  %3108 = vmatprep.subr.bf16.mxu1 %v3107_v51  ;;  %v3643_v49 = vld [vmem:[%s5031_s1 + $0x820] ss:$24 sps:$4 sm:$0xff]   ;;  %v3651_v51 = vld [vmem:[%s5031_s1 + $0x884] ss:$24 sps:$4 sm:$0xff]  }
 0x109   :  { %2180 = vmatprep.subr.bf16.mxu0 %v3618_v19  ;;  %v3648_v19 = vld [vmem:[%s5031_s1 + $0x854] ss:$24 sps:$4 sm:$0xff]  }
 0x10b   :  { %3110 = vmatpush3.bf16.msra.mxu1 %v3109_v57  ;;  %v4770_v57 = vld [vmem:[%s5032_s2] sm:$0x3f] }
 0x10c   :  { %2181 = vmatpush1.bf16.msra.mxu0 %v3616_v55  ;;  %3112 = vmatprep.subr.bf16.mxu1 %v3111_v58  ;;  %v3655_v55 = vld [vmem:[%s5031_s1 + $0x8e0] ss:$24 sps:$4 sm:$0xff]   ;;  %v330_v58 = vsub.s32 1, %v3865_v42 }
 0x10d   :  { %2182 = vmatprep.subr.bf16.mxu0 %v3621_v56  ;;  %v326_v56 = vsub.s32 0, %v3865_v42 }
 0x10e   :  { %v331_v0 = vrot.slane %v4770_v57, %v330_v58 }
 0x10f   :  { %3114 = vmatpush3.bf16.msra.mxu1 %v3113_v4  ;;  %v327_v60 = vrot.slane %v4770_v57, %v326_v56 }
 0x110   :  { %2183 = vmatpush1.bf16.msra.mxu0 %v3619_v1  ;;  %3116 = vmatprep.subr.bf16.mxu1 %v3115_v5 }
 0x111   :  { %2184 = vmatprep.subr.bf16.mxu0 %v3624_v2 }
 0x113   :  { %3118 = vmatpush3.bf16.msra.mxu1 %v3117_v12  ;;  %v2232_v12 = vrot.slane %v4783_v9, %v330_v58 }
 0x114   :  { %2185 = vmatpush1.bf16.msra.mxu0 %v3622_v10  ;;  %3120 = vmatprep.subr.bf16.mxu1 %v3119_v14  ;;  %v4785_v10 = vpop.eup %3658  ;;  %v4792_v14 = vld [vmem:[%s5033_s3] sm:$0x3f] }
 0x115   :  { %2186 = vmatprep.subr.bf16.mxu0 %v3627_v11  ;;  %v4680_v24 = vpop.f32.mrb[0].mxu1  ;;  %v2228_v11 = vrot.slane %v4783_v9, %v326_v56  ;;  %v2268_v15 = vrot.slane %v4785_v10, %v326_v56  ;;  %v2272_v17 = vrot.slane %v4785_v10, %v330_v58 }
 0x116   :  { %v4688_v28 = vpop.f32.mrb[1].mxu1 }
 0x117   :  { %v1886_v32 = vpop.f32.mrb[2].mxu1  ;;  %3122 = vmatpush3.bf16.msra.mxu1 %v3121_v22  ;;  %v1885_v1 = vadd.f32 %v4688_v28, %v331_v0  ;;  %v2306_v22 = vrot.slane %v4792_v14, %v326_v56  ;;  %v2420_v0 = vld [vmem:[%s5037_s7 + $0x158] sm:$0xff] }
 0x118   :  { %2187 = vmatpush1.bf16.msra.mxu0 %v3625_v20  ;;  %v1887_v34 = vpop.f32.mrb[3].mxu1  ;;  %3124 = vmatprep.subr.bf16.mxu1 %v3123_v25  ;;  %v2310_v25 = vrot.slane %v4792_v14, %v330_v58  ;;  %v2410_v32 = vld [vmem:[%s5037_s7 + $0x108] sm:$0xff] }
 0x119   :  { %2188 = vmatprep.subr.bf16.mxu0 %v3630_v21  ;;  %v4799_v21 = vld [vmem:[%s5034_s4] sm:$0x3f]  ;;  %v2427_v34 = vld [vmem:[%s5037_s7 + $0x190] sm:$0xff] }
 0x11a   :  { %v2348_v28 = vrot.slane %v4799_v21, %v330_v58  ;;  %v2344_v30 = vrot.slane %v4799_v21, %v326_v56  ;;  %v2435_v56 = vld [vmem:[%s5037_s7 + $0x1d0] sm:$0xff]  ;;  %v2436_v58 = vld [vmem:[%s5037_s7 + $0x1d8] sm:$0xff] }
 0x11b   :  { %3126 = vmatpush3.bf16.msra.mxu1 %v3125_v35  ;;  %v2428_v35 = vld [vmem:[%s5037_s7 + $0x198] sm:$0xff] }
 0x11c   :  { %2189 = vmatpush1.bf16.msra.mxu0 %v3628_v31  ;;  %3128 = vmatprep.subr.bf16.mxu1 %v3127_v36  ;;  %v2409_v31 = vld [vmem:[%s5037_s7 + $0x100] sm:$0xff]  ;;  %v3135_v38 = vpack.c.bf16 %v2428_v35, %v2427_v34 }
 0x11d   :  { %2190 = vmatprep.subr.bf16.mxu0 %v3633_v33  ;;  %v3133_v37 = vpack.c.bf16 %v2410_v32, %v2409_v31 }
 0x11f   :  { %3130 = vmatpush3.bf16.msra.mxu1 %v3129_v41  ;;  %v2430_v41 = vld [vmem:[%s5037_s7 + $0x1a8] sm:$0xff] }
 0x120   :  { %2191 = vmatpush1.bf16.msra.mxu0 %v3631_v39  ;;  %3132 = vmatprep.subr.bf16.mxu1 %v3131_v3  ;;  %v2412_v39 = vld [vmem:[%s5037_s7 + $0x118] sm:$0xff] }
 0x121   :  { %2192 = vmatprep.subr.bf16.mxu0 %v3636_v40  ;;  %v2429_v40 = vld [vmem:[%s5037_s7 + $0x1a0] sm:$0xff]  ;;  %v3137_v3 = vpack.c.bf16 %v2412_v39, %v2411_v13 }
 0x124   :  { %2193 = vmatpush1.bf16.msra.mxu0 %v3634_v43  ;;  %v3139_v43 = vpack.c.bf16 %v2430_v41, %v2429_v40 }
 0x125   :  { %2194 = vmatprep.subr.bf16.mxu0 %v3639_v44  ;;  %v2413_v44 = vld [vmem:[%s5037_s7 + $0x120] sm:$0xff] }
 0x128   :  { %2195 = vmatpush1.bf16.msra.mxu0 %v3637_v45  ;;  %v2414_v45 = vld [vmem:[%s5037_s7 + $0x128] sm:$0xff] }
 0x129   :  { %2196 = vmatprep.subr.bf16.mxu0 %v3642_v46  ;;  %v2431_v46 = vld [vmem:[%s5037_s7 + $0x1b0] sm:$0xff] }
 0x12c   :  { %2197 = vmatpush1.bf16.msra.mxu0 %v3640_v47  ;;  %v2432_v47 = vld [vmem:[%s5037_s7 + $0x1b8] sm:$0xff] }
 0x12d   :  { %2198 = vmatprep.subr.bf16.mxu0 %v3645_v48  ;;  %v3141_v48 = vpack.c.bf16 %v2414_v45, %v2413_v44 }
 0x130   :  { %2199 = vmatpush1.bf16.msra.mxu0 %v3643_v49  ;;  %v3143_v49 = vpack.c.bf16 %v2432_v47, %v2431_v46  ;;  %v2441_v47 = vld [vmem:[%s5037_s7 + $0x200] sm:$0xff] }
 0x131   :  { %2200 = vmatprep.subr.bf16.mxu0 %v3648_v19  ;;  %v2415_v19 = vld [vmem:[%s5037_s7 + $0x130] sm:$0xff] }
 0x134   :  { %2201 = vmatpush1.bf16.msra.mxu0 %v3646_v50  ;;  %v2416_v50 = vld [vmem:[%s5037_s7 + $0x138] sm:$0xff] }
 0x135   :  { %2202 = vmatprep.subr.bf16.mxu0 %v3651_v51  ;;  %v2433_v51 = vld [vmem:[%s5037_s7 + $0x1c0] sm:$0xff] }
 0x138   :  { %2203 = vmatpush1.bf16.msra.mxu0 %v3649_v52  ;;  %v2434_v52 = vld [vmem:[%s5037_s7 + $0x1c8] sm:$0xff] }
 0x139   :  { %2204 = vmatprep.subr.bf16.mxu0 %v3654_v53  ;;  %v3145_v53 = vpack.c.bf16 %v2416_v50, %v2415_v19  ;;  %v2459_v19 = vld [vmem:[%s5037_s7 + $0x290] sm:$0xff]  ;;  %v2460_v50 = vld [vmem:[%s5037_s7 + $0x298] sm:$0xff] }
 0x13c   :  { %2205 = vmatpush1.bf16.msra.mxu0 %v3652_v23  ;;  %v3147_v23 = vpack.c.bf16 %v2434_v52, %v2433_v51 }
 0x13d   :  { %2206 = vmatprep.subr.bf16.mxu0 %v3657_v54  ;;  %v2417_v54 = vld [vmem:[%s5037_s7 + $0x140] sm:$0xff] }
 0x140   :  { %2207 = vmatpush1.bf16.msra.mxu0 %v3655_v55  ;;  %v2418_v55 = vld [vmem:[%s5037_s7 + $0x148] sm:$0xff] }
 0x141   :  { %v3149_v59 = vpack.c.bf16 %v2418_v55, %v2417_v54  ;;  %v2443_v54 = vld [vmem:[%s5037_s7 + $0x210] sm:$0xff]  ;;  %v2444_v55 = vld [vmem:[%s5037_s7 + $0x218] sm:$0xff] }
 0x143   :  { %2209 = vmatmul.mubr.bf16.vlgmr.msra.gmra.mrb[4].mxu0 %v3915_v63  ;;  %v1883_v63 = vadd.f32 %v4680_v24, %v327_v60  ;;  %v3151_v60 = vpack.c.bf16 %v2436_v58, %v2435_v56  ;;  %v2461_v56 = vld [vmem:[%s5037_s7 + $0x2a0] sm:$0xff]  ;;  %v2462_v58 = vld [vmem:[%s5037_s7 + $0x2a8] sm:$0xff] }
 0x156   :  { %v1964_v2 = vpop.f32.mrb[0].mxu0 }
 0x157   :  { %v3196_v4 = vadd.f32 %v1964_v2, %v1883_v63  ;;  %v1966_v5 = vpop.f32.mrb[1].mxu0  ;;  %v2437_v63 = vld [vmem:[%s5037_s7 + $0x1e0] sm:$0xff]  ;;  %v3153_v2 = vpack.c.bf16 %v2420_v0, %v2419_v61  ;;  %v2446_v0 = vld [vmem:[%s5037_s7 + $0x228] sm:$0xff] }
 0x158   :  { %v3198_v6 = vadd.f32 %v1966_v5, %v1885_v1  ;;  %v1968_v7 = vpop.f32.mrb[2].mxu0  ;;  %v2438_v1 = vld [vmem:[%s5037_s7 + $0x1e8] sm:$0xff]  ;;  %v2421_v5 = vld [vmem:[%s5037_s7 + $0x160] sm:$0xff] }
 0x159   :  { %3660 = vtanh.f32 %v3196_v4  ;;  %v1969_v8 = vpop.f32.mrb[3].mxu0  ;;  %v3155_v4 = vpack.c.bf16 %v2438_v1, %v2437_v63  ;;  %v2439_v7 = vld [vmem:[%s5037_s7 + $0x1f0] sm:$0xff]  ;;  %v2445_v61 = vld [vmem:[%s5037_s7 + $0x220] sm:$0xff]  ;;  %v2464_v1 = vld [vmem:[%s5037_s7 + $0x2b8] sm:$0xff] }
 0x15a   :  { %3662 = vtanh.f32 %v3198_v6  ;;  %v2422_v6 = vld [vmem:[%s5037_s7 + $0x168] sm:$0xff]  ;;  %v2440_v8 = vld [vmem:[%s5037_s7 + $0x1f8] sm:$0xff]  ;;  %v2463_v63 = vld [vmem:[%s5037_s7 + $0x2b0] sm:$0xff] }
 0x163   :  { %v3661_v16 = vpop.eup %3660 }
 0x164   :  { %v3663_v18 = vpop.eup %3662  ;;  %v2255_v20 = vsub.f32 %v3661_v16, %v2228_v11  ;;  %v3157_v11 = vpack.c.bf16 %v2422_v6, %v2421_v5  ;;  %v2424_v16 = vld [vmem:[%s5037_s7 + $0x178] sm:$0xff]  ;;  %v2447_v5 = vld [vmem:[%s5037_s7 + $0x230] sm:$0xff] }
 0x165   :  { %v2256_v24 = vsub.f32 %v3663_v18, %v2232_v12  ;;  %v3159_v12 = vpack.c.bf16 %v2440_v8, %v2439_v7  ;;  %v2458_v18 = vld [vmem:[%s5037_s7 + $0x288] sm:$0xff]  ;;  %v2448_v6 = vld [vmem:[%s5037_s7 + $0x238] sm:$0xff]  ;;  %v2465_v7 = vld [vmem:[%s5037_s7 + $0x2c0] sm:$0xff] }
 0x166   :  { %v2295_v26 = vmul.f32 %v2268_v15, %v2255_v20  ;;  %v2423_v15 = vld [vmem:[%s5037_s7 + $0x170] sm:$0xff]  ;;  %v2466_v8 = vld [vmem:[%s5037_s7 + $0x2c8] sm:$0xff] }
 0x167   :  { %v2296_v27 = vmul.f32 %v2272_v17, %v2256_v24  ;;  %v2457_v17 = vld [vmem:[%s5037_s7 + $0x280] sm:$0xff]  ;;  %v3161_v20 = vpack.c.bf16 %v2424_v16, %v2423_v15  ;;  %v334_v24 = vsub.s32 2, %v3865_v42  ;;  %v2450_v16 = vld [vmem:[%s5037_s7 + $0x248] sm:$0xff] }
 0x168   :  { %v2333_v29 = vmul.f32 %v2306_v22, %v2295_v26  ;;  %v3163_v22 = vpack.c.bf16 %v2458_v18, %v2457_v17  ;;  %v2449_v15 = vld [vmem:[%s5037_s7 + $0x240] sm:$0xff]  ;;  %v2467_v17 = vld [vmem:[%s5037_s7 + $0x2d0] sm:$0xff]  ;;  %v2468_v18 = vld [vmem:[%s5037_s7 + $0x2d8] sm:$0xff] }
 0x169   :  { %v2334_v33 = vmul.f32 %v2310_v25, %v2296_v27  ;;  %v338_v25 = vsub.s32 3, %v3865_v42  ;;  %v335_v26 = vrot.slane %v4770_v57, %v334_v24  ;;  %v2236_v34 = vrot.slane %v4783_v9, %v334_v24 }
 0x16a   :  { %v2371_v62 = vadd.f32 %v2344_v30, %v2333_v29  ;;  %v2314_v39 = vrot.slane %v4792_v14, %v334_v24  ;;  %v2352_v46 = vrot.slane %v4799_v21, %v334_v24 }
 0x16b   :  { %v2372_v36 = vadd.f32 %v2348_v28, %v2334_v33  ;;  %v339_v27 = vrot.slane %v4770_v57, %v338_v25  ;;  %v2240_v35 = vrot.slane %v4783_v9, %v338_v25  ;;  %v2318_v41 = vrot.slane %v4792_v14, %v338_v25 }
 0x16c   :  { %v2356_v44 = vrot.slane %v4799_v21, %v338_v25 }
 0x16d   :  { %2544 = vmatprep.mubr.f32.mxu1 %v2372_v36  ;;  %v2276_v36 = vrot.slane %v4785_v10, %v334_v24  ;;  %v2451_v24 = vld [vmem:[%s5037_s7 + $0x250] sm:$0xff] }
 0x16e   :  { %2545 = vmatmul.mubr.f32.vlgmr.msra.gmra.mrb[8].mxu1 %v2371_v62  ;;  %v2280_v62 = vrot.slane %v4785_v10, %v338_v25  ;;  %v2452_v25 = vld [vmem:[%s5037_s7 + $0x258] sm:$0xff] }
 0x16f   :  { %3134 = vmatpush3.bf16.msra.mxu1 %v3133_v37 }
 0x170   :  { %3136 = vmatprep.subr.bf16.mxu1 %v3135_v38 }
 0x173   :  { %3138 = vmatpush3.bf16.msra.mxu1 %v3137_v3 }
 0x174   :  { %3140 = vmatprep.subr.bf16.mxu1 %v3139_v43 }
 0x177   :  { %3142 = vmatpush3.bf16.msra.mxu1 %v3141_v48  ;;  %v2442_v48 = vld [vmem:[%s5037_s7 + $0x208] sm:$0xff] }
 0x178   :  { %3144 = vmatprep.subr.bf16.mxu1 %v3143_v49  ;;  %v3165_v52 = vpack.c.bf16 %v2442_v48, %v2441_v47 }
 0x17b   :  { %3146 = vmatpush3.bf16.msra.mxu1 %v3145_v53 }
 0x17c   :  { %3148 = vmatprep.subr.bf16.mxu1 %v3147_v23  ;;  %v3167_v23 = vpack.c.bf16 %v2460_v50, %v2459_v19 }
 0x17f   :  { %3150 = vmatpush3.bf16.msra.mxu1 %v3149_v59  ;;  %v3169_v59 = vpack.c.bf16 %v2444_v55, %v2443_v54 }
 0x180   :  { %3152 = vmatprep.subr.bf16.mxu1 %v3151_v60  ;;  %v3171_v60 = vpack.c.bf16 %v2462_v58, %v2461_v56 }
 0x183   :  { %3154 = vmatpush3.bf16.msra.mxu1 %v3153_v2  ;;  %v3173_v2 = vpack.c.bf16 %v2446_v0, %v2445_v61 }
 0x184   :  { %3156 = vmatprep.subr.bf16.mxu1 %v3155_v4  ;;  %v3175_v4 = vpack.c.bf16 %v2464_v1, %v2463_v63  ;;  %v2993_v63 = vld [vmem:[%s5038_s8] ss:$0 sm:$0xff] }
 0x187   :  { %3158 = vmatpush3.bf16.msra.mxu1 %v3157_v11  ;;  %v3177_v11 = vpack.c.bf16 %v2448_v6, %v2447_v5 }
 0x188   :  { %3160 = vmatprep.subr.bf16.mxu1 %v3159_v12  ;;  %v3179_v12 = vpack.c.bf16 %v2466_v8, %v2465_v7 }
 0x18b   :  { %3162 = vmatpush3.bf16.msra.mxu1 %v3161_v20  ;;  %v3181_v20 = vpack.c.bf16 %v2450_v16, %v2449_v15 }
 0x18c   :  { %3164 = vmatprep.subr.bf16.mxu1 %v3163_v22  ;;  %v3183_v22 = vpack.c.bf16 %v2468_v18, %v2467_v17 }
 0x1d5   :  { %v2087_v28 = vpop.f32.mrb[4].mxu1 }
 0x1d6   :  { %v3199_v29 = vadd.f32 %v2087_v28, %v335_v26  ;;  %v2089_v30 = vpop.f32.mrb[5].mxu1  ;;  %v2469_v26 = vld [vmem:[%s5037_s7 + $0x2e0] sm:$0xff]  ;;  %v3185_v28 = vpack.c.bf16 %v2452_v25, %v2451_v24 }
 0x1d7   :  { %v3200_v31 = vadd.f32 %v2089_v30, %v339_v27  ;;  %v2091_v32 = vpop.f32.mrb[6].mxu1  ;;  %v2470_v27 = vld [vmem:[%s5037_s7 + $0x2e8] sm:$0xff]  ;;  %v2453_v30 = vld [vmem:[%s5037_s7 + $0x260] sm:$0xff] }
 0x1d8   :  { %3664 = vtanh.f32 %v3199_v29  ;;  %v2092_v33 = vpop.f32.mrb[7].mxu1  ;;  %v3187_v29 = vpack.c.bf16 %v2470_v27, %v2469_v26  ;;  %v2471_v32 = vld [vmem:[%s5037_s7 + $0x2f0] sm:$0xff] }
 0x1d9   :  { %3666 = vtanh.f32 %v3200_v31  ;;  %v2454_v31 = vld [vmem:[%s5037_s7 + $0x268] sm:$0xff]  ;;  %v2472_v33 = vld [vmem:[%s5037_s7 + $0x2f8] sm:$0xff] }
 0x1e2   :  { %v3665_v37 = vpop.eup %3664 }
 0x1e3   :  { %v3667_v38 = vpop.eup %3666  ;;  %v2257_v13 = vsub.f32 %v3665_v37, %v2236_v34  ;;  %v3189_v34 = vpack.c.bf16 %v2454_v31, %v2453_v30  ;;  %v2456_v37 = vld [vmem:[%s5037_s7 + $0x278] sm:$0xff] }
 0x1e4   :  { %v2258_v40 = vsub.f32 %v3667_v38, %v2240_v35  ;;  %v3191_v35 = vpack.c.bf16 %v2472_v33, %v2471_v32  ;;  %v342_v38 = vsub.s32 4, %v3865_v42 }
 0x1e5   :  { %v2297_v3 = vmul.f32 %v2276_v36, %v2257_v13  ;;  %v2455_v36 = vld [vmem:[%s5037_s7 + $0x270] sm:$0xff]  ;;  %v346_v13 = vsub.s32 5, %v3865_v42 }
 0x1e6   :  { %v2298_v43 = vmul.f32 %v2280_v62, %v2258_v40  ;;  %v3193_v62 = vpack.c.bf16 %v2456_v37, %v2455_v36  ;;  %v2244_v47 = vrot.slane %v4783_v9, %v342_v38  ;;  %v2360_v58 = vrot.slane %v4799_v21, %v342_v38 }
 0x1e7   :  { %v2335_v45 = vmul.f32 %v2314_v39, %v2297_v3  ;;  %v343_v39 = vrot.slane %v4770_v57, %v342_v38  ;;  %v347_v40 = vrot.slane %v4770_v57, %v346_v13  ;;  %v2248_v48 = vrot.slane %v4783_v9, %v346_v13 }
 0x1e8   :  { %v2336_v49 = vmul.f32 %v2318_v41, %v2298_v43  ;;  %v2288_v42 = vrot.slane %v4785_v10, %v346_v13  ;;  %v2322_v57 = vrot.slane %v4792_v14, %v342_v38  ;;  %v2364_v55 = vrot.slane %v4799_v21, %v346_v13 }
 0x1e9   :  { %v2373_v53 = vadd.f32 %v2352_v46, %v2335_v45 }
 0x1ea   :  { %v2374_v51 = vadd.f32 %v2356_v44, %v2336_v49  ;;  %v2284_v49 = vrot.slane %v4785_v10, %v342_v38 }
 0x1ec   :  { %2614 = vmatprep.mubr.f32.mxu1 %v2374_v51 }
 0x1ed   :  { %2615 = vmatmul.mubr.f32.vlgmr.msra.gmra.mrb[10].mxu1 %v2373_v53  ;;  %v2326_v53 = vrot.slane %v4792_v14, %v346_v13 }
 0x1ee   :  { %3166 = vmatpush3.bf16.msra.mxu1 %v3165_v52 }
 0x1ef   :  { %3168 = vmatprep.subr.bf16.mxu1 %v3167_v23 }
 0x1f2   :  { %3170 = vmatpush3.bf16.msra.mxu1 %v3169_v59 }
 0x1f3   :  { %3172 = vmatprep.subr.bf16.mxu1 %v3171_v60 }
 0x1f6   :  { %3174 = vmatpush3.bf16.msra.mxu1 %v3173_v2 }
 0x1f7   :  { %3176 = vmatprep.subr.bf16.mxu1 %v3175_v4 }
 0x1fa   :  { %3178 = vmatpush3.bf16.msra.mxu1 %v3177_v11 }
 0x1fb   :  { %3180 = vmatprep.subr.bf16.mxu1 %v3179_v12 }
 0x1fe   :  { %3182 = vmatpush3.bf16.msra.mxu1 %v3181_v20 }
 0x1ff   :  { %3184 = vmatprep.subr.bf16.mxu1 %v3183_v22 }
 0x202   :  { %3186 = vmatpush3.bf16.msra.mxu1 %v3185_v28 }
 0x203   :  { %3188 = vmatprep.subr.bf16.mxu1 %v3187_v29 }
 0x206   :  { %3190 = vmatpush3.bf16.msra.mxu1 %v3189_v34 }
 0x207   :  { %3192 = vmatprep.subr.bf16.mxu1 %v3191_v35 }
 0x20a   :  { %3194 = vmatpush3.bf16.msra.mxu1 %v3193_v62 }
 0x216   :  { %v2210_v41 = vpop.f32.mrb[4].mxu0 }
 0x217   :  { %v3201_v3 = vadd.f32 %v2210_v41, %v343_v39  ;;  %v2212_v43 = vpop.f32.mrb[5].mxu0 }
 0x218   :  { %v3202_v44 = vadd.f32 %v2212_v43, %v347_v40  ;;  %v2214_v45 = vpop.f32.mrb[6].mxu0 }
 0x219   :  { %3668 = vtanh.f32 %v3201_v3  ;;  %v2215_v46 = vpop.f32.mrb[7].mxu0 }
 0x21a   :  { %3670 = vtanh.f32 %v3202_v44 }
 0x223   :  { %v3669_v19 = vpop.eup %3668 }
 0x224   :  { %v3671_v50 = vpop.eup %3670  ;;  %v2259_v51 = vsub.f32 %v3669_v19, %v2244_v47 }
 0x225   :  { %v2260_v52 = vsub.f32 %v3671_v50, %v2248_v48 }
 0x226   :  { %v2299_v23 = vmul.f32 %v2284_v49, %v2259_v51 }
 0x227   :  { %v2300_v54 = vmul.f32 %v2288_v42, %v2260_v52 }
 0x228   :  { %v2337_v56 = vmul.f32 %v2322_v57, %v2299_v23 }
 0x229   :  { %v2338_v9 = vmul.f32 %v2326_v53, %v2300_v54 }
 0x22a   :  { %v2375_v60 = vadd.f32 %v2360_v58, %v2337_v56 }
 0x22b   :  { %v2376_v59 = vadd.f32 %v2364_v55, %v2338_v9 }
 0x22d   :  { %2684 = vmatprep.mubr.f32.mxu1 %v2376_v59 }
 0x22e   :  { %2685 = vmatmul.mubr.f32.vlgmr.msra.gmra.mrb[12].mxu1 %v2375_v60 }
 0x241   :  { %v3026_v10 = vpop.f32.mrb[8].mxu1 }
 0x242   :  { %v3027_v61 = vpop.f32.mrb[9].mxu1 }
 0x243   :  { %v3028_v0 = vadd.f32 %v3027_v61, %v3026_v10 }
 0x245   :  { %v2547_v2 = vadd.f32 %v3028_v0, %v2993_v63 }
 0x2c0   :  { %v3061_v14 = vpop.f32.mrb[10].mxu1 }
 0x2c1   :  { %v3062_v1 = vpop.f32.mrb[11].mxu1 }
 0x2c2   :  { %v3063_v4 = vadd.f32 %v3062_v1, %v3061_v14 }
 0x2c4   :  { %v2617_v5 = vadd.f32 %v3063_v4, %v2547_v2 }
 0x301   :  { %v3096_v6 = vpop.f32.mrb[12].mxu1 }
 0x302   :  { %v3097_v7 = vpop.f32.mrb[13].mxu1 }
 0x303   :  { %v3098_v21 = vadd.f32 %v3097_v7, %v3096_v6 }
 0x305   :  { %v2687_v8 = vadd.f32 %v3098_v21, %v2617_v5 }
 0x307   :  { %2690 = vst [vmem:[#allocation2] sm:$0x3] %v2687_v8 }
 0x308   :  { %3683 = shalt.err (!%p3680_p4)
}
 0x309   :  { %s3684_s20 = scalar_lea.hbm %s5039_s9, 32 }
 0x30a   :  { %p3685_p5 = scmp.ne.s32.totalorder %s5039_s9, %s3684_s20  ;;  %p3688_p6 = scmp.lt.u32.totalorder %s3684_s20, %s5039_s9 }
 0x30c   :  { %p3690_p7 = pnand %p3688_p6, %p3685_p5 }
 0x30e   :  { %3693 = shalt.err (!%p3690_p7)
}
 0x30f   :  { %2700 = dma.vmem_to_hbm [thread:$0]  %s2698_s17, 32, %s5039_s9, [#allocation3]  }
 0x310   :  { %3694 = dma.done.wait [#allocation3], 32  }
 0x311   :  { %3695 = vsyncadd [#allocation3], 4294967264 }
 0x312   :  { %2704 = vsyncpa [#allocation3], 1 }

</bundles_post_ra>
